<compile_context>
chip_gen: v5e
topology: v5e:2x2
jax: 0.10.0
libtpu: 0.0.40
codegen_flags: <defaults>
</compile_context>

<pallas_src>
import functools
import math

import jax
import jax.numpy as jnp
from jax.experimental import pallas as pl
from jax.experimental.pallas import tpu as pltpu

CP = 128                       # every channel dim is zero-padded to 128 lanes (lane-dense)
STEM_C = 16
STEM_K = 32                    # 3x3 taps x 3 input channels = 27, padded to 32 for the MXU
BLOCK_CFG = [(16, 16, 1, 1), (16, 24, 2, 4), (24, 24, 1, 4)]   # (cin, cout, stride, expand)
HEAD_C = 64
_VMEM_LIMIT = 32 * 1024 * 1024

# Stride-2 3x3 "SAME" conv on a parity-split input: tap (ki, kj) reads parity grid
# (_PAR[ki]*2 + _PAR[kj]) at row/col offset (_OFF[ki], _OFF[kj]).
_PAR = (0, 1, 0)
_OFF = (0, 0, 1)
_WPAD = 8                      # sublane-aligned left halo offset for the stride-1 dw scratch


def _round8(n):
    return -(-n // 8) * 8


def _sigmoid(x):
    # single EUP op (tanh) instead of exp + divide
    return 0.5 * (1.0 + jnp.tanh(0.5 * x))


def _swish(x):
    return x * _sigmoid(x)


# ----------------------------- Pallas kernels -----------------------------

def _stem_kernel(col_ref, w_ref, b_ref, o_ref):
    """Stem 3x3 stride-2 conv as ONE MXU matmul over a host-built (9 taps x cin) im2col,
    plus folded-BN bias and swish."""
    ho, wo, cp = o_ref.shape[1], o_ref.shape[2], o_ref.shape[3]
    k = col_ref.shape[3]
    col = col_ref[0].reshape(ho * wo, k)                      # bf16, fed to the MXU directly
    y = jnp.dot(col, w_ref[...], preferred_element_type=jnp.float32) + b_ref[...]
    y = _swish(y)
    o_ref[0] = y.reshape(ho, wo, cp).astype(o_ref.dtype)


def _mbconv_s1_kernel(*refs, has_expand, has_skip, has_head):
    """Fused stride-1 MBConv: [expand 1x1+swish] -> dw3x3+swish -> SE -> project 1x1
    [-> +residual] [-> conv-head 1x1+swish].  All channel dims padded to CP lanes."""
    it = iter(refs)
    x_ref = next(it)
    if has_expand:
        ew_ref, eb_ref = next(it), next(it)
    dw_w_ref, dw_b_ref = next(it), next(it)
    s1w_ref, s1b_ref, s2w_ref, s2b_ref = next(it), next(it), next(it), next(it)
    pw_ref, pb_ref = next(it), next(it)
    if has_head:
        hw_ref, hb_ref = next(it), next(it)
    o_ref, pad_ref = next(it), next(it)

    h, w, cp = x_ref.shape[1], x_ref.shape[2], x_ref.shape[3]
    wc = pad_ref.shape[1]

    # Zero only the halo perimeter the 3x3 taps read (not the whole scratch); the interior is
    # fully overwritten below, so this is correct under any grid-to-core partitioning.
    pad_ref[0:1, :, :] = jnp.zeros((1, wc, cp), pad_ref.dtype)
    pad_ref[h + 1:h + 2, :, :] = jnp.zeros((1, wc, cp), pad_ref.dtype)
    pad_ref[:, _WPAD - 1:_WPAD, :] = jnp.zeros((h + 2, 1, cp), pad_ref.dtype)
    pad_ref[:, _WPAD + w:_WPAD + w + 1, :] = jnp.zeros((h + 2, 1, cp), pad_ref.dtype)

    if has_expand:
        xf = x_ref[0].reshape(h * w, cp)                      # bf16 straight into the MXU
        ex = jnp.dot(xf, ew_ref[...], preferred_element_type=jnp.float32) + eb_ref[...]
        ex = _swish(ex)
        pad_ref[1:h + 1, _WPAD:_WPAD + w, :] = ex.reshape(h, w, cp).astype(pad_ref.dtype)
    else:
        pad_ref[1:h + 1, _WPAD:_WPAD + w, :] = x_ref[0].astype(pad_ref.dtype)

    acc = jnp.zeros((h, w, cp), jnp.float32)
    for ki in range(3):
        for kj in range(3):
            t = ki * 3 + kj
            acc = acc + (pad_ref[ki:ki + h, _WPAD - 1 + kj:_WPAD - 1 + kj + w, :]
                         * dw_w_ref[t:t + 1, :])
    dw = _swish(acc + dw_b_ref[...])
    dwf = dw.reshape(h * w, cp)

    # squeeze-and-excitation (global pool -> FC -> swish -> FC -> sigmoid -> channel scale)
    pooled = jnp.mean(dwf, axis=0, keepdims=True)                       # (1, CP)
    se = jnp.dot(pooled.astype(jnp.bfloat16), s1w_ref[...],
                 preferred_element_type=jnp.float32) + s1b_ref[...]
    se = _swish(se)
    gate = _sigmoid(jnp.dot(se.astype(jnp.bfloat16), s2w_ref[...],
                            preferred_element_type=jnp.float32) + s2b_ref[...])
    dwf = dwf * gate

    # linear projection; residual and conv-head fused into the epilogue
    y = jnp.dot(dwf.astype(jnp.bfloat16), pw_ref[...],
                preferred_element_type=jnp.float32) + pb_ref[...]
    if has_skip:
        y = y + x_ref[0].astype(jnp.float32).reshape(h * w, cp)
    if has_head:
        y = jnp.dot(y.astype(jnp.bfloat16), hw_ref[...],
                    preferred_element_type=jnp.float32) + hb_ref[...]
        y = _swish(y)
    oc = o_ref.shape[3]
    o_ref[0] = y[:, :oc].reshape(h, w, oc).astype(o_ref.dtype)


def _mbconv_s2_kernel(xpar_ref, ew_ref, eb_ref, dw_w_ref, dw_b_ref,
                      s1w_ref, s1b_ref, s2w_ref, s2b_ref, pw_ref, pb_ref,
                      o_ref, pad_ref):
    """Fused stride-2 MBConv (expand 4, no skip): stride-2 output is computed directly from
    parity-split taps -- no stride-1 compute-then-subsample, no strided memory ops."""
    ho, wo, cp = o_ref.shape[1], o_ref.shape[2], o_ref.shape[3]

    # Zero only the bottom-row / right-column halo the stride-2 taps read (TF asymmetric SAME);
    # the interior is fully overwritten every step.
    pad_ref[:, ho:ho + 1, :, :] = jnp.zeros((4, 1, wo + 1, cp), pad_ref.dtype)
    pad_ref[:, :, wo:wo + 1, :] = jnp.zeros((4, ho + 1, 1, cp), pad_ref.dtype)

    xf = xpar_ref[0].reshape(4 * ho * wo, cp)                 # bf16 straight into the MXU
    ex = jnp.dot(xf, ew_ref[...], preferred_element_type=jnp.float32) + eb_ref[...]
    ex = _swish(ex)
    pad_ref[:, 0:ho, 0:wo, :] = ex.reshape(4, ho, wo, cp).astype(pad_ref.dtype)

    acc = jnp.zeros((ho, wo, cp), jnp.float32)
    for ki in range(3):
        for kj in range(3):
            t = ki * 3 + kj
            tap = pad_ref[_PAR[ki] * 2 + _PAR[kj],
                          _OFF[ki]:_OFF[ki] + ho, _OFF[kj]:_OFF[kj] + wo, :]
            acc = acc + tap * dw_w_ref[t:t + 1, :]
    dw = _swish(acc + dw_b_ref[...])
    dwf = dw.reshape(ho * wo, cp)

    pooled = jnp.mean(dwf, axis=0, keepdims=True)
    se = jnp.dot(pooled.astype(jnp.bfloat16), s1w_ref[...],
                 preferred_element_type=jnp.float32) + s1b_ref[...]
    se = _swish(se)
    gate = _sigmoid(jnp.dot(se.astype(jnp.bfloat16), s2w_ref[...],
                            preferred_element_type=jnp.float32) + s2b_ref[...])
    dwf = dwf * gate

    y = jnp.dot(dwf.astype(jnp.bfloat16), pw_ref[...],
                preferred_element_type=jnp.float32) + pb_ref[...]
    o_ref[0] = y.reshape(ho, wo, cp).astype(o_ref.dtype)


# ----------------------------- Pallas wrappers -----------------------------

def _rep_spec(shape):
    nd = len(shape)
    return pl.BlockSpec(tuple(shape), lambda *_: (0,) * nd)


def _parity_split(x):
    """NHWC -> (N, 4, H/2, W/2, C); parity index p*2+q holds x[:, p::2, q::2, :]."""
    n, h, w, c = x.shape
    x = x.reshape(n, h // 2, 2, w // 2, 2, c)
    x = jnp.transpose(x, (0, 2, 4, 1, 3, 5))
    return x.reshape(n, 4, h // 2, w // 2, c)


def stem_conv(x_nhwc, w, b, out_dtype=jnp.bfloat16):
    n, h, wd, cin = x_nhwc.shape
    ho, wo = h // 2, wd // 2
    # host-side im2col of the tiny (cin=3) input: "SAME" stride-2 pads bottom/right only
    xp = jnp.pad(x_nhwc, ((0, 0), (0, 1), (0, 1), (0, 0)))
    taps = [xp[:, ki:ki + 2 * ho:2, kj:kj + 2 * wo:2, :]
            for ki in range(3) for kj in range(3)]
    col = jnp.concatenate(taps, axis=-1)                               # (n, ho, wo, 9*cin)
    kdim = w.shape[0]
    col = jnp.pad(col, ((0, 0), (0, 0), (0, 0), (0, kdim - 9 * cin)))
    col = col.astype(jnp.bfloat16)
    cp = w.shape[1]
    return pl.pallas_call(
        _stem_kernel,
        out_shape=jax.ShapeDtypeStruct((n, ho, wo, cp), out_dtype),
        grid=(n,),
        in_specs=[
            pl.BlockSpec((1, ho, wo, kdim), lambda bi: (bi, 0, 0, 0)),
            _rep_spec(w.shape),
            _rep_spec(b.shape),
        ],
        out_specs=pl.BlockSpec((1, ho, wo, cp), lambda bi: (bi, 0, 0, 0)),
        compiler_params=pltpu.CompilerParams(
            dimension_semantics=("parallel",), vmem_limit_bytes=_VMEM_LIMIT),
    )(col, w, b)


def mbconv_s1(x, p, *, has_skip, head=None, out_dtype=None, out_c=None):
    n, h, w_, cp = x.shape
    has_expand = "exp_w" in p          # static structure (never a traced value)
    has_head = head is not None
    out_dtype = x.dtype if out_dtype is None else out_dtype
    out_c = cp if out_c is None else out_c
    weights = []
    if has_expand:
        weights += [p["exp_w"], p["exp_b"]]
    weights += [p["dw_w"], p["dw_b"], p["se_w1"], p["se_b1"],
                p["se_w2"], p["se_b2"], p["proj_w"], p["proj_b"]]
    if has_head:
        weights += list(head)
    kernel = functools.partial(_mbconv_s1_kernel, has_expand=has_expand,
                               has_skip=has_skip, has_head=has_head)
    wcols = _WPAD + _round8(w_ + 1)    # only cols [_WPAD-1, _WPAD+w] are ever read
    return pl.pallas_call(
        kernel,
        out_shape=jax.ShapeDtypeStruct((n, h, w_, out_c), out_dtype),
        grid=(n,),
        in_specs=([pl.BlockSpec((1, h, w_, cp), lambda bi: (bi, 0, 0, 0))]
                  + [_rep_spec(a.shape) for a in weights]),
        out_specs=pl.BlockSpec((1, h, w_, out_c), lambda bi: (bi, 0, 0, 0)),
        scratch_shapes=[pltpu.VMEM((h + 2, wcols, cp), jnp.bfloat16)],
        compiler_params=pltpu.CompilerParams(
            dimension_semantics=("parallel",), vmem_limit_bytes=_VMEM_LIMIT),
    )(x, *weights)


def mbconv_s2(x, p, out_dtype=None):
    n, h, w_, cp = x.shape
    ho, wo = h // 2, w_ // 2
    out_dtype = x.dtype if out_dtype is None else out_dtype
    xp = _parity_split(x)                                         # (n, 4, ho, wo, cp)
    weights = [p["exp_w"], p["exp_b"], p["dw_w"], p["dw_b"], p["se_w1"], p["se_b1"],
               p["se_w2"], p["se_b2"], p["proj_w"], p["proj_b"]]
    return pl.pallas_call(
        _mbconv_s2_kernel,
        out_shape=jax.ShapeDtypeStruct((n, ho, wo, cp), out_dtype),
        grid=(n,),
        in_specs=([pl.BlockSpec((1, 4, ho, wo, cp), lambda bi: (bi, 0, 0, 0, 0))]
                  + [_rep_spec(a.shape) for a in weights]),
        out_specs=pl.BlockSpec((1, ho, wo, cp), lambda bi: (bi, 0, 0, 0)),
        scratch_shapes=[pltpu.VMEM((4, ho + 1, wo + 1, cp), jnp.bfloat16)],
        compiler_params=pltpu.CompilerParams(
            dimension_semantics=("parallel",), vmem_limit_bytes=_VMEM_LIMIT),
    )(xp, *weights)


# ----------------------------- parameters (deterministic, synthetic) -----------------------------

def _bn_fold(key, c):
    """Synthetic inference BatchNorm (running mean=0, var=1): (scale, bias) to fold into conv."""
    kg, kb = jax.random.split(key)
    gamma = 1.0 + 0.1 * jax.random.normal(kg, (c,), jnp.float32)
    beta = 0.1 * jax.random.normal(kb, (c,), jnp.float32)
    return gamma / jnp.sqrt(1.0 + 1e-3), beta


def _pad2(w):
    return jnp.pad(w, ((0, CP - w.shape[0]), (0, CP - w.shape[1])))


def _pad_bias(b):
    return jnp.pad(b, (0, CP - b.shape[0])).reshape(1, CP).astype(jnp.float32)


def _conv1x1_folded(key, cin, cout):
    kw, kbn = jax.random.split(key)
    w = jax.random.normal(kw, (cin, cout), jnp.float32) / math.sqrt(cin)
    scale, beta = _bn_fold(kbn, cout)
    return _pad2(w * scale).astype(jnp.bfloat16), _pad_bias(beta)    # BN scale folded host-side


def _dwconv_folded(key, c):
    kw, kbn = jax.random.split(key)
    w = jax.random.normal(kw, (9, c), jnp.float32) / 3.0             # rows = tap ki*3+kj
    scale, beta = _bn_fold(kbn, c)
    return jnp.pad(w * scale, ((0, 0), (0, CP - c))).astype(jnp.float32), _pad_bias(beta)


def _se_params(key, c, cr):
    k1, k2, k3, k4 = jax.random.split(key, 4)
    w1 = jax.random.normal(k1, (c, cr), jnp.float32) / math.sqrt(c)
    b1 = 0.01 * jax.random.normal(k2, (cr,), jnp.float32)
    w2 = jax.random.normal(k3, (cr, c), jnp.float32) / math.sqrt(cr)
    b2 = 0.01 * jax.random.normal(k4, (c,), jnp.float32)
    return (_pad2(w1).astype(jnp.bfloat16), _pad_bias(b1),
            _pad2(w2).astype(jnp.bfloat16), _pad_bias(b2))


def _stem_params(key):
    kw, kbn = jax.random.split(key)
    w = jax.random.normal(kw, (3, 3, 3, STEM_C), jnp.float32) / math.sqrt(27.0)
    scale, beta = _bn_fold(kbn, STEM_C)
    w = (w * scale).reshape(27, STEM_C)                              # rows = (ki*3+kj)*3 + c
    w = jnp.pad(w, ((0, STEM_K - 27), (0, CP - STEM_C)))
    return w.astype(jnp.bfloat16), _pad_bias(beta)


def _mbconv_params(key, cin, cout, expand_ratio):
    ks = jax.random.split(key, 4)
    cmid = cin * expand_ratio
    p = {}
    if expand_ratio != 1:
        p["exp_w"], p["exp_b"] = _conv1x1_folded(ks[0], cin, cmid)
    p["dw_w"], p["dw_b"] = _dwconv_folded(ks[1], cmid)
    p["se_w1"], p["se_b1"], p["se_w2"], p["se_b2"] = _se_params(ks[2], cmid, max(1, cin // 4))
    p["proj_w"], p["proj_b"] = _conv1x1_folded(ks[3], cmid, cout)
    return p


def init_params(key):
    keys = jax.random.split(key, 2 + len(BLOCK_CFG))
    params = {}
    params["stem_w"], params["stem_b"] = _stem_params(keys[0])
    params["blocks"] = [_mbconv_params(keys[1 + i], cin, cout, er)
                        for i, (cin, cout, _s, er) in enumerate(BLOCK_CFG)]
    params["head_w"], params["head_b"] = _conv1x1_folded(keys[-1], BLOCK_CFG[-1][1], HEAD_C)
    return params


# ----------------------------- forward -----------------------------

def efficientdet_v1_forward(x_nchw, params):
    """EfficientDetv1.forward: x = backbone.extract_features(x); return the final feature map."""
    x = jnp.transpose(x_nchw, (0, 2, 3, 1))                            # NCHW -> NHWC
    x = stem_conv(x, params["stem_w"], params["stem_b"])               # (N, H/2, W/2, CP) bf16
    b0, b1, b2 = params["blocks"]
    x = mbconv_s1(x, b0, has_skip=True)                                # stride 1, expand 1
    x = mbconv_s2(x, b1)                                               # stride 2, expand 4
    x = mbconv_s1(x, b2, has_skip=True,
                  head=(params["head_w"], params["head_b"]),
                  out_dtype=jnp.float32, out_c=HEAD_C)                 # stride 1 + fused conv-head
    return jnp.transpose(x, (0, 3, 1, 2))                              # NHWC -> NCHW


if __name__ == "__main__":
    key = jax.random.PRNGKey(0)
    k_in, k_params = jax.random.split(key)
    x = jax.random.normal(k_in, (2, 3, 32, 32), jnp.float32)           # NCHW, like the PyTorch module
    params = init_params(k_params)
    fwd = jax.jit(efficientdet_v1_forward)
    y = fwd(x, params)
    jax.block_until_ready(y)
    assert y.shape == (2, HEAD_C, 8, 8), y.shape
    print("KERNEL_OK")
</pallas_src>

<mosaic_0001>
module attributes {stable_mosaic.version = 11 : i64} {
  func.func @_stem_kernel(%arg0: i32, %arg1: memref<1x16x16x32xbf16, #tpu.memory_space<vmem>>, %arg2: memref<32x128xbf16, #tpu.memory_space<vmem>>, %arg3: memref<1x128xf32, #tpu.memory_space<vmem>>, %arg4: memref<1x16x16x128xbf16, #tpu.memory_space<vmem>>) attributes {dimension_semantics = [#tpu.dimension_semantics<parallel>], iteration_bounds = array<i64: 2>, scalar_prefetch = 0 : i64, scratch_operands = 0 : i64, tpu.core_type = #tpu.core_type<tc>, window_params = [{transform_indices = @transform_0, window_bounds = array<i64: 1, 16, 16, 32>}, {pipeline_mode = #tpu.pipeline_mode<synchronous>, transform_indices = @transform_1, window_bounds = array<i64: 32, 128>}, {pipeline_mode = #tpu.pipeline_mode<synchronous>, transform_indices = @transform_2, window_bounds = array<i64: 1, 128>}, {transform_indices = @transform_3, window_bounds = array<i64: 1, 16, 16, 128>}]} {
    %c0 = arith.constant 0 : index
    %c0_0 = arith.constant 0 : index
    %c0_1 = arith.constant 0 : index
    %c0_2 = arith.constant 0 : index
    %0 = vector.load %arg1[%c0, %c0_0, %c0_1, %c0_2] : memref<1x16x16x32xbf16, #tpu.memory_space<vmem>>, vector<1x16x16x32xbf16>
    %1 = vector.shape_cast %0 : vector<1x16x16x32xbf16> to vector<16x16x32xbf16>
    %2 = vector.shape_cast %1 : vector<16x16x32xbf16> to vector<256x32xbf16>
    %c0_3 = arith.constant 0 : index
    %c0_4 = arith.constant 0 : index
    %3 = vector.load %arg2[%c0_3, %c0_4] : memref<32x128xbf16, #tpu.memory_space<vmem>>, vector<32x128xbf16>
    %cst = arith.constant dense<0.000000e+00> : vector<256x128xf32>
    %4 = tpu.matmul %2, %3, %cst {dimension_numbers = #tpu.dot_dimension_numbers<[1], [0], [0], [1], [0, 0, 1, 1], [], []>} : vector<256x32xbf16>, vector<32x128xbf16>, vector<256x128xf32> -> vector<256x128xf32>
    %c0_5 = arith.constant 0 : index
    %c0_6 = arith.constant 0 : index
    %5 = vector.load %arg3[%c0_5, %c0_6] : memref<1x128xf32, #tpu.memory_space<vmem>>, vector<1x128xf32>
    %6 = vector.broadcast %5 : vector<1x128xf32> to vector<256x128xf32>
    %7 = arith.addf %4, %6 : vector<256x128xf32>
    %cst_7 = arith.constant 5.000000e-01 : f32
    %8 = vector.broadcast %cst_7 : f32 to vector<256x128xf32>
    %9 = arith.mulf %8, %7 : vector<256x128xf32>
    %10 = math.tanh %9 : vector<256x128xf32>
    %cst_8 = arith.constant 1.000000e+00 : f32
    %11 = vector.broadcast %cst_8 : f32 to vector<256x128xf32>
    %12 = arith.addf %11, %10 : vector<256x128xf32>
    %cst_9 = arith.constant 5.000000e-01 : f32
    %13 = vector.broadcast %cst_9 : f32 to vector<256x128xf32>
    %14 = arith.mulf %13, %12 : vector<256x128xf32>
    %15 = arith.mulf %7, %14 : vector<256x128xf32>
    %16 = vector.shape_cast %15 : vector<256x128xf32> to vector<16x16x128xf32>
    %17 = arith.truncf %16 : vector<16x16x128xf32> to vector<16x16x128xbf16>
    %c0_10 = arith.constant 0 : index
    %c0_11 = arith.constant 0 : index
    %c0_12 = arith.constant 0 : index
    %c0_13 = arith.constant 0 : index
    %18 = vector.load %arg4[%c0_10, %c0_11, %c0_12, %c0_13] : memref<1x16x16x128xbf16, #tpu.memory_space<vmem>>, vector<1x16x16x128xbf16>
    %19 = vector.shape_cast %18 : vector<1x16x16x128xbf16> to vector<16x16x128xbf16>
    %20 = vector.shape_cast %17 : vector<16x16x128xbf16> to vector<1x16x16x128xbf16>
    tpu.vector_store %arg4[%c0_10, %c0_11, %c0_12, %c0_13], %20 {strides = array<i32>} : memref<1x16x16x128xbf16, #tpu.memory_space<vmem>>, vector<1x16x16x128xbf16>,
    return
  }
  func.func @transform_0(%arg0: i32) -> (i32, i32, i32, i32) {
    %c0_i32 = arith.constant 0 : i32
    %c0_i32_0 = arith.constant 0 : i32
    %c0_i32_1 = arith.constant 0 : i32
    %c0_i32_2 = arith.constant 0 : i32
    return %arg0, %c0_i32, %c0_i32_0, %c0_i32_1 : i32, i32, i32, i32
  }
  func.func @transform_1(%arg0: i32) -> (i32, i32) {
    %c0_i32 = arith.constant 0 : i32
    %c0_i32_0 = arith.constant 0 : i32
    %c0_i32_1 = arith.constant 0 : i32
    return %c0_i32, %c0_i32_0 : i32, i32
  }
  func.func @transform_2(%arg0: i32) -> (i32, i32) {
    %c0_i32 = arith.constant 0 : i32
    %c0_i32_0 = arith.constant 0 : i32
    %c0_i32_1 = arith.constant 0 : i32
    return %c0_i32, %c0_i32_0 : i32, i32
  }
  func.func @transform_3(%arg0: i32) -> (i32, i32, i32, i32) {
    %c0_i32 = arith.constant 0 : i32
    %c0_i32_0 = arith.constant 0 : i32
    %c0_i32_1 = arith.constant 0 : i32
    %c0_i32_2 = arith.constant 0 : i32
    return %arg0, %c0_i32, %c0_i32_0, %c0_i32_1 : i32, i32, i32, i32
  }
}

module attributes {stable_mosaic.version = 11 : i64} {
  func.func @_mbconv_s1_kernel(%arg0: i32, %arg1: memref<1x16x16x128xbf16, #tpu.memory_space<vmem>>, %arg2: memref<9x128xf32, #tpu.memory_space<vmem>>, %arg3: memref<1x128xf32, #tpu.memory_space<vmem>>, %arg4: memref<128x128xbf16, #tpu.memory_space<vmem>>, %arg5: memref<1x128xf32, #tpu.memory_space<vmem>>, %arg6: memref<128x128xbf16, #tpu.memory_space<vmem>>, %arg7: memref<1x128xf32, #tpu.memory_space<vmem>>, %arg8: memref<128x128xbf16, #tpu.memory_space<vmem>>, %arg9: memref<1x128xf32, #tpu.memory_space<vmem>>, %arg10: memref<1x16x16x128xbf16, #tpu.memory_space<vmem>>, %arg11: memref<18x32x128xbf16, #tpu.memory_space<vmem>>) attributes {dimension_semantics = [#tpu.dimension_semantics<parallel>], iteration_bounds = array<i64: 2>, scalar_prefetch = 0 : i64, scratch_operands = 1 : i64, tpu.core_type = #tpu.core_type<tc>, window_params = [{transform_indices = @transform_0, window_bounds = array<i64: 1, 16, 16, 128>}, {pipeline_mode = #tpu.pipeline_mode<synchronous>, transform_indices = @transform_1, window_bounds = array<i64: 9, 128>}, {pipeline_mode = #tpu.pipeline_mode<synchronous>, transform_indices = @transform_2, window_bounds = array<i64: 1, 128>}, {pipeline_mode = #tpu.pipeline_mode<synchronous>, transform_indices = @transform_3, window_bounds = array<i64: 128, 128>}, {pipeline_mode = #tpu.pipeline_mode<synchronous>, transform_indices = @transform_4, window_bounds = array<i64: 1, 128>}, {pipeline_mode = #tpu.pipeline_mode<synchronous>, transform_indices = @transform_5, window_bounds = array<i64: 128, 128>}, {pipeline_mode = #tpu.pipeline_mode<synchronous>, transform_indices = @transform_6, window_bounds = array<i64: 1, 128>}, {pipeline_mode = #tpu.pipeline_mode<synchronous>, transform_indices = @transform_7, window_bounds = array<i64: 128, 128>}, {pipeline_mode = #tpu.pipeline_mode<synchronous>, transform_indices = @transform_8, window_bounds = array<i64: 1, 128>}, {transform_indices = @transform_9, window_bounds = array<i64: 1, 16, 16, 128>}]} {
    %cst = arith.constant 0.000000e+00 : bf16
    %0 = vector.broadcast %cst : bf16 to vector<1x32x128xbf16>
    %c0 = arith.constant 0 : index
    %c0_0 = arith.constant 0 : index
    %c0_1 = arith.constant 0 : index
    %1 = vector.load %arg11[%c0, %c0_0, %c0_1] : memref<18x32x128xbf16, #tpu.memory_space<vmem>>, vector<1x32x128xbf16>
    tpu.vector_store %arg11[%c0, %c0_0, %c0_1], %0 {strides = array<i32>} : memref<18x32x128xbf16, #tpu.memory_space<vmem>>, vector<1x32x128xbf16>,
    %cst_2 = arith.constant 0.000000e+00 : bf16
    %2 = vector.broadcast %cst_2 : bf16 to vector<1x32x128xbf16>
    %c17 = arith.constant 17 : index
    %c0_3 = arith.constant 0 : index
    %c0_4 = arith.constant 0 : index
    %3 = vector.load %arg11[%c17, %c0_3, %c0_4] : memref<18x32x128xbf16, #tpu.memory_space<vmem>>, vector<1x32x128xbf16>
    tpu.vector_store %arg11[%c17, %c0_3, %c0_4], %2 {strides = array<i32>} : memref<18x32x128xbf16, #tpu.memory_space<vmem>>, vector<1x32x128xbf16>,
    %cst_5 = arith.constant 0.000000e+00 : bf16
    %4 = vector.broadcast %cst_5 : bf16 to vector<18x1x128xbf16>
    %c0_6 = arith.constant 0 : index
    %c7 = arith.constant 7 : index
    %c0_7 = arith.constant 0 : index
    %5 = vector.load %arg11[%c0_6, %c7, %c0_7] : memref<18x32x128xbf16, #tpu.memory_space<vmem>>, vector<18x1x128xbf16>
    tpu.vector_store %arg11[%c0_6, %c7, %c0_7], %4 {strides = array<i32>} : memref<18x32x128xbf16, #tpu.memory_space<vmem>>, vector<18x1x128xbf16>,
    %cst_8 = arith.constant 0.000000e+00 : bf16
    %6 = vector.broadcast %cst_8 : bf16 to vector<18x1x128xbf16>
    %c0_9 = arith.constant 0 : index
    %c24 = arith.constant 24 : index
    %c0_10 = arith.constant 0 : index
    %7 = vector.load %arg11[%c0_9, %c24, %c0_10] : memref<18x32x128xbf16, #tpu.memory_space<vmem>>, vector<18x1x128xbf16>
    tpu.vector_store %arg11[%c0_9, %c24, %c0_10], %6 {strides = array<i32>} : memref<18x32x128xbf16, #tpu.memory_space<vmem>>, vector<18x1x128xbf16>,
    %c0_11 = arith.constant 0 : index
    %c0_12 = arith.constant 0 : index
    %c0_13 = arith.constant 0 : index
    %c0_14 = arith.constant 0 : index
    %8 = vector.load %arg1[%c0_11, %c0_12, %c0_13, %c0_14] : memref<1x16x16x128xbf16, #tpu.memory_space<vmem>>, vector<1x16x16x128xbf16>
    %9 = vector.shape_cast %8 : vector<1x16x16x128xbf16> to vector<16x16x128xbf16>
    %c1 = arith.constant 1 : index
    %c8 = arith.constant 8 : index
    %c0_15 = arith.constant 0 : index
    %10 = vector.load %arg11[%c1, %c8, %c0_15] : memref<18x32x128xbf16, #tpu.memory_space<vmem>>, vector<16x16x128xbf16>
    tpu.vector_store %arg11[%c1, %c8, %c0_15], %9 {strides = array<i32>} : memref<18x32x128xbf16, #tpu.memory_space<vmem>>, vector<16x16x128xbf16>,
    %cst_16 = arith.constant 0.000000e+00 : f32
    %11 = vector.broadcast %cst_16 : f32 to vector<16x16x128xf32>
    %c0_17 = arith.constant 0 : index
    %c7_18 = arith.constant 7 : index
    %c0_19 = arith.constant 0 : index
    %12 = vector.load %arg11[%c0_17, %c7_18, %c0_19] : memref<18x32x128xbf16, #tpu.memory_space<vmem>>, vector<16x16x128xbf16>
    %c0_20 = arith.constant 0 : index
    %c0_21 = arith.constant 0 : index
    %13 = vector.load %arg2[%c0_20, %c0_21] : memref<9x128xf32, #tpu.memory_space<vmem>>, vector<1x128xf32>
    %14 = arith.extf %12 : vector<16x16x128xbf16> to vector<16x16x128xf32>
    %15 = vector.shape_cast %13 : vector<1x128xf32> to vector<1x1x128xf32>
    %16 = vector.broadcast %15 : vector<1x1x128xf32> to vector<16x16x128xf32>
    %17 = arith.mulf %14, %16 : vector<16x16x128xf32>
    %18 = arith.addf %11, %17 : vector<16x16x128xf32>
    %c0_22 = arith.constant 0 : index
    %c8_23 = arith.constant 8 : index
    %c0_24 = arith.constant 0 : index
    %19 = vector.load %arg11[%c0_22, %c8_23, %c0_24] : memref<18x32x128xbf16, #tpu.memory_space<vmem>>, vector<16x16x128xbf16>
    %c1_25 = arith.constant 1 : index
    %c0_26 = arith.constant 0 : index
    %20 = vector.load %arg2[%c1_25, %c0_26] : memref<9x128xf32, #tpu.memory_space<vmem>>, vector<1x128xf32>
    %21 = arith.extf %19 : vector<16x16x128xbf16> to vector<16x16x128xf32>
    %22 = vector.shape_cast %20 : vector<1x128xf32> to vector<1x1x128xf32>
    %23 = vector.broadcast %22 : vector<1x1x128xf32> to vector<16x16x128xf32>
    %24 = arith.mulf %21, %23 : vector<16x16x128xf32>
    %25 = arith.addf %18, %24 : vector<16x16x128xf32>
    %c0_27 = arith.constant 0 : index
    %c9 = arith.constant 9 : index
    %c0_28 = arith.constant 0 : index
    %26 = vector.load %arg11[%c0_27, %c9, %c0_28] : memref<18x32x128xbf16, #tpu.memory_space<vmem>>, vector<16x16x128xbf16>
    %c2 = arith.constant 2 : index
    %c0_29 = arith.constant 0 : index
    %27 = vector.load %arg2[%c2, %c0_29] : memref<9x128xf32, #tpu.memory_space<vmem>>, vector<1x128xf32>
    %28 = arith.extf %26 : vector<16x16x128xbf16> to vector<16x16x128xf32>
    %29 = vector.shape_cast %27 : vector<1x128xf32> to vector<1x1x128xf32>
    %30 = vector.broadcast %29 : vector<1x1x128xf32> to vector<16x16x128xf32>
    %31 = arith.mulf %28, %30 : vector<16x16x128xf32>
    %32 = arith.addf %25, %31 : vector<16x16x128xf32>
    %c1_30 = arith.constant 1 : index
    %c7_31 = arith.constant 7 : index
    %c0_32 = arith.constant 0 : index
    %33 = vector.load %arg11[%c1_30, %c7_31, %c0_32] : memref<18x32x128xbf16, #tpu.memory_space<vmem>>, vector<16x16x128xbf16>
    %c3 = arith.constant 3 : index
    %c0_33 = arith.constant 0 : index
    %34 = vector.load %arg2[%c3, %c0_33] : memref<9x128xf32, #tpu.memory_space<vmem>>, vector<1x128xf32>
    %35 = arith.extf %33 : vector<16x16x128xbf16> to vector<16x16x128xf32>
    %36 = vector.shape_cast %34 : vector<1x128xf32> to vector<1x1x128xf32>
    %37 = vector.broadcast %36 : vector<1x1x128xf32> to vector<16x16x128xf32>
    %38 = arith.mulf %35, %37 : vector<16x16x128xf32>
    %39 = arith.addf %32, %38 : vector<16x16x128xf32>
    %c1_34 = arith.constant 1 : index
    %c8_35 = arith.constant 8 : index
    %c0_36 = arith.constant 0 : index
    %40 = vector.load %arg11[%c1_34, %c8_35, %c0_36] : memref<18x32x128xbf16, #tpu.memory_space<vmem>>, vector<16x16x128xbf16>
    %c4 = arith.constant 4 : index
    %c0_37 = arith.constant 0 : index
    %41 = vector.load %arg2[%c4, %c0_37] : memref<9x128xf32, #tpu.memory_space<vmem>>, vector<1x128xf32>
    %42 = arith.extf %40 : vector<16x16x128xbf16> to vector<16x16x128xf32>
    %43 = vector.shape_cast %41 : vector<1x128xf32> to vector<1x1x128xf32>
    %44 = vector.broadcast %43 : vector<1x1x128xf32> to vector<16x16x128xf32>
    %45 = arith.mulf %42, %44 : vector<16x16x128xf32>
    %46 = arith.addf %39, %45 : vector<16x16x128xf32>
    %c1_38 = arith.constant 1 : index
    %c9_39 = arith.constant 9 : index
    %c0_40 = arith.constant 0 : index
    %47 = vector.load %arg11[%c1_38, %c9_39, %c0_40] : memref<18x32x128xbf16, #tpu.memory_space<vmem>>, vector<16x16x128xbf16>
    %c5 = arith.constant 5 : index
    %c0_41 = arith.constant 0 : index
    %48 = vector.load %arg2[%c5, %c0_41] : memref<9x128xf32, #tpu.memory_space<vmem>>, vector<1x128xf32>
    %49 = arith.extf %47 : vector<16x16x128xbf16> to vector<16x16x128xf32>
    %50 = vector.shape_cast %48 : vector<1x128xf32> to vector<1x1x128xf32>
    %51 = vector.broadcast %50 : vector<1x1x128xf32> to vector<16x16x128xf32>
    %52 = arith.mulf %49, %51 : vector<16x16x128xf32>
    %53 = arith.addf %46, %52 : vector<16x16x128xf32>
    %c2_42 = arith.constant 2 : index
    %c7_43 = arith.constant 7 : index
    %c0_44 = arith.constant 0 : index
    %54 = vector.load %arg11[%c2_42, %c7_43, %c0_44] : memref<18x32x128xbf16, #tpu.memory_space<vmem>>, vector<16x16x128xbf16>
    %c6 = arith.constant 6 : index
    %c0_45 = arith.constant 0 : index
    %55 = vector.load %arg2[%c6, %c0_45] : memref<9x128xf32, #tpu.memory_space<vmem>>, vector<1x128xf32>
    %56 = arith.extf %54 : vector<16x16x128xbf16> to vector<16x16x128xf32>
    %57 = vector.shape_cast %55 : vector<1x128xf32> to vector<1x1x128xf32>
    %58 = vector.broadcast %57 : vector<1x1x128xf32> to vector<16x16x128xf32>
    %59 = arith.mulf %56, %58 : vector<16x16x128xf32>
    %60 = arith.addf %53, %59 : vector<16x16x128xf32>
    %c2_46 = arith.constant 2 : index
    %c8_47 = arith.constant 8 : index
    %c0_48 = arith.constant 0 : index
    %61 = vector.load %arg11[%c2_46, %c8_47, %c0_48] : memref<18x32x128xbf16, #tpu.memory_space<vmem>>, vector<16x16x128xbf16>
    %c7_49 = arith.constant 7 : index
    %c0_50 = arith.constant 0 : index
    %62 = vector.load %arg2[%c7_49, %c0_50] : memref<9x128xf32, #tpu.memory_space<vmem>>, vector<1x128xf32>
    %63 = arith.extf %61 : vector<16x16x128xbf16> to vector<16x16x128xf32>
    %64 = vector.shape_cast %62 : vector<1x128xf32> to vector<1x1x128xf32>
    %65 = vector.broadcast %64 : vector<1x1x128xf32> to vector<16x16x128xf32>
    %66 = arith.mulf %63, %65 : vector<16x16x128xf32>
    %67 = arith.addf %60, %66 : vector<16x16x128xf32>
    %c2_51 = arith.constant 2 : index
    %c9_52 = arith.constant 9 : index
    %c0_53 = arith.constant 0 : index
    %68 = vector.load %arg11[%c2_51, %c9_52, %c0_53] : memref<18x32x128xbf16, #tpu.memory_space<vmem>>, vector<16x16x128xbf16>
    %c8_54 = arith.constant 8 : index
    %c0_55 = arith.constant 0 : index
    %69 = vector.load %arg2[%c8_54, %c0_55] : memref<9x128xf32, #tpu.memory_space<vmem>>, vector<1x128xf32>
    %70 = arith.extf %68 : vector<16x16x128xbf16> to vector<16x16x128xf32>
    %71 = vector.shape_cast %69 : vector<1x128xf32> to vector<1x1x128xf32>
    %72 = vector.broadcast %71 : vector<1x1x128xf32> to vector<16x16x128xf32>
    %73 = arith.mulf %70, %72 : vector<16x16x128xf32>
    %74 = arith.addf %67, %73 : vector<16x16x128xf32>
    %c0_56 = arith.constant 0 : index
    %c0_57 = arith.constant 0 : index
    %75 = vector.load %arg3[%c0_56, %c0_57] : memref<1x128xf32, #tpu.memory_space<vmem>>, vector<1x128xf32>
    %76 = vector.shape_cast %75 : vector<1x128xf32> to vector<1x1x128xf32>
    %77 = vector.broadcast %76 : vector<1x1x128xf32> to vector<16x16x128xf32>
    %78 = arith.addf %74, %77 : vector<16x16x128xf32>
    %cst_58 = arith.constant 5.000000e-01 : f32
    %79 = vector.broadcast %cst_58 : f32 to vector<16x16x128xf32>
    %80 = arith.mulf %79, %78 : vector<16x16x128xf32>
    %81 = math.tanh %80 : vector<16x16x128xf32>
    %cst_59 = arith.constant 1.000000e+00 : f32
    %82 = vector.broadcast %cst_59 : f32 to vector<16x16x128xf32>
    %83 = arith.addf %82, %81 : vector<16x16x128xf32>
    %cst_60 = arith.constant 5.000000e-01 : f32
    %84 = vector.broadcast %cst_60 : f32 to vector<16x16x128xf32>
    %85 = arith.mulf %84, %83 : vector<16x16x128xf32>
    %86 = arith.mulf %78, %85 : vector<16x16x128xf32>
    %87 = vector.shape_cast %86 : vector<16x16x128xf32> to vector<256x128xf32>
    %cst_61 = arith.constant dense<0.000000e+00> : vector<128xf32>
    %88 = vector.multi_reduction <add>, %87, %cst_61 [0] : vector<256x128xf32> to vector<128xf32>
    %89 = vector.shape_cast %88 : vector<128xf32> to vector<1x128xf32>
    %cst_62 = arith.constant 2.560000e+02 : f32
    %90 = vector.broadcast %cst_62 : f32 to vector<1x128xf32>
    %91 = arith.divf %89, %90 : vector<1x128xf32>
    %92 = arith.truncf %91 : vector<1x128xf32> to vector<1x128xbf16>
    %c0_63 = arith.constant 0 : index
    %c0_64 = arith.constant 0 : index
    %93 = vector.load %arg4[%c0_63, %c0_64] : memref<128x128xbf16, #tpu.memory_space<vmem>>, vector<128x128xbf16>
    %cst_65 = arith.constant dense<0.000000e+00> : vector<1x128xf32>
    %94 = tpu.matmul %92, %93, %cst_65 {dimension_numbers = #tpu.dot_dimension_numbers<[1], [0], [0], [1], [0, 0, 1, 1], [], []>} : vector<1x128xbf16>, vector<128x128xbf16>, vector<1x128xf32> -> vector<1x128xf32>
    %c0_66 = arith.constant 0 : index
    %c0_67 = arith.constant 0 : index
    %95 = vector.load %arg5[%c0_66, %c0_67] : memref<1x128xf32, #tpu.memory_space<vmem>>, vector<1x128xf32>
    %96 = arith.addf %94, %95 : vector<1x128xf32>
    %cst_68 = arith.constant 5.000000e-01 : f32
    %97 = vector.broadcast %cst_68 : f32 to vector<1x128xf32>
    %98 = arith.mulf %97, %96 : vector<1x128xf32>
    %99 = math.tanh %98 : vector<1x128xf32>
    %cst_69 = arith.constant 1.000000e+00 : f32
    %100 = vector.broadcast %cst_69 : f32 to vector<1x128xf32>
    %101 = arith.addf %100, %99 : vector<1x128xf32>
    %cst_70 = arith.constant 5.000000e-01 : f32
    %102 = vector.broadcast %cst_70 : f32 to vector<1x128xf32>
    %103 = arith.mulf %102, %101 : vector<1x128xf32>
    %104 = arith.mulf %96, %103 : vector<1x128xf32>
    %105 = arith.truncf %104 : vector<1x128xf32> to vector<1x128xbf16>
    %c0_71 = arith.constant 0 : index
    %c0_72 = arith.constant 0 : index
    %106 = vector.load %arg6[%c0_71, %c0_72] : memref<128x128xbf16, #tpu.memory_space<vmem>>, vector<128x128xbf16>
    %cst_73 = arith.constant dense<0.000000e+00> : vector<1x128xf32>
    %107 = tpu.matmul %105, %106, %cst_73 {dimension_numbers = #tpu.dot_dimension_numbers<[1], [0], [0], [1], [0, 0, 1, 1], [], []>} : vector<1x128xbf16>, vector<128x128xbf16>, vector<1x128xf32> -> vector<1x128xf32>
    %c0_74 = arith.constant 0 : index
    %c0_75 = arith.constant 0 : index
    %108 = vector.load %arg7[%c0_74, %c0_75] : memref<1x128xf32, #tpu.memory_space<vmem>>, vector<1x128xf32>
    %109 = arith.addf %107, %108 : vector<1x128xf32>
    %cst_76 = arith.constant 5.000000e-01 : f32
    %110 = vector.broadcast %cst_76 : f32 to vector<1x128xf32>
    %111 = arith.mulf %110, %109 : vector<1x128xf32>
    %112 = math.tanh %111 : vector<1x128xf32>
    %cst_77 = arith.constant 1.000000e+00 : f32
    %113 = vector.broadcast %cst_77 : f32 to vector<1x128xf32>
    %114 = arith.addf %113, %112 : vector<1x128xf32>
    %cst_78 = arith.constant 5.000000e-01 : f32
    %115 = vector.broadcast %cst_78 : f32 to vector<1x128xf32>
    %116 = arith.mulf %115, %114 : vector<1x128xf32>
    %117 = vector.broadcast %116 : vector<1x128xf32> to vector<256x128xf32>
    %118 = arith.mulf %87, %117 : vector<256x128xf32>
    %119 = arith.truncf %118 : vector<256x128xf32> to vector<256x128xbf16>
    %c0_79 = arith.constant 0 : index
    %c0_80 = arith.constant 0 : index
    %120 = vector.load %arg8[%c0_79, %c0_80] : memref<128x128xbf16, #tpu.memory_space<vmem>>, vector<128x128xbf16>
    %cst_81 = arith.constant dense<0.000000e+00> : vector<256x128xf32>
    %121 = tpu.matmul %119, %120, %cst_81 {dimension_numbers = #tpu.dot_dimension_numbers<[1], [0], [0], [1], [0, 0, 1, 1], [], []>} : vector<256x128xbf16>, vector<128x128xbf16>, vector<256x128xf32> -> vector<256x128xf32>
    %c0_82 = arith.constant 0 : index
    %c0_83 = arith.constant 0 : index
    %122 = vector.load %arg9[%c0_82, %c0_83] : memref<1x128xf32, #tpu.memory_space<vmem>>, vector<1x128xf32>
    %123 = vector.broadcast %122 : vector<1x128xf32> to vector<256x128xf32>
    %124 = arith.addf %121, %123 : vector<256x128xf32>
    %c0_84 = arith.constant 0 : index
    %c0_85 = arith.constant 0 : index
    %c0_86 = arith.constant 0 : index
    %c0_87 = arith.constant 0 : index
    %125 = vector.load %arg1[%c0_84, %c0_85, %c0_86, %c0_87] : memref<1x16x16x128xbf16, #tpu.memory_space<vmem>>, vector<1x16x16x128xbf16>
    %126 = vector.shape_cast %125 : vector<1x16x16x128xbf16> to vector<16x16x128xbf16>
    %127 = arith.extf %126 : vector<16x16x128xbf16> to vector<16x16x128xf32>
    %128 = vector.shape_cast %127 : vector<16x16x128xf32> to vector<256x128xf32>
    %129 = arith.addf %124, %128 : vector<256x128xf32>
    %130 = vector.shape_cast %129 : vector<256x128xf32> to vector<16x16x128xf32>
    %131 = arith.truncf %130 : vector<16x16x128xf32> to vector<16x16x128xbf16>
    %c0_88 = arith.constant 0 : index
    %c0_89 = arith.constant 0 : index
    %c0_90 = arith.constant 0 : index
    %c0_91 = arith.constant 0 : index
    %132 = vector.load %arg10[%c0_88, %c0_89, %c0_90, %c0_91] : memref<1x16x16x128xbf16, #tpu.memory_space<vmem>>, vector<1x16x16x128xbf16>
    %133 = vector.shape_cast %132 : vector<1x16x16x128xbf16> to vector<16x16x128xbf16>
    %134 = vector.shape_cast %131 : vector<16x16x128xbf16> to vector<1x16x16x128xbf16>
    tpu.vector_store %arg10[%c0_88, %c0_89, %c0_90, %c0_91], %134 {strides = array<i32>} : memref<1x16x16x128xbf16, #tpu.memory_space<vmem>>, vector<1x16x16x128xbf16>,
    return
  }
  func.func @transform_0(%arg0: i32) -> (i32, i32, i32, i32) {
    %c0_i32 = arith.constant 0 : i32
    %c0_i32_0 = arith.constant 0 : i32
    %c0_i32_1 = arith.constant 0 : i32
    %c0_i32_2 = arith.constant 0 : i32
    return %arg0, %c0_i32, %c0_i32_0, %c0_i32_1 : i32, i32, i32, i32
  }
  func.func @transform_1(%arg0: i32) -> (i32, i32) {
    %c0_i32 = arith.constant 0 : i32
    %c0_i32_0 = arith.constant 0 : i32
    %c0_i32_1 = arith.constant 0 : i32
    return %c0_i32, %c0_i32_0 : i32, i32
  }
  func.func @transform_2(%arg0: i32) -> (i32, i32) {
    %c0_i32 = arith.constant 0 : i32
    %c0_i32_0 = arith.constant 0 : i32
    %c0_i32_1 = arith.constant 0 : i32
    return %c0_i32, %c0_i32_0 : i32, i32
  }
  func.func @transform_3(%arg0: i32) -> (i32, i32) {
    %c0_i32 = arith.constant 0 : i32
    %c0_i32_0 = arith.constant 0 : i32
    %c0_i32_1 = arith.constant 0 : i32
    return %c0_i32, %c0_i32_0 : i32, i32
  }
  func.func @transform_4(%arg0: i32) -> (i32, i32) {
    %c0_i32 = arith.constant 0 : i32
    %c0_i32_0 = arith.constant 0 : i32
    %c0_i32_1 = arith.constant 0 : i32
    return %c0_i32, %c0_i32_0 : i32, i32
  }
  func.func @transform_5(%arg0: i32) -> (i32, i32) {
    %c0_i32 = arith.constant 0 : i32
    %c0_i32_0 = arith.constant 0 : i32
    %c0_i32_1 = arith.constant 0 : i32
    return %c0_i32, %c0_i32_0 : i32, i32
  }
  func.func @transform_6(%arg0: i32) -> (i32, i32) {
    %c0_i32 = arith.constant 0 : i32
    %c0_i32_0 = arith.constant 0 : i32
    %c0_i32_1 = arith.constant 0 : i32
    return %c0_i32, %c0_i32_0 : i32, i32
  }
  func.func @transform_7(%arg0: i32) -> (i32, i32) {
    %c0_i32 = arith.constant 0 : i32
    %c0_i32_0 = arith.constant 0 : i32
    %c0_i32_1 = arith.constant 0 : i32
    return %c0_i32, %c0_i32_0 : i32, i32
  }
  func.func @transform_8(%arg0: i32) -> (i32, i32) {
    %c0_i32 = arith.constant 0 : i32
    %c0_i32_0 = arith.constant 0 : i32
    %c0_i32_1 = arith.constant 0 : i32
    return %c0_i32, %c0_i32_0 : i32, i32
  }
  func.func @transform_9(%arg0: i32) -> (i32, i32, i32, i32) {
    %c0_i32 = arith.constant 0 : i32
    %c0_i32_0 = arith.constant 0 : i32
    %c0_i32_1 = arith.constant 0 : i32
    %c0_i32_2 = arith.constant 0 : i32
    return %arg0, %c0_i32, %c0_i32_0, %c0_i32_1 : i32, i32, i32, i32
  }
}

module attributes {stable_mosaic.version = 11 : i64} {
  func.func @_mbconv_s2_kernel(%arg0: i32, %arg1: memref<1x4x8x8x128xbf16, #tpu.memory_space<vmem>>, %arg2: memref<128x128xbf16, #tpu.memory_space<vmem>>, %arg3: memref<1x128xf32, #tpu.memory_space<vmem>>, %arg4: memref<9x128xf32, #tpu.memory_space<vmem>>, %arg5: memref<1x128xf32, #tpu.memory_space<vmem>>, %arg6: memref<128x128xbf16, #tpu.memory_space<vmem>>, %arg7: memref<1x128xf32, #tpu.memory_space<vmem>>, %arg8: memref<128x128xbf16, #tpu.memory_space<vmem>>, %arg9: memref<1x128xf32, #tpu.memory_space<vmem>>, %arg10: memref<128x128xbf16, #tpu.memory_space<vmem>>, %arg11: memref<1x128xf32, #tpu.memory_space<vmem>>, %arg12: memref<1x8x8x128xbf16, #tpu.memory_space<vmem>>, %arg13: memref<4x9x9x128xbf16, #tpu.memory_space<vmem>>) attributes {dimension_semantics = [#tpu.dimension_semantics<parallel>], iteration_bounds = array<i64: 2>, scalar_prefetch = 0 : i64, scratch_operands = 1 : i64, tpu.core_type = #tpu.core_type<tc>, window_params = [{transform_indices = @transform_0, window_bounds = array<i64: 1, 4, 8, 8, 128>}, {pipeline_mode = #tpu.pipeline_mode<synchronous>, transform_indices = @transform_1, window_bounds = array<i64: 128, 128>}, {pipeline_mode = #tpu.pipeline_mode<synchronous>, transform_indices = @transform_2, window_bounds = array<i64: 1, 128>}, {pipeline_mode = #tpu.pipeline_mode<synchronous>, transform_indices = @transform_3, window_bounds = array<i64: 9, 128>}, {pipeline_mode = #tpu.pipeline_mode<synchronous>, transform_indices = @transform_4, window_bounds = array<i64: 1, 128>}, {pipeline_mode = #tpu.pipeline_mode<synchronous>, transform_indices = @transform_5, window_bounds = array<i64: 128, 128>}, {pipeline_mode = #tpu.pipeline_mode<synchronous>, transform_indices = @transform_6, window_bounds = array<i64: 1, 128>}, {pipeline_mode = #tpu.pipeline_mode<synchronous>, transform_indices = @transform_7, window_bounds = array<i64: 128, 128>}, {pipeline_mode = #tpu.pipeline_mode<synchronous>, transform_indices = @transform_8, window_bounds = array<i64: 1, 128>}, {pipeline_mode = #tpu.pipeline_mode<synchronous>, transform_indices = @transform_9, window_bounds = array<i64: 128, 128>}, {pipeline_mode = #tpu.pipeline_mode<synchronous>, transform_indices = @transform_10, window_bounds = array<i64: 1, 128>}, {transform_indices = @transform_11, window_bounds = array<i64: 1, 8, 8, 128>}]} {
    %cst = arith.constant 0.000000e+00 : bf16
    %0 = vector.broadcast %cst : bf16 to vector<4x1x9x128xbf16>
    %c0 = arith.constant 0 : index
    %c8 = arith.constant 8 : index
    %c0_0 = arith.constant 0 : index
    %c0_1 = arith.constant 0 : index
    %1 = vector.load %arg13[%c0, %c8, %c0_0, %c0_1] : memref<4x9x9x128xbf16, #tpu.memory_space<vmem>>, vector<4x1x9x128xbf16>
    tpu.vector_store %arg13[%c0, %c8, %c0_0, %c0_1], %0 {strides = array<i32>} : memref<4x9x9x128xbf16, #tpu.memory_space<vmem>>, vector<4x1x9x128xbf16>,
    %cst_2 = arith.constant 0.000000e+00 : bf16
    %2 = vector.broadcast %cst_2 : bf16 to vector<4x9x1x128xbf16>
    %c0_3 = arith.constant 0 : index
    %c0_4 = arith.constant 0 : index
    %c8_5 = arith.constant 8 : index
    %c0_6 = arith.constant 0 : index
    %3 = vector.load %arg13[%c0_3, %c0_4, %c8_5, %c0_6] : memref<4x9x9x128xbf16, #tpu.memory_space<vmem>>, vector<4x9x1x128xbf16>
    tpu.vector_store %arg13[%c0_3, %c0_4, %c8_5, %c0_6], %2 {strides = array<i32>} : memref<4x9x9x128xbf16, #tpu.memory_space<vmem>>, vector<4x9x1x128xbf16>,
    %c0_7 = arith.constant 0 : index
    %c0_8 = arith.constant 0 : index
    %c0_9 = arith.constant 0 : index
    %c0_10 = arith.constant 0 : index
    %c0_11 = arith.constant 0 : index
    %4 = vector.load %arg1[%c0_7, %c0_8, %c0_9, %c0_10, %c0_11] : memref<1x4x8x8x128xbf16, #tpu.memory_space<vmem>>, vector<1x4x8x8x128xbf16>
    %5 = vector.shape_cast %4 : vector<1x4x8x8x128xbf16> to vector<4x8x8x128xbf16>
    %6 = vector.shape_cast %5 : vector<4x8x8x128xbf16> to vector<256x128xbf16>
    %c0_12 = arith.constant 0 : index
    %c0_13 = arith.constant 0 : index
    %7 = vector.load %arg2[%c0_12, %c0_13] : memref<128x128xbf16, #tpu.memory_space<vmem>>, vector<128x128xbf16>
    %cst_14 = arith.constant dense<0.000000e+00> : vector<256x128xf32>
    %8 = tpu.matmul %6, %7, %cst_14 {dimension_numbers = #tpu.dot_dimension_numbers<[1], [0], [0], [1], [0, 0, 1, 1], [], []>} : vector<256x128xbf16>, vector<128x128xbf16>, vector<256x128xf32> -> vector<256x128xf32>
    %c0_15 = arith.constant 0 : index
    %c0_16 = arith.constant 0 : index
    %9 = vector.load %arg3[%c0_15, %c0_16] : memref<1x128xf32, #tpu.memory_space<vmem>>, vector<1x128xf32>
    %10 = vector.broadcast %9 : vector<1x128xf32> to vector<256x128xf32>
    %11 = arith.addf %8, %10 : vector<256x128xf32>
    %cst_17 = arith.constant 5.000000e-01 : f32
    %12 = vector.broadcast %cst_17 : f32 to vector<256x128xf32>
    %13 = arith.mulf %12, %11 : vector<256x128xf32>
    %14 = math.tanh %13 : vector<256x128xf32>
    %cst_18 = arith.constant 1.000000e+00 : f32
    %15 = vector.broadcast %cst_18 : f32 to vector<256x128xf32>
    %16 = arith.addf %15, %14 : vector<256x128xf32>
    %cst_19 = arith.constant 5.000000e-01 : f32
    %17 = vector.broadcast %cst_19 : f32 to vector<256x128xf32>
    %18 = arith.mulf %17, %16 : vector<256x128xf32>
    %19 = arith.mulf %11, %18 : vector<256x128xf32>
    %20 = vector.shape_cast %19 : vector<256x128xf32> to vector<4x8x8x128xf32>
    %21 = arith.truncf %20 : vector<4x8x8x128xf32> to vector<4x8x8x128xbf16>
    %c0_20 = arith.constant 0 : index
    %c0_21 = arith.constant 0 : index
    %c0_22 = arith.constant 0 : index
    %c0_23 = arith.constant 0 : index
    %22 = vector.load %arg13[%c0_20, %c0_21, %c0_22, %c0_23] : memref<4x9x9x128xbf16, #tpu.memory_space<vmem>>, vector<4x8x8x128xbf16>
    tpu.vector_store %arg13[%c0_20, %c0_21, %c0_22, %c0_23], %21 {strides = array<i32>} : memref<4x9x9x128xbf16, #tpu.memory_space<vmem>>, vector<4x8x8x128xbf16>,
    %cst_24 = arith.constant 0.000000e+00 : f32
    %23 = vector.broadcast %cst_24 : f32 to vector<8x8x128xf32>
    %c0_25 = arith.constant 0 : index
    %c0_26 = arith.constant 0 : index
    %c0_27 = arith.constant 0 : index
    %c0_28 = arith.constant 0 : index
    %24 = vector.load %arg13[%c0_25, %c0_26, %c0_27, %c0_28] : memref<4x9x9x128xbf16, #tpu.memory_space<vmem>>, vector<1x8x8x128xbf16>
    %25 = vector.shape_cast %24 : vector<1x8x8x128xbf16> to vector<8x8x128xbf16>
    %c0_29 = arith.constant 0 : index
    %c0_30 = arith.constant 0 : index
    %26 = vector.load %arg4[%c0_29, %c0_30] : memref<9x128xf32, #tpu.memory_space<vmem>>, vector<1x128xf32>
    %27 = arith.extf %25 : vector<8x8x128xbf16> to vector<8x8x128xf32>
    %28 = vector.shape_cast %26 : vector<1x128xf32> to vector<1x1x128xf32>
    %29 = vector.broadcast %28 : vector<1x1x128xf32> to vector<8x8x128xf32>
    %30 = arith.mulf %27, %29 : vector<8x8x128xf32>
    %31 = arith.addf %23, %30 : vector<8x8x128xf32>
    %c1 = arith.constant 1 : index
    %c0_31 = arith.constant 0 : index
    %c0_32 = arith.constant 0 : index
    %c0_33 = arith.constant 0 : index
    %32 = vector.load %arg13[%c1, %c0_31, %c0_32, %c0_33] : memref<4x9x9x128xbf16, #tpu.memory_space<vmem>>, vector<1x8x8x128xbf16>
    %33 = vector.shape_cast %32 : vector<1x8x8x128xbf16> to vector<8x8x128xbf16>
    %c1_34 = arith.constant 1 : index
    %c0_35 = arith.constant 0 : index
    %34 = vector.load %arg4[%c1_34, %c0_35] : memref<9x128xf32, #tpu.memory_space<vmem>>, vector<1x128xf32>
    %35 = arith.extf %33 : vector<8x8x128xbf16> to vector<8x8x128xf32>
    %36 = vector.shape_cast %34 : vector<1x128xf32> to vector<1x1x128xf32>
    %37 = vector.broadcast %36 : vector<1x1x128xf32> to vector<8x8x128xf32>
    %38 = arith.mulf %35, %37 : vector<8x8x128xf32>
    %39 = arith.addf %31, %38 : vector<8x8x128xf32>
    %c0_36 = arith.constant 0 : index
    %c0_37 = arith.constant 0 : index
    %c1_38 = arith.constant 1 : index
    %c0_39 = arith.constant 0 : index
    %40 = vector.load %arg13[%c0_36, %c0_37, %c1_38, %c0_39] : memref<4x9x9x128xbf16, #tpu.memory_space<vmem>>, vector<1x8x8x128xbf16>
    %41 = vector.shape_cast %40 : vector<1x8x8x128xbf16> to vector<8x8x128xbf16>
    %c2 = arith.constant 2 : index
    %c0_40 = arith.constant 0 : index
    %42 = vector.load %arg4[%c2, %c0_40] : memref<9x128xf32, #tpu.memory_space<vmem>>, vector<1x128xf32>
    %43 = arith.extf %41 : vector<8x8x128xbf16> to vector<8x8x128xf32>
    %44 = vector.shape_cast %42 : vector<1x128xf32> to vector<1x1x128xf32>
    %45 = vector.broadcast %44 : vector<1x1x128xf32> to vector<8x8x128xf32>
    %46 = arith.mulf %43, %45 : vector<8x8x128xf32>
    %47 = arith.addf %39, %46 : vector<8x8x128xf32>
    %c2_41 = arith.constant 2 : index
    %c0_42 = arith.constant 0 : index
    %c0_43 = arith.constant 0 : index
    %c0_44 = arith.constant 0 : index
    %48 = vector.load %arg13[%c2_41, %c0_42, %c0_43, %c0_44] : memref<4x9x9x128xbf16, #tpu.memory_space<vmem>>, vector<1x8x8x128xbf16>
    %49 = vector.shape_cast %48 : vector<1x8x8x128xbf16> to vector<8x8x128xbf16>
    %c3 = arith.constant 3 : index
    %c0_45 = arith.constant 0 : index
    %50 = vector.load %arg4[%c3, %c0_45] : memref<9x128xf32, #tpu.memory_space<vmem>>, vector<1x128xf32>
    %51 = arith.extf %49 : vector<8x8x128xbf16> to vector<8x8x128xf32>
    %52 = vector.shape_cast %50 : vector<1x128xf32> to vector<1x1x128xf32>
    %53 = vector.broadcast %52 : vector<1x1x128xf32> to vector<8x8x128xf32>
    %54 = arith.mulf %51, %53 : vector<8x8x128xf32>
    %55 = arith.addf %47, %54 : vector<8x8x128xf32>
    %c3_46 = arith.constant 3 : index
    %c0_47 = arith.constant 0 : index
    %c0_48 = arith.constant 0 : index
    %c0_49 = arith.constant 0 : index
    %56 = vector.load %arg13[%c3_46, %c0_47, %c0_48, %c0_49] : memref<4x9x9x128xbf16, #tpu.memory_space<vmem>>, vector<1x8x8x128xbf16>
    %57 = vector.shape_cast %56 : vector<1x8x8x128xbf16> to vector<8x8x128xbf16>
    %c4 = arith.constant 4 : index
    %c0_50 = arith.constant 0 : index
    %58 = vector.load %arg4[%c4, %c0_50] : memref<9x128xf32, #tpu.memory_space<vmem>>, vector<1x128xf32>
    %59 = arith.extf %57 : vector<8x8x128xbf16> to vector<8x8x128xf32>
    %60 = vector.shape_cast %58 : vector<1x128xf32> to vector<1x1x128xf32>
    %61 = vector.broadcast %60 : vector<1x1x128xf32> to vector<8x8x128xf32>
    %62 = arith.mulf %59, %61 : vector<8x8x128xf32>
    %63 = arith.addf %55, %62 : vector<8x8x128xf32>
    %c2_51 = arith.constant 2 : index
    %c0_52 = arith.constant 0 : index
    %c1_53 = arith.constant 1 : index
    %c0_54 = arith.constant 0 : index
    %64 = vector.load %arg13[%c2_51, %c0_52, %c1_53, %c0_54] : memref<4x9x9x128xbf16, #tpu.memory_space<vmem>>, vector<1x8x8x128xbf16>
    %65 = vector.shape_cast %64 : vector<1x8x8x128xbf16> to vector<8x8x128xbf16>
    %c5 = arith.constant 5 : index
    %c0_55 = arith.constant 0 : index
    %66 = vector.load %arg4[%c5, %c0_55] : memref<9x128xf32, #tpu.memory_space<vmem>>, vector<1x128xf32>
    %67 = arith.extf %65 : vector<8x8x128xbf16> to vector<8x8x128xf32>
    %68 = vector.shape_cast %66 : vector<1x128xf32> to vector<1x1x128xf32>
    %69 = vector.broadcast %68 : vector<1x1x128xf32> to vector<8x8x128xf32>
    %70 = arith.mulf %67, %69 : vector<8x8x128xf32>
    %71 = arith.addf %63, %70 : vector<8x8x128xf32>
    %c0_56 = arith.constant 0 : index
    %c1_57 = arith.constant 1 : index
    %c0_58 = arith.constant 0 : index
    %c0_59 = arith.constant 0 : index
    %72 = vector.load %arg13[%c0_56, %c1_57, %c0_58, %c0_59] : memref<4x9x9x128xbf16, #tpu.memory_space<vmem>>, vector<1x8x8x128xbf16>
    %73 = vector.shape_cast %72 : vector<1x8x8x128xbf16> to vector<8x8x128xbf16>
    %c6 = arith.constant 6 : index
    %c0_60 = arith.constant 0 : index
    %74 = vector.load %arg4[%c6, %c0_60] : memref<9x128xf32, #tpu.memory_space<vmem>>, vector<1x128xf32>
    %75 = arith.extf %73 : vector<8x8x128xbf16> to vector<8x8x128xf32>
    %76 = vector.shape_cast %74 : vector<1x128xf32> to vector<1x1x128xf32>
    %77 = vector.broadcast %76 : vector<1x1x128xf32> to vector<8x8x128xf32>
    %78 = arith.mulf %75, %77 : vector<8x8x128xf32>
    %79 = arith.addf %71, %78 : vector<8x8x128xf32>
    %c1_61 = arith.constant 1 : index
    %c1_62 = arith.constant 1 : index
    %c0_63 = arith.constant 0 : index
    %c0_64 = arith.constant 0 : index
    %80 = vector.load %arg13[%c1_61, %c1_62, %c0_63, %c0_64] : memref<4x9x9x128xbf16, #tpu.memory_space<vmem>>, vector<1x8x8x128xbf16>
    %81 = vector.shape_cast %80 : vector<1x8x8x128xbf16> to vector<8x8x128xbf16>
    %c7 = arith.constant 7 : index
    %c0_65 = arith.constant 0 : index
    %82 = vector.load %arg4[%c7, %c0_65] : memref<9x128xf32, #tpu.memory_space<vmem>>, vector<1x128xf32>
    %83 = arith.extf %81 : vector<8x8x128xbf16> to vector<8x8x128xf32>
    %84 = vector.shape_cast %82 : vector<1x128xf32> to vector<1x1x128xf32>
    %85 = vector.broadcast %84 : vector<1x1x128xf32> to vector<8x8x128xf32>
    %86 = arith.mulf %83, %85 : vector<8x8x128xf32>
    %87 = arith.addf %79, %86 : vector<8x8x128xf32>
    %c0_66 = arith.constant 0 : index
    %c1_67 = arith.constant 1 : index
    %c1_68 = arith.constant 1 : index
    %c0_69 = arith.constant 0 : index
    %88 = vector.load %arg13[%c0_66, %c1_67, %c1_68, %c0_69] : memref<4x9x9x128xbf16, #tpu.memory_space<vmem>>, vector<1x8x8x128xbf16>
    %89 = vector.shape_cast %88 : vector<1x8x8x128xbf16> to vector<8x8x128xbf16>
    %c8_70 = arith.constant 8 : index
    %c0_71 = arith.constant 0 : index
    %90 = vector.load %arg4[%c8_70, %c0_71] : memref<9x128xf32, #tpu.memory_space<vmem>>, vector<1x128xf32>
    %91 = arith.extf %89 : vector<8x8x128xbf16> to vector<8x8x128xf32>
    %92 = vector.shape_cast %90 : vector<1x128xf32> to vector<1x1x128xf32>
    %93 = vector.broadcast %92 : vector<1x1x128xf32> to vector<8x8x128xf32>
    %94 = arith.mulf %91, %93 : vector<8x8x128xf32>
    %95 = arith.addf %87, %94 : vector<8x8x128xf32>
    %c0_72 = arith.constant 0 : index
    %c0_73 = arith.constant 0 : index
    %96 = vector.load %arg5[%c0_72, %c0_73] : memref<1x128xf32, #tpu.memory_space<vmem>>, vector<1x128xf32>
    %97 = vector.shape_cast %96 : vector<1x128xf32> to vector<1x1x128xf32>
    %98 = vector.broadcast %97 : vector<1x1x128xf32> to vector<8x8x128xf32>
    %99 = arith.addf %95, %98 : vector<8x8x128xf32>
    %cst_74 = arith.constant 5.000000e-01 : f32
    %100 = vector.broadcast %cst_74 : f32 to vector<8x8x128xf32>
    %101 = arith.mulf %100, %99 : vector<8x8x128xf32>
    %102 = math.tanh %101 : vector<8x8x128xf32>
    %cst_75 = arith.constant 1.000000e+00 : f32
    %103 = vector.broadcast %cst_75 : f32 to vector<8x8x128xf32>
    %104 = arith.addf %103, %102 : vector<8x8x128xf32>
    %cst_76 = arith.constant 5.000000e-01 : f32
    %105 = vector.broadcast %cst_76 : f32 to vector<8x8x128xf32>
    %106 = arith.mulf %105, %104 : vector<8x8x128xf32>
    %107 = arith.mulf %99, %106 : vector<8x8x128xf32>
    %108 = vector.shape_cast %107 : vector<8x8x128xf32> to vector<64x128xf32>
    %cst_77 = arith.constant dense<0.000000e+00> : vector<128xf32>
    %109 = vector.multi_reduction <add>, %108, %cst_77 [0] : vector<64x128xf32> to vector<128xf32>
    %110 = vector.shape_cast %109 : vector<128xf32> to vector<1x128xf32>
    %cst_78 = arith.constant 6.400000e+01 : f32
    %111 = vector.broadcast %cst_78 : f32 to vector<1x128xf32>
    %112 = arith.divf %110, %111 : vector<1x128xf32>
    %113 = arith.truncf %112 : vector<1x128xf32> to vector<1x128xbf16>
    %c0_79 = arith.constant 0 : index
    %c0_80 = arith.constant 0 : index
    %114 = vector.load %arg6[%c0_79, %c0_80] : memref<128x128xbf16, #tpu.memory_space<vmem>>, vector<128x128xbf16>
    %cst_81 = arith.constant dense<0.000000e+00> : vector<1x128xf32>
    %115 = tpu.matmul %113, %114, %cst_81 {dimension_numbers = #tpu.dot_dimension_numbers<[1], [0], [0], [1], [0, 0, 1, 1], [], []>} : vector<1x128xbf16>, vector<128x128xbf16>, vector<1x128xf32> -> vector<1x128xf32>
    %c0_82 = arith.constant 0 : index
    %c0_83 = arith.constant 0 : index
    %116 = vector.load %arg7[%c0_82, %c0_83] : memref<1x128xf32, #tpu.memory_space<vmem>>, vector<1x128xf32>
    %117 = arith.addf %115, %116 : vector<1x128xf32>
    %cst_84 = arith.constant 5.000000e-01 : f32
    %118 = vector.broadcast %cst_84 : f32 to vector<1x128xf32>
    %119 = arith.mulf %118, %117 : vector<1x128xf32>
    %120 = math.tanh %119 : vector<1x128xf32>
    %cst_85 = arith.constant 1.000000e+00 : f32
    %121 = vector.broadcast %cst_85 : f32 to vector<1x128xf32>
    %122 = arith.addf %121, %120 : vector<1x128xf32>
    %cst_86 = arith.constant 5.000000e-01 : f32
    %123 = vector.broadcast %cst_86 : f32 to vector<1x128xf32>
    %124 = arith.mulf %123, %122 : vector<1x128xf32>
    %125 = arith.mulf %117, %124 : vector<1x128xf32>
    %126 = arith.truncf %125 : vector<1x128xf32> to vector<1x128xbf16>
    %c0_87 = arith.constant 0 : index
    %c0_88 = arith.constant 0 : index
    %127 = vector.load %arg8[%c0_87, %c0_88] : memref<128x128xbf16, #tpu.memory_space<vmem>>, vector<128x128xbf16>
    %cst_89 = arith.constant dense<0.000000e+00> : vector<1x128xf32>
    %128 = tpu.matmul %126, %127, %cst_89 {dimension_numbers = #tpu.dot_dimension_numbers<[1], [0], [0], [1], [0, 0, 1, 1], [], []>} : vector<1x128xbf16>, vector<128x128xbf16>, vector<1x128xf32> -> vector<1x128xf32>
    %c0_90 = arith.constant 0 : index
    %c0_91 = arith.constant 0 : index
    %129 = vector.load %arg9[%c0_90, %c0_91] : memref<1x128xf32, #tpu.memory_space<vmem>>, vector<1x128xf32>
    %130 = arith.addf %128, %129 : vector<1x128xf32>
    %cst_92 = arith.constant 5.000000e-01 : f32
    %131 = vector.broadcast %cst_92 : f32 to vector<1x128xf32>
    %132 = arith.mulf %131, %130 : vector<1x128xf32>
    %133 = math.tanh %132 : vector<1x128xf32>
    %cst_93 = arith.constant 1.000000e+00 : f32
    %134 = vector.broadcast %cst_93 : f32 to vector<1x128xf32>
    %135 = arith.addf %134, %133 : vector<1x128xf32>
    %cst_94 = arith.constant 5.000000e-01 : f32
    %136 = vector.broadcast %cst_94 : f32 to vector<1x128xf32>
    %137 = arith.mulf %136, %135 : vector<1x128xf32>
    %138 = vector.broadcast %137 : vector<1x128xf32> to vector<64x128xf32>
    %139 = arith.mulf %108, %138 : vector<64x128xf32>
    %140 = arith.truncf %139 : vector<64x128xf32> to vector<64x128xbf16>
    %c0_95 = arith.constant 0 : index
    %c0_96 = arith.constant 0 : index
    %141 = vector.load %arg10[%c0_95, %c0_96] : memref<128x128xbf16, #tpu.memory_space<vmem>>, vector<128x128xbf16>
    %cst_97 = arith.constant dense<0.000000e+00> : vector<64x128xf32>
    %142 = tpu.matmul %140, %141, %cst_97 {dimension_numbers = #tpu.dot_dimension_numbers<[1], [0], [0], [1], [0, 0, 1, 1], [], []>} : vector<64x128xbf16>, vector<128x128xbf16>, vector<64x128xf32> -> vector<64x128xf32>
    %c0_98 = arith.constant 0 : index
    %c0_99 = arith.constant 0 : index
    %143 = vector.load %arg11[%c0_98, %c0_99] : memref<1x128xf32, #tpu.memory_space<vmem>>, vector<1x128xf32>
    %144 = vector.broadcast %143 : vector<1x128xf32> to vector<64x128xf32>
    %145 = arith.addf %142, %144 : vector<64x128xf32>
    %146 = vector.shape_cast %145 : vector<64x128xf32> to vector<8x8x128xf32>
    %147 = arith.truncf %146 : vector<8x8x128xf32> to vector<8x8x128xbf16>
    %c0_100 = arith.constant 0 : index
    %c0_101 = arith.constant 0 : index
    %c0_102 = arith.constant 0 : index
    %c0_103 = arith.constant 0 : index
    %148 = vector.load %arg12[%c0_100, %c0_101, %c0_102, %c0_103] : memref<1x8x8x128xbf16, #tpu.memory_space<vmem>>, vector<1x8x8x128xbf16>
    %149 = vector.shape_cast %148 : vector<1x8x8x128xbf16> to vector<8x8x128xbf16>
    %150 = vector.shape_cast %147 : vector<8x8x128xbf16> to vector<1x8x8x128xbf16>
    tpu.vector_store %arg12[%c0_100, %c0_101, %c0_102, %c0_103], %150 {strides = array<i32>} : memref<1x8x8x128xbf16, #tpu.memory_space<vmem>>, vector<1x8x8x128xbf16>,
    return
  }
  func.func @transform_0(%arg0: i32) -> (i32, i32, i32, i32, i32) {
    %c0_i32 = arith.constant 0 : i32
    %c0_i32_0 = arith.constant 0 : i32
    %c0_i32_1 = arith.constant 0 : i32
    %c0_i32_2 = arith.constant 0 : i32
    %c0_i32_3 = arith.constant 0 : i32
    return %arg0, %c0_i32, %c0_i32_0, %c0_i32_1, %c0_i32_2 : i32, i32, i32, i32, i32
  }
  func.func @transform_1(%arg0: i32) -> (i32, i32) {
    %c0_i32 = arith.constant 0 : i32
    %c0_i32_0 = arith.constant 0 : i32
    %c0_i32_1 = arith.constant 0 : i32
    return %c0_i32, %c0_i32_0 : i32, i32
  }
  func.func @transform_2(%arg0: i32) -> (i32, i32) {
    %c0_i32 = arith.constant 0 : i32
    %c0_i32_0 = arith.constant 0 : i32
    %c0_i32_1 = arith.constant 0 : i32
    return %c0_i32, %c0_i32_0 : i32, i32
  }
  func.func @transform_3(%arg0: i32) -> (i32, i32) {
    %c0_i32 = arith.constant 0 : i32
    %c0_i32_0 = arith.constant 0 : i32
    %c0_i32_1 = arith.constant 0 : i32
    return %c0_i32, %c0_i32_0 : i32, i32
  }
  func.func @transform_4(%arg0: i32) -> (i32, i32) {
    %c0_i32 = arith.constant 0 : i32
    %c0_i32_0 = arith.constant 0 : i32
    %c0_i32_1 = arith.constant 0 : i32
    return %c0_i32, %c0_i32_0 : i32, i32
  }
  func.func @transform_5(%arg0: i32) -> (i32, i32) {
    %c0_i32 = arith.constant 0 : i32
    %c0_i32_0 = arith.constant 0 : i32
    %c0_i32_1 = arith.constant 0 : i32
    return %c0_i32, %c0_i32_0 : i32, i32
  }
  func.func @transform_6(%arg0: i32) -> (i32, i32) {
    %c0_i32 = arith.constant 0 : i32
    %c0_i32_0 = arith.constant 0 : i32
    %c0_i32_1 = arith.constant 0 : i32
    return %c0_i32, %c0_i32_0 : i32, i32
  }
  func.func @transform_7(%arg0: i32) -> (i32, i32) {
    %c0_i32 = arith.constant 0 : i32
    %c0_i32_0 = arith.constant 0 : i32
    %c0_i32_1 = arith.constant 0 : i32
    return %c0_i32, %c0_i32_0 : i32, i32
  }
  func.func @transform_8(%arg0: i32) -> (i32, i32) {
    %c0_i32 = arith.constant 0 : i32
    %c0_i32_0 = arith.constant 0 : i32
    %c0_i32_1 = arith.constant 0 : i32
    return %c0_i32, %c0_i32_0 : i32, i32
  }
  func.func @transform_9(%arg0: i32) -> (i32, i32) {
    %c0_i32 = arith.constant 0 : i32
    %c0_i32_0 = arith.constant 0 : i32
    %c0_i32_1 = arith.constant 0 : i32
    return %c0_i32, %c0_i32_0 : i32, i32
  }
  func.func @transform_10(%arg0: i32) -> (i32, i32) {
    %c0_i32 = arith.constant 0 : i32
    %c0_i32_0 = arith.constant 0 : i32
    %c0_i32_1 = arith.constant 0 : i32
    return %c0_i32, %c0_i32_0 : i32, i32
  }
  func.func @transform_11(%arg0: i32) -> (i32, i32, i32, i32) {
    %c0_i32 = arith.constant 0 : i32
    %c0_i32_0 = arith.constant 0 : i32
    %c0_i32_1 = arith.constant 0 : i32
    %c0_i32_2 = arith.constant 0 : i32
    return %arg0, %c0_i32, %c0_i32_0, %c0_i32_1 : i32, i32, i32, i32
  }
}

module attributes {stable_mosaic.version = 11 : i64} {
  func.func @_mbconv_s1_kernel(%arg0: i32, %arg1: memref<1x8x8x128xbf16, #tpu.memory_space<vmem>>, %arg2: memref<128x128xbf16, #tpu.memory_space<vmem>>, %arg3: memref<1x128xf32, #tpu.memory_space<vmem>>, %arg4: memref<9x128xf32, #tpu.memory_space<vmem>>, %arg5: memref<1x128xf32, #tpu.memory_space<vmem>>, %arg6: memref<128x128xbf16, #tpu.memory_space<vmem>>, %arg7: memref<1x128xf32, #tpu.memory_space<vmem>>, %arg8: memref<128x128xbf16, #tpu.memory_space<vmem>>, %arg9: memref<1x128xf32, #tpu.memory_space<vmem>>, %arg10: memref<128x128xbf16, #tpu.memory_space<vmem>>, %arg11: memref<1x128xf32, #tpu.memory_space<vmem>>, %arg12: memref<128x128xbf16, #tpu.memory_space<vmem>>, %arg13: memref<1x128xf32, #tpu.memory_space<vmem>>, %arg14: memref<1x8x8x64xf32, #tpu.memory_space<vmem>>, %arg15: memref<10x24x128xbf16, #tpu.memory_space<vmem>>) attributes {dimension_semantics = [#tpu.dimension_semantics<parallel>], iteration_bounds = array<i64: 2>, scalar_prefetch = 0 : i64, scratch_operands = 1 : i64, tpu.core_type = #tpu.core_type<tc>, window_params = [{transform_indices = @transform_0, window_bounds = array<i64: 1, 8, 8, 128>}, {pipeline_mode = #tpu.pipeline_mode<synchronous>, transform_indices = @transform_1, window_bounds = array<i64: 128, 128>}, {pipeline_mode = #tpu.pipeline_mode<synchronous>, transform_indices = @transform_2, window_bounds = array<i64: 1, 128>}, {pipeline_mode = #tpu.pipeline_mode<synchronous>, transform_indices = @transform_3, window_bounds = array<i64: 9, 128>}, {pipeline_mode = #tpu.pipeline_mode<synchronous>, transform_indices = @transform_4, window_bounds = array<i64: 1, 128>}, {pipeline_mode = #tpu.pipeline_mode<synchronous>, transform_indices = @transform_5, window_bounds = array<i64: 128, 128>}, {pipeline_mode = #tpu.pipeline_mode<synchronous>, transform_indices = @transform_6, window_bounds = array<i64: 1, 128>}, {pipeline_mode = #tpu.pipeline_mode<synchronous>, transform_indices = @transform_7, window_bounds = array<i64: 128, 128>}, {pipeline_mode = #tpu.pipeline_mode<synchronous>, transform_indices = @transform_8, window_bounds = array<i64: 1, 128>}, {pipeline_mode = #tpu.pipeline_mode<synchronous>, transform_indices = @transform_9, window_bounds = array<i64: 128, 128>}, {pipeline_mode = #tpu.pipeline_mode<synchronous>, transform_indices = @transform_10, window_bounds = array<i64: 1, 128>}, {pipeline_mode = #tpu.pipeline_mode<synchronous>, transform_indices = @transform_11, window_bounds = array<i64: 128, 128>}, {pipeline_mode = #tpu.pipeline_mode<synchronous>, transform_indices = @transform_12, window_bounds = array<i64: 1, 128>}, {transform_indices = @transform_13, window_bounds = array<i64: 1, 8, 8, 64>}]} {
    %cst = arith.constant 0.000000e+00 : bf16
    %0 = vector.broadcast %cst : bf16 to vector<1x24x128xbf16>
    %c0 = arith.constant 0 : index
    %c0_0 = arith.constant 0 : index
    %c0_1 = arith.constant 0 : index
    %1 = vector.load %arg15[%c0, %c0_0, %c0_1] : memref<10x24x128xbf16, #tpu.memory_space<vmem>>, vector<1x24x128xbf16>
    tpu.vector_store %arg15[%c0, %c0_0, %c0_1], %0 {strides = array<i32>} : memref<10x24x128xbf16, #tpu.memory_space<vmem>>, vector<1x24x128xbf16>,
    %cst_2 = arith.constant 0.000000e+00 : bf16
    %2 = vector.broadcast %cst_2 : bf16 to vector<1x24x128xbf16>
    %c9 = arith.constant 9 : index
    %c0_3 = arith.constant 0 : index
    %c0_4 = arith.constant 0 : index
    %3 = vector.load %arg15[%c9, %c0_3, %c0_4] : memref<10x24x128xbf16, #tpu.memory_space<vmem>>, vector<1x24x128xbf16>
    tpu.vector_store %arg15[%c9, %c0_3, %c0_4], %2 {strides = array<i32>} : memref<10x24x128xbf16, #tpu.memory_space<vmem>>, vector<1x24x128xbf16>,
    %cst_5 = arith.constant 0.000000e+00 : bf16
    %4 = vector.broadcast %cst_5 : bf16 to vector<10x1x128xbf16>
    %c0_6 = arith.constant 0 : index
    %c7 = arith.constant 7 : index
    %c0_7 = arith.constant 0 : index
    %5 = vector.load %arg15[%c0_6, %c7, %c0_7] : memref<10x24x128xbf16, #tpu.memory_space<vmem>>, vector<10x1x128xbf16>
    tpu.vector_store %arg15[%c0_6, %c7, %c0_7], %4 {strides = array<i32>} : memref<10x24x128xbf16, #tpu.memory_space<vmem>>, vector<10x1x128xbf16>,
    %cst_8 = arith.constant 0.000000e+00 : bf16
    %6 = vector.broadcast %cst_8 : bf16 to vector<10x1x128xbf16>
    %c0_9 = arith.constant 0 : index
    %c16 = arith.constant 16 : index
    %c0_10 = arith.constant 0 : index
    %7 = vector.load %arg15[%c0_9, %c16, %c0_10] : memref<10x24x128xbf16, #tpu.memory_space<vmem>>, vector<10x1x128xbf16>
    tpu.vector_store %arg15[%c0_9, %c16, %c0_10], %6 {strides = array<i32>} : memref<10x24x128xbf16, #tpu.memory_space<vmem>>, vector<10x1x128xbf16>,
    %c0_11 = arith.constant 0 : index
    %c0_12 = arith.constant 0 : index
    %c0_13 = arith.constant 0 : index
    %c0_14 = arith.constant 0 : index
    %8 = vector.load %arg1[%c0_11, %c0_12, %c0_13, %c0_14] : memref<1x8x8x128xbf16, #tpu.memory_space<vmem>>, vector<1x8x8x128xbf16>
    %9 = vector.shape_cast %8 : vector<1x8x8x128xbf16> to vector<8x8x128xbf16>
    %10 = vector.shape_cast %9 : vector<8x8x128xbf16> to vector<64x128xbf16>
    %c0_15 = arith.constant 0 : index
    %c0_16 = arith.constant 0 : index
    %11 = vector.load %arg2[%c0_15, %c0_16] : memref<128x128xbf16, #tpu.memory_space<vmem>>, vector<128x128xbf16>
    %cst_17 = arith.constant dense<0.000000e+00> : vector<64x128xf32>
    %12 = tpu.matmul %10, %11, %cst_17 {dimension_numbers = #tpu.dot_dimension_numbers<[1], [0], [0], [1], [0, 0, 1, 1], [], []>} : vector<64x128xbf16>, vector<128x128xbf16>, vector<64x128xf32> -> vector<64x128xf32>
    %c0_18 = arith.constant 0 : index
    %c0_19 = arith.constant 0 : index
    %13 = vector.load %arg3[%c0_18, %c0_19] : memref<1x128xf32, #tpu.memory_space<vmem>>, vector<1x128xf32>
    %14 = vector.broadcast %13 : vector<1x128xf32> to vector<64x128xf32>
    %15 = arith.addf %12, %14 : vector<64x128xf32>
    %cst_20 = arith.constant 5.000000e-01 : f32
    %16 = vector.broadcast %cst_20 : f32 to vector<64x128xf32>
    %17 = arith.mulf %16, %15 : vector<64x128xf32>
    %18 = math.tanh %17 : vector<64x128xf32>
    %cst_21 = arith.constant 1.000000e+00 : f32
    %19 = vector.broadcast %cst_21 : f32 to vector<64x128xf32>
    %20 = arith.addf %19, %18 : vector<64x128xf32>
    %cst_22 = arith.constant 5.000000e-01 : f32
    %21 = vector.broadcast %cst_22 : f32 to vector<64x128xf32>
    %22 = arith.mulf %21, %20 : vector<64x128xf32>
    %23 = arith.mulf %15, %22 : vector<64x128xf32>
    %24 = vector.shape_cast %23 : vector<64x128xf32> to vector<8x8x128xf32>
    %25 = arith.truncf %24 : vector<8x8x128xf32> to vector<8x8x128xbf16>
    %c1 = arith.constant 1 : index
    %c8 = arith.constant 8 : index
    %c0_23 = arith.constant 0 : index
    %26 = vector.load %arg15[%c1, %c8, %c0_23] : memref<10x24x128xbf16, #tpu.memory_space<vmem>>, vector<8x8x128xbf16>
    tpu.vector_store %arg15[%c1, %c8, %c0_23], %25 {strides = array<i32>} : memref<10x24x128xbf16, #tpu.memory_space<vmem>>, vector<8x8x128xbf16>,
    %cst_24 = arith.constant 0.000000e+00 : f32
    %27 = vector.broadcast %cst_24 : f32 to vector<8x8x128xf32>
    %c0_25 = arith.constant 0 : index
    %c7_26 = arith.constant 7 : index
    %c0_27 = arith.constant 0 : index
    %28 = vector.load %arg15[%c0_25, %c7_26, %c0_27] : memref<10x24x128xbf16, #tpu.memory_space<vmem>>, vector<8x8x128xbf16>
    %c0_28 = arith.constant 0 : index
    %c0_29 = arith.constant 0 : index
    %29 = vector.load %arg4[%c0_28, %c0_29] : memref<9x128xf32, #tpu.memory_space<vmem>>, vector<1x128xf32>
    %30 = arith.extf %28 : vector<8x8x128xbf16> to vector<8x8x128xf32>
    %31 = vector.shape_cast %29 : vector<1x128xf32> to vector<1x1x128xf32>
    %32 = vector.broadcast %31 : vector<1x1x128xf32> to vector<8x8x128xf32>
    %33 = arith.mulf %30, %32 : vector<8x8x128xf32>
    %34 = arith.addf %27, %33 : vector<8x8x128xf32>
    %c0_30 = arith.constant 0 : index
    %c8_31 = arith.constant 8 : index
    %c0_32 = arith.constant 0 : index
    %35 = vector.load %arg15[%c0_30, %c8_31, %c0_32] : memref<10x24x128xbf16, #tpu.memory_space<vmem>>, vector<8x8x128xbf16>
    %c1_33 = arith.constant 1 : index
    %c0_34 = arith.constant 0 : index
    %36 = vector.load %arg4[%c1_33, %c0_34] : memref<9x128xf32, #tpu.memory_space<vmem>>, vector<1x128xf32>
    %37 = arith.extf %35 : vector<8x8x128xbf16> to vector<8x8x128xf32>
    %38 = vector.shape_cast %36 : vector<1x128xf32> to vector<1x1x128xf32>
    %39 = vector.broadcast %38 : vector<1x1x128xf32> to vector<8x8x128xf32>
    %40 = arith.mulf %37, %39 : vector<8x8x128xf32>
    %41 = arith.addf %34, %40 : vector<8x8x128xf32>
    %c0_35 = arith.constant 0 : index
    %c9_36 = arith.constant 9 : index
    %c0_37 = arith.constant 0 : index
    %42 = vector.load %arg15[%c0_35, %c9_36, %c0_37] : memref<10x24x128xbf16, #tpu.memory_space<vmem>>, vector<8x8x128xbf16>
    %c2 = arith.constant 2 : index
    %c0_38 = arith.constant 0 : index
    %43 = vector.load %arg4[%c2, %c0_38] : memref<9x128xf32, #tpu.memory_space<vmem>>, vector<1x128xf32>
    %44 = arith.extf %42 : vector<8x8x128xbf16> to vector<8x8x128xf32>
    %45 = vector.shape_cast %43 : vector<1x128xf32> to vector<1x1x128xf32>
    %46 = vector.broadcast %45 : vector<1x1x128xf32> to vector<8x8x128xf32>
    %47 = arith.mulf %44, %46 : vector<8x8x128xf32>
    %48 = arith.addf %41, %47 : vector<8x8x128xf32>
    %c1_39 = arith.constant 1 : index
    %c7_40 = arith.constant 7 : index
    %c0_41 = arith.constant 0 : index
    %49 = vector.load %arg15[%c1_39, %c7_40, %c0_41] : memref<10x24x128xbf16, #tpu.memory_space<vmem>>, vector<8x8x128xbf16>
    %c3 = arith.constant 3 : index
    %c0_42 = arith.constant 0 : index
    %50 = vector.load %arg4[%c3, %c0_42] : memref<9x128xf32, #tpu.memory_space<vmem>>, vector<1x128xf32>
    %51 = arith.extf %49 : vector<8x8x128xbf16> to vector<8x8x128xf32>
    %52 = vector.shape_cast %50 : vector<1x128xf32> to vector<1x1x128xf32>
    %53 = vector.broadcast %52 : vector<1x1x128xf32> to vector<8x8x128xf32>
    %54 = arith.mulf %51, %53 : vector<8x8x128xf32>
    %55 = arith.addf %48, %54 : vector<8x8x128xf32>
    %c1_43 = arith.constant 1 : index
    %c8_44 = arith.constant 8 : index
    %c0_45 = arith.constant 0 : index
    %56 = vector.load %arg15[%c1_43, %c8_44, %c0_45] : memref<10x24x128xbf16, #tpu.memory_space<vmem>>, vector<8x8x128xbf16>
    %c4 = arith.constant 4 : index
    %c0_46 = arith.constant 0 : index
    %57 = vector.load %arg4[%c4, %c0_46] : memref<9x128xf32, #tpu.memory_space<vmem>>, vector<1x128xf32>
    %58 = arith.extf %56 : vector<8x8x128xbf16> to vector<8x8x128xf32>
    %59 = vector.shape_cast %57 : vector<1x128xf32> to vector<1x1x128xf32>
    %60 = vector.broadcast %59 : vector<1x1x128xf32> to vector<8x8x128xf32>
    %61 = arith.mulf %58, %60 : vector<8x8x128xf32>
    %62 = arith.addf %55, %61 : vector<8x8x128xf32>
    %c1_47 = arith.constant 1 : index
    %c9_48 = arith.constant 9 : index
    %c0_49 = arith.constant 0 : index
    %63 = vector.load %arg15[%c1_47, %c9_48, %c0_49] : memref<10x24x128xbf16, #tpu.memory_space<vmem>>, vector<8x8x128xbf16>
    %c5 = arith.constant 5 : index
    %c0_50 = arith.constant 0 : index
    %64 = vector.load %arg4[%c5, %c0_50] : memref<9x128xf32, #tpu.memory_space<vmem>>, vector<1x128xf32>
    %65 = arith.extf %63 : vector<8x8x128xbf16> to vector<8x8x128xf32>
    %66 = vector.shape_cast %64 : vector<1x128xf32> to vector<1x1x128xf32>
    %67 = vector.broadcast %66 : vector<1x1x128xf32> to vector<8x8x128xf32>
    %68 = arith.mulf %65, %67 : vector<8x8x128xf32>
    %69 = arith.addf %62, %68 : vector<8x8x128xf32>
    %c2_51 = arith.constant 2 : index
    %c7_52 = arith.constant 7 : index
    %c0_53 = arith.constant 0 : index
    %70 = vector.load %arg15[%c2_51, %c7_52, %c0_53] : memref<10x24x128xbf16, #tpu.memory_space<vmem>>, vector<8x8x128xbf16>
    %c6 = arith.constant 6 : index
    %c0_54 = arith.constant 0 : index
    %71 = vector.load %arg4[%c6, %c0_54] : memref<9x128xf32, #tpu.memory_space<vmem>>, vector<1x128xf32>
    %72 = arith.extf %70 : vector<8x8x128xbf16> to vector<8x8x128xf32>
    %73 = vector.shape_cast %71 : vector<1x128xf32> to vector<1x1x128xf32>
    %74 = vector.broadcast %73 : vector<1x1x128xf32> to vector<8x8x128xf32>
    %75 = arith.mulf %72, %74 : vector<8x8x128xf32>
    %76 = arith.addf %69, %75 : vector<8x8x128xf32>
    %c2_55 = arith.constant 2 : index
    %c8_56 = arith.constant 8 : index
    %c0_57 = arith.constant 0 : index
    %77 = vector.load %arg15[%c2_55, %c8_56, %c0_57] : memref<10x24x128xbf16, #tpu.memory_space<vmem>>, vector<8x8x128xbf16>
    %c7_58 = arith.constant 7 : index
    %c0_59 = arith.constant 0 : index
    %78 = vector.load %arg4[%c7_58, %c0_59] : memref<9x128xf32, #tpu.memory_space<vmem>>, vector<1x128xf32>
    %79 = arith.extf %77 : vector<8x8x128xbf16> to vector<8x8x128xf32>
    %80 = vector.shape_cast %78 : vector<1x128xf32> to vector<1x1x128xf32>
    %81 = vector.broadcast %80 : vector<1x1x128xf32> to vector<8x8x128xf32>
    %82 = arith.mulf %79, %81 : vector<8x8x128xf32>
    %83 = arith.addf %76, %82 : vector<8x8x128xf32>
    %c2_60 = arith.constant 2 : index
    %c9_61 = arith.constant 9 : index
    %c0_62 = arith.constant 0 : index
    %84 = vector.load %arg15[%c2_60, %c9_61, %c0_62] : memref<10x24x128xbf16, #tpu.memory_space<vmem>>, vector<8x8x128xbf16>
    %c8_63 = arith.constant 8 : index
    %c0_64 = arith.constant 0 : index
    %85 = vector.load %arg4[%c8_63, %c0_64] : memref<9x128xf32, #tpu.memory_space<vmem>>, vector<1x128xf32>
    %86 = arith.extf %84 : vector<8x8x128xbf16> to vector<8x8x128xf32>
    %87 = vector.shape_cast %85 : vector<1x128xf32> to vector<1x1x128xf32>
    %88 = vector.broadcast %87 : vector<1x1x128xf32> to vector<8x8x128xf32>
    %89 = arith.mulf %86, %88 : vector<8x8x128xf32>
    %90 = arith.addf %83, %89 : vector<8x8x128xf32>
    %c0_65 = arith.constant 0 : index
    %c0_66 = arith.constant 0 : index
    %91 = vector.load %arg5[%c0_65, %c0_66] : memref<1x128xf32, #tpu.memory_space<vmem>>, vector<1x128xf32>
    %92 = vector.shape_cast %91 : vector<1x128xf32> to vector<1x1x128xf32>
    %93 = vector.broadcast %92 : vector<1x1x128xf32> to vector<8x8x128xf32>
    %94 = arith.addf %90, %93 : vector<8x8x128xf32>
    %cst_67 = arith.constant 5.000000e-01 : f32
    %95 = vector.broadcast %cst_67 : f32 to vector<8x8x128xf32>
    %96 = arith.mulf %95, %94 : vector<8x8x128xf32>
    %97 = math.tanh %96 : vector<8x8x128xf32>
    %cst_68 = arith.constant 1.000000e+00 : f32
    %98 = vector.broadcast %cst_68 : f32 to vector<8x8x128xf32>
    %99 = arith.addf %98, %97 : vector<8x8x128xf32>
    %cst_69 = arith.constant 5.000000e-01 : f32
    %100 = vector.broadcast %cst_69 : f32 to vector<8x8x128xf32>
    %101 = arith.mulf %100, %99 : vector<8x8x128xf32>
    %102 = arith.mulf %94, %101 : vector<8x8x128xf32>
    %103 = vector.shape_cast %102 : vector<8x8x128xf32> to vector<64x128xf32>
    %cst_70 = arith.constant dense<0.000000e+00> : vector<128xf32>
    %104 = vector.multi_reduction <add>, %103, %cst_70 [0] : vector<64x128xf32> to vector<128xf32>
    %105 = vector.shape_cast %104 : vector<128xf32> to vector<1x128xf32>
    %cst_71 = arith.constant 6.400000e+01 : f32
    %106 = vector.broadcast %cst_71 : f32 to vector<1x128xf32>
    %107 = arith.divf %105, %106 : vector<1x128xf32>
    %108 = arith.truncf %107 : vector<1x128xf32> to vector<1x128xbf16>
    %c0_72 = arith.constant 0 : index
    %c0_73 = arith.constant 0 : index
    %109 = vector.load %arg6[%c0_72, %c0_73] : memref<128x128xbf16, #tpu.memory_space<vmem>>, vector<128x128xbf16>
    %cst_74 = arith.constant dense<0.000000e+00> : vector<1x128xf32>
    %110 = tpu.matmul %108, %109, %cst_74 {dimension_numbers = #tpu.dot_dimension_numbers<[1], [0], [0], [1], [0, 0, 1, 1], [], []>} : vector<1x128xbf16>, vector<128x128xbf16>, vector<1x128xf32> -> vector<1x128xf32>
    %c0_75 = arith.constant 0 : index
    %c0_76 = arith.constant 0 : index
    %111 = vector.load %arg7[%c0_75, %c0_76] : memref<1x128xf32, #tpu.memory_space<vmem>>, vector<1x128xf32>
    %112 = arith.addf %110, %111 : vector<1x128xf32>
    %cst_77 = arith.constant 5.000000e-01 : f32
    %113 = vector.broadcast %cst_77 : f32 to vector<1x128xf32>
    %114 = arith.mulf %113, %112 : vector<1x128xf32>
    %115 = math.tanh %114 : vector<1x128xf32>
    %cst_78 = arith.constant 1.000000e+00 : f32
    %116 = vector.broadcast %cst_78 : f32 to vector<1x128xf32>
    %117 = arith.addf %116, %115 : vector<1x128xf32>
    %cst_79 = arith.constant 5.000000e-01 : f32
    %118 = vector.broadcast %cst_79 : f32 to vector<1x128xf32>
    %119 = arith.mulf %118, %117 : vector<1x128xf32>
    %120 = arith.mulf %112, %119 : vector<1x128xf32>
    %121 = arith.truncf %120 : vector<1x128xf32> to vector<1x128xbf16>
    %c0_80 = arith.constant 0 : index
    %c0_81 = arith.constant 0 : index
    %122 = vector.load %arg8[%c0_80, %c0_81] : memref<128x128xbf16, #tpu.memory_space<vmem>>, vector<128x128xbf16>
    %cst_82 = arith.constant dense<0.000000e+00> : vector<1x128xf32>
    %123 = tpu.matmul %121, %122, %cst_82 {dimension_numbers = #tpu.dot_dimension_numbers<[1], [0], [0], [1], [0, 0, 1, 1], [], []>} : vector<1x128xbf16>, vector<128x128xbf16>, vector<1x128xf32> -> vector<1x128xf32>
    %c0_83 = arith.constant 0 : index
    %c0_84 = arith.constant 0 : index
    %124 = vector.load %arg9[%c0_83, %c0_84] : memref<1x128xf32, #tpu.memory_space<vmem>>, vector<1x128xf32>
    %125 = arith.addf %123, %124 : vector<1x128xf32>
    %cst_85 = arith.constant 5.000000e-01 : f32
    %126 = vector.broadcast %cst_85 : f32 to vector<1x128xf32>
    %127 = arith.mulf %126, %125 : vector<1x128xf32>
    %128 = math.tanh %127 : vector<1x128xf32>
    %cst_86 = arith.constant 1.000000e+00 : f32
    %129 = vector.broadcast %cst_86 : f32 to vector<1x128xf32>
    %130 = arith.addf %129, %128 : vector<1x128xf32>
    %cst_87 = arith.constant 5.000000e-01 : f32
    %131 = vector.broadcast %cst_87 : f32 to vector<1x128xf32>
    %132 = arith.mulf %131, %130 : vector<1x128xf32>
    %133 = vector.broadcast %132 : vector<1x128xf32> to vector<64x128xf32>
    %134 = arith.mulf %103, %133 : vector<64x128xf32>
    %135 = arith.truncf %134 : vector<64x128xf32> to vector<64x128xbf16>
    %c0_88 = arith.constant 0 : index
    %c0_89 = arith.constant 0 : index
    %136 = vector.load %arg10[%c0_88, %c0_89] : memref<128x128xbf16, #tpu.memory_space<vmem>>, vector<128x128xbf16>
    %cst_90 = arith.constant dense<0.000000e+00> : vector<64x128xf32>
    %137 = tpu.matmul %135, %136, %cst_90 {dimension_numbers = #tpu.dot_dimension_numbers<[1], [0], [0], [1], [0, 0, 1, 1], [], []>} : vector<64x128xbf16>, vector<128x128xbf16>, vector<64x128xf32> -> vector<64x128xf32>
    %c0_91 = arith.constant 0 : index
    %c0_92 = arith.constant 0 : index
    %138 = vector.load %arg11[%c0_91, %c0_92] : memref<1x128xf32, #tpu.memory_space<vmem>>, vector<1x128xf32>
    %139 = vector.broadcast %138 : vector<1x128xf32> to vector<64x128xf32>
    %140 = arith.addf %137, %139 : vector<64x128xf32>
    %c0_93 = arith.constant 0 : index
    %c0_94 = arith.constant 0 : index
    %c0_95 = arith.constant 0 : index
    %c0_96 = arith.constant 0 : index
    %141 = vector.load %arg1[%c0_93, %c0_94, %c0_95, %c0_96] : memref<1x8x8x128xbf16, #tpu.memory_space<vmem>>, vector<1x8x8x128xbf16>
    %142 = vector.shape_cast %141 : vector<1x8x8x128xbf16> to vector<8x8x128xbf16>
    %143 = arith.extf %142 : vector<8x8x128xbf16> to vector<8x8x128xf32>
    %144 = vector.shape_cast %143 : vector<8x8x128xf32> to vector<64x128xf32>
    %145 = arith.addf %140, %144 : vector<64x128xf32>
    %146 = arith.truncf %145 : vector<64x128xf32> to vector<64x128xbf16>
    %c0_97 = arith.constant 0 : index
    %c0_98 = arith.constant 0 : index
    %147 = vector.load %arg12[%c0_97, %c0_98] : memref<128x128xbf16, #tpu.memory_space<vmem>>, vector<128x128xbf16>
    %cst_99 = arith.constant dense<0.000000e+00> : vector<64x128xf32>
    %148 = tpu.matmul %146, %147, %cst_99 {dimension_numbers = #tpu.dot_dimension_numbers<[1], [0], [0], [1], [0, 0, 1, 1], [], []>} : vector<64x128xbf16>, vector<128x128xbf16>, vector<64x128xf32> -> vector<64x128xf32>
    %c0_100 = arith.constant 0 : index
    %c0_101 = arith.constant 0 : index
    %149 = vector.load %arg13[%c0_100, %c0_101] : memref<1x128xf32, #tpu.memory_space<vmem>>, vector<1x128xf32>
    %150 = vector.broadcast %149 : vector<1x128xf32> to vector<64x128xf32>
    %151 = arith.addf %148, %150 : vector<64x128xf32>
    %cst_102 = arith.constant 5.000000e-01 : f32
    %152 = vector.broadcast %cst_102 : f32 to vector<64x128xf32>
    %153 = arith.mulf %152, %151 : vector<64x128xf32>
    %154 = math.tanh %153 : vector<64x128xf32>
    %cst_103 = arith.constant 1.000000e+00 : f32
    %155 = vector.broadcast %cst_103 : f32 to vector<64x128xf32>
    %156 = arith.addf %155, %154 : vector<64x128xf32>
    %cst_104 = arith.constant 5.000000e-01 : f32
    %157 = vector.broadcast %cst_104 : f32 to vector<64x128xf32>
    %158 = arith.mulf %157, %156 : vector<64x128xf32>
    %159 = arith.mulf %151, %158 : vector<64x128xf32>
    %160 = vector.extract_strided_slice %159 {offsets = [0, 0], sizes = [64, 64], strides = [1, 1]} : vector<64x128xf32> to vector<64x64xf32>
    %161 = vector.shape_cast %160 : vector<64x64xf32> to vector<8x8x64xf32>
    %c0_105 = arith.constant 0 : index
    %c0_106 = arith.constant 0 : index
    %c0_107 = arith.constant 0 : index
    %c0_108 = arith.constant 0 : index
    %162 = vector.load %arg14[%c0_105, %c0_106, %c0_107, %c0_108] : memref<1x8x8x64xf32, #tpu.memory_space<vmem>>, vector<1x8x8x64xf32>
    %163 = vector.shape_cast %162 : vector<1x8x8x64xf32> to vector<8x8x64xf32>
    %164 = vector.shape_cast %161 : vector<8x8x64xf32> to vector<1x8x8x64xf32>
    tpu.vector_store %arg14[%c0_105, %c0_106, %c0_107, %c0_108], %164 {strides = array<i32>} : memref<1x8x8x64xf32, #tpu.memory_space<vmem>>, vector<1x8x8x64xf32>,
    return
  }
  func.func @transform_0(%arg0: i32) -> (i32, i32, i32, i32) {
    %c0_i32 = arith.constant 0 : i32
    %c0_i32_0 = arith.constant 0 : i32
    %c0_i32_1 = arith.constant 0 : i32
    %c0_i32_2 = arith.constant 0 : i32
    return %arg0, %c0_i32, %c0_i32_0, %c0_i32_1 : i32, i32, i32, i32
  }
  func.func @transform_1(%arg0: i32) -> (i32, i32) {
    %c0_i32 = arith.constant 0 : i32
    %c0_i32_0 = arith.constant 0 : i32
    %c0_i32_1 = arith.constant 0 : i32
    return %c0_i32, %c0_i32_0 : i32, i32
  }
  func.func @transform_2(%arg0: i32) -> (i32, i32) {
    %c0_i32 = arith.constant 0 : i32
    %c0_i32_0 = arith.constant 0 : i32
    %c0_i32_1 = arith.constant 0 : i32
    return %c0_i32, %c0_i32_0 : i32, i32
  }
  func.func @transform_3(%arg0: i32) -> (i32, i32) {
    %c0_i32 = arith.constant 0 : i32
    %c0_i32_0 = arith.constant 0 : i32
    %c0_i32_1 = arith.constant 0 : i32
    return %c0_i32, %c0_i32_0 : i32, i32
  }
  func.func @transform_4(%arg0: i32) -> (i32, i32) {
    %c0_i32 = arith.constant 0 : i32
    %c0_i32_0 = arith.constant 0 : i32
    %c0_i32_1 = arith.constant 0 : i32
    return %c0_i32, %c0_i32_0 : i32, i32
  }
  func.func @transform_5(%arg0: i32) -> (i32, i32) {
    %c0_i32 = arith.constant 0 : i32
    %c0_i32_0 = arith.constant 0 : i32
    %c0_i32_1 = arith.constant 0 : i32
    return %c0_i32, %c0_i32_0 : i32, i32
  }
  func.func @transform_6(%arg0: i32) -> (i32, i32) {
    %c0_i32 = arith.constant 0 : i32
    %c0_i32_0 = arith.constant 0 : i32
    %c0_i32_1 = arith.constant 0 : i32
    return %c0_i32, %c0_i32_0 : i32, i32
  }
  func.func @transform_7(%arg0: i32) -> (i32, i32) {
    %c0_i32 = arith.constant 0 : i32
    %c0_i32_0 = arith.constant 0 : i32
    %c0_i32_1 = arith.constant 0 : i32
    return %c0_i32, %c0_i32_0 : i32, i32
  }
  func.func @transform_8(%arg0: i32) -> (i32, i32) {
    %c0_i32 = arith.constant 0 : i32
    %c0_i32_0 = arith.constant 0 : i32
    %c0_i32_1 = arith.constant 0 : i32
    return %c0_i32, %c0_i32_0 : i32, i32
  }
  func.func @transform_9(%arg0: i32) -> (i32, i32) {
    %c0_i32 = arith.constant 0 : i32
    %c0_i32_0 = arith.constant 0 : i32
    %c0_i32_1 = arith.constant 0 : i32
    return %c0_i32, %c0_i32_0 : i32, i32
  }
  func.func @transform_10(%arg0: i32) -> (i32, i32) {
    %c0_i32 = arith.constant 0 : i32
    %c0_i32_0 = arith.constant 0 : i32
    %c0_i32_1 = arith.constant 0 : i32
    return %c0_i32, %c0_i32_0 : i32, i32
  }
  func.func @transform_11(%arg0: i32) -> (i32, i32) {
    %c0_i32 = arith.constant 0 : i32
    %c0_i32_0 = arith.constant 0 : i32
    %c0_i32_1 = arith.constant 0 : i32
    return %c0_i32, %c0_i32_0 : i32, i32
  }
  func.func @transform_12(%arg0: i32) -> (i32, i32) {
    %c0_i32 = arith.constant 0 : i32
    %c0_i32_0 = arith.constant 0 : i32
    %c0_i32_1 = arith.constant 0 : i32
    return %c0_i32, %c0_i32_0 : i32, i32
  }
  func.func @transform_13(%arg0: i32) -> (i32, i32, i32, i32) {
    %c0_i32 = arith.constant 0 : i32
    %c0_i32_0 = arith.constant 0 : i32
    %c0_i32_1 = arith.constant 0 : i32
    %c0_i32_2 = arith.constant 0 : i32
    return %arg0, %c0_i32, %c0_i32_0, %c0_i32_1 : i32, i32, i32, i32
  }
}

</mosaic_0001>

<bundles_post_ra>
// kernel: efficientdet_v1_forward.4
= control target key start
LH: loop header
LB: loop body
LE: loop exit
PB: predicated region body
PF: predicated region fallthrough
CT: control target
= control target key end

     0   :  { %s1042_s12 = smov 0   ;;  %s1253_s0 = inlined_call_operand.vmem [shape: bf16[2,16,16,32], index: 0, kind: input, shape index: {}]   ;;  %s1254_s1 = inlined_call_operand.vmem [shape: bf16[32,128], index: 1, kind: input, shape index: {}]   ;;  %s1255_s2 = inlined_call_operand.vmem [shape: f32[1,128], index: 2, kind: input, shape index: {}]   ;;  %s1256_s3 = inlined_call_operand.vmem [shape: bf16[2,16,16,128], index: 3, kind: output, shape index: {}]  }
   0x1 LB: > { %s721_s13 = sadd.s32 4294967295, %s1020_s12   ;;  %p725_p0 = scmp.ge.s32.totalorder %s1020_s12, 1  ;;  %s1020_s12 = sphi %s1042_s12, %s13_s12  }
   0x2   : > { %p137_p1 = scmp.lt.s32.totalorder %s1020_s12, 3 }
   0x4   : > { %p138_p2 = pnand %p725_p0, %p137_p1 }
   0x5   : > { %p161_p3 = scmp.lt.s32.totalorder (!%p138_p2), %s721_s13, 1 }
   0x6   : > { %141 = sbr.rel (%p138_p2) target bundleno = 229 (0xe5), region = 32 }
   0xb   : > { %v839_v0 = vld [vmem:[%s1254_s1 + $0x8] sm:$0xff]  ;;  %v838_v1 = vld [vmem:[%s1254_s1] sm:$0xff]  ;;  %s1258_s13 = smov (!%p161_p3, %s721_s13), 1  ;;  %vm304_vm0 = vcmask 261120  }
   0xc   : > { %359 = vmatpush.bf16.msra.mxu0 %v839_v0  ;;  %935 = vmatpush.bf16.msra.mxu1 %v839_v0  ;;  %s820_s18 = sshll.u32 %s1258_s13, 7  ;;  %v1101_v18 = vld [vmem:[%s1255_s2] ss:$0 sm:$0xff] }
   0xd   : > { %936 = vmatpush.bf16.msra.mxu2 %v839_v0  ;;  %937 = vmatpush.bf16.msra.mxu3 %v839_v0  ;;  %s1064_s21 = scalar_lea.vmem %s1253_s0, %s820_s18  ;;  %s1145_s26 = scalar_lea.vmem %s1256_s3, %s820_s18 }
   0xe   : > { %v822_v2 = vld [vmem:[%s1064_s21] sm:$0xff]  ;;  %v823_v6 = vld [vmem:[%s1064_s21 + $0x8] sm:$0xff]  ;;  %v824_v10 = vld [vmem:[%s1064_s21 + $0x10] sm:$0xff] }
   0xf   : > { %v826_v3 = vld [vmem:[%s1064_s21 + $0x20] sm:$0xff]  ;;  %v827_v7 = vld [vmem:[%s1064_s21 + $0x28] sm:$0xff]  ;;  %v828_v11 = vld [vmem:[%s1064_s21 + $0x30] sm:$0xff] }
  0x10   : > { %360 = vmatpush.bf16.msra.mxu0 %v838_v1  ;;  %938 = vmatpush.bf16.msra.mxu1 %v838_v1  ;;  %v830_v4 = vld [vmem:[%s1064_s21 + $0x40] sm:$0xff]  ;;  %v831_v8 = vld [vmem:[%s1064_s21 + $0x48] sm:$0xff]  ;;  %v832_v12 = vld [vmem:[%s1064_s21 + $0x50] sm:$0xff] }
  0x11   : > { %939 = vmatpush.bf16.msra.mxu2 %v838_v1  ;;  %940 = vmatpush.bf16.msra.mxu3 %v838_v1  ;;  %v834_v5 = vld [vmem:[%s1064_s21 + $0x60] sm:$0xff]  ;;  %v835_v9 = vld [vmem:[%s1064_s21 + $0x68] sm:$0xff]  ;;  %v836_v13 = vld [vmem:[%s1064_s21 + $0x70] sm:$0xff] }
  0x12   : > { %v825_v14 = vld [vmem:[%s1064_s21 + $0x18] sm:$0xff] }
  0x13   : > { %802 = vmatmul.msk.bf16.vlgmr.msra.gmra.mxu0 %vm304_vm0, %v822_v2  ;;  %806 = vmatmul.msk.bf16.vlgmr.msra.gmra.mxu1 %vm304_vm0, %v826_v3  ;;  %v829_v15 = vld [vmem:[%s1064_s21 + $0x38] sm:$0xff] }
  0x14   : > { %810 = vmatmul.msk.bf16.vlgmr.msra.gmra.mxu2 %vm304_vm0, %v830_v4  ;;  %814 = vmatmul.msk.bf16.vlgmr.msra.gmra.mxu3 %vm304_vm0, %v834_v5  ;;  %v833_v16 = vld [vmem:[%s1064_s21 + $0x58] sm:$0xff] }
  0x15   : > { %v837_v17 = vld [vmem:[%s1064_s21 + $0x78] sm:$0xff] }
  0x23   : > { %803 = vmatmul.msk.bf16.gmra.mxu0 %vm304_vm0, %v823_v6  ;;  %807 = vmatmul.msk.bf16.gmra.mxu1 %vm304_vm0, %v827_v7 }
  0x24   : > { %811 = vmatmul.msk.bf16.gmra.mxu2 %vm304_vm0, %v831_v8  ;;  %815 = vmatmul.msk.bf16.gmra.mxu3 %vm304_vm0, %v835_v9 }
  0x33   : > { %804 = vmatmul.msk.bf16.gmra.mxu0 %vm304_vm0, %v824_v10  ;;  %808 = vmatmul.msk.bf16.gmra.mxu1 %vm304_vm0, %v828_v11 }
  0x34   : > { %812 = vmatmul.msk.bf16.gmra.mxu2 %vm304_vm0, %v832_v12  ;;  %816 = vmatmul.msk.bf16.gmra.mxu3 %vm304_vm0, %v836_v13 }
  0x43   : > { %805 = vmatmul.msk.bf16.gmra.mxu0 %vm304_vm0, %v825_v14  ;;  %809 = vmatmul.msk.bf16.gmra.mxu1 %vm304_vm0, %v829_v15 }
  0x44   : > { %813 = vmatmul.msk.bf16.gmra.mxu2 %vm304_vm0, %v833_v16  ;;  %817 = vmatmul.msk.bf16.gmra.mxu3 %vm304_vm0, %v837_v17 }
  0x90   : > { %v362_v19 = vpop.f32.mrf.mxu0  ;;  %v382_v20 = vpop.f32.mrf.mxu1 }
  0x91   : > { %v363_v21 = vadd.f32 %v1101_v18, %v362_v19  ;;  %v383_v22 = vadd.f32 %v1101_v18, %v382_v20 }
  0x93   : > { %v442_v23 = vmul.f32 0.5, %v363_v21  ;;  %v450_v24 = vmul.f32 0.5, %v383_v22 }
  0x95   : > { %950 = vtanh.f32 %v442_v23 }
  0x96   : > { %952 = vtanh.f32 %v450_v24 }
  0x97   : > { %v402_v25 = vpop.f32.mrf.mxu2  ;;  %v422_v26 = vpop.f32.mrf.mxu3 }
  0x98   : > { %v1106_v27 = vadd.f32 %v1101_v18, %v402_v25  ;;  %v1109_v28 = vadd.f32 %v1101_v18, %v422_v26  ;;  %v364_v29 = vpop.f32.mrf.mxu0  ;;  %v384_v30 = vpop.f32.mrf.mxu1 }
  0x99   : > { %v365_v31 = vadd.f32 %v1101_v18, %v364_v29  ;;  %v385_v32 = vadd.f32 %v1101_v18, %v384_v30 }
  0x9a   : > { %v458_v33 = vmul.f32 0.5, %v1106_v27  ;;  %v466_v34 = vmul.f32 0.5, %v1109_v28 }
  0x9b   : > { %v443_v35 = vmul.f32 0.5, %v365_v31  ;;  %v451_v36 = vmul.f32 0.5, %v385_v32  ;;  %v951_v37 = vpop.eup %950 }
  0x9c   : > { %954 = vtanh.f32 %v458_v33  ;;  %v953_v38 = vpop.eup %952  ;;  %v506_v39 = vadd.f32 1.0, %v951_v37 }
  0x9d   : > { %956 = vtanh.f32 %v466_v34  ;;  %v514_v46 = vadd.f32 1.0, %v953_v38 }
  0x9e   : > { %958 = vtanh.f32 %v443_v35  ;;  %v538_v53 = vmul.f32 0.5, %v506_v39 }
  0x9f   : > { %960 = vtanh.f32 %v451_v36  ;;  %v404_v40 = vpop.f32.mrf.mxu2  ;;  %v424_v41 = vpop.f32.mrf.mxu3  ;;  %v546_v58 = vmul.f32 0.5, %v514_v46 }
  0xa0   : > { %v405_v42 = vadd.f32 %v1101_v18, %v404_v40  ;;  %v1117_v43 = vadd.f32 %v1101_v18, %v424_v41  ;;  %v367_v44 = vpop.f32.mrf.mxu0  ;;  %v387_v45 = vpop.f32.mrf.mxu1  ;;  %v570_v62 = vmul.f32 %v538_v53, %v363_v21 }
  0xa1   : > { %v1120_v47 = vadd.f32 %v1101_v18, %v367_v44  ;;  %v1123_v48 = vadd.f32 %v1101_v18, %v387_v45  ;;  %v578_v8 = vmul.f32 %v546_v58, %v383_v22 }
  0xa2   : > { %v955_v49 = vpop.eup %954  ;;  %v459_v50 = vmul.f32 0.5, %v405_v42  ;;  %v467_v51 = vmul.f32 0.5, %v1117_v43 }
  0xa3   : > { %v957_v52 = vpop.eup %956  ;;  %v444_v54 = vmul.f32 0.5, %v1120_v47  ;;  %v452_v56 = vmul.f32 0.5, %v1123_v48  ;;  %v522_v60 = vadd.f32 1.0, %v955_v49 }
  0xa4   : > { %v959_v55 = vpop.eup %958  ;;  %962 = vtanh.f32 %v459_v50  ;;  %v530_v63 = vadd.f32 1.0, %v957_v52 }
  0xa5   : > { %v961_v57 = vpop.eup %960  ;;  %v507_v59 = vadd.f32 1.0, %v959_v55  ;;  %964 = vtanh.f32 %v467_v51  ;;  %v554_v13 = vmul.f32 0.5, %v522_v60 }
  0xa6   : > { %v515_v61 = vadd.f32 1.0, %v961_v57  ;;  %966 = vtanh.f32 %v444_v54  ;;  %v562_v24 = vmul.f32 0.5, %v530_v63 }
  0xa7   : > { %v539_v0 = vmul.f32 0.5, %v507_v59  ;;  %v407_v1 = vpop.f32.mrf.mxu2  ;;  %v427_v2 = vpop.f32.mrf.mxu3  ;;  %968 = vtanh.f32 %v452_v56 }
  0xa8   : > { %v547_v3 = vmul.f32 0.5, %v515_v61  ;;  %v1129_v4 = vadd.f32 %v1101_v18, %v407_v1  ;;  %v1132_v5 = vadd.f32 %v1101_v18, %v427_v2  ;;  %v369_v6 = vpop.f32.mrf.mxu0  ;;  %v389_v7 = vpop.f32.mrf.mxu1  ;;  %v594_v37 = vmul.f32 %v562_v24, %v1109_v28 }
  0xa9   : > { %v571_v9 = vmul.f32 %v539_v0, %v365_v31  ;;  %v1135_v10 = vadd.f32 %v1101_v18, %v369_v6  ;;  %v1138_v11 = vadd.f32 %v1101_v18, %v389_v7 }
  0xaa   : > { %v963_v12 = vpop.eup %962  ;;  %v579_v14 = vmul.f32 %v547_v3, %v385_v32  ;;  %v460_v15 = vmul.f32 0.5, %v1129_v4  ;;  %v468_v16 = vmul.f32 0.5, %v1132_v5  ;;  %v586_v32 = vmul.f32 %v554_v13, %v1106_v27 }
  0xab   : > { %v965_v17 = vpop.eup %964  ;;  %v843_v19 = vpack.c.bf16 %v571_v9, %v570_v62  ;;  %v523_v20 = vadd.f32 1.0, %v963_v12  ;;  %v445_v21 = vmul.f32 0.5, %v1135_v10  ;;  %v453_v22 = vmul.f32 0.5, %v1138_v11 }
  0xac   : > { %v967_v23 = vpop.eup %966  ;;  %v863_v25 = vpack.c.bf16 %v579_v14, %v578_v8  ;;  %v531_v26 = vadd.f32 1.0, %v965_v17  ;;  %970 = vtanh.f32 %v460_v15 }
  0xad   : > { %844 = vst [vmem:[%s1145_s26] sm:$0xff] %v843_v19   ;;  %v555_v29 = vmul.f32 0.5, %v523_v20  ;;  %972 = vtanh.f32 %v468_v16  ;;  %v969_v30 = vpop.eup %968  ;;  %v508_v34 = vadd.f32 1.0, %v967_v23 }
  0xae   : > { %923 = vst [vmem:[%s1145_s26 + $0x20] sm:$0xff] %v863_v25   ;;  %v563_v31 = vmul.f32 0.5, %v531_v26  ;;  %974 = vtanh.f32 %v445_v21 }
  0xaf   : > { %v587_v33 = vmul.f32 %v555_v29, %v405_v42  ;;  %976 = vtanh.f32 %v453_v22  ;;  %v409_v35 = vpop.f32.mrf.mxu2  ;;  %v429_v36 = vpop.f32.mrf.mxu3  ;;  %v516_v42 = vadd.f32 1.0, %v969_v30  ;;  %v540_v52 = vmul.f32 0.5, %v508_v34 }
  0xb0   : > { %v595_v38 = vmul.f32 %v563_v31, %v1117_v43  ;;  %v1157_v39 = vadd.f32 %v1101_v18, %v409_v35  ;;  %v1160_v40 = vadd.f32 %v1101_v18, %v429_v36  ;;  %v372_v41 = vpop.f32.mrf.mxu0  ;;  %v392_v44 = vpop.f32.mrf.mxu1 }
  0xb1   : > { %v883_v27 = vpack.c.bf16 %v587_v33, %v586_v32  ;;  %v1163_v45 = vadd.f32 %v1101_v18, %v372_v41  ;;  %v1166_v46 = vadd.f32 %v1101_v18, %v392_v44  ;;  %v548_v57 = vmul.f32 0.5, %v516_v42 }
  0xb2   : > { %v971_v28 = vpop.eup %970  ;;  %v903_v49 = vpack.c.bf16 %v595_v38, %v594_v37  ;;  %v461_v43 = vmul.f32 0.5, %v1157_v39  ;;  %v469_v50 = vmul.f32 0.5, %v1160_v40  ;;  %v572_v61 = vmul.f32 %v540_v52, %v1120_v47 }
  0xb3   : > { %v973_v51 = vpop.eup %972  ;;  %927 = vst [vmem:[%s1145_s26 + $0x40] sm:$0xff] %v883_v27   ;;  %v446_v53 = vmul.f32 0.5, %v1163_v45  ;;  %v454_v54 = vmul.f32 0.5, %v1166_v46  ;;  %v524_v59 = vadd.f32 1.0, %v971_v28  ;;  %v580_v9 = vmul.f32 %v548_v57, %v1123_v48 }
  0xb4   : > { %v975_v55 = vpop.eup %974  ;;  %931 = vst [vmem:[%s1145_s26 + $0x60] sm:$0xff] %v903_v49   ;;  %978 = vtanh.f32 %v461_v43  ;;  %v532_v1 = vadd.f32 1.0, %v973_v51 }
  0xb5   : > { %v977_v56 = vpop.eup %976  ;;  %v509_v58 = vadd.f32 1.0, %v975_v55  ;;  %980 = vtanh.f32 %v469_v50  ;;  %v556_v15 = vmul.f32 0.5, %v524_v59 }
  0xb6   : > { %v517_v60 = vadd.f32 1.0, %v977_v56  ;;  %982 = vtanh.f32 %v446_v53  ;;  %v564_v24 = vmul.f32 0.5, %v532_v1 }
  0xb7   : > { %v541_v62 = vmul.f32 0.5, %v509_v58  ;;  %984 = vtanh.f32 %v454_v54  ;;  %v412_v63 = vpop.f32.mrf.mxu2  ;;  %v432_v0 = vpop.f32.mrf.mxu3  ;;  %v588_v30 = vmul.f32 %v556_v15, %v1129_v4 }
  0xb8   : > { %v549_v2 = vmul.f32 0.5, %v517_v60  ;;  %v1176_v3 = vadd.f32 %v1101_v18, %v412_v63  ;;  %v1179_v6 = vadd.f32 %v1101_v18, %v432_v0  ;;  %v374_v7 = vpop.f32.mrf.mxu0  ;;  %v394_v8 = vpop.f32.mrf.mxu1  ;;  %v596_v37 = vmul.f32 %v564_v24, %v1132_v5 }
  0xb9   : > { %v573_v12 = vmul.f32 %v541_v62, %v1135_v10  ;;  %v1184_v47 = vadd.f32 %v1101_v18, %v374_v7  ;;  %v1187_v13 = vadd.f32 %v1101_v18, %v394_v8 }
  0xba   : > { %v979_v14 = vpop.eup %978  ;;  %v581_v16 = vmul.f32 %v549_v2, %v1138_v11  ;;  %v462_v17 = vmul.f32 0.5, %v1176_v3  ;;  %v470_v19 = vmul.f32 0.5, %v1179_v6 }
  0xbb   : > { %v981_v20 = vpop.eup %980  ;;  %v848_v48 = vpack.c.bf16 %v573_v12, %v572_v61  ;;  %v525_v21 = vadd.f32 1.0, %v979_v14  ;;  %v447_v10 = vmul.f32 0.5, %v1184_v47  ;;  %v455_v22 = vmul.f32 0.5, %v1187_v13 }
  0xbc   : > { %v983_v23 = vpop.eup %982  ;;  %v868_v25 = vpack.c.bf16 %v581_v16, %v580_v9  ;;  %v533_v26 = vadd.f32 1.0, %v981_v20  ;;  %986 = vtanh.f32 %v462_v17 }
  0xbd   : > { %v985_v29 = vpop.eup %984  ;;  %920 = vst [vmem:[%s1145_s26 + $0x8] sm:$0xff] %v848_v48   ;;  %v557_v11 = vmul.f32 0.5, %v525_v21  ;;  %988 = vtanh.f32 %v470_v19  ;;  %v510_v33 = vadd.f32 1.0, %v983_v23 }
  0xbe   : > { %924 = vst [vmem:[%s1145_s26 + $0x28] sm:$0xff] %v868_v25   ;;  %v565_v31 = vmul.f32 0.5, %v533_v26  ;;  %990 = vtanh.f32 %v447_v10  ;;  %v518_v34 = vadd.f32 1.0, %v985_v29 }
  0xbf   : > { %v589_v32 = vmul.f32 %v557_v11, %v1157_v39  ;;  %992 = vtanh.f32 %v455_v22  ;;  %v414_v35 = vpop.f32.mrf.mxu2  ;;  %v434_v36 = vpop.f32.mrf.mxu3  ;;  %v542_v51 = vmul.f32 0.5, %v510_v33 }
  0xc0   : > { %v597_v38 = vmul.f32 %v565_v31, %v1160_v40  ;;  %v1201_v41 = vadd.f32 %v1101_v18, %v414_v35  ;;  %v1204_v4 = vadd.f32 %v1101_v18, %v434_v36  ;;  %v377_v44 = vpop.f32.mrf.mxu0  ;;  %v397_v27 = vpop.f32.mrf.mxu1  ;;  %v550_v52 = vmul.f32 0.5, %v518_v34 }
  0xc1   : > { %v888_v39 = vpack.c.bf16 %v589_v32, %v588_v30  ;;  %v1207_v42 = vadd.f32 %v1101_v18, %v377_v44  ;;  %v1210_v28 = vadd.f32 %v1101_v18, %v397_v27  ;;  %v574_v60 = vmul.f32 %v542_v51, %v1163_v45 }
  0xc2   : > { %v987_v49 = vpop.eup %986  ;;  %v908_v5 = vpack.c.bf16 %v597_v38, %v596_v37  ;;  %v463_v40 = vmul.f32 0.5, %v1201_v41  ;;  %v471_v43 = vmul.f32 0.5, %v1204_v4  ;;  %v582_v61 = vmul.f32 %v550_v52, %v1166_v46 }
  0xc3   : > { %v989_v50 = vpop.eup %988  ;;  %928 = vst [vmem:[%s1145_s26 + $0x48] sm:$0xff] %v888_v39   ;;  %v448_v54 = vmul.f32 0.5, %v1207_v42  ;;  %v456_v57 = vmul.f32 0.5, %v1210_v28  ;;  %v526_v58 = vadd.f32 1.0, %v987_v49 }
  0xc4   : > { %v991_v53 = vpop.eup %990  ;;  %932 = vst [vmem:[%s1145_s26 + $0x68] sm:$0xff] %v908_v5   ;;  %994 = vtanh.f32 %v463_v40  ;;  %v534_v62 = vadd.f32 1.0, %v989_v50 }
  0xc5   : > { %v993_v55 = vpop.eup %992  ;;  %v511_v56 = vadd.f32 1.0, %v991_v53  ;;  %996 = vtanh.f32 %v471_v43  ;;  %v558_v16 = vmul.f32 0.5, %v526_v58 }
  0xc6   : > { %v519_v59 = vadd.f32 1.0, %v993_v55  ;;  %998 = vtanh.f32 %v448_v54  ;;  %v566_v23 = vmul.f32 0.5, %v534_v62 }
  0xc7   : > { %v543_v63 = vmul.f32 0.5, %v511_v56  ;;  %v417_v0 = vpop.f32.mrf.mxu2  ;;  %v437_v1 = vpop.f32.mrf.mxu3  ;;  %1000 = vtanh.f32 %v456_v57  ;;  %v590_v30 = vmul.f32 %v558_v16, %v1176_v3 }
  0xc8   : > { %v551_v2 = vmul.f32 0.5, %v519_v59  ;;  %v1221_v7 = vadd.f32 %v1101_v18, %v417_v0  ;;  %v1224_v8 = vadd.f32 %v1101_v18, %v437_v1  ;;  %v379_v9 = vpop.f32.mrf.mxu0  ;;  %v399_v12 = vpop.f32.mrf.mxu1  ;;  %v598_v34 = vmul.f32 %v566_v23, %v1179_v6 }
  0xc9   : > { %v575_v14 = vmul.f32 %v543_v63, %v1184_v47  ;;  %v380_v45 = vadd.f32 %v1101_v18, %v379_v9  ;;  %v400_v46 = vadd.f32 %v1101_v18, %v399_v12 }
  0xca   : > { %v995_v15 = vpop.eup %994  ;;  %v583_v17 = vmul.f32 %v551_v2, %v1187_v13  ;;  %v464_v19 = vmul.f32 0.5, %v1221_v7  ;;  %v472_v20 = vmul.f32 0.5, %v1224_v8 }
  0xcb   : > { %v997_v48 = vpop.eup %996  ;;  %v853_v21 = vpack.c.bf16 %v575_v14, %v574_v60  ;;  %v527_v10 = vadd.f32 1.0, %v995_v15  ;;  %v449_v22 = vmul.f32 0.5, %v380_v45  ;;  %v457_v47 = vmul.f32 0.5, %v400_v46 }
  0xcc   : > { %v873_v24 = vpack.c.bf16 %v583_v17, %v582_v61  ;;  %v535_v25 = vadd.f32 1.0, %v997_v48  ;;  %1002 = vtanh.f32 %v464_v19  ;;  %v999_v29 = vpop.eup %998 }
  0xcd   : > { %921 = vst [vmem:[%s1145_s26 + $0x10] sm:$0xff] %v853_v21   ;;  %v559_v26 = vmul.f32 0.5, %v527_v10  ;;  %1004 = vtanh.f32 %v472_v20  ;;  %v1001_v11 = vpop.eup %1000  ;;  %v512_v44 = vadd.f32 1.0, %v999_v29 }
  0xce   : > { %925 = vst [vmem:[%s1145_s26 + $0x30] sm:$0xff] %v873_v24   ;;  %v567_v13 = vmul.f32 0.5, %v535_v25  ;;  %1006 = vtanh.f32 %v449_v22  ;;  %v520_v3 = vadd.f32 1.0, %v1001_v11 }
  0xcf   : > { %v591_v31 = vmul.f32 %v559_v26, %v1201_v41  ;;  %1008 = vtanh.f32 %v457_v47  ;;  %v419_v32 = vpop.f32.mrf.mxu2  ;;  %v439_v33 = vpop.f32.mrf.mxu3  ;;  %v544_v6 = vmul.f32 0.5, %v512_v44 }
  0xd0   : > { %v599_v35 = vmul.f32 %v567_v13, %v1204_v4  ;;  %v420_v36 = vadd.f32 %v1101_v18, %v419_v32  ;;  %v440_v37 = vadd.f32 %v1101_v18, %v439_v33  ;;  %v552_v4 = vmul.f32 0.5, %v520_v3 }
  0xd1   : > { %v893_v38 = vpack.c.bf16 %v591_v31, %v590_v30  ;;  %v576_v55 = vmul.f32 %v544_v6, %v1207_v42 }
  0xd2   : > { %v1003_v27 = vpop.eup %1002  ;;  %v913_v39 = vpack.c.bf16 %v599_v35, %v598_v34  ;;  %v465_v49 = vmul.f32 0.5, %v420_v36  ;;  %v473_v41 = vmul.f32 0.5, %v440_v37  ;;  %v584_v58 = vmul.f32 %v552_v4, %v1210_v28 }
  0xd3   : > { %v1005_v5 = vpop.eup %1004  ;;  %929 = vst [vmem:[%s1145_s26 + $0x50] sm:$0xff] %v893_v38   ;;  %v528_v52 = vadd.f32 1.0, %v1003_v27 }
  0xd4   : > { %v1007_v40 = vpop.eup %1006  ;;  %933 = vst [vmem:[%s1145_s26 + $0x70] sm:$0xff] %v913_v39   ;;  %1010 = vtanh.f32 %v465_v49  ;;  %v536_v53 = vadd.f32 1.0, %v1005_v5 }
  0xd5   : > { %v1009_v43 = vpop.eup %1008  ;;  %v513_v50 = vadd.f32 1.0, %v1007_v40  ;;  %1012 = vtanh.f32 %v473_v41  ;;  %v560_v61 = vmul.f32 0.5, %v528_v52 }
  0xd6   : > { %v521_v51 = vadd.f32 1.0, %v1009_v43  ;;  %v568_v0 = vmul.f32 0.5, %v536_v53 }
  0xd7   : > { %v545_v18 = vmul.f32 0.5, %v513_v50  ;;  %v592_v42 = vmul.f32 %v560_v61, %v1221_v7 }
  0xd8   : > { %v553_v54 = vmul.f32 0.5, %v521_v51 }
  0xd9   : > { %v577_v56 = vmul.f32 %v545_v18, %v380_v45  ;;  %v600_v45 = vmul.f32 %v568_v0, %v1224_v8 }
  0xda   : > { %v1011_v57 = vpop.eup %1010  ;;  %v585_v59 = vmul.f32 %v553_v54, %v400_v46 }
  0xdb   : > { %v1013_v60 = vpop.eup %1012  ;;  %v858_v62 = vpack.c.bf16 %v577_v56, %v576_v55  ;;  %v529_v63 = vadd.f32 1.0, %v1011_v57 }
  0xdc   : > { %v878_v1 = vpack.c.bf16 %v585_v59, %v584_v58  ;;  %v537_v2 = vadd.f32 1.0, %v1013_v60 }
  0xdd   : > { %922 = vst [vmem:[%s1145_s26 + $0x18] sm:$0xff] %v858_v62   ;;  %v561_v9 = vmul.f32 0.5, %v529_v63 }
  0xde   : > { %926 = vst [vmem:[%s1145_s26 + $0x38] sm:$0xff] %v878_v1   ;;  %v569_v12 = vmul.f32 0.5, %v537_v2 }
  0xdf   : > { %v593_v14 = vmul.f32 %v561_v9, %v420_v36 }
  0xe0   : > { %v601_v28 = vmul.f32 %v569_v12, %v440_v37 }
  0xe1   : > { %v898_v46 = vpack.c.bf16 %v593_v14, %v592_v42 }
  0xe2   : > { %v918_v15 = vpack.c.bf16 %v601_v28, %v600_v45 }
  0xe3   : > { %930 = vst [vmem:[%s1145_s26 + $0x58] sm:$0xff] %v898_v46  }
  0xe4   : > { %934 = vst [vmem:[%s1145_s26 + $0x78] sm:$0xff] %v918_v15  }
  0xe5 PF: > { %s13_s12 = sadd.s32 1, %s1020_s12  }
  0xe6   : > { %p10_p4 = scmp.ge.s32.totalorder %s13_s12, 4  }
  0xe8   :  { %12 = sbr.rel (!%p10_p4) target bundleno = 1 (0x1), region = 62 }

// kernel: efficientdet_v1_forward.6
= control target key start
LH: loop header
LB: loop body
LE: loop exit
PB: predicated region body
PF: predicated region fallthrough
CT: control target
= control target key end

     0   :  { %s2396_s17 = smov 0   ;;  %s3318_s0 = inlined_call_operand.vmem [shape: bf16[2,4,8,8,128], index: 0, kind: input, shape index: {}]   ;;  %s3319_s1 = inlined_call_operand.vmem [shape: bf16[128,128], index: 1, kind: input, shape index: {}]   ;;  %s3320_s2 = inlined_call_operand.vmem [shape: f32[1,128], index: 2, kind: input, shape index: {}]   ;;  %s3321_s3 = inlined_call_operand.vmem [shape: f32[9,128], index: 3, kind: input, shape index: {}]   ;;  %s3322_s4 = inlined_call_operand.vmem [shape: f32[1,128], index: 4, kind: input, shape index: {}]   ;;  %s3323_s5 = inlined_call_operand.vmem [shape: bf16[128,128], index: 5, kind: input, shape index: {}]   ;;  %s3324_s6 = inlined_call_operand.vmem [shape: f32[1,128], index: 6, kind: input, shape index: {}]   ;;  %s3325_s7 = inlined_call_operand.vmem [shape: bf16[128,128], index: 7, kind: input, shape index: {}]   ;;  %s3326_s8 = inlined_call_operand.vmem [shape: f32[1,128], index: 8, kind: input, shape index: {}]   ;;  %s3327_s9 = inlined_call_operand.vmem [shape: bf16[128,128], index: 9, kind: input, shape index: {}]   ;;  %s3328_s10 = inlined_call_operand.vmem [shape: f32[1,128], index: 10, kind: input, shape index: {}]   ;;  %s3329_s11 = inlined_call_operand.vmem [shape: bf16[2,8,8,128], index: 11, kind: output, shape index: {}]  }
   0x1 LB: > { %s1926_s18 = sadd.s32 4294967295, %s2332_s17   ;;  %p1930_p0 = scmp.ge.s32.totalorder %s2332_s17, 1  ;;  %s2332_s17 = sphi %s2396_s17, %s21_s17  }
   0x2   : > { %p337_p1 = scmp.lt.s32.totalorder %s2332_s17, 3 }
   0x4   : > { %p338_p2 = pnand %p1930_p0, %p337_p1 }
   0x6   : > { %341 = sbr.rel (%p338_p2) target bundleno = 872 (0x368), region = 64 }
   0xb   : > { %v2154_v0 = vld [vmem:[%s3319_s1 + $0x38] sm:$0xff]  ;;  %v2153_v1 = vld [vmem:[%s3319_s1 + $0x30] sm:$0xff]  ;;  %v2152_v2 = vld [vmem:[%s3319_s1 + $0x28] sm:$0xff]  ;;  %p377_p3 = scmp.lt.s32.totalorder %s1926_s18, 1  ;;  %vm390_vm0 = vcmask 1040384   ;;  %vm1144_vm3 = vcmask 1046528  }
   0xc   : > { %712 = vmatpush.bf16.msra.mxu0 %v2154_v0  ;;  %2202 = vmatpush.bf16.msra.mxu1 %v2154_v0  ;;  %v2151_v3 = vld [vmem:[%s3319_s1 + $0x20] sm:$0xff]  ;;  %v2150_v4 = vld [vmem:[%s3319_s1 + $0x18] sm:$0xff]  ;;  %v2149_v5 = vld [vmem:[%s3319_s1 + $0x10] sm:$0xff]  ;;  %vm391_vm1 = vsmask.f32 256 }
   0xd   : > { %2203 = vmatpush.bf16.msra.mxu2 %v2154_v0  ;;  %s3388_s18 = smov (!%p377_p3, %s1926_s18), 1  ;;  %v2148_v6 = vld [vmem:[%s3319_s1 + $0x8] sm:$0xff]  ;;  %v2147_v7 = vld [vmem:[%s3319_s1] sm:$0xff]  ;;  %vm2452_vm2 = vmand %vm390_vm0, %vm391_vm1 }
   0xe   : > { %s2129_s14 = sshll.u32 %s3388_s18, 7  ;;  %v408_v25 = vld [vmem:[#allocation2 + $0x4] sm:$0x1]  ;;  %v2461_v27 = vld [vmem:[%s3320_s2] ss:$0 sm:$0xff]  ;;  %s2130_s30 = sshll.u32 %s3388_s18, 5 }
   0xf   : > { %s2434_s21 = scalar_lea.vmem %s3318_s0, %s2129_s14  ;;  %v409_v26 = vsel %vm2452_vm2, 0, %v408_v25  ;;  %v411_v44 = vld [vmem:[#allocation2 + $0xc] sm:$0x1]  ;;  %s386_s14 = scalar_lea.vmem %s3329_s11, %s2130_s30 }
  0x10   : > { %713 = vmatpush.bf16.msra.mxu0 %v2153_v1  ;;  %2204 = vmatpush.bf16.msra.mxu1 %v2153_v1  ;;  %v2131_v8 = vld [vmem:[%s2434_s21] sm:$0xff]  ;;  %v2137_v9 = vld [vmem:[%s2434_s21 + $0x30] sm:$0xff]  ;;  %v2142_v10 = vld [vmem:[%s2434_s21 + $0x58] sm:$0xff]  ;;  %410 = vst [vmem:[#allocation2 + $0x4] sm:$0x1] %v409_v26  ;;  %v412_v47 = vsel %vm2452_vm2, 0, %v411_v44 }
  0x11   : > { %2205 = vmatpush.bf16.msra.mxu2 %v2153_v1  ;;  %v2132_v11 = vld [vmem:[%s2434_s21 + $0x8] sm:$0xff]  ;;  %v2138_v12 = vld [vmem:[%s2434_s21 + $0x38] sm:$0xff]  ;;  %v2143_v13 = vld [vmem:[%s2434_s21 + $0x60] sm:$0xff]  ;;  %413 = vst [vmem:[#allocation2 + $0xc] sm:$0x1] %v412_v47 }
  0x12   : > { %v2133_v14 = vld [vmem:[%s2434_s21 + $0x10] sm:$0xff]  ;;  %v2139_v15 = vld [vmem:[%s2434_s21 + $0x40] sm:$0xff]  ;;  %v2144_v16 = vld [vmem:[%s2434_s21 + $0x68] sm:$0xff] }
  0x13   : > { %v2134_v17 = vld [vmem:[%s2434_s21 + $0x18] sm:$0xff]  ;;  %v2140_v18 = vld [vmem:[%s2434_s21 + $0x48] sm:$0xff]  ;;  %v2145_v19 = vld [vmem:[%s2434_s21 + $0x70] sm:$0xff] }
  0x14   : > { %714 = vmatpush.bf16.msra.mxu0 %v2152_v2  ;;  %2206 = vmatpush.bf16.msra.mxu1 %v2152_v2  ;;  %v2135_v20 = vld [vmem:[%s2434_s21 + $0x20] sm:$0xff]  ;;  %v2141_v21 = vld [vmem:[%s2434_s21 + $0x50] sm:$0xff]  ;;  %v2146_v22 = vld [vmem:[%s2434_s21 + $0x78] sm:$0xff] }
  0x15   : > { %2207 = vmatpush.bf16.msra.mxu2 %v2152_v2  ;;  %v2136_v23 = vld [vmem:[%s2434_s21 + $0x28] sm:$0xff] }
  0x18   : > { %715 = vmatpush.bf16.msra.mxu0 %v2151_v3  ;;  %2208 = vmatpush.bf16.msra.mxu1 %v2151_v3 }
  0x19   : > { %2209 = vmatpush.bf16.msra.mxu2 %v2151_v3  ;;  %v414_v3 = vld [vmem:[#allocation2 + $0x14] sm:$0x1] }
  0x1c   : > { %716 = vmatpush.bf16.msra.mxu0 %v2150_v4  ;;  %2210 = vmatpush.bf16.msra.mxu1 %v2150_v4 }
  0x1d   : > { %2211 = vmatpush.bf16.msra.mxu2 %v2150_v4 }
  0x20   : > { %717 = vmatpush.bf16.msra.mxu0 %v2149_v5  ;;  %2212 = vmatpush.bf16.msra.mxu1 %v2149_v5 }
  0x21   : > { %2213 = vmatpush.bf16.msra.mxu2 %v2149_v5 }
  0x24   : > { %718 = vmatpush.bf16.msra.mxu0 %v2148_v6  ;;  %2214 = vmatpush.bf16.msra.mxu1 %v2148_v6 }
  0x25   : > { %2215 = vmatpush.bf16.msra.mxu2 %v2148_v6  ;;  %v415_v6 = vsel %vm2452_vm2, 0, %v414_v3 }
  0x26   : > { %416 = vst [vmem:[#allocation2 + $0x14] sm:$0x1] %v415_v6 }
  0x28   : > { %719 = vmatpush.bf16.msra.mxu0 %v2147_v7  ;;  %2216 = vmatpush.bf16.msra.mxu1 %v2147_v7 }
  0x29   : > { %2217 = vmatpush.bf16.msra.mxu2 %v2147_v7 }
  0x2b   : > { %720 = vmatmul.bf16.vlgmr.msra.gmra.mxu0 %v2131_v8  ;;  %750 = vmatmul.bf16.vlgmr.msra.gmra.mxu1 %v2137_v9 }
  0x2c   : > { %775 = vmatmul.bf16.vlgmr.msra.gmra.mxu2 %v2142_v10 }
  0x3b   : > { %725 = vmatmul.bf16.gmra.mxu0 %v2132_v11  ;;  %755 = vmatmul.bf16.gmra.mxu1 %v2138_v12 }
  0x3c   : > { %780 = vmatmul.bf16.gmra.mxu2 %v2143_v13 }
  0x4b   : > { %730 = vmatmul.bf16.gmra.mxu0 %v2133_v14  ;;  %760 = vmatmul.bf16.gmra.mxu1 %v2139_v15 }
  0x4c   : > { %785 = vmatmul.bf16.gmra.mxu2 %v2144_v16 }
  0x5b   : > { %735 = vmatmul.bf16.gmra.mxu0 %v2134_v17  ;;  %765 = vmatmul.bf16.gmra.mxu1 %v2140_v18 }
  0x5c   : > { %790 = vmatmul.bf16.gmra.mxu2 %v2145_v19 }
  0x6b   : > { %740 = vmatmul.bf16.gmra.mxu0 %v2135_v20  ;;  %770 = vmatmul.bf16.gmra.mxu1 %v2141_v21 }
  0x6c   : > { %795 = vmatmul.bf16.gmra.mxu2 %v2146_v22 }
  0x7b   : > { %745 = vmatmul.bf16.gmra.mxu0 %v2136_v23 }
  0xa8   : > { %v721_v28 = vpop.f32.mrf.mxu0  ;;  %v751_v29 = vpop.f32.mrf.mxu1 }
  0xa9   : > { %v722_v30 = vadd.f32 %v2461_v27, %v721_v28  ;;  %v752_v31 = vadd.f32 %v2461_v27, %v751_v29 }
  0xab   : > { %v801_v32 = vmul.f32 0.5, %v722_v30  ;;  %v813_v33 = vmul.f32 0.5, %v752_v31 }
  0xad   : > { %2240 = vtanh.f32 %v801_v32 }
  0xae   : > { %2242 = vtanh.f32 %v813_v33 }
  0xaf   : > { %v776_v34 = vpop.f32.mrf.mxu2 }
  0xb0   : > { %v777_v35 = vadd.f32 %v2461_v27, %v776_v34  ;;  %v723_v36 = vpop.f32.mrf.mxu0  ;;  %v753_v37 = vpop.f32.mrf.mxu1 }
  0xb1   : > { %v724_v38 = vadd.f32 %v2461_v27, %v723_v36  ;;  %v754_v39 = vadd.f32 %v2461_v27, %v753_v37 }
  0xb2   : > { %v823_v40 = vmul.f32 0.5, %v777_v35 }
  0xb3   : > { %v2241_v41 = vpop.eup %2240  ;;  %v802_v42 = vmul.f32 0.5, %v724_v38  ;;  %v814_v43 = vmul.f32 0.5, %v754_v39 }
  0xb4   : > { %v2243_v45 = vpop.eup %2242  ;;  %v865_v46 = vadd.f32 1.0, %v2241_v41  ;;  %2244 = vtanh.f32 %v823_v40 }
  0xb5   : > { %v877_v48 = vadd.f32 1.0, %v2243_v45  ;;  %2246 = vtanh.f32 %v802_v42 }
  0xb6   : > { %v897_v49 = vmul.f32 0.5, %v865_v46  ;;  %2248 = vtanh.f32 %v814_v43 }
  0xb7   : > { %v909_v50 = vmul.f32 0.5, %v877_v48  ;;  %v778_v51 = vpop.f32.mrf.mxu2 }
  0xb8   : > { %v929_v52 = vmul.f32 %v897_v49, %v722_v30  ;;  %v779_v53 = vadd.f32 %v2461_v27, %v778_v51  ;;  %v726_v54 = vpop.f32.mrf.mxu0  ;;  %v756_v55 = vpop.f32.mrf.mxu1 }
  0xb9   : > { %v941_v56 = vmul.f32 %v909_v50, %v752_v31  ;;  %v727_v57 = vadd.f32 %v2461_v27, %v726_v54  ;;  %v2473_v58 = vadd.f32 %v2461_v27, %v756_v55  ;;  %v1094_v54 = vld [vmem:[#allocation2 + $0x4] sm:$0x1] }
  0xba   : > { %v2245_v59 = vpop.eup %2244  ;;  %v961_v60 = vpack.c.bf16 %v929_v52, %v929_v52  ;;  %v824_v61 = vmul.f32 0.5, %v779_v53 }
  0xbb   : > { %v2247_v62 = vpop.eup %2246  ;;  %v973_v63 = vpack.c.bf16 %v941_v56, %v941_v56  ;;  %v887_v0 = vadd.f32 1.0, %v2245_v59  ;;  %v803_v1 = vmul.f32 0.5, %v727_v57  ;;  %v815_v2 = vmul.f32 0.5, %v2473_v58 }
  0xbc   : > { %v2249_v4 = vpop.eup %2248  ;;  %993 = vst [vmem:[#allocation2] sm:$0xf] %v961_v60  ;;  %v866_v5 = vadd.f32 1.0, %v2247_v62  ;;  %2250 = vtanh.f32 %v824_v61  ;;  %v1095_v61 = vld [vmem:[#allocation2 + $0xc] sm:$0x1] }
  0xbd   : > { %1005 = vst [vmem:[#allocation2 + $0x68] sm:$0xf] %v973_v63  ;;  %v919_v7 = vmul.f32 0.5, %v887_v0  ;;  %v878_v8 = vadd.f32 1.0, %v2249_v4  ;;  %2252 = vtanh.f32 %v803_v1  ;;  %v2506_v62 = vld [vmem:[%s3321_s3 + $0x2] ss:$0 sm:$0xff]  ;;  %v1103_v1 = vunpack.c.l.bf16 %v1094_v54 }
  0xbe   : > { %v898_v9 = vmul.f32 0.5, %v866_v5  ;;  %2254 = vtanh.f32 %v815_v2 }
  0xbf   : > { %v951_v10 = vmul.f32 %v919_v7, %v777_v35  ;;  %v910_v11 = vmul.f32 0.5, %v878_v8  ;;  %v781_v12 = vpop.f32.mrf.mxu2  ;;  %v417_v35 = vld [vmem:[#allocation2 + $0x1c] sm:$0x1] }
  0xc0   : > { %v930_v13 = vmul.f32 %v898_v9, %v724_v38  ;;  %v2479_v14 = vadd.f32 %v2461_v27, %v781_v12  ;;  %v728_v15 = vpop.f32.mrf.mxu0  ;;  %v758_v16 = vpop.f32.mrf.mxu1  ;;  %v418_v40 = vsel %vm2452_vm2, 0, %v417_v35 }
  0xc1   : > { %v983_v17 = vpack.c.bf16 %v951_v10, %v951_v10  ;;  %v942_v18 = vmul.f32 %v910_v11, %v754_v39  ;;  %v729_v19 = vadd.f32 %v2461_v27, %v728_v15  ;;  %v2483_v20 = vadd.f32 %v2461_v27, %v758_v16  ;;  %419 = vst [vmem:[#allocation2 + $0x1c] sm:$0x1] %v418_v40 }
  0xc2   : > { %v2251_v21 = vpop.eup %2250  ;;  %v962_v22 = vpack.c.bf16 %v930_v13, %v930_v13  ;;  %v825_v23 = vmul.f32 0.5, %v2479_v14  ;;  %v1104_v11 = vunpack.c.l.bf16 %v1095_v61 }
  0xc3   : > { %v2253_v25 = vpop.eup %2252  ;;  %1015 = vst [vmem:[#allocation2 + $0xc0] sm:$0xf] %v983_v17  ;;  %v974_v26 = vpack.c.bf16 %v942_v18, %v942_v18  ;;  %v888_v28 = vadd.f32 1.0, %v2251_v21  ;;  %v804_v29 = vmul.f32 0.5, %v729_v19  ;;  %v816_v32 = vmul.f32 0.5, %v2483_v20 }
  0xc4   : > { %v2255_v30 = vpop.eup %2254  ;;  %994 = vst [vmem:[#allocation2 + $0x8] sm:$0xf] %v962_v22  ;;  %v867_v31 = vadd.f32 1.0, %v2253_v25  ;;  %2256 = vtanh.f32 %v825_v23  ;;  %v2500_v56 = vld [vmem:[#allocation2] sm:$0xf]  ;;  %v1113_v18 = vmul.f32 %v2506_v62, %v1103_v1 }
  0xc5   : > { %1006 = vst [vmem:[#allocation2 + $0x70] sm:$0xf] %v974_v26  ;;  %v920_v33 = vmul.f32 0.5, %v888_v28  ;;  %v879_v34 = vadd.f32 1.0, %v2255_v30  ;;  %2258 = vtanh.f32 %v804_v29  ;;  %v1034_v2 = vunpack.c.l.bf16 %v2500_v56  ;;  %v2526_v22 = vld [vmem:[%s3321_s3] ss:$0 sm:$0xff] }
  0xc6   : > { %v899_v36 = vmul.f32 0.5, %v867_v31  ;;  %2260 = vtanh.f32 %v816_v32  ;;  %v1064_v23 = vld [vmem:[#allocation2 + $0x68] sm:$0xf]  ;;  %v2534_v32 = vmul.f32 %v2506_v62, %v1104_v11 }
  0xc7   : > { %v952_v37 = vmul.f32 %v920_v33, %v779_v53  ;;  %v911_v38 = vmul.f32 0.5, %v879_v34  ;;  %v783_v39 = vpop.f32.mrf.mxu2  ;;  %v423_v34 = vld [vmem:[#allocation2 + $0x2c] sm:$0x1]  ;;  %v1073_v35 = vunpack.c.l.bf16 %v1064_v23 }
  0xc8   : > { %v931_v41 = vmul.f32 %v899_v36, %v727_v57  ;;  %v2490_v42 = vadd.f32 %v2461_v27, %v783_v39  ;;  %v731_v43 = vpop.f32.mrf.mxu0  ;;  %v761_v44 = vpop.f32.mrf.mxu1 }
  0xc9   : > { %v984_v45 = vpack.c.bf16 %v952_v37, %v952_v37  ;;  %v943_v46 = vmul.f32 %v911_v38, %v2473_v58  ;;  %v2494_v47 = vadd.f32 %v2461_v27, %v731_v43  ;;  %v2498_v53 = vadd.f32 %v2461_v27, %v761_v44 }
  0xca   : > { %v2257_v48 = vpop.eup %2256  ;;  %v963_v49 = vpack.c.bf16 %v931_v41, %v931_v41  ;;  %v826_v50 = vmul.f32 0.5, %v2490_v42  ;;  %v1146_v38 = vrot.slane %v1113_v18, 1  ;;  %v2541_v41 = vld [vmem:[%s3321_s3 + $0x1] ss:$0 sm:$0xff] }
  0xcb   : > { %v2259_v51 = vpop.eup %2258  ;;  %1016 = vst [vmem:[#allocation2 + $0xc8] sm:$0xf] %v984_v45  ;;  %v975_v52 = vpack.c.bf16 %v943_v46, %v943_v46  ;;  %v889_v57 = vadd.f32 1.0, %v2257_v48  ;;  %v805_v60 = vmul.f32 0.5, %v2494_v47  ;;  %v817_v4 = vmul.f32 0.5, %v2498_v53 }
  0xcc   : > { %v2261_v55 = vpop.eup %2260  ;;  %995 = vst [vmem:[#allocation2 + $0x10] sm:$0xf] %v963_v49  ;;  %v868_v58 = vadd.f32 1.0, %v2259_v51  ;;  %2262 = vtanh.f32 %v826_v50  ;;  %v2531_v29 = vld [vmem:[#allocation2 + $0x8] sm:$0xf]  ;;  %v424_v45 = vsel %vm2452_vm2, 0, %v423_v34  ;;  %v2566_v1 = vmul.f32 %v2541_v41, %v1073_v35 }
  0xcd   : > { %1007 = vst [vmem:[#allocation2 + $0x78] sm:$0xf] %v975_v52  ;;  %v880_v59 = vadd.f32 1.0, %v2261_v55  ;;  %v921_v63 = vmul.f32 0.5, %v889_v57  ;;  %2264 = vtanh.f32 %v805_v60  ;;  %v1035_v43 = vunpack.c.l.bf16 %v2531_v29 }
  0xce   : > { %v900_v0 = vmul.f32 0.5, %v868_v58  ;;  %2266 = vtanh.f32 %v817_v4  ;;  %425 = vst [vmem:[#allocation2 + $0x2c] sm:$0x1] %v424_v45  ;;  %v2548_v52 = vmul.f32 %v2526_v22, %v1034_v2  ;;  %v1149_v57 = vrot.slane %v2534_v32, 1  ;;  %v2559_v58 = vld [vmem:[#allocation2 + $0x8] sm:$0xf] }
  0xcf   : > { %v912_v3 = vmul.f32 0.5, %v880_v59  ;;  %v786_v5 = vpop.f32.mrf.mxu2  ;;  %v953_v6 = vmul.f32 %v921_v63, %v2479_v14  ;;  %3344 = vst [vmem:[#allocation3_spill] sm:$0xff] %v2559_v58  ;;  %v2583_v23 = vmul.f32 %v2526_v22, %v1035_v43  ;;  %v405_v45 = vld [vmem:[#allocation2 + $0x11c] sm:$0x1]  ;;  %v393_v58 = vld [vmem:[#allocation2 + $0x44] sm:$0x1] }
  0xd0   : > { %v932_v7 = vmul.f32 %v900_v0, %v729_v19  ;;  %v2512_v8 = vadd.f32 %v2461_v27, %v786_v5  ;;  %v733_v9 = vpop.f32.mrf.mxu0  ;;  %v763_v10 = vpop.f32.mrf.mxu1  ;;  %v420_v19 = vld [vmem:[#allocation2 + $0x24] sm:$0x1] }
  0xd1   : > { %v944_v12 = vmul.f32 %v912_v3, %v2483_v20  ;;  %v2516_v13 = vadd.f32 %v2461_v27, %v733_v9  ;;  %v2519_v15 = vadd.f32 %v2461_v27, %v763_v10  ;;  %v985_v16 = vpack.c.bf16 %v953_v6, %v953_v6  ;;  %v1065_v3 = vld [vmem:[#allocation2 + $0x70] sm:$0xf] }
  0xd2   : > { %v964_v17 = vpack.c.bf16 %v932_v7, %v932_v7  ;;  %v827_v14 = vmul.f32 0.5, %v2512_v8  ;;  %v2263_v21 = vpop.eup %2262  ;;  %v1112_v20 = vmul.f32 %v2506_v62, %v1034_v2  ;;  %v421_v33 = vsel %vm2452_vm2, 0, %v420_v19 }
  0xd3   : > { %v976_v25 = vpack.c.bf16 %v944_v12, %v944_v12  ;;  %v806_v26 = vmul.f32 0.5, %v2516_v13  ;;  %v818_v28 = vmul.f32 0.5, %v2519_v15  ;;  %1017 = vst [vmem:[#allocation2 + $0xd8] sm:$0xf] %v985_v16  ;;  %v890_v30 = vadd.f32 1.0, %v2263_v21  ;;  %v2265_v31 = vpop.eup %2264 }
  0xd4   : > { %2268 = vtanh.f32 %v827_v14  ;;  %996 = vst [vmem:[#allocation2 + $0x18] sm:$0xf] %v964_v17  ;;  %v869_v37 = vadd.f32 1.0, %v2265_v31  ;;  %v2267_v39 = vpop.eup %2266  ;;  %v1145_v40 = vrot.slane %v1112_v20, 1  ;;  %v2550_v54 = vld [vmem:[#allocation2 + $0x10] sm:$0xf]  ;;  %v2569_v2 = vmul.f32 %v2506_v62, %v1035_v43 }
  0xd5   : > { %2270 = vtanh.f32 %v806_v26  ;;  %1008 = vst [vmem:[#allocation2 + $0x80] sm:$0xf] %v976_v25  ;;  %v922_v36 = vmul.f32 0.5, %v890_v30  ;;  %v881_v49 = vadd.f32 1.0, %v2267_v39  ;;  %v1036_v6 = vunpack.c.l.bf16 %v2550_v54 }
  0xd6   : > { %2272 = vtanh.f32 %v818_v28  ;;  %422 = vst [vmem:[#allocation2 + $0x24] sm:$0x1] %v421_v33  ;;  %v901_v48 = vmul.f32 0.5, %v869_v37  ;;  %v2572_v5 = vsel %vm1144_vm3, %v1145_v40, %v1146_v38  ;;  %v1074_v14 = vunpack.c.l.bf16 %v1065_v3  ;;  %v401_v37 = vld [vmem:[#allocation2 + $0xd4] sm:$0x1] }
  0xd7   : > { %v788_v44 = vpop.f32.mrf.mxu2  ;;  %v954_v46 = vmul.f32 %v922_v36, %v2490_v42  ;;  %v913_v61 = vmul.f32 0.5, %v881_v49  ;;  %v2590_v29 = vmul.f32 %v2506_v62, %v1036_v6  ;;  %v2597_v38 = vld [vmem:[#allocation2 + $0x10] sm:$0xf] }
  0xd8   : > { %v736_v50 = vpop.f32.mrf.mxu0  ;;  %v766_v51 = vpop.f32.mrf.mxu1  ;;  %v2553_v55 = vadd.f32 %v2461_v27, %v788_v44  ;;  %v933_v60 = vmul.f32 %v901_v48, %v2494_v47  ;;  %3345 = vst [vmem:[#allocation4_spill] sm:$0xff] %v2597_v38  ;;  %v2607_v48 = vld [vmem:[#allocation2 + $0x78] sm:$0xf] }
  0xd9   : > { %v2556_v56 = vadd.f32 %v2461_v27, %v736_v50  ;;  %v986_v59 = vpack.c.bf16 %v954_v46, %v954_v46  ;;  %v2563_v63 = vadd.f32 %v2461_v27, %v766_v51  ;;  %v945_v7 = vmul.f32 %v913_v61, %v2498_v53  ;;  %v435_v50 = vld [vmem:[#allocation2 + $0x4c] sm:$0x1]  ;;  %v2614_v51 = vld [vmem:[#allocation2 + $0x34] sm:$0x1] }
  0xda   : > { %v2269_v42 = vpop.eup %2268  ;;  %v965_v47 = vpack.c.bf16 %v933_v60, %v933_v60  ;;  %v828_v9 = vmul.f32 0.5, %v2553_v55  ;;  %v1148_v53 = vrot.slane %v2569_v2, 1  ;;  %v2605_v46 = vmul.f32 %v2541_v41, %v1074_v14  ;;  %v438_v61 = vld [vmem:[#allocation2 + $0x54] sm:$0x1]  ;;  %v2620_v2 = vld [vmem:[#allocation2 + $0xd8] sm:$0xf] }
  0xdb   : > { %v2271_v0 = vpop.eup %2270  ;;  %v891_v4 = vadd.f32 1.0, %v2269_v42  ;;  %1018 = vst [vmem:[#allocation2 + $0xe0] sm:$0xf] %v986_v59  ;;  %v807_v17 = vmul.f32 0.5, %v2556_v56  ;;  %v2579_v18 = vld [vmem:[#allocation2 + $0x18] sm:$0xf]  ;;  %v977_v19 = vpack.c.bf16 %v945_v7, %v945_v7 }
  0xdc   : > { %v2273_v10 = vpop.eup %2272  ;;  %v870_v16 = vadd.f32 1.0, %v2271_v0  ;;  %997 = vst [vmem:[#allocation2 + $0x20] sm:$0xf] %v965_v47  ;;  %v819_v20 = vmul.f32 0.5, %v2563_v63  ;;  %2274 = vtanh.f32 %v828_v9  ;;  %v1037_v34 = vunpack.c.l.bf16 %v2579_v18  ;;  %v2696_v0 = vld [vmem:[#allocation2 + $0x84] sm:$0x1] }
  0xdd   : > { %v923_v12 = vmul.f32 0.5, %v891_v4  ;;  %v882_v21 = vadd.f32 1.0, %v2273_v10  ;;  %1009 = vst [vmem:[#allocation2 + $0x90] sm:$0xf] %v977_v19  ;;  %2276 = vtanh.f32 %v807_v17  ;;  %v402_v60 = vsel %vm2452_vm2, 0, %v401_v37 }
  0xde   : > { %v902_v26 = vmul.f32 0.5, %v870_v16  ;;  %2278 = vtanh.f32 %v819_v20  ;;  %v406_v47 = vsel %vm2452_vm2, 0, %v405_v45  ;;  %v2630_v7 = vsel %vm1144_vm3, %v1148_v53, %v1149_v57  ;;  %v441_v17 = vld [vmem:[#allocation2 + $0x5c] sm:$0x1]  ;;  %403 = vst [vmem:[#allocation2 + $0xd4] sm:$0x1] %v402_v60 }
  0xdf   : > { %v955_v25 = vmul.f32 %v923_v12, %v2512_v8  ;;  %v791_v28 = vpop.f32.mrf.mxu2  ;;  %v914_v30 = vmul.f32 0.5, %v882_v21  ;;  %v397_v8 = vld [vmem:[#allocation2 + $0x8c] sm:$0x1]  ;;  %v2636_v12 = vmul.f32 %v2506_v62, %v1037_v34  ;;  %v436_v16 = vsel %vm2452_vm2, 0, %v435_v50  ;;  %407 = vst [vmem:[#allocation2 + $0x11c] sm:$0x1] %v406_v47 }
  0xe0   : > { %v2593_v31 = vadd.f32 %v2461_v27, %v791_v28  ;;  %v738_v33 = vpop.f32.mrf.mxu0  ;;  %v934_v36 = vmul.f32 %v902_v26, %v2516_v13  ;;  %v768_v44 = vpop.f32.mrf.mxu1  ;;  %v439_v20 = vsel %vm2452_vm2, 0, %v438_v61  ;;  %v2650_v28 = vld [vmem:[%s3321_s3 + $0x5] ss:$0 sm:$0xff]  ;;  %437 = vst [vmem:[#allocation2 + $0x4c] sm:$0x1] %v436_v16  ;;  %v2665_v45 = vmul.f32 %v2526_v22, %v1036_v6 }
  0xe1   : > { %v987_v35 = vpack.c.bf16 %v955_v25, %v955_v25  ;;  %v946_v39 = vmul.f32 %v914_v30, %v2519_v15  ;;  %v2602_v43 = vadd.f32 %v2461_v27, %v738_v33  ;;  %v2610_v49 = vadd.f32 %v2461_v27, %v768_v44  ;;  %v444_v33 = vld [vmem:[#allocation2 + $0x64] sm:$0x1]  ;;  %440 = vst [vmem:[#allocation2 + $0x54] sm:$0x1] %v439_v20  ;;  %v2715_v11 = vld [vmem:[#allocation2 + $0x18] sm:$0xf] }
  0xe2   : > { %v829_v40 = vmul.f32 0.5, %v2593_v31  ;;  %v966_v13 = vpack.c.bf16 %v934_v36, %v934_v36  ;;  %v398_v15 = vsel %vm2452_vm2, 0, %v397_v8  ;;  %v2275_v9 = vpop.eup %2274  ;;  %v2669_v50 = vld [vmem:[#allocation2 + $0xe0] sm:$0xf]  ;;  %3347 = vst [vmem:[#allocation6_spill] sm:$0xff] %v2715_v11 }
  0xe3   : > { %1019 = vst [vmem:[#allocation2 + $0xe8] sm:$0xf] %v987_v35  ;;  %v978_v42 = vpack.c.bf16 %v946_v39, %v946_v39  ;;  %v808_v59 = vmul.f32 0.5, %v2602_v43  ;;  %v2622_v3 = vld [vmem:[#allocation2 + $0x20] sm:$0xf]  ;;  %v820_v4 = vmul.f32 0.5, %v2610_v49  ;;  %v2277_v14 = vpop.eup %2276 }
  0xe4   : > { %2280 = vtanh.f32 %v829_v40  ;;  %399 = vst [vmem:[#allocation2 + $0x8c] sm:$0x1] %v398_v15  ;;  %v1038_v32 = vunpack.c.l.bf16 %v2622_v3  ;;  %v2641_v19 = vld [vmem:[#allocation2 + $0x90] sm:$0xf]  ;;  %v892_v57 = vadd.f32 1.0, %v2275_v9  ;;  %v2279_v53 = vpop.eup %2278  ;;  %v871_v30 = vadd.f32 1.0, %v2277_v14 }
  0xe5   : > { %998 = vst [vmem:[#allocation2 + $0x28] sm:$0xf] %v966_v13  ;;  %2282 = vtanh.f32 %v808_v59  ;;  %v1195_v26 = vunpack.c.l.bf16 %v2641_v19  ;;  %v883_v37 = vadd.f32 1.0, %v2279_v53  ;;  %v442_v40 = vsel %vm2452_vm2, 0, %v441_v17  ;;  %v447_v14 = vld [vmem:[#allocation2 + $0x6c] sm:$0x1] }
  0xe6   : > { %1010 = vst [vmem:[#allocation2 + $0x98] sm:$0xf] %v978_v42  ;;  %2284 = vtanh.f32 %v820_v4  ;;  %v924_v8 = vmul.f32 0.5, %v892_v57  ;;  %v1230_v13 = vunpack.c.l.bf16 %v2620_v2  ;;  %v903_v42 = vmul.f32 0.5, %v871_v30  ;;  %v498_v3 = vld [vmem:[#allocation2 + $0xf4] sm:$0x1] }
  0xe7   : > { %v793_v21 = vpop.f32.mrf.mxu2  ;;  %v2674_v59 = vmul.f32 %v2506_v62, %v1038_v32  ;;  %v915_v61 = vmul.f32 0.5, %v883_v37  ;;  %443 = vst [vmem:[#allocation2 + $0x5c] sm:$0x1] %v442_v40  ;;  %v2680_v4 = vmul.f32 %v2650_v28, %v1195_v26  ;;  %v445_v17 = vsel %vm2452_vm2, 0, %v444_v33  ;;  %v513_v38 = vld [vmem:[#allocation2 + $0x11c] sm:$0x1] }
  0xe8   : > { %v2652_v35 = vpop.f32.mrf.mxu0  ;;  %v2658_v39 = vadd.f32 %v2461_v27, %v793_v21  ;;  %v956_v60 = vmul.f32 %v924_v8, %v2553_v55  ;;  %v935_v9 = vmul.f32 %v903_v42, %v2556_v56  ;;  %v1231_v57 = vunpack.c.l.bf16 %v2669_v50  ;;  %446 = vst [vmem:[#allocation2 + $0x64] sm:$0x1] %v445_v17  ;;  %v450_v8 = vld [vmem:[#allocation2 + $0x74] sm:$0x1]  ;;  %v453_v42 = vld [vmem:[#allocation2 + $0x7c] sm:$0x1]  ;;  %v2698_v50 = vpop.f32.mrf.mxu1 }
  0xe9   : > { %3346 = vst [vmem:[#allocation5_spill] sm:$0xff] %v2680_v4  ;;  %v947_v30 = vmul.f32 %v915_v61, %v2563_v63  ;;  %v448_v15 = vsel %vm2452_vm2, 0, %v447_v14  ;;  %v457_v14 = vsel %vm2452_vm2, 0, %v2696_v0 }
  0xea   : > { %v2281_v44 = vpop.eup %2280  ;;  %v830_v16 = vmul.f32 0.5, %v2658_v39  ;;  %v988_v53 = vpack.c.bf16 %v956_v60, %v956_v60  ;;  %v2693_v37 = vld [vmem:[#allocation2 + $0xe8] sm:$0xf]  ;;  %v967_v40 = vpack.c.bf16 %v935_v9, %v935_v9  ;;  %v2703_v60 = vld [vmem:[%s3321_s3 + $0x4] ss:$0 sm:$0xff] }
  0xeb   : > { %v893_v54 = vadd.f32 1.0, %v2281_v44  ;;  %v2283_v6 = vpop.eup %2282  ;;  %v2711_v9 = vld [vmem:[#allocation2 + $0x8c] sm:$0x1]  ;;  %449 = vst [vmem:[#allocation2 + $0x6c] sm:$0x1] %v448_v15  ;;  %v2762_v0 = vmul.f32 %v2703_v60, %v1230_v13 }
  0xec   : > { %v2682_v47 = vld [vmem:[#allocation2 + $0x28] sm:$0xf]  ;;  %v2285_v55 = vpop.eup %2284  ;;  %v872_v33 = vadd.f32 1.0, %v2283_v6  ;;  %1020 = vst [vmem:[#allocation2 + $0xf0] sm:$0xf] %v988_v53  ;;  %2286 = vtanh.f32 %v830_v16  ;;  %v454_v16 = vsel %vm2452_vm2, 0, %v453_v42 }
  0xed   : > { %v3330_v21 = vunpack.c.l.bf16 %v2682_v47  ;;  %v2690_v20 = vld [vmem:[#allocation2 + $0x98] sm:$0xf]  ;;  %v925_v44 = vmul.f32 0.5, %v893_v54  ;;  %v979_v54 = vpack.c.bf16 %v947_v30, %v947_v30  ;;  %v884_v6 = vadd.f32 1.0, %v2285_v55  ;;  %999 = vst [vmem:[#allocation2 + $0x30] sm:$0xf] %v967_v40 }
  0xee   : > { %v3331_v56 = vunpack.c.l.bf16 %v2690_v20  ;;  %v904_v36 = vmul.f32 0.5, %v872_v33  ;;  %v2724_v53 = vld [vmem:[#allocation2 + $0xd4] sm:$0x1]  ;;  %v1232_v33 = vunpack.c.l.bf16 %v2693_v37  ;;  %455 = vst [vmem:[#allocation2 + $0x7c] sm:$0x1] %v454_v16 }
  0xef   : > { %v2709_v61 = vmul.f32 %v2506_v62, %v3330_v21  ;;  %v2713_v17 = vpop.f32.mrf.mxu2  ;;  %v957_v10 = vmul.f32 %v925_v44, %v2593_v31  ;;  %1011 = vst [vmem:[#allocation2 + $0xa0] sm:$0xf] %v979_v54  ;;  %v916_v25 = vmul.f32 0.5, %v884_v6  ;;  %v2731_v21 = vld [vmem:[#allocation2 + $0x80] sm:$0xf]  ;;  %v451_v44 = vsel %vm2452_vm2, 0, %v450_v8 }
  0xf0   : > { %v2721_v63 = vmul.f32 %v2650_v28, %v3331_v56  ;;  %v2726_v55 = vpop.f32.mrf.mxu0  ;;  %v936_v31 = vmul.f32 %v904_v36, %v2602_v43  ;;  %452 = vst [vmem:[#allocation2 + $0x74] sm:$0x1] %v451_v44  ;;  %v489_v6 = vld [vmem:[#allocation2 + $0xdc] sm:$0x1]  ;;  %v2747_v43 = vld [vmem:[%s3321_s3 + $0x3] ss:$0 sm:$0xff]  ;;  %v2757_v36 = vadd.f32 %v2461_v27, %v2652_v35  ;;  %v2772_v35 = vmul.f32 %v2703_v60, %v1231_v57 }
  0xf1   : > { %v989_v40 = vpack.c.bf16 %v957_v10, %v957_v10  ;;  %v948_v54 = vmul.f32 %v916_v25, %v2610_v49  ;;  %v460_v49 = vsel %vm2452_vm2, 0, %v2711_v9  ;;  %v487_v25 = vsel %vm2452_vm2, 0, %v2724_v53  ;;  %v492_v42 = vld [vmem:[#allocation2 + $0xe4] sm:$0x1]  ;;  %v495_v9 = vld [vmem:[#allocation2 + $0xec] sm:$0x1] }
  0xf2   : > { %3348 = vst [vmem:[#allocation7_spill] sm:$0xff] %v2721_v63  ;;  %v968_v10 = vpack.c.bf16 %v936_v31, %v936_v31  ;;  %v2769_v53 = vmul.f32 %v2526_v22, %v1037_v34  ;;  %v490_v13 = vsel %vm2452_vm2, 0, %v489_v6  ;;  %v2287_v31 = vpop.eup %2286  ;;  %v2782_v44 = vmul.f32 %v2526_v22, %v1038_v32 }
  0xf3   : > { %1021 = vst [vmem:[#allocation2 + $0xf8] sm:$0xf] %v989_v40  ;;  %v980_v37 = vpack.c.bf16 %v948_v54, %v948_v54  ;;  %v2774_v2 = vld [vmem:[#allocation2 + $0xf0] sm:$0xf]  ;;  %v809_v40 = vmul.f32 0.5, %v2757_v36  ;;  %v2787_v18 = vmul.f32 %v2747_v43, %v1195_v26  ;;  %v2790_v34 = vmul.f32 %v2703_v60, %v1232_v33  ;;  %v773_v33 = vpop.f32.mrf.mxu1 }
  0xf4   : > { %1000 = vst [vmem:[#allocation2 + $0x38] sm:$0xf] %v968_v10  ;;  %v3349_v57 = vunpack.c.l.bf16 %v2682_v47  ;;  %v2797_v16 = vld [vmem:[#allocation2 + $0x30] sm:$0xf]  ;;  %v894_v32 = vadd.f32 1.0, %v2287_v31  ;;  %v493_v19 = vsel %vm2452_vm2, 0, %v492_v42  ;;  %v2803_v26 = vadd.f32 %v2461_v27, %v2698_v50 }
  0xf5   : > { %1012 = vst [vmem:[#allocation2 + $0xa8] sm:$0xf] %v980_v37  ;;  %2288 = vtanh.f32 %v809_v40  ;;  %v3350_v10 = vunpack.c.l.bf16 %v2690_v20  ;;  %v3334_v37 = vunpack.c.l.bf16 %v2797_v16  ;;  %v504_v31 = vld [vmem:[#allocation2 + $0x104] sm:$0x1]  ;;  %v2813_v42 = vadd.f32 %v2461_v27, %v2713_v17  ;;  %v507_v17 = vld [vmem:[#allocation2 + $0x10c] sm:$0x1] }
  0xf6   : > { %v2795_v54 = vmul.f32 %v2526_v22, %v3349_v57  ;;  %v1188_v6 = vld [vmem:[#allocation2 + $0xa0] sm:$0xf]  ;;  %458 = vst [vmem:[#allocation2 + $0x84] sm:$0x1] %v457_v14  ;;  %v501_v14 = vld [vmem:[#allocation2 + $0xfc] sm:$0x1] }
  0xf7   : > { %v2808_v57 = vmul.f32 %v2747_v43, %v3350_v10  ;;  %v1197_v15 = vunpack.c.l.bf16 %v1188_v6  ;;  %461 = vst [vmem:[#allocation2 + $0x8c] sm:$0x1] %v460_v49  ;;  %v798_v40 = vpop.f32.mrf.mxu2  ;;  %v926_v50 = vmul.f32 0.5, %v894_v32  ;;  %v496_v56 = vsel %vm2452_vm2, 0, %v495_v9 }
  0xf8   : > { %v746_v47 = vpop.f32.mrf.mxu0  ;;  %488 = vst [vmem:[#allocation2 + $0xd4] sm:$0x1] %v487_v25  ;;  %v499_v20 = vsel %vm2452_vm2, 0, %v498_v3  ;;  %v502_v10 = vsel %vm2452_vm2, 0, %v501_v14  ;;  %v2829_v25 = vadd.f32 %v2461_v27, %v2726_v55  ;;  %v2832_v9 = vadd.f32 %v2461_v27, %v773_v33  ;;  %v510_v14 = vld [vmem:[#allocation2 + $0x114] sm:$0x1] }
  0xf9   : > { %v2823_v6 = vmul.f32 %v2650_v28, %v1197_v15  ;;  %491 = vst [vmem:[#allocation2 + $0xdc] sm:$0x1] %v490_v13  ;;  %v958_v3 = vmul.f32 %v926_v50, %v2658_v39  ;;  %v505_v32 = vsel %vm2452_vm2, 0, %v504_v31  ;;  %v821_v49 = vmul.f32 0.5, %v2803_v26 }
  0xfa   : > { %v2825_v30 = vld [vmem:[#allocation2 + $0xf8] sm:$0xf]  ;;  %494 = vst [vmem:[#allocation2 + $0xe4] sm:$0x1] %v493_v19  ;;  %v2839_v8 = vadd.f32 %v2461_v27, %v798_v40  ;;  %v2844_v55 = vmul.f32 %v2506_v62, %v3334_v37  ;;  %v508_v39 = vsel %vm2452_vm2, 0, %v507_v17  ;;  %v2852_v19 = vadd.f32 %v2461_v27, %v746_v47 }
  0xfb   : > { %3351 = vst [vmem:[#allocation8_spill] sm:$0xff] %v2823_v6  ;;  %v2847_v33 = vld [vmem:[#allocation2 + $0x38] sm:$0xf]  ;;  %v2289_v31 = vpop.eup %2288  ;;  %v2855_v40 = vmul.f32 %v2747_v43, %v1197_v15  ;;  %v990_v37 = vpack.c.bf16 %v958_v3, %v958_v3  ;;  %2290 = vtanh.f32 %v821_v49  ;;  %v831_v47 = vmul.f32 0.5, %v2813_v42  ;;  %v2902_v6 = vld [vmem:[#allocation2 + $0x9c] sm:$0x1] }
  0xfc   : > { %497 = vst [vmem:[#allocation2 + $0xec] sm:$0x1] %v496_v56  ;;  %v1189_v11 = vld [vmem:[#allocation2 + $0xa8] sm:$0xf]  ;;  %v511_v56 = vsel %vm2452_vm2, 0, %v510_v14  ;;  %v873_v17 = vadd.f32 1.0, %v2289_v31 }
  0xfd   : > { %500 = vst [vmem:[#allocation2 + $0xf4] sm:$0x1] %v499_v20  ;;  %v1198_v13 = vunpack.c.l.bf16 %v1189_v11  ;;  %v810_v15 = vmul.f32 0.5, %v2829_v25  ;;  %v822_v50 = vmul.f32 0.5, %v2832_v9  ;;  %v832_v3 = vmul.f32 0.5, %v2839_v8  ;;  %v2162_v14 = vld [vmem:[%s3323_s5 + $0x38] sm:$0xff] }
  0xfe   : > { %503 = vst [vmem:[#allocation2 + $0xfc] sm:$0x1] %v502_v10  ;;  %v514_v11 = vsel %vm2452_vm2, 0, %v513_v38  ;;  %v905_v10 = vmul.f32 0.5, %v873_v17  ;;  %2292 = vtanh.f32 %v831_v47  ;;  %v811_v49 = vmul.f32 0.5, %v2852_v19  ;;  %1644 = vmatpush.bf16.msrb.mxu1 %v2162_v14  ;;  %v2161_v47 = vld [vmem:[%s3323_s5 + $0x30] sm:$0xff] }
  0xff   : > { %1022 = vst [vmem:[#allocation2 + $0x100] sm:$0xf] %v990_v37  ;;  %v2872_v37 = vmul.f32 %v2747_v43, %v1198_v13  ;;  %2294 = vtanh.f32 %v810_v15  ;;  %v2880_v38 = vmul.f32 %v2650_v28, %v1198_v13 }
 0x100   : > { %v748_v20 = vpop.f32.mrf.mxu0  ;;  %506 = vst [vmem:[#allocation2 + $0x104] sm:$0x1] %v505_v32  ;;  %v2877_v32 = vld [vmem:[#allocation2 + $0xc4] sm:$0x1]  ;;  %v937_v17 = vmul.f32 %v905_v10, %v2757_v36  ;;  %2296 = vtanh.f32 %v822_v50  ;;  %v429_v36 = vld [vmem:[#allocation2 + $0x3c] sm:$0x1]  ;;  %v3354_v50 = vunpack.c.l.bf16 %v2847_v33 }
 0x101   : > { %509 = vst [vmem:[#allocation2 + $0x10c] sm:$0x1] %v508_v39  ;;  %v2875_v31 = vadd.f32 %v2461_v27, %v748_v20  ;;  %v3353_v39 = vunpack.c.l.bf16 %v2797_v16  ;;  %v2291_v15 = vpop.eup %2290  ;;  %2298 = vtanh.f32 %v832_v3  ;;  %v2160_v16 = vld [vmem:[%s3323_s5 + $0x28] sm:$0xff]  ;;  %v430_v3 = vsel %vm2452_vm2, 0, %v429_v36 }
 0x102   : > { %3352 = vst [vmem:[#allocation9_spill] sm:$0xff] %v2880_v38  ;;  %v1050_v20 = vmul.f32 %v2526_v22, %v3354_v50  ;;  %v969_v10 = vpack.c.bf16 %v937_v17, %v937_v17  ;;  %v885_v14 = vadd.f32 1.0, %v2291_v15  ;;  %2300 = vtanh.f32 %v811_v49  ;;  %1645 = vmatpush.bf16.msrb.mxu1 %v2161_v47 }
 0x103   : > { %512 = vst [vmem:[#allocation2 + $0x114] sm:$0x1] %v511_v56  ;;  %v1049_v27 = vmul.f32 %v2526_v22, %v3353_v39  ;;  %v812_v13 = vmul.f32 0.5, %v2875_v31  ;;  %v394_v56 = vsel %vm2452_vm2, 0, %v393_v58  ;;  %v2334_v39 = vmov 0  }
 0x104   : > { %515 = vst [vmem:[#allocation2 + $0x11c] sm:$0x1] %v514_v11  ;;  %v462_v11 = vld [vmem:[#allocation2 + $0x94] sm:$0x1]  ;;  %v3355_v49 = vunpack.c.l.bf16 %v2607_v48  ;;  %v2293_v15 = vpop.eup %2292  ;;  %v917_v50 = vmul.f32 0.5, %v885_v14  ;;  %v3356_v36 = vunpack.c.l.bf16 %v2731_v21  ;;  %v2920_v22 = vadd.f32 %v2566_v1, %v2782_v44  ;;  %v2159_v44 = vld [vmem:[%s3323_s5 + $0x20] sm:$0xff] }
 0x105   : > { %389 = vst [vmem:[#allocation2 + $0x40] sm:$0xf] %v2334_v39  ;;  %2302 = vtanh.f32 %v812_v13  ;;  %v463_v58 = vsel %vm2452_vm2, 0, %v462_v11  ;;  %v2295_v48 = vpop.eup %2294  ;;  %v2929_v14 = vadd.f32 %v2605_v46, %v2795_v54 }
 0x106   : > { %395 = vst [vmem:[#allocation2 + $0x44] sm:$0x1] %v394_v56  ;;  %v1084_v17 = vmul.f32 %v2541_v41, %v3355_v49  ;;  %v2913_v56 = vld [vmem:[#allocation2 + $0xa4] sm:$0x1]  ;;  %v1085_v11 = vmul.f32 %v2541_v41, %v3356_v36  ;;  %v895_v49 = vadd.f32 1.0, %v2293_v15  ;;  %v2297_v36 = vpop.eup %2296  ;;  %v949_v13 = vmul.f32 %v917_v50, %v2803_v26  ;;  %1646 = vmatpush.bf16.msrb.mxu1 %v2160_v16 }
 0x107   : > { %1001 = vst [vmem:[#allocation2 + $0x48] sm:$0xf] %v969_v10  ;;  %v2925_v10 = vld [vmem:[#allocation2 + $0xac] sm:$0x1]  ;;  %v874_v1 = vadd.f32 1.0, %v2295_v48  ;;  %v2299_v46 = vpop.eup %2298 }
 0x108   : > { %396 = vst [vmem:[#allocation2 + $0x88] sm:$0xf] %v2334_v39  ;;  %v2931_v21 = vadd.f32 %v1084_v17, %v1049_v27  ;;  %v2940_v15 = vld [vmem:[#allocation2 + $0xb4] sm:$0x1]  ;;  %v2942_v47 = vadd.f32 %v1085_v11, %v1050_v20  ;;  %v927_v54 = vmul.f32 0.5, %v895_v49  ;;  %v886_v27 = vadd.f32 1.0, %v2297_v36  ;;  %v2301_v50 = vpop.eup %2300 }
 0x109   : > { %v981_v48 = vpack.c.bf16 %v949_v13, %v949_v13  ;;  %v906_v63 = vmul.f32 0.5, %v874_v1  ;;  %v896_v4 = vadd.f32 1.0, %v2299_v46  ;;  %v3357_v39 = vsel %vm2452_vm2, 0, %v2614_v51  ;;  %v2952_v20 = vld [vmem:[#allocation2 + $0xbc] sm:$0x1] }
 0x10a   : > { %428 = vst [vmem:[#allocation2 + $0x34] sm:$0x1] %v3357_v39  ;;  %v3358_v11 = vunpack.c.l.bf16 %v2847_v33  ;;  %v959_v17 = vmul.f32 %v927_v54, %v2813_v42  ;;  %v918_v26 = vmul.f32 0.5, %v886_v27  ;;  %v875_v13 = vadd.f32 1.0, %v2301_v50  ;;  %1647 = vmatpush.bf16.msrb.mxu1 %v2159_v44 }
 0x10b   : > { %v2303_v36 = vpop.eup %2302  ;;  %431 = vst [vmem:[#allocation2 + $0x3c] sm:$0x1] %v430_v3  ;;  %v478_v16 = vsel %vm2452_vm2, 0, %v2952_v20  ;;  %v938_v51 = vmul.f32 %v906_v63, %v2829_v25  ;;  %v928_v1 = vmul.f32 0.5, %v896_v4  ;;  %v3359_v33 = vunpack.c.l.bf16 %v2774_v2  ;;  %v2158_v2 = vld [vmem:[%s3323_s5 + $0x18] sm:$0xff] }
 0x10c   : > { %v2957_v49 = vmul.f32 %v2506_v62, %v3358_v11  ;;  %1013 = vst [vmem:[#allocation2 + $0xb0] sm:$0xf] %v981_v48  ;;  %v876_v39 = vadd.f32 1.0, %v2303_v36  ;;  %v991_v42 = vpack.c.bf16 %v959_v17, %v959_v17  ;;  %v950_v54 = vmul.f32 %v918_v26, %v2832_v9  ;;  %v2976_v25 = vld [vmem:[#allocation2 + $0xcc] sm:$0x1] }
 0x10d   : > { %v432_v46 = vld [vmem:[#allocation2 + $0x44] sm:$0x1]  ;;  %v2967_v11 = vmul.f32 %v2703_v60, %v3359_v33  ;;  %v907_v3 = vmul.f32 0.5, %v875_v13  ;;  %464 = vst [vmem:[#allocation2 + $0x94] sm:$0x1] %v463_v58  ;;  %v970_v48 = vpack.c.bf16 %v938_v51, %v938_v51  ;;  %v960_v4 = vmul.f32 %v928_v1, %v2839_v8  ;;  %v2157_v13 = vld [vmem:[%s3323_s5 + $0x10] sm:$0xff] }
 0x10e   : > { %v1060_v38 = vld [vmem:[#allocation2 + $0x48] sm:$0xf]  ;;  %v433_v27 = vsel %vm2452_vm2, 0, %v432_v46  ;;  %v908_v63 = vmul.f32 0.5, %v876_v39  ;;  %1023 = vst [vmem:[#allocation2 + $0x108] sm:$0xf] %v991_v42  ;;  %v982_v9 = vpack.c.bf16 %v950_v54, %v950_v54  ;;  %1648 = vmatpush.bf16.msrb.mxu1 %v2158_v2 }
 0x10f   : > { %v1069_v50 = vunpack.c.l.bf16 %v1060_v38  ;;  %434 = vst [vmem:[#allocation2 + $0x44] sm:$0x1] %v433_v27  ;;  %v939_v26 = vmul.f32 %v907_v3, %v2852_v19  ;;  %v484_v38 = vsel %vm2452_vm2, 0, %v2976_v25  ;;  %v1096_v58 = vld [vmem:[#allocation2 + $0x14] sm:$0x1]  ;;  %v1166_v8 = vrot.slane %v2957_v49, 1 }
 0x110   : > { %1002 = vst [vmem:[#allocation2 + $0x50] sm:$0xf] %v970_v48  ;;  %v992_v17 = vpack.c.bf16 %v960_v4, %v960_v4  ;;  %v940_v36 = vmul.f32 %v908_v63, %v2875_v31  ;;  %v1097_v51 = vld [vmem:[#allocation2 + $0x1c] sm:$0x1]  ;;  %v1098_v1 = vld [vmem:[#allocation2 + $0x24] sm:$0x1]  ;;  %v1105_v19 = vunpack.c.l.bf16 %v1096_v58  ;;  %v3360_v3 = vunpack.c.l.bf16 %v2825_v30 }
 0x111   : > { %v1078_v44 = vmul.f32 %v2541_v41, %v1069_v50  ;;  %1014 = vst [vmem:[#allocation2 + $0xb8] sm:$0xf] %v982_v9  ;;  %v971_v39 = vpack.c.bf16 %v939_v26, %v939_v26  ;;  %v1099_v46 = vld [vmem:[#allocation2 + $0x2c] sm:$0x1]  ;;  %v1100_v33 = vld [vmem:[#allocation2 + $0x34] sm:$0x1]  ;;  %v1106_v42 = vunpack.c.l.bf16 %v1097_v51  ;;  %v1107_v54 = vunpack.c.l.bf16 %v1098_v1 }
 0x112   : > { %v2991_v27 = vmul.f32 %v2703_v60, %v3360_v3  ;;  %1024 = vst [vmem:[#allocation2 + $0x110] sm:$0xf] %v992_v17  ;;  %v972_v50 = vpack.c.bf16 %v940_v36, %v940_v36  ;;  %v1101_v48 = vld [vmem:[#allocation2 + $0x3c] sm:$0x1]  ;;  %v1108_v4 = vunpack.c.l.bf16 %v1099_v46  ;;  %v1109_v63 = vunpack.c.l.bf16 %v1100_v33  ;;  %v2994_v58 = vld [vmem:[#allocation2 + $0xc0] sm:$0xf]  ;;  %1649 = vmatpush.bf16.msrb.mxu1 %v2157_v13 }
 0x113   : > { %v1086_v31 = vadd.f32 %v1078_v44, %v2548_v52  ;;  %v2996_v9 = vld [vmem:[#allocation2 + $0xb0] sm:$0xf]  ;;  %1003 = vst [vmem:[#allocation2 + $0x58] sm:$0xf] %v971_v39  ;;  %v1110_v26 = vunpack.c.l.bf16 %v1101_v48  ;;  %v1117_v51 = vmul.f32 %v2506_v62, %v1105_v19  ;;  %v1119_v30 = vmul.f32 %v2506_v62, %v1106_v42  ;;  %v3001_v3 = vld [vmem:[#allocation2 + $0xc8] sm:$0xf] }
 0x114   : > { %v1121_v1 = vmul.f32 %v2506_v62, %v1107_v54  ;;  %v1199_v2 = vunpack.c.l.bf16 %v2996_v9  ;;  %1004 = vst [vmem:[#allocation2 + $0x60] sm:$0xf] %v972_v50  ;;  %v1123_v44 = vmul.f32 %v2506_v62, %v1108_v4  ;;  %v1125_v17 = vmul.f32 %v2506_v62, %v1109_v63  ;;  %v2156_v36 = vld [vmem:[%s3323_s5 + $0x8] sm:$0xff]  ;;  %v1226_v4 = vld [vmem:[#allocation2 + $0x100] sm:$0xf] }
 0x115   : > { %v1177_v52 = vadd.f32 %v2572_v5, %v1086_v31  ;;  %v3361_v19 = vsel %vm2452_vm2, 0, %v2902_v6  ;;  %v1127_v39 = vmul.f32 %v2506_v62, %v1110_v26  ;;  %v1152_v46 = vrot.slane %v1117_v51, 1  ;;  %479 = vst [vmem:[#allocation2 + $0xbc] sm:$0x1] %v478_v16 }
 0x116   : > { %467 = vst [vmem:[#allocation2 + $0x9c] sm:$0x1] %v3361_v19  ;;  %v1155_v5 = vrot.slane %v1119_v30, 1  ;;  %v1158_v33 = vrot.slane %v1121_v1, 1  ;;  %v3362_v42 = vsel %vm2452_vm2, 0, %v2913_v56  ;;  %v1161_v54 = vrot.slane %v1123_v44, 1  ;;  %1650 = vmatpush.bf16.msrb.mxu1 %v2156_v36 }
 0x117   : > { %470 = vst [vmem:[#allocation2 + $0xa4] sm:$0x1] %v3362_v42  ;;  %v1164_v31 = vrot.slane %v1125_v17, 1  ;;  %v1201_v50 = vunpack.c.l.bf16 %v2994_v58  ;;  %v1202_v48 = vunpack.c.l.bf16 %v3001_v3  ;;  %v1061_v6 = vld [vmem:[#allocation2 + $0x50] sm:$0xf]  ;;  %v3363_v62 = vsel %vm2452_vm2, 0, %v2925_v10 }
 0x118   : > { %v3021_v63 = vld [vmem:[#allocation2 + $0x50] sm:$0xf]  ;;  %473 = vst [vmem:[#allocation2 + $0xac] sm:$0x1] %v3363_v62  ;;  %v3364_v13 = vrot.slane %v2590_v29, 1  ;;  %v3365_v26 = vrot.slane %v2636_v12, 1  ;;  %v1208_v44 = vmul.f32 %v2747_v43, %v1199_v2  ;;  %v1070_v17 = vunpack.c.l.bf16 %v1061_v6 }
 0x119   : > { %v3366_v30 = vrot.slane %v2674_v59, 1  ;;  %v1390_v10 = vunpack.c.l.bf16 %v3021_v63  ;;  %v3040_v19 = vld [vmem:[#allocation2 + $0xb8] sm:$0xf]  ;;  %v3367_v29 = vsel %vm2452_vm2, 0, %v2940_v15  ;;  %v3368_v12 = vrot.slane %v2709_v61, 1  ;;  %v2155_v42 = vld [vmem:[%s3323_s5] sm:$0xff] }
 0x11a   : > { %v1153_v56 = vsel %vm1144_vm3, %v3364_v13, %v1152_v46  ;;  %v1156_v51 = vsel %vm1144_vm3, %v3365_v26, %v1155_v5  ;;  %476 = vst [vmem:[#allocation2 + $0xb4] sm:$0x1] %v3367_v29  ;;  %v3369_v46 = vrot.slane %v2844_v55, 1  ;;  %v1167_v15 = vrot.slane %v1127_v39, 1  ;;  %v1062_v6 = vld [vmem:[#allocation2 + $0x58] sm:$0xf]  ;;  %1651 = vmatpush.bf16.msrb.mxu1 %v2155_v42 }
 0x11b   : > { %v1159_v1 = vsel %vm1144_vm3, %v3366_v30, %v1158_v33  ;;  %v1162_v59 = vsel %vm1144_vm3, %v3368_v12, %v1161_v54  ;;  %v1200_v33 = vunpack.c.l.bf16 %v3040_v19  ;;  %v1079_v55 = vmul.f32 %v2541_v41, %v1070_v17  ;;  %v1063_v39 = vld [vmem:[#allocation2 + $0x60] sm:$0xf]  ;;  %485 = vst [vmem:[#allocation2 + $0xcc] sm:$0x1] %v484_v38  ;;  %v1227_v30 = vld [vmem:[#allocation2 + $0x108] sm:$0xf] }
 0x11c   : > { %v1165_v5 = vsel %vm1144_vm3, %v3369_v46, %v1164_v31  ;;  %v1181_v61 = vadd.f32 %v1159_v1, %v2920_v22  ;;  %v1182_v54 = vadd.f32 %v1162_v59, %v2929_v14  ;;  %v3063_v31 = vld [vmem:[#allocation2 + $0x58] sm:$0xf]  ;;  %v3370_v62 = vsel %vm2452_vm2, 0, %v2877_v32  ;;  %v1228_v25 = vld [vmem:[#allocation2 + $0x110] sm:$0xf] }
 0x11d   : > { %482 = vst [vmem:[#allocation2 + $0xc4] sm:$0x1] %v3370_v62  ;;  %v1183_v13 = vadd.f32 %v1165_v5, %v2931_v21  ;;  %v1210_v20 = vmul.f32 %v2747_v43, %v1201_v50  ;;  %v1235_v22 = vunpack.c.l.bf16 %v1226_v4  ;;  %v1071_v16 = vunpack.c.l.bf16 %v1062_v6  ;;  %v1255_v5 = vld [vmem:[#allocation2 + $0x94] sm:$0x1]  ;;  %v1260_v62 = vld [vmem:[#allocation2 + $0xbc] sm:$0x1] }
 0x11e   : > { %v1391_v14 = vunpack.c.l.bf16 %v3063_v31  ;;  %v1168_v32 = vsel %vm1144_vm3, %v1166_v8, %v1167_v15  ;;  %v1209_v21 = vmul.f32 %v2747_v43, %v1200_v33  ;;  %v1087_v36 = vadd.f32 %v1079_v55, %v2583_v23  ;;  %v1256_v15 = vld [vmem:[#allocation2 + $0x9c] sm:$0x1]  ;;  %v3371_v19 = vld [vmem:[#allocation9_spill] sm:$0xff]  ;;  %v2237_v31 = vld [vmem:[%s3321_s3 + $0x8] ss:$0 sm:$0xff] }
 0x11f   : > { %v1072_v4 = vunpack.c.l.bf16 %v1063_v39  ;;  %v1184_v26 = vadd.f32 %v1168_v32, %v2942_v47  ;;  %v1211_v24 = vmul.f32 %v2747_v43, %v1202_v48  ;;  %v1080_v38 = vmul.f32 %v2541_v41, %v1071_v16  ;;  %v3372_v58 = vld [vmem:[#allocation5_spill] sm:$0xff] }
 0x120   : > { %v1212_v49 = vadd.f32 %v2787_v18, %v1177_v52  ;;  %v1216_v8 = vadd.f32 %v1208_v44, %v1181_v61  ;;  %v1217_v1 = vadd.f32 %v1209_v21, %v1182_v54  ;;  %v1178_v17 = vadd.f32 %v2630_v7, %v1087_v36  ;;  %v1258_v54 = vld [vmem:[#allocation2 + $0xac] sm:$0x1] }
 0x121   : > { %v1081_v29 = vmul.f32 %v2541_v41, %v1072_v4  ;;  %v1218_v23 = vadd.f32 %v1210_v20, %v1183_v13  ;;  %v1219_v12 = vadd.f32 %v1211_v24, %v1184_v26  ;;  %v1088_v47 = vadd.f32 %v1080_v38, %v2665_v45  ;;  %v1257_v41 = vld [vmem:[#allocation2 + $0xa4] sm:$0x1]  ;;  %v1259_v6 = vld [vmem:[#allocation2 + $0xb4] sm:$0x1] }
 0x122   : > { %v1236_v59 = vunpack.c.l.bf16 %v1227_v30  ;;  %v1237_v46 = vunpack.c.l.bf16 %v1228_v25  ;;  %v1244_v43 = vmul.f32 %v2703_v60, %v1235_v22  ;;  %v1213_v18 = vadd.f32 %v2808_v57, %v1178_v17  ;;  %v1262_v20 = vld [vmem:[#allocation2 + $0xcc] sm:$0x1] }
 0x123   : > { %v1089_v55 = vadd.f32 %v1081_v29, %v2769_v53  ;;  %v1247_v52 = vadd.f32 %v2762_v0, %v1212_v49  ;;  %v3099_v7 = vadd.f32 %v2991_v27, %v1216_v8  ;;  %v1179_v44 = vadd.f32 %v1153_v56, %v1088_v47 }
 0x124   : > { %v1245_v42 = vmul.f32 %v2703_v60, %v1236_v59  ;;  %v1246_v45 = vmul.f32 %v2703_v60, %v1237_v46  ;;  %v3103_v61 = vadd.f32 %v1244_v43, %v1217_v1  ;;  %v1248_v53 = vadd.f32 %v2772_v35, %v1213_v18  ;;  %v1261_v57 = vld [vmem:[#allocation2 + $0xc4] sm:$0x1] }
 0x125   : > { %v1180_v13 = vadd.f32 %v1156_v51, %v1089_v55  ;;  %v1264_v0 = vunpack.c.l.bf16 %v1255_v5  ;;  %v1265_v22 = vunpack.c.l.bf16 %v1256_v15  ;;  %v1214_v27 = vadd.f32 %v2855_v40, %v1179_v44  ;;  %v3374_v43 = vld [vmem:[#allocation7_spill] sm:$0xff] }
 0x126   : > { %v1253_v16 = vadd.f32 %v1245_v42, %v1218_v23  ;;  %v1254_v56 = vadd.f32 %v1246_v45, %v1219_v12  ;;  %v1266_v39 = vunpack.c.l.bf16 %v1257_v41  ;;  %v1267_v60 = vunpack.c.l.bf16 %v1258_v54  ;;  %v3142_v45 = vld [vmem:[#allocation2 + $0x20] sm:$0xf]  ;;  %v3144_v54 = vld [vmem:[#allocation2 + $0x28] sm:$0xf] }
 0x127   : > { %v1215_v32 = vadd.f32 %v2872_v37, %v1180_v13  ;;  %v1268_v21 = vunpack.c.l.bf16 %v1259_v6  ;;  %v1269_v36 = vunpack.c.l.bf16 %v1260_v62  ;;  %v1249_v4 = vadd.f32 %v2790_v34, %v1214_v27 }
 0x128   : > { %v1270_v26 = vunpack.c.l.bf16 %v1261_v57  ;;  %v1271_v51 = vunpack.c.l.bf16 %v1262_v20  ;;  %v1274_v35 = vmul.f32 %v2650_v28, %v1264_v0  ;;  %v1276_v30 = vmul.f32 %v2650_v28, %v1265_v22  ;;  %v3147_v20 = vld [vmem:[#allocation2 + $0x30] sm:$0xf]  ;;  %v2235_v0 = vld [vmem:[%s3321_s3 + $0x6] ss:$0 sm:$0xff] }
 0x129   : > { %v1250_v24 = vadd.f32 %v2967_v11, %v1215_v32  ;;  %v1278_v40 = vmul.f32 %v2650_v28, %v1266_v39  ;;  %v1280_v25 = vmul.f32 %v2650_v28, %v1267_v60  ;;  %v1281_v37 = vmul.f32 %v2650_v28, %v1199_v2  ;;  %v3153_v60 = vld [vmem:[#allocation2 + $0x38] sm:$0xf] }
 0x12a   : > { %v1282_v38 = vmul.f32 %v2650_v28, %v1268_v21  ;;  %v1283_v34 = vmul.f32 %v2650_v28, %v1200_v33  ;;  %v1284_v49 = vmul.f32 %v2650_v28, %v1269_v36  ;;  %v1285_v11 = vmul.f32 %v2650_v28, %v1201_v50  ;;  %v3155_v21 = vld [vmem:[#allocation2 + $0x40] sm:$0xf] }
 0x12b   : > { %v1286_v8 = vmul.f32 %v2650_v28, %v1270_v26  ;;  %v1287_v9 = vmul.f32 %v2650_v28, %v1202_v48  ;;  %v1288_v2 = vmul.f32 %v2650_v28, %v1271_v51  ;;  %v1306_v1 = vrot.slane %v1274_v35, 1  ;;  %v3376_v48 = vld [vmem:[#allocation8_spill] sm:$0xff] }
 0x12c   : > { %v1309_v17 = vrot.slane %v1276_v30, 1  ;;  %v1312_v29 = vrot.slane %v1278_v40, 1  ;;  %v1314_v23 = vrot.slane %v3371_v19, 1  ;;  %v1315_v33 = vrot.slane %v1280_v25, 1  ;;  %v3378_v25 = vld [vmem:[#allocation3_spill] sm:$0xff] }
 0x12d   : > { %v1317_v12 = vrot.slane %v1281_v37, 1  ;;  %v1318_v47 = vrot.slane %v1282_v38, 1  ;;  %v1320_v59 = vrot.slane %v1283_v34, 1  ;;  %v3373_v46 = vrot.slane %v3372_v58, 1  ;;  %v3380_v34 = vld [vmem:[#allocation4_spill] sm:$0xff] }
 0x12e   : > { %v3375_v5 = vrot.slane %v3374_v43, 1  ;;  %v3377_v15 = vrot.slane %v3376_v48, 1  ;;  %v1321_v55 = vrot.slane %v1284_v49, 1  ;;  %v1316_v18 = vsel %vm1144_vm3, %v1314_v23, %v1315_v33  ;;  %v2236_v58 = vld [vmem:[%s3321_s3 + $0x7] ss:$0 sm:$0xff] }
 0x12f   : > { %v1307_v50 = vsel %vm1144_vm3, %v3373_v46, %v1306_v1  ;;  %v1319_v41 = vsel %vm1144_vm3, %v1317_v12, %v1318_v47  ;;  %v1323_v44 = vrot.slane %v1285_v11, 1  ;;  %v1324_v42 = vrot.slane %v1286_v8, 1  ;;  %v1383_v11 = vld [vmem:[#allocation2 + $0x60] sm:$0xf]  ;;  %v1384_v1 = vld [vmem:[#allocation2 + $0x68] sm:$0xf] }
 0x130   : > { %v1310_v3 = vsel %vm1144_vm3, %v3375_v5, %v1309_v17  ;;  %v1313_v28 = vsel %vm1144_vm3, %v3377_v15, %v1312_v29  ;;  %v1322_v6 = vsel %vm1144_vm3, %v1320_v59, %v1321_v55  ;;  %v1326_v62 = vrot.slane %v1287_v9, 1  ;;  %v1385_v17 = vld [vmem:[#allocation2 + $0x70] sm:$0xf]  ;;  %v1386_v29 = vld [vmem:[#allocation2 + $0x78] sm:$0xf] }
 0x131   : > { %v1327_v13 = vrot.slane %v1288_v2, 1  ;;  %v1337_v57 = vadd.f32 %v1307_v50, %v1247_v52  ;;  %v1325_v22 = vsel %vm1144_vm3, %v1323_v44, %v1324_v42  ;;  %v1338_v27 = vadd.f32 %v1310_v3, %v1248_v53  ;;  %v1387_v47 = vld [vmem:[#allocation2 + $0x80] sm:$0xf]  ;;  %v1388_v59 = vld [vmem:[#allocation2 + $0x88] sm:$0xf] }
 0x132   : > { %v1339_v39 = vadd.f32 %v1313_v28, %v1249_v4  ;;  %v1340_v32 = vadd.f32 %v1316_v18, %v1250_v24  ;;  %v1341_v26 = vadd.f32 %v1319_v41, %v3099_v7  ;;  %v1342_v52 = vadd.f32 %v1322_v6, %v3103_v61  ;;  %v3382_v61 = vld [vmem:[#allocation6_spill] sm:$0xff] }
 0x133   : > { %v1328_v36 = vsel %vm1144_vm3, %v1326_v62, %v1327_v13  ;;  %v1343_v51 = vadd.f32 %v1325_v22, %v1253_v16  ;;  %v1358_v30 = vunpack.c.l.bf16 %v3142_v45  ;;  %v1359_v40 = vunpack.c.l.bf16 %v3144_v54  ;;  %v1417_v22 = vld [vmem:[#allocation2 + $0x1c] sm:$0x1] }
 0x134   : > { %v1344_v35 = vadd.f32 %v1328_v36, %v1254_v56  ;;  %v1360_v53 = vunpack.c.l.bf16 %v3147_v20  ;;  %v1361_v4 = vunpack.c.l.bf16 %v3153_v60  ;;  %v1362_v24 = vunpack.c.l.bf16 %v3155_v21 }
 0x135   : > { %v3379_v37 = vunpack.c.l.bf16 %v3378_v25  ;;  %v3381_v49 = vunpack.c.l.bf16 %v3380_v34  ;;  %v3383_v16 = vunpack.c.l.bf16 %v3382_v61  ;;  %v1367_v8 = vmul.f32 %v2235_v0, %v1358_v30 }
 0x136   : > { %v1368_v9 = vmul.f32 %v2235_v0, %v1359_v40  ;;  %v1369_v2 = vmul.f32 %v2235_v0, %v1360_v53  ;;  %v1370_v19 = vmul.f32 %v2235_v0, %v1361_v4  ;;  %v1371_v23 = vmul.f32 %v2235_v0, %v1362_v24 }
 0x137   : > { %v1364_v38 = vmul.f32 %v2235_v0, %v3379_v37  ;;  %v1365_v7 = vmul.f32 %v2235_v0, %v3381_v49  ;;  %v1366_v56 = vmul.f32 %v2235_v0, %v3383_v16  ;;  %v1375_v50 = vadd.f32 %v1367_v8, %v1340_v32  ;;  %v1416_v0 = vld [vmem:[#allocation2 + $0x14] sm:$0x1]  ;;  %v1422_v49 = vld [vmem:[#allocation2 + $0x44] sm:$0x1] }
 0x138   : > { %v1376_v43 = vadd.f32 %v1368_v9, %v1341_v26  ;;  %v1377_v5 = vadd.f32 %v1369_v2, %v1342_v52  ;;  %v1378_v3 = vadd.f32 %v1370_v19, %v1343_v51  ;;  %v1379_v48 = vadd.f32 %v1371_v23, %v1344_v35  ;;  %v1418_v26 = vld [vmem:[#allocation2 + $0x24] sm:$0x1]  ;;  %v1419_v52 = vld [vmem:[#allocation2 + $0x2c] sm:$0x1]  ;;  %v1420_v51 = vld [vmem:[#allocation2 + $0x34] sm:$0x1] }
 0x139   : > { %v1372_v33 = vadd.f32 %v1364_v38, %v1337_v57  ;;  %v1373_v12 = vadd.f32 %v1365_v7, %v1338_v27  ;;  %v1374_v46 = vadd.f32 %v1366_v56, %v1339_v39  ;;  %v1392_v15 = vunpack.c.l.bf16 %v1383_v11  ;;  %v1415_v57 = vld [vmem:[#allocation2 + $0xc] sm:$0x1] }
 0x13a   : > { %v1393_v28 = vunpack.c.l.bf16 %v1384_v1  ;;  %v1394_v55 = vunpack.c.l.bf16 %v1385_v17  ;;  %v1395_v18 = vunpack.c.l.bf16 %v1386_v29  ;;  %v1396_v41 = vunpack.c.l.bf16 %v1387_v47 }
 0x13b   : > { %v1397_v44 = vunpack.c.l.bf16 %v1388_v59  ;;  %v1399_v42 = vmul.f32 %v2236_v58, %v1390_v10  ;;  %v1400_v6 = vmul.f32 %v2236_v58, %v1391_v14  ;;  %v1401_v62 = vmul.f32 %v2236_v58, %v1392_v15  ;;  %v1421_v10 = vld [vmem:[#allocation2 + $0x3c] sm:$0x1] }
 0x13c   : > { %v1402_v13 = vmul.f32 %v2236_v58, %v1393_v28  ;;  %v1403_v27 = vmul.f32 %v2236_v58, %v1394_v55  ;;  %v1404_v39 = vmul.f32 %v2236_v58, %v1395_v18  ;;  %v1405_v32 = vmul.f32 %v2236_v58, %v1396_v41 }
 0x13d   : > { %v1406_v36 = vmul.f32 %v2236_v58, %v1397_v44  ;;  %v1407_v35 = vadd.f32 %v1399_v42, %v1372_v33  ;;  %v1408_v37 = vadd.f32 %v1400_v6, %v1373_v12  ;;  %v1409_v38 = vadd.f32 %v1401_v62, %v1374_v46 }
 0x13e   : > { %v1410_v63 = vadd.f32 %v1402_v13, %v1375_v50  ;;  %v1411_v14 = vadd.f32 %v1403_v27, %v1376_v43  ;;  %v1412_v7 = vadd.f32 %v1404_v39, %v1377_v5  ;;  %v1413_v11 = vadd.f32 %v1405_v32, %v1378_v3 }
 0x13f   : > { %v1414_v16 = vadd.f32 %v1406_v36, %v1379_v48  ;;  %v1424_v56 = vunpack.c.l.bf16 %v1415_v57  ;;  %v1425_v8 = vunpack.c.l.bf16 %v1416_v0  ;;  %v1426_v9 = vunpack.c.l.bf16 %v1417_v22 }
 0x140   : > { %v1427_v2 = vunpack.c.l.bf16 %v1418_v26  ;;  %v1428_v1 = vunpack.c.l.bf16 %v1419_v52  ;;  %v1429_v17 = vunpack.c.l.bf16 %v1420_v51  ;;  %v1430_v29 = vunpack.c.l.bf16 %v1421_v10  ;;  %v2238_v52 = vld [vmem:[%s3322_s4] ss:$0 sm:$0xff] }
 0x141   : > { %v1431_v19 = vunpack.c.l.bf16 %v1422_v49  ;;  %v3384_v23 = vunpack.c.l.bf16 %v3378_v25  ;;  %v1434_v12 = vmul.f32 %v2237_v31, %v1424_v56  ;;  %v3385_v47 = vunpack.c.l.bf16 %v3380_v34 }
 0x142   : > { %v1436_v58 = vmul.f32 %v2237_v31, %v1425_v8  ;;  %v3386_v46 = vunpack.c.l.bf16 %v3382_v61  ;;  %v1438_v43 = vmul.f32 %v2237_v31, %v1426_v9  ;;  %v1439_v5 = vmul.f32 %v2237_v31, %v1358_v30 }
 0x143   : > { %v1433_v33 = vmul.f32 %v2237_v31, %v3384_v23  ;;  %v1435_v59 = vmul.f32 %v2237_v31, %v3385_v47  ;;  %v1440_v3 = vmul.f32 %v2237_v31, %v1427_v2  ;;  %v1441_v48 = vmul.f32 %v2237_v31, %v1359_v40 }
 0x144   : > { %v1437_v50 = vmul.f32 %v2237_v31, %v3386_v46  ;;  %v1442_v15 = vmul.f32 %v2237_v31, %v1428_v1  ;;  %v1443_v25 = vmul.f32 %v2237_v31, %v1360_v53  ;;  %v1444_v28 = vmul.f32 %v2237_v31, %v1429_v17 }
 0x145   : > { %v1445_v34 = vmul.f32 %v2237_v31, %v1361_v4  ;;  %v1446_v55 = vmul.f32 %v2237_v31, %v1430_v29  ;;  %v1447_v61 = vmul.f32 %v2237_v31, %v1362_v24  ;;  %v1448_v18 = vmul.f32 %v2237_v31, %v1431_v19 }
 0x146   : > { %v1465_v41 = vrot.slane %v1433_v33, 1  ;;  %v1466_v45 = vrot.slane %v1434_v12, 1  ;;  %v1468_v30 = vrot.slane %v1435_v59, 1  ;;  %v1469_v44 = vrot.slane %v1436_v58, 1 }
 0x147   : > { %v1471_v42 = vrot.slane %v1437_v50, 1  ;;  %v1472_v54 = vrot.slane %v1438_v43, 1  ;;  %v1474_v40 = vrot.slane %v1439_v5, 1  ;;  %v1475_v6 = vrot.slane %v1440_v3, 1 }
 0x148   : > { %v1467_v20 = vsel %vm1144_vm3, %v1465_v41, %v1466_v45  ;;  %v1470_v53 = vsel %vm1144_vm3, %v1468_v30, %v1469_v44  ;;  %v1477_v62 = vrot.slane %v1441_v48, 1  ;;  %v1478_v60 = vrot.slane %v1442_v15, 1 }
 0x149   : > { %v1473_v4 = vsel %vm1144_vm3, %v1471_v42, %v1472_v54  ;;  %v1476_v21 = vsel %vm1144_vm3, %v1474_v40, %v1475_v6  ;;  %v1480_v24 = vrot.slane %v1443_v25, 1  ;;  %v1481_v13 = vrot.slane %v1444_v28, 1  ;;  %v2170_v54 = vld [vmem:[%s3325_s7 + $0x38] sm:$0xff] }
 0x14a   : > { %v1479_v57 = vsel %vm1144_vm3, %v1477_v62, %v1478_v60  ;;  %v1483_v0 = vrot.slane %v1445_v34, 1  ;;  %v1484_v22 = vrot.slane %v1446_v55, 1  ;;  %v1486_v27 = vrot.slane %v1447_v61, 1  ;;  %1728 = vmatpush.bf16.msrb.mxu2 %v2170_v54 }
 0x14b   : > { %v1482_v39 = vsel %vm1144_vm3, %v1480_v24, %v1481_v13  ;;  %v1487_v32 = vrot.slane %v1448_v18, 1  ;;  %v1497_v36 = vadd.f32 %v1467_v20, %v1407_v35  ;;  %v1498_v26 = vadd.f32 %v1470_v53, %v1408_v37 }
 0x14c   : > { %v1485_v51 = vsel %vm1144_vm3, %v1483_v0, %v1484_v22  ;;  %v1499_v10 = vadd.f32 %v1473_v4, %v1409_v38  ;;  %v1500_v49 = vadd.f32 %v1476_v21, %v1410_v63  ;;  %v1501_v31 = vadd.f32 %v1479_v57, %v1411_v14  ;;  %v2169_v4 = vld [vmem:[%s3325_s7 + $0x30] sm:$0xff] }
 0x14d   : > { %v1488_v56 = vsel %vm1144_vm3, %v1486_v27, %v1487_v32  ;;  %v1502_v8 = vadd.f32 %v1482_v39, %v1412_v7  ;;  %v1503_v9 = vadd.f32 %v1485_v51, %v1413_v11  ;;  %v1509_v2 = vadd.f32 %v2238_v52, %v1497_v36  ;;  %v2168_v39 = vld [vmem:[%s3325_s7 + $0x28] sm:$0xff] }
 0x14e   : > { %v1504_v1 = vadd.f32 %v1488_v56, %v1414_v16  ;;  %v1510_v17 = vadd.f32 %v2238_v52, %v1498_v26  ;;  %v1511_v29 = vadd.f32 %v2238_v52, %v1499_v10  ;;  %v1512_v19 = vadd.f32 %v2238_v52, %v1500_v49  ;;  %1729 = vmatpush.bf16.msrb.mxu2 %v2169_v4  ;;  %v2167_v49 = vld [vmem:[%s3325_s7 + $0x20] sm:$0xff] }
 0x14f   : > { %v1513_v35 = vadd.f32 %v2238_v52, %v1501_v31  ;;  %v1514_v37 = vadd.f32 %v2238_v52, %v1502_v8  ;;  %v1515_v23 = vadd.f32 %v2238_v52, %v1503_v9  ;;  %v1517_v33 = vmul.f32 0.5, %v1509_v2 }
 0x150   : > { %v3218_v12 = vadd.f32 %v2238_v52, %v1504_v1  ;;  %v1518_v47 = vmul.f32 0.5, %v1510_v17  ;;  %v1519_v59 = vmul.f32 0.5, %v1511_v29  ;;  %v1520_v38 = vmul.f32 0.5, %v1512_v19 }
 0x151   : > { %v1521_v63 = vmul.f32 0.5, %v1513_v35  ;;  %2304 = vtanh.f32 %v1517_v33  ;;  %v1522_v14 = vmul.f32 0.5, %v1514_v37  ;;  %v1523_v7 = vmul.f32 0.5, %v1515_v23 }
 0x152   : > { %2306 = vtanh.f32 %v1518_v47  ;;  %v1524_v11 = vmul.f32 0.5, %v3218_v12  ;;  %v2335_v18 = vmov 64.0   ;;  %1730 = vmatpush.bf16.msrb.mxu2 %v2168_v39 }
 0x153   : > { %2308 = vtanh.f32 %v1519_v59 }
 0x154   : > { %2310 = vtanh.f32 %v1520_v38 }
 0x155   : > { %2312 = vtanh.f32 %v1521_v63  ;;  %v2164_v63 = vld [vmem:[%s3325_s7 + $0x8] sm:$0xff] }
 0x156   : > { %2314 = vtanh.f32 %v1522_v14  ;;  %1731 = vmatpush.bf16.msrb.mxu2 %v2167_v49  ;;  %v2163_v14 = vld [vmem:[%s3325_s7] sm:$0xff] }
 0x157   : > { %v2305_v16 = vpop.eup %2304  ;;  %2316 = vtanh.f32 %v1523_v7  ;;  %v2178_v7 = vld [vmem:[%s3327_s9 + $0x38] sm:$0xff] }
 0x158   : > { %v2307_v58 = vpop.eup %2306  ;;  %2318 = vtanh.f32 %v1524_v11  ;;  %v1533_v46 = vadd.f32 1.0, %v2305_v16  ;;  %1826 = vmatpush.bf16.msra.mxu3 %v2178_v7  ;;  %v2177_v11 = vld [vmem:[%s3327_s9 + $0x30] sm:$0xff]  ;;  %v2176_v16 = vld [vmem:[%s3327_s9 + $0x28] sm:$0xff] }
 0x159   : > { %v2309_v50 = vpop.eup %2308  ;;  %v1534_v43 = vadd.f32 1.0, %v2307_v58  ;;  %2320 = vrcp.f32 %v2335_v18  ;;  %v1595_v58 = vld [vmem:[%s3324_s6] sm:$0x1]  ;;  %v2172_v18 = vld [vmem:[%s3327_s9 + $0x8] sm:$0xff] }
 0x15a   : > { %v2311_v5 = vpop.eup %2310  ;;  %v1535_v3 = vadd.f32 1.0, %v2309_v50  ;;  %v1541_v48 = vmul.f32 0.5, %v1533_v46 }
 0x15b   : > { %v2313_v15 = vpop.eup %2312  ;;  %v1536_v25 = vadd.f32 1.0, %v2311_v5  ;;  %v1542_v28 = vmul.f32 0.5, %v1534_v43 }
 0x15c   : > { %v2315_v34 = vpop.eup %2314  ;;  %v1537_v55 = vadd.f32 1.0, %v2313_v15  ;;  %v1543_v61 = vmul.f32 0.5, %v1535_v3  ;;  %v3221_v44 = vmul.f32 %v1541_v48, %v1509_v2  ;;  %v2166_v2 = vld [vmem:[%s3325_s7 + $0x18] sm:$0xff]  ;;  %1827 = vmatpush.bf16.msra.mxu3 %v2177_v11 }
 0x15d   : > { %v2317_v41 = vpop.eup %2316  ;;  %v1538_v45 = vadd.f32 1.0, %v2315_v34  ;;  %v1544_v30 = vmul.f32 0.5, %v1536_v25  ;;  %v3223_v42 = vmul.f32 %v1542_v28, %v1510_v17  ;;  %1732 = vmatpush.bf16.msrb.mxu2 %v2166_v2  ;;  %v2175_v34 = vld [vmem:[%s3327_s9 + $0x20] sm:$0xff] }
 0x15e   : > { %v2319_v40 = vpop.eup %2318  ;;  %v3228_v6 = vmul.f32 %v1543_v61, %v1511_v29  ;;  %v1539_v20 = vadd.f32 1.0, %v2317_v41  ;;  %v1545_v53 = vmul.f32 0.5, %v1537_v55  ;;  %v2174_v55 = vld [vmem:[%s3327_s9 + $0x18] sm:$0xff]  ;;  %v2173_v61 = vld [vmem:[%s3327_s9 + $0x10] sm:$0xff]  ;;  %v1679_v41 = vld [vmem:[%s3326_s8] sm:$0x1] }
 0x15f   : > { %v3230_v62 = vmul.f32 %v1544_v30, %v1512_v19  ;;  %v1557_v60 = vadd.f32 %v3223_v42, %v3221_v44  ;;  %v1540_v21 = vadd.f32 1.0, %v2319_v40  ;;  %v1546_v24 = vmul.f32 0.5, %v1538_v45  ;;  %v2321_v57 = vpop.eup %2320  ;;  %v2165_v19 = vld [vmem:[%s3325_s7 + $0x10] sm:$0xff]  ;;  %v2171_v45 = vld [vmem:[%s3327_s9] sm:$0xff] }
 0x160   : > { %v1547_v0 = vmul.f32 0.5, %v1539_v20  ;;  %v3238_v22 = vmul.f32 %v1545_v53, %v1513_v35  ;;  %v1571_v52 = vmul.f32 64.0, %v2321_v57  ;;  %vm1575_vm4 = vweird.f32 %v2321_v57  ;;  %1828 = vmatpush.bf16.msra.mxu3 %v2176_v16 }
 0x161   : > { %v1558_v13 = vadd.f32 %v1557_v60, %v3228_v6  ;;  %v1548_v32 = vmul.f32 0.5, %v1540_v21  ;;  %v3244_v36 = vmul.f32 %v1546_v24, %v1514_v37  ;;  %1733 = vmatpush.bf16.msrb.mxu2 %v2165_v19 }
 0x162   : > { %v3247_v51 = vmul.f32 %v1547_v0, %v1515_v23  ;;  %v1572_v8 = vsub.f32 1.0, %v1571_v52 }
 0x163   : > { %v1559_v27 = vadd.f32 %v1558_v13, %v3230_v62  ;;  %v3254_v31 = vmul.f32 %v1548_v32, %v3218_v12 }
 0x164   : > { %v1573_v17 = vmul.f32 %v2321_v57, %v1572_v8  ;;  %1829 = vmatpush.bf16.msra.mxu3 %v2175_v34 }
 0x165   : > { %v1560_v26 = vadd.f32 %v1559_v27, %v3238_v22  ;;  %1734 = vmatpush.bf16.msrb.mxu2 %v2164_v63 }
 0x166   : > { %v1574_v37 = vadd.f32 %v2321_v57, %v1573_v17 }
 0x167   : > { %v1561_v10 = vadd.f32 %v1560_v26, %v3244_v36 }
 0x168   : > { %v1576_v12 = vsel %vm1575_vm4, %v2321_v57, %v1574_v37  ;;  %1830 = vmatpush.bf16.msra.mxu3 %v2174_v55 }
 0x169   : > { %v1562_v56 = vadd.f32 %v1561_v10, %v3247_v51  ;;  %1735 = vmatpush.bf16.msrb.mxu2 %v2163_v14 }
 0x16b   : > { %v1563_v9 = vadd.f32 %v1562_v56, %v3254_v31 }
 0x16c   : > { %1831 = vmatpush.bf16.msra.mxu3 %v2173_v61 }
 0x16d   : > { %v1564_v1 = vrot.slane %v1563_v9, 4 }
 0x16f   : > { %v1565_v29 = vadd.f32 %v1564_v1, %v1563_v9 }
 0x170   : > { %1832 = vmatpush.bf16.msra.mxu3 %v2172_v18 }
 0x171   : > { %v1566_v35 = vrot.slane %v1565_v29, 2 }
 0x173   : > { %v1567_v23 = vadd.f32 %v1566_v35, %v1565_v29 }
 0x174   : > { %1833 = vmatpush.bf16.msra.mxu3 %v2171_v45 }
 0x175   : > { %v1568_v33 = vrot.slane %v1567_v23, 1 }
 0x177   : > { %v1569_v47 = vadd.f32 %v1568_v33, %v1567_v23 }
 0x179   : > { %v1577_v59 = vmul.f32 %v1576_v12, %v1569_v47 }
 0x17b   : > { %v1578_v38 = vpack.c.bf16 %v1577_v59, %v1577_v59 }
 0x17d   : > { %1652 = vmatmul.bf16.vlgmr.msrb.gmra.mxu1 %v1578_v38 }
 0x1fa   : > { %v1653_v46 = vpop.f32.mrf.mxu1 }
 0x1fb   : > { %v1654_v50 = vadd.f32 %v1653_v46, %v1595_v58 }
 0x1fd   : > { %v1657_v43 = vmul.f32 0.5, %v1654_v50 }
 0x1ff   : > { %2322 = vtanh.f32 %v1657_v43 }
 0x202   : > { %v1655_v5 = vpop.f32.mrf.mxu1 }
 0x205   : > { %v2323_v3 = vpop.eup %2322 }
 0x206   : > { %v1659_v48 = vadd.f32 1.0, %v2323_v3 }
 0x208   : > { %v1660_v15 = vmul.f32 0.5, %v1659_v48 }
 0x20a   : > { %v1661_v25 = vmul.f32 %v1660_v15, %v1654_v50 }
 0x20c   : > { %v1662_v28 = vpack.c.bf16 %v1661_v25, %v1661_v25 }
 0x20e   : > { %1736 = vmatmul.bf16.vlgmr.msrb.gmra.mxu2 %v1662_v28 }
 0x291   : > { %v1737_v30 = vpop.f32.mrf.mxu2 }
 0x292   : > { %v1738_v54 = vadd.f32 %v1737_v30, %v1679_v41 }
 0x294   : > { %v1741_v40 = vmul.f32 0.5, %v1738_v54 }
 0x296   : > { %2324 = vtanh.f32 %v1741_v40 }
 0x299   : > { %v1739_v20 = vpop.f32.mrf.mxu2 }
 0x29c   : > { %v2325_v53 = vpop.eup %2324 }
 0x29d   : > { %v1743_v60 = vadd.f32 1.0, %v2325_v53 }
 0x29f   : > { %v1744_v4 = vmul.f32 0.5, %v1743_v60 }
 0x2a1   : > { %v1745_v21 = vperm.slane %v1744_v4, 0 }
 0x2a3   : > { %v1746_v24 = vmul.f32 %v1745_v21, %v3221_v44  ;;  %v1747_v13 = vmul.f32 %v1745_v21, %v3223_v42  ;;  %v1748_v0 = vmul.f32 %v1745_v21, %v3228_v6  ;;  %v1749_v27 = vmul.f32 %v1745_v21, %v3230_v62  ;;  %v2239_v6 = vld [vmem:[%s3328_s10] ss:$0 sm:$0xff] }
 0x2a4   : > { %v1750_v32 = vmul.f32 %v1745_v21, %v3238_v22  ;;  %v1751_v26 = vmul.f32 %v1745_v21, %v3244_v36  ;;  %v1752_v10 = vmul.f32 %v1745_v21, %v3247_v51  ;;  %v1753_v44 = vmul.f32 %v1745_v21, %v3254_v31 }
 0x2a5   : > { %v1754_v57 = vpack.c.bf16 %v1747_v13, %v1746_v24  ;;  %v1755_v39 = vpack.c.bf16 %v1749_v27, %v1748_v0 }
 0x2a6   : > { %v1756_v52 = vpack.c.bf16 %v1751_v26, %v1750_v32  ;;  %v1757_v42 = vpack.c.bf16 %v1753_v44, %v1752_v10 }
 0x2a7   : > { %1834 = vmatmul.bf16.vlgmr.msra.gmra.mxu3 %v1754_v57 }
 0x2b7   : > { %1839 = vmatmul.bf16.gmra.mxu3 %v1755_v39 }
 0x2c7   : > { %1844 = vmatmul.bf16.gmra.mxu3 %v1756_v52 }
 0x2d7   : > { %1849 = vmatmul.bf16.gmra.mxu3 %v1757_v42 }
 0x32a   : > { %v1835_v49 = vpop.f32.mrf.mxu3 }
 0x32b   : > { %v1836_v56 = vadd.f32 %v2239_v6, %v1835_v49 }
 0x332   : > { %v1837_v62 = vpop.f32.mrf.mxu3 }
 0x333   : > { %v1838_v8 = vadd.f32 %v2239_v6, %v1837_v62 }
 0x335   : > { %v2182_v22 = vpack.c.bf16 %v1838_v8, %v1836_v56 }
 0x337   : > { %2183 = vst [vmem:[%s386_s14] sm:$0xff] %v2182_v22  }
 0x33a   : > { %v1840_v36 = vpop.f32.mrf.mxu3 }
 0x33b   : > { %v1841_v31 = vadd.f32 %v2239_v6, %v1840_v36 }
 0x342   : > { %v1842_v51 = vpop.f32.mrf.mxu3 }
 0x343   : > { %v1843_v9 = vadd.f32 %v2239_v6, %v1842_v51 }
 0x345   : > { %v2187_v2 = vpack.c.bf16 %v1843_v9, %v1841_v31 }
 0x347   : > { %2199 = vst [vmem:[%s386_s14 + $0x8] sm:$0xff] %v2187_v2  }
 0x34a   : > { %v1845_v1 = vpop.f32.mrf.mxu3 }
 0x34b   : > { %v1846_v29 = vadd.f32 %v2239_v6, %v1845_v1 }
 0x352   : > { %v1847_v17 = vpop.f32.mrf.mxu3 }
 0x353   : > { %v1848_v19 = vadd.f32 %v2239_v6, %v1847_v17 }
 0x355   : > { %v2192_v35 = vpack.c.bf16 %v1848_v19, %v1846_v29 }
 0x357   : > { %2200 = vst [vmem:[%s386_s14 + $0x10] sm:$0xff] %v2192_v35  }
 0x35a   : > { %v1850_v37 = vpop.f32.mrf.mxu3 }
 0x35b   : > { %v1851_v33 = vadd.f32 %v2239_v6, %v1850_v37 }
 0x362   : > { %v1852_v23 = vpop.f32.mrf.mxu3 }
 0x363   : > { %v1853_v12 = vadd.f32 %v2239_v6, %v1852_v23 }
 0x365   : > { %v2197_v47 = vpack.c.bf16 %v1853_v12, %v1851_v33 }
 0x367   : > { %2201 = vst [vmem:[%s386_s14 + $0x18] sm:$0xff] %v2197_v47  }
 0x368 PF: > { %s21_s17 = sadd.s32 1, %s2332_s17  }
 0x369   : > { %p18_p4 = scmp.ge.s32.totalorder %s21_s17, 4  }
 0x36b   :  { %20 = sbr.rel (!%p18_p4) target bundleno = 1 (0x1), region = 100 }

// kernel: efficientdet_v1_forward.7
= control target key start
LH: loop header
LB: loop body
LE: loop exit
PB: predicated region body
PF: predicated region fallthrough
CT: control target
= control target key end

     0   :  { %18 = vsyncpa [#allocation4], 0  ;;  %s3476_s0 = inlined_call_operand.vmem [shape: bf16[2,8,8,128], index: 0, kind: input, shape index: {}]   ;;  %s3477_s1 = inlined_call_operand.vmem [shape: bf16[128,128], index: 1, kind: input, shape index: {}]   ;;  %s3478_s2 = inlined_call_operand.vmem [shape: f32[1,128], index: 2, kind: input, shape index: {}]   ;;  %s3479_s3 = inlined_call_operand.vmem [shape: f32[9,128], index: 3, kind: input, shape index: {}]   ;;  %s3480_s4 = inlined_call_operand.vmem [shape: f32[1,128], index: 4, kind: input, shape index: {}]   ;;  %s3481_s5 = inlined_call_operand.vmem [shape: bf16[128,128], index: 5, kind: input, shape index: {}]   ;;  %s3482_s6 = inlined_call_operand.vmem [shape: f32[1,128], index: 6, kind: input, shape index: {}]   ;;  %s3483_s7 = inlined_call_operand.vmem [shape: bf16[128,128], index: 7, kind: input, shape index: {}]   ;;  %s3484_s8 = inlined_call_operand.vmem [shape: f32[1,128], index: 8, kind: input, shape index: {}]   ;;  %s3485_s9 = inlined_call_operand.vmem [shape: bf16[128,128], index: 9, kind: input, shape index: {}]   ;;  %s3486_s10 = inlined_call_operand.vmem [shape: f32[1,128], index: 10, kind: input, shape index: {}]   ;;  %s3487_s11 = inlined_call_operand.vmem [shape: bf16[128,128], index: 11, kind: input, shape index: {}]   ;;  %s3488_s12 = inlined_call_operand.vmem [shape: f32[1,128], index: 12, kind: input, shape index: {}]   ;;  %s3489_s13 = inlined_call_operand.hbm [shape: f32[2,8,8,64], index: 13, kind: output, shape index: {}]  }
   0x1   :  { %20 = vsyncpa [#allocation4 + $0x1], 0  ;;  %s2583_s25 = smov 0   ;;  %s2585_s26 = smov 0  }
   0x2   :  { %s2587_s27 = smov 0   ;;  %s2589_s28 = smov 0  }
   0x3 LB: > { %3493 = sst [smem:[#allocation6_spill]] %s2503_s27  ;;  %s2604_s29 = sadd.s32 4294967295, %s2507_s28   ;;  %s2507_s28 = sphi %s2589_s28, %s3505_s28   ;;  %s2503_s27 = sphi %s2587_s27, %s3507_s27   ;;  %s2499_s26 = sphi %s2585_s26, %s3509_s26   ;;  %s2495_s25 = sphi %s2583_s25, %s3508_s25  }
   0x4   : > { %s2066_s30 = sadd.s32 4294967294, %s2507_s28   ;;  %s2608_s14 = sadd.s32 1, %s2507_s28  }
   0x5   : > { %3494 = sst [smem:[#allocation7_spill]] %s2608_s14  ;;  %s311_s15 = sadd.s32 1, %s2503_s27 }
   0x6   : > { %s308_s16 = ssub.s32 %s2507_s28, %s2608_s14  ;;  %p321_p0 = scmp.ne.s32.totalorder %s2503_s27, %s2499_s26 }
   0x7   : > { %p309_p1 = scmp.eq.s32.totalorder %s308_s16, 0  ;;  %p322_p2 = scmp.eq.s32.totalorder %s2604_s29, 1 }
   0x8   : > { %p327_p3 = scmp.ne.s32.totalorder %s2499_s26, %s2495_s25  ;;  %p328_p4 = scmp.eq.s32.totalorder %s2066_s30, 1 }
   0x9   : > { %s2619_s17 = scalar_select %p309_p1, %s2503_s27, %s311_s15  }
   0xa   : > { %p2621_p5 = por %p322_p2, %p321_p0  ;;  %p2625_p6 = por %p328_p4, %p327_p3 }
   0xb   : > { %3495 = sst [smem:[#allocation8_spill]] %s2619_s17  ;;  %p2069_p7 = scmp.ge.s32.totalorder %s2507_s28, 1 }
   0xc   : > { %p390_p8 = scmp.lt.s32.totalorder %s2507_s28, 3 }
   0xe   : > { %p391_p9 = pnand %p2069_p7, %p390_p8 }
   0xf   : > { %p434_p10 = scmp.lt.s32.totalorder (!%p391_p9), %s2604_s29, 1  ;;  %s2299_s15 = sshll.u32 (!%p391_p9), %s2604_s29, 6 }
  0x10   : > { %394 = sbr.rel (%p391_p9) target bundleno = 1024 (0x400), region = 72  ;;  %s2000_s21 = scalar_lea.hbm (!%p391_p9), %s3489_s13, %s2299_s15 }
  0x11   : > { %s2003_s17 = sshll.u32 (!%p391_p9), %s2000_s21, 4  ;;  %s2465_s16 = scalar_lea.hbm (!%p391_p9), %s3489_s13, 128  ;;  %s2004_s17 = int_to_ptr.hbm [resolvable:$true] %s2003_s17 }
  0x12   : > { %s2459_s22 = sshra.s32 (!%p391_p9), %s2004_s17, 4  ;;  %s2460_s22 = int_to_ptr.hbm [resolvable:$true] %s2459_s22 }
  0x13   : > { %p2466_p0 = scmp.lt.s32.totalorder (!%p391_p9), %s2460_s22, %s3489_s13 }
  0x15   : > { %v2266_v0 = vld [vmem:[%s3477_s1 + $0x38] sm:$0xff]  ;;  %v2265_v1 = vld [vmem:[%s3477_s1 + $0x30] sm:$0xff]  ;;  %v2264_v2 = vld [vmem:[%s3477_s1 + $0x28] sm:$0xff]  ;;  %s435_s23 = scalar_select %p434_p10, %s2604_s29, 1  ;;  %vm447_vm0 = vcmask 1043459   ;;  %v2509_v15 = vmov 0  }
  0x16   : > { %613 = vmatpush.bf16.msra.mxu0 %v2266_v0  ;;  %v2263_v3 = vld [vmem:[%s3477_s1 + $0x20] sm:$0xff]  ;;  %v2262_v4 = vld [vmem:[%s3477_s1 + $0x18] sm:$0xff]  ;;  %v2261_v5 = vld [vmem:[%s3477_s1 + $0x10] sm:$0xff]  ;;  %vm448_vm1 = vsmask.f32 7950  ;;  %vm480_vm3 = vcmask 1040384  }
  0x17   : > { %v2260_v6 = vld [vmem:[%s3477_s1 + $0x8] sm:$0xff]  ;;  %s2254_s27 = sshll.u32 %s435_s23, 5  ;;  %v2259_v7 = vld [vmem:[%s3477_s1] sm:$0xff]  ;;  %vm2664_vm2 = vmand %vm447_vm0, %vm448_vm1  ;;  %440 = vst [vmem:[#allocation2] sm:$0xf] %v2509_v15  ;;  %vm865_vm6 = vcmask 1045504  }
  0x18   : > { %s2660_s14 = scalar_lea.vmem %s3476_s0, %s2254_s27  ;;  %v453_v10 = vld [vmem:[#allocation2 + $0xc] sm:$0x8]  ;;  %441 = vst [vmem:[#allocation2 + $0x4] sm:$0xf] %v2509_v15  ;;  %vm481_vm4 = vsmask.f32 256 }
  0x19   : > { %v2255_v8 = vld [vmem:[%s2660_s14] sm:$0xff]  ;;  %v2256_v9 = vld [vmem:[%s2660_s14 + $0x8] sm:$0xff]  ;;  %v454_v12 = vsel %vm2664_vm2, 0, %v453_v10  ;;  %v2257_v13 = vld [vmem:[%s2660_s14 + $0x10] sm:$0xff]  ;;  %442 = vst [vmem:[#allocation2 + $0x8] sm:$0xf] %v2509_v15 }
  0x1a   : > { %614 = vmatpush.bf16.msra.mxu0 %v2265_v1  ;;  %455 = vst [vmem:[#allocation2 + $0xc] sm:$0x8] %v454_v12  ;;  %v2258_v14 = vld [vmem:[%s2660_s14 + $0x18] sm:$0xff]  ;;  %vm2673_vm5 = vmand %vm480_vm3, %vm481_vm4  ;;  %v486_v21 = vld [vmem:[#allocation2 + $0x14] sm:$0x1]  ;;  %vm1979_vm8 = vcmask 523264  }
  0x1b   : > { %444 = vst [vmem:[#allocation2 + $0x6c] sm:$0xf] %v2509_v15  ;;  %v487_v22 = vsel %vm2673_vm5, 0, %v486_v21  ;;  %v456_v23 = vld [vmem:[#allocation2 + $0x18] sm:$0x8]  ;;  %s2461_s23 = scalar_lea.hbm %s2460_s22, 64 }
  0x1c   : > { %445 = vst [vmem:[#allocation2 + $0x70] sm:$0xf] %v2509_v15  ;;  %v457_v24 = vsel %vm2664_vm2, 0, %v456_v23  ;;  %v489_v25 = vld [vmem:[#allocation2 + $0x20] sm:$0x1]  ;;  %p2462_p11 = scmp.ne.s32.totalorder %s2460_s22, %s2461_s23  ;;  %p2467_p1 = scmp.lt.s32.totalorder %s2465_s16, %s2461_s23 }
  0x1d   : > { %446 = vst [vmem:[#allocation2 + $0x74] sm:$0xf] %v2509_v15  ;;  %v2688_v26 = vld [vmem:[%s3478_s2] ss:$0 sm:$0xff]  ;;  %v490_v27 = vsel %vm2673_vm5, 0, %v489_v25 }
  0x1e   : > { %615 = vmatpush.bf16.msra.mxu0 %v2264_v2  ;;  %v450_v17 = vld [vmem:[#allocation2] sm:$0x8]  ;;  %488 = vst [vmem:[#allocation2 + $0x14] sm:$0x1] %v487_v22  ;;  %v459_v30 = vld [vmem:[#allocation2 + $0x24] sm:$0x8]  ;;  %p2463_p12 = pnand %p2462_p11, %p2621_p5  ;;  %p2468_p2 = por %p2467_p1, %p2466_p0 }
  0x1f   : > { %v451_v18 = vsel %vm2664_vm2, 0, %v450_v17  ;;  %458 = vst [vmem:[#allocation2 + $0x18] sm:$0x8] %v457_v24  ;;  %v460_v32 = vsel %vm2664_vm2, 0, %v459_v30  ;;  %v492_v33 = vld [vmem:[#allocation2 + $0x2c] sm:$0x1] }
  0x20   : > { %v483_v19 = vld [vmem:[#allocation2 + $0x8] sm:$0x1]  ;;  %452 = vst [vmem:[#allocation2] sm:$0x8] %v451_v18  ;;  %v493_v34 = vsel %vm2673_vm5, 0, %v492_v33  ;;  %p2464_p13 = pneg %p2463_p12 }
  0x21   : > { %v484_v20 = vsel %vm2673_vm5, 0, %v483_v19  ;;  %491 = vst [vmem:[#allocation2 + $0x20] sm:$0x1] %v490_v27  ;;  %v700_v36 = vld [vmem:[#allocation2 + $0x4] sm:$0xf] }
  0x22   : > { %616 = vmatpush.bf16.msra.mxu0 %v2263_v3  ;;  %485 = vst [vmem:[#allocation2 + $0x8] sm:$0x1] %v484_v20  ;;  %v2701_v38 = vld [vmem:[%s3479_s3 + $0x1] ss:$0 sm:$0xff]  ;;  %v462_v39 = vld [vmem:[#allocation2 + $0x30] sm:$0x8]  ;;  %v717_v44 = vunpack.c.l.bf16 %v700_v36  ;;  %p2469_p3 = pnand %p2468_p2, %p2464_p13 }
  0x23   : > { %461 = vst [vmem:[#allocation2 + $0x24] sm:$0x8] %v460_v32  ;;  %v463_v42 = vsel %vm2664_vm2, 0, %v462_v39  ;;  %v495_v47 = vld [vmem:[#allocation2 + $0x38] sm:$0x1] }
  0x24   : > { %494 = vst [vmem:[#allocation2 + $0x2c] sm:$0x1] %v493_v34  ;;  %v496_v48 = vsel %vm2673_vm5, 0, %v495_v47  ;;  %v2710_v51 = vld [vmem:[%s3479_s3 + $0x2] ss:$0 sm:$0xff]  ;;  %v767_v55 = vmul.f32 %v2701_v38, %v717_v44 }
  0x25   : > { %464 = vst [vmem:[#allocation2 + $0x30] sm:$0x8] %v463_v42  ;;  %v816_v49 = vld [vmem:[#allocation2 + $0x14] sm:$0x1]  ;;  %v2715_v53 = vld [vmem:[%s3479_s3] ss:$0 sm:$0xff]  ;;  %v833_v63 = vmul.f32 %v2710_v51, %v717_v44 }
  0x26   : > { %617 = vmatpush.bf16.msra.mxu0 %v2262_v4  ;;  %497 = vst [vmem:[#allocation2 + $0x38] sm:$0x1] %v496_v48  ;;  %v825_v58 = vunpack.c.l.bf16 %v816_v49  ;;  %v701_v61 = vld [vmem:[#allocation2 + $0xc] sm:$0x8]  ;;  %v465_v62 = vld [vmem:[#allocation2 + $0x3c] sm:$0x8]  ;;  %v734_v15 = vmul.f32 %v2715_v53, %v717_v44 }
  0x27   : > { %v699_v43 = vld [vmem:[#allocation2] sm:$0x8]  ;;  %v466_v3 = vsel %vm2664_vm2, 0, %v465_v62  ;;  %v718_v10 = vunpack.c.l.bf16 %v701_v61  ;;  %v866_v17 = vrot.slane %v833_v63, 2  ;;  %v703_v23 = vld [vmem:[#allocation2 + $0x18] sm:$0x8] }
  0x28   : > { %v716_v54 = vunpack.c.l.bf16 %v699_v43  ;;  %467 = vst [vmem:[#allocation2 + $0x3c] sm:$0x8] %v466_v3  ;;  %v2736_v21 = vld [vmem:[%s3479_s3 + $0x3] ss:$0 sm:$0xff]  ;;  %v924_v32 = vld [vmem:[#allocation2 + $0x18] sm:$0x8] }
  0x29   : > { %v815_v45 = vld [vmem:[#allocation2 + $0x8] sm:$0x1]  ;;  %v1038_v33 = vld [vmem:[#allocation2 + $0x14] sm:$0x1]  ;;  %v2749_v44 = vld [vmem:[%s3479_s3 + $0x5] ss:$0 sm:$0xff] }
  0x2a   : > { %618 = vmatpush.bf16.msra.mxu0 %v2261_v5  ;;  %v824_v52 = vunpack.c.l.bf16 %v815_v45  ;;  %v733_v4 = vmul.f32 %v2715_v53, %v716_v54  ;;  %v783_v5 = vrot.slane %v767_v55, 1  ;;  %v720_v45 = vunpack.c.l.bf16 %v703_v23  ;;  %v1039_v49 = vld [vmem:[#allocation2 + $0x20] sm:$0x1]  ;;  %v501_v54 = vld [vmem:[#allocation2 + $0x50] sm:$0x1] }
  0x2b   : > { %v818_v20 = vld [vmem:[#allocation2 + $0x2c] sm:$0x1]  ;;  %v1047_v61 = vunpack.c.l.bf16 %v1038_v33 }
  0x2c   : > { %v834_v0 = vmul.f32 %v2710_v51, %v824_v52  ;;  %v799_v19 = vadd.f32 %v783_v5, %v733_v4  ;;  %v800_v36 = vadd.f32 %v783_v5, %v734_v15  ;;  %v707_v4 = vld [vmem:[#allocation2 + $0x30] sm:$0x8] }
  0x2d   : > { %v819_v39 = vld [vmem:[#allocation2 + $0x38] sm:$0x1]  ;;  %v724_v23 = vunpack.c.l.bf16 %v707_v4 }
  0x2e   : > { %619 = vmatpush.bf16.msra.mxu0 %v2260_v6  ;;  %v922_v6 = vld [vmem:[#allocation2 + $0xc] sm:$0x8]  ;;  %v867_v18 = vrot.slane %v834_v0, 2  ;;  %v906_v48 = vadd.f32 %v866_v17, %v799_v19  ;;  %v828_v63 = vunpack.c.l.bf16 %v819_v39 }
  0x2f   : > { %v709_v33 = vld [vmem:[#allocation2 + $0x3c] sm:$0x8] }
  0x30   : > { %v726_v4 = vunpack.c.l.bf16 %v709_v33 }
  0x32   : > { %620 = vmatpush.bf16.msra.mxu0 %v2259_v7 }
  0x35   : > { %621 = vmatmul.bf16.vlgmr.msra.gmra.mxu0 %v2255_v8  ;;  %v498_v8 = vld [vmem:[#allocation2 + $0x44] sm:$0x1] }
  0x36   : > { %v499_v12 = vsel %vm2673_vm5, 0, %v498_v8 }
  0x37   : > { %500 = vst [vmem:[#allocation2 + $0x44] sm:$0x1] %v499_v12 }
  0x45   : > { %626 = vmatmul.bf16.gmra.mxu0 %v2256_v9  ;;  %v2728_v9 = vmul.f32 %v2710_v51, %v825_v58  ;;  %v502_v58 = vsel %vm2673_vm5, 0, %v501_v54  ;;  %v2807_v54 = vmul.f32 %v2715_v53, %v724_v23 }
  0x46   : > { %503 = vst [vmem:[#allocation2 + $0x50] sm:$0x1] %v502_v58 }
  0x47   : > { %v870_v27 = vrot.slane %v2728_v9, 2 }
  0x55   : > { %631 = vmatmul.bf16.gmra.mxu0 %v2257_v13  ;;  %v817_v13 = vld [vmem:[#allocation2 + $0x20] sm:$0x1] }
  0x56   : > { %v826_v25 = vunpack.c.l.bf16 %v817_v13 }
  0x58   : > { %v2755_v55 = vmul.f32 %v2710_v51, %v826_v25  ;;  %v2789_v25 = vmul.f32 %v2710_v51, %v828_v63 }
  0x5a   : > { %v873_v13 = vrot.slane %v2755_v55, 2  ;;  %v2272_v55 = vld [vmem:[%s3481_s5 + $0x28] sm:$0xff] }
  0x65   : > { %636 = vmatmul.bf16.gmra.mxu0 %v2258_v14 }
  0xb2   : > { %v622_v28 = vpop.f32.mrf.mxu0 }
  0xb3   : > { %v623_v29 = vadd.f32 %v2688_v26, %v622_v28  ;;  %v939_v28 = vunpack.c.l.bf16 %v922_v6  ;;  %v1048_v6 = vunpack.c.l.bf16 %v1039_v49 }
  0xb5   : > { %v642_v31 = vmul.f32 0.5, %v623_v29  ;;  %v2796_v39 = vmul.f32 %v2749_v44, %v1048_v6 }
  0xb7   : > { %2375 = vtanh.f32 %v642_v31  ;;  %v705_v31 = vld [vmem:[#allocation2 + $0x24] sm:$0x8] }
  0xb8   : > { %v722_v62 = vunpack.c.l.bf16 %v705_v31 }
  0xba   : > { %v624_v35 = vpop.f32.mrf.mxu0 }
  0xbb   : > { %v625_v37 = vadd.f32 %v2688_v26, %v624_v35  ;;  %v468_v35 = vld [vmem:[#allocation2 + $0x48] sm:$0x8] }
  0xbc   : > { %v469_v47 = vsel %vm2664_vm2, 0, %v468_v35 }
  0xbd   : > { %v2376_v40 = vpop.eup %2375  ;;  %v643_v41 = vmul.f32 0.5, %v625_v37  ;;  %470 = vst [vmem:[#allocation2 + $0x48] sm:$0x8] %v469_v47 }
  0xbe   : > { %v658_v46 = vadd.f32 1.0, %v2376_v40  ;;  %v868_v40 = vsel %vm865_vm6, %v866_v17, %v867_v18 }
  0xbf   : > { %2377 = vtanh.f32 %v643_v41  ;;  %v926_v41 = vld [vmem:[#allocation2 + $0x24] sm:$0x8] }
  0xc0   : > { %v666_v50 = vmul.f32 0.5, %v658_v46  ;;  %v943_v5 = vunpack.c.l.bf16 %v926_v41 }
  0xc2   : > { %v674_v56 = vmul.f32 %v666_v50, %v623_v29  ;;  %v627_v57 = vpop.f32.mrf.mxu0  ;;  %v2740_v29 = vmul.f32 %v2715_v53, %v718_v10  ;;  %v2770_v10 = vld [vmem:[%s3479_s3 + $0x4] ss:$0 sm:$0xff] }
  0xc3   : > { %v2719_v59 = vadd.f32 %v2688_v26, %v627_v57 }
  0xc4   : > { %v682_v60 = vpack.c.bf16 %v674_v56, %v674_v56  ;;  %v956_v56 = vmul.f32 %v2736_v21, %v939_v28 }
  0xc5   : > { %v2378_v1 = vpop.eup %2377  ;;  %v644_v2 = vmul.f32 0.5, %v2719_v59 }
  0xc6   : > { %691 = vst [vmem:[#allocation2 + $0x10] sm:$0xf] %v682_v60  ;;  %v659_v7 = vadd.f32 1.0, %v2378_v1  ;;  %v941_v60 = vunpack.c.l.bf16 %v924_v32  ;;  %v907_v1 = vadd.f32 %v868_v40, %v800_v36  ;;  %v2773_v15 = vadd.f32 %v956_v56, %v906_v48 }
  0xc7   : > { %2379 = vtanh.f32 %v644_v2  ;;  %v2764_v2 = vmul.f32 %v2715_v53, %v720_v45  ;;  %v2793_v36 = vmul.f32 %v2736_v21, %v943_v5  ;;  %v504_v45 = vld [vmem:[#allocation2 + $0x5c] sm:$0x1] }
  0xc8   : > { %v667_v14 = vmul.f32 0.5, %v659_v7  ;;  %v2780_v19 = vmul.f32 %v2736_v21, %v941_v60  ;;  %v505_v49 = vsel %vm2673_vm5, 0, %v504_v45  ;;  %v507_v45 = vld [vmem:[#allocation2 + $0x68] sm:$0x1] }
  0xc9   : > { %506 = vst [vmem:[#allocation2 + $0x5c] sm:$0x1] %v505_v49 }
  0xca   : > { %v675_v22 = vmul.f32 %v667_v14, %v625_v37  ;;  %v629_v24 = vpop.f32.mrf.mxu0  ;;  %v827_v37 = vunpack.c.l.bf16 %v818_v20  ;;  %v928_v14 = vld [vmem:[#allocation2 + $0x30] sm:$0x8]  ;;  %v2783_v20 = vmul.f32 %v2749_v44, %v1047_v61 }
  0xcb   : > { %v2743_v30 = vadd.f32 %v2688_v26, %v629_v24  ;;  %v2786_v24 = vmul.f32 %v2715_v53, %v722_v62  ;;  %v945_v35 = vunpack.c.l.bf16 %v928_v14 }
  0xcc   : > { %v683_v34 = vpack.c.bf16 %v675_v22, %v675_v22  ;;  %v2761_v0 = vmul.f32 %v2710_v51, %v827_v37  ;;  %v471_v22 = vld [vmem:[#allocation2 + $0x54] sm:$0x8] }
  0xcd   : > { %v2380_v42 = vpop.eup %2379  ;;  %v702_v43 = vld [vmem:[#allocation2 + $0x10] sm:$0xf]  ;;  %v645_v46 = vmul.f32 0.5, %v2743_v30  ;;  %v472_v48 = vsel %vm2664_vm2, 0, %v471_v22  ;;  %v2812_v61 = vmul.f32 %v2736_v21, %v945_v35  ;;  %v2840_v35 = vmul.f32 %v2715_v53, %v726_v4  ;;  %v932_v4 = vld [vmem:[#allocation2 + $0x48] sm:$0x8] }
  0xce   : > { %v719_v50 = vunpack.c.l.bf16 %v702_v43  ;;  %692 = vst [vmem:[#allocation2 + $0x1c] sm:$0xf] %v683_v34  ;;  %v660_v52 = vadd.f32 1.0, %v2380_v42  ;;  %v923_v57 = vld [vmem:[#allocation2 + $0x10] sm:$0xf]  ;;  %v876_v28 = vrot.slane %v2761_v0, 2 }
  0xcf   : > { %2381 = vtanh.f32 %v645_v46  ;;  %v940_v8 = vunpack.c.l.bf16 %v923_v57  ;;  %v820_v34 = vld [vmem:[#allocation2 + $0x44] sm:$0x1]  ;;  %473 = vst [vmem:[#allocation2 + $0x54] sm:$0x8] %v472_v48  ;;  %v879_v57 = vrot.slane %v2789_v25, 2 }
  0xd0   : > { %v668_v3 = vmul.f32 0.5, %v660_v52  ;;  %v768_v7 = vmul.f32 %v2701_v38, %v719_v50  ;;  %v835_v40 = vmul.f32 %v2710_v51, %v719_v50  ;;  %v829_v56 = vunpack.c.l.bf16 %v820_v34 }
  0xd1   : > { %v957_v41 = vmul.f32 %v2736_v21, %v940_v8  ;;  %v990_v42 = vmul.f32 %v2770_v10, %v940_v8  ;;  %v736_v58 = vmul.f32 %v2715_v53, %v719_v50  ;;  %v2819_v50 = vld [vmem:[#allocation2 + $0x3c] sm:$0x8] }
  0xd2   : > { %v632_v12 = vpop.f32.mrf.mxu0  ;;  %v676_v17 = vmul.f32 %v668_v3, %v2719_v59  ;;  %v784_v37 = vrot.slane %v768_v7, 1  ;;  %v869_v62 = vrot.slane %v835_v40, 2  ;;  %v821_v40 = vld [vmem:[#allocation2 + $0x50] sm:$0x1] }
  0xd3   : > { %v2777_v18 = vadd.f32 %v2688_v26, %v632_v12  ;;  %v973_v5 = vadd.f32 %v957_v41, %v907_v1  ;;  %v1006_v7 = vrot.slane %v990_v42, 1  ;;  %v2829_v1 = vmul.f32 %v2710_v51, %v829_v56 }
  0xd4   : > { %v684_v32 = vpack.c.bf16 %v676_v17, %v676_v17  ;;  %v801_v6 = vadd.f32 %v784_v37, %v2740_v29  ;;  %v2822_v17 = vmul.f32 %v2749_v44, %v940_v8  ;;  %v2831_v29 = vadd.f32 %v784_v37, %v736_v58  ;;  %v2274_v58 = vld [vmem:[%s3481_s5 + $0x38] sm:$0xff] }
  0xd5   : > { %v2382_v59 = vpop.eup %2381  ;;  %v704_v31 = vld [vmem:[#allocation2 + $0x1c] sm:$0xf]  ;;  %v646_v47 = vmul.f32 0.5, %v2777_v18  ;;  %v871_v37 = vsel %vm865_vm6, %v869_v62, %v870_v27  ;;  %v947_v41 = vunpack.c.l.bf16 %v2819_v50  ;;  %v2851_v48 = vadd.f32 %v1006_v7, %v973_v5  ;;  %1603 = vmatpush.bf16.msra.mxu2 %v2274_v58 }
  0xd6   : > { %v925_v43 = vld [vmem:[#allocation2 + $0x1c] sm:$0xf]  ;;  %693 = vst [vmem:[#allocation2 + $0x28] sm:$0xf] %v684_v32  ;;  %v661_v46 = vadd.f32 1.0, %v2382_v59  ;;  %v721_v52 = vunpack.c.l.bf16 %v704_v31 }
  0xd7   : > { %2383 = vtanh.f32 %v646_v47  ;;  %v942_v63 = vunpack.c.l.bf16 %v925_v43  ;;  %v474_v59 = vld [vmem:[#allocation2 + $0x60] sm:$0x8]  ;;  %v2846_v43 = vadd.f32 %v869_v62, %v801_v6  ;;  %v2849_v47 = vadd.f32 %v1006_v7, %v2773_v15  ;;  %v713_v50 = vld [vmem:[#allocation2 + $0x54] sm:$0x8] }
  0xd8   : > { %v669_v60 = vmul.f32 0.5, %v661_v46  ;;  %v769_v22 = vmul.f32 %v2701_v38, %v721_v52  ;;  %v2826_v23 = vmul.f32 %v2710_v51, %v721_v52  ;;  %v475_v33 = vsel %vm2664_vm2, 0, %v474_v59  ;;  %v711_v46 = vld [vmem:[#allocation2 + $0x48] sm:$0x8] }
  0xd9   : > { %v2837_v8 = vmul.f32 %v2770_v10, %v942_v63  ;;  %476 = vst [vmem:[#allocation2 + $0x60] sm:$0x8] %v475_v33  ;;  %v2861_v62 = vmul.f32 %v2736_v21, %v942_v63  ;;  %v2864_v15 = vmul.f32 %v2749_v44, %v942_v63 }
  0xda   : > { %v634_v3 = vpop.f32.mrf.mxu0  ;;  %v677_v12 = vmul.f32 %v669_v60, %v2743_v30  ;;  %v1146_v30 = vld [vmem:[#allocation2 + $0x1c] sm:$0xf]  ;;  %v785_v49 = vrot.slane %v769_v22, 1  ;;  %v872_v56 = vrot.slane %v2826_v23, 2  ;;  %v738_v60 = vmul.f32 %v2715_v53, %v721_v52  ;;  %v477_v22 = vld [vmem:[#allocation2 + $0x6c] sm:$0x8] }
  0xdb   : > { %v2817_v14 = vadd.f32 %v2688_v26, %v634_v3  ;;  %v2854_v9 = vunpack.c.l.bf16 %v1146_v30  ;;  %v1007_v5 = vrot.slane %v2837_v8, 1  ;;  %v508_v52 = vsel %vm2673_vm5, 0, %v507_v45 }
  0xdc   : > { %v685_v31 = vpack.c.bf16 %v677_v12, %v677_v12  ;;  %v2273_v12 = vld [vmem:[%s3481_s5 + $0x30] sm:$0xff]  ;;  %v728_v23 = vunpack.c.l.bf16 %v711_v46  ;;  %v478_v30 = vsel %vm2664_vm2, 0, %v477_v22  ;;  %509 = vst [vmem:[#allocation2 + $0x68] sm:$0x1] %v508_v52  ;;  %v803_v33 = vadd.f32 %v785_v49, %v2764_v2 }
  0xdd   : > { %v647_v32 = vmul.f32 0.5, %v2817_v14  ;;  %v706_v34 = vld [vmem:[#allocation2 + $0x28] sm:$0xf]  ;;  %v2384_v42 = vpop.eup %2383  ;;  %479 = vst [vmem:[#allocation2 + $0x6c] sm:$0x8] %v478_v30  ;;  %v874_v45 = vsel %vm865_vm6, %v872_v56, %v873_v13  ;;  %v949_v22 = vunpack.c.l.bf16 %v932_v4  ;;  %1604 = vmatpush.bf16.msra.mxu2 %v2273_v12  ;;  %v909_v4 = vadd.f32 %v871_v37, %v2831_v29 }
  0xde   : > { %694 = vst [vmem:[#allocation2 + $0x34] sm:$0xf] %v685_v31  ;;  %v662_v27 = vadd.f32 1.0, %v2384_v42  ;;  %v723_v3 = vunpack.c.l.bf16 %v706_v34  ;;  %v927_v59 = vld [vmem:[#allocation2 + $0x28] sm:$0xf]  ;;  %v830_v31 = vunpack.c.l.bf16 %v821_v40  ;;  %v804_v34 = vadd.f32 %v785_v49, %v738_v60 }
  0xdf   : > { %2385 = vtanh.f32 %v647_v32  ;;  %v1148_v11 = vld [vmem:[#allocation2 + $0x28] sm:$0xf]  ;;  %v2896_v13 = vmul.f32 %v2715_v53, %v728_v23  ;;  %v822_v12 = vld [vmem:[#allocation2 + $0x5c] sm:$0x1]  ;;  %v910_v30 = vadd.f32 %v872_v56, %v803_v33  ;;  %v2907_v23 = vmul.f32 %v2736_v21, %v947_v41  ;;  %v2271_v56 = vld [vmem:[%s3481_s5 + $0x20] sm:$0xff] }
  0xe0   : > { %v670_v6 = vmul.f32 0.5, %v662_v27  ;;  %v510_v27 = vld [vmem:[#allocation2 + $0x74] sm:$0x1]  ;;  %v770_v58 = vmul.f32 %v2701_v38, %v723_v3  ;;  %v2888_v2 = vmul.f32 %v2710_v51, %v723_v3  ;;  %v2899_v16 = vmul.f32 %v2710_v51, %v830_v31 }
  0xe1   : > { %v511_v40 = vsel %vm2673_vm5, 0, %v510_v27  ;;  %v740_v31 = vmul.f32 %v2715_v53, %v723_v3  ;;  %1605 = vmatpush.bf16.msra.mxu2 %v2272_v55  ;;  %v974_v41 = vadd.f32 %v2780_v19, %v2846_v43  ;;  %v2935_v19 = vadd.f32 %v2793_v36, %v910_v30  ;;  %v934_v36 = vld [vmem:[#allocation2 + $0x54] sm:$0x8] }
  0xe2   : > { %v637_v7 = vpop.f32.mrf.mxu0  ;;  %v678_v42 = vmul.f32 %v670_v6, %v2777_v18  ;;  %v2890_v18 = vunpack.c.l.bf16 %v927_v59  ;;  %512 = vst [vmem:[#allocation2 + $0x74] sm:$0x1] %v511_v40  ;;  %v2902_v59 = vunpack.c.l.bf16 %v1148_v11  ;;  %v786_v27 = vrot.slane %v770_v58, 1 }
  0xe3   : > { %v2873_v63 = vadd.f32 %v2688_v26, %v637_v7  ;;  %v875_v29 = vrot.slane %v2888_v2, 2 }
  0xe4   : > { %v686_v60 = vpack.c.bf16 %v678_v42, %v678_v42  ;;  %v911_v42 = vadd.f32 %v874_v45, %v804_v34  ;;  %v961_v37 = vmul.f32 %v2736_v21, %v2890_v18  ;;  %v831_v45 = vunpack.c.l.bf16 %v822_v12 }
  0xe5   : > { %v2386_v46 = vpop.eup %2385  ;;  %v648_v7 = vmul.f32 0.5, %v2873_v63  ;;  %v708_v49 = vld [vmem:[#allocation2 + $0x34] sm:$0xf]  ;;  %v2928_v58 = vmul.f32 %v2770_v10, %v2890_v18  ;;  %1606 = vmatpush.bf16.msra.mxu2 %v2271_v56  ;;  %v806_v55 = vadd.f32 %v786_v27, %v740_v31  ;;  %v2949_v12 = vadd.f32 %v1007_v5, %v974_v41 }
  0xe6   : > { %v725_v6 = vunpack.c.l.bf16 %v708_v49  ;;  %v663_v52 = vadd.f32 1.0, %v2386_v46  ;;  %695 = vst [vmem:[#allocation2 + $0x40] sm:$0xf] %v686_v60  ;;  %v2910_v46 = vmul.f32 %v2736_v21, %v949_v22  ;;  %v929_v40 = vld [vmem:[#allocation2 + $0x34] sm:$0xf]  ;;  %v2932_v22 = vadd.f32 %v2861_v62, %v909_v4  ;;  %v2270_v60 = vld [vmem:[%s3481_s5 + $0x18] sm:$0xff] }
  0xe7   : > { %2387 = vtanh.f32 %v648_v7  ;;  %v1150_v43 = vld [vmem:[#allocation2 + $0x34] sm:$0xf]  ;;  %v877_v62 = vsel %vm865_vm6, %v875_v29, %v876_v28  ;;  %v2945_v4 = vadd.f32 %v961_v37, %v911_v42  ;;  %v2951_v30 = vunpack.c.l.bf16 %v929_v40 }
  0xe8   : > { %v671_v32 = vmul.f32 0.5, %v663_v52  ;;  %v771_v33 = vmul.f32 %v2701_v38, %v725_v6  ;;  %v841_v7 = vmul.f32 %v2710_v51, %v725_v6  ;;  %v936_v52 = vld [vmem:[#allocation2 + $0x60] sm:$0x8]  ;;  %v2956_v0 = vunpack.c.l.bf16 %v1150_v43 }
  0xe9   : > { %v742_v42 = vmul.f32 %v2715_v53, %v725_v6  ;;  %1607 = vmatpush.bf16.msra.mxu2 %v2270_v60 }
  0xea   : > { %v639_v11 = vpop.f32.mrf.mxu0  ;;  %v679_v34 = vmul.f32 %v671_v32, %v2817_v14  ;;  %v805_v32 = vadd.f32 %v786_v27, %v2786_v24  ;;  %v787_v24 = vrot.slane %v771_v33, 1  ;;  %v2954_v27 = vmul.f32 %v2710_v51, %v831_v45  ;;  %v2269_v45 = vld [vmem:[%s3481_s5 + $0x10] sm:$0xff] }
  0xeb   : > { %v2924_v3 = vadd.f32 %v2688_v26, %v639_v11  ;;  %v730_v26 = vunpack.c.l.bf16 %v713_v50  ;;  %v878_v56 = vrot.slane %v841_v7, 2  ;;  %v951_v33 = vunpack.c.l.bf16 %v934_v36 }
  0xec   : > { %v687_v2 = vpack.c.bf16 %v679_v34, %v679_v34  ;;  %v912_v41 = vadd.f32 %v875_v29, %v805_v32  ;;  %v807_v7 = vadd.f32 %v787_v24, %v2807_v54  ;;  %v808_v6 = vadd.f32 %v787_v24, %v742_v42 }
  0xed   : > { %v649_v14 = vmul.f32 0.5, %v2924_v3  ;;  %v2388_v49 = vpop.eup %2387  ;;  %v710_v11 = vld [vmem:[#allocation2 + $0x40] sm:$0xf]  ;;  %v2960_v50 = vmul.f32 %v2715_v53, %v730_v26  ;;  %v963_v29 = vmul.f32 %v2736_v21, %v2951_v30  ;;  %v880_v60 = vsel %vm865_vm6, %v878_v56, %v879_v57  ;;  %1608 = vmatpush.bf16.msra.mxu2 %v2269_v45 }
  0xee   : > { %696 = vst [vmem:[#allocation2 + $0x4c] sm:$0xf] %v687_v2  ;;  %v727_v28 = vunpack.c.l.bf16 %v710_v11  ;;  %v664_v31 = vadd.f32 1.0, %v2388_v49  ;;  %v931_v37 = vld [vmem:[#allocation2 + $0x40] sm:$0xf]  ;;  %v953_v2 = vunpack.c.l.bf16 %v936_v52  ;;  %v913_v11 = vadd.f32 %v877_v62, %v806_v55 }
  0xef   : > { %2389 = vtanh.f32 %v649_v14  ;;  %v2971_v26 = vunpack.c.l.bf16 %v931_v37  ;;  %v2979_v54 = vmul.f32 %v2736_v21, %v951_v33  ;;  %v978_v24 = vadd.f32 %v2812_v61, %v912_v41 }
  0xf0   : > { %v772_v34 = vmul.f32 %v2701_v38, %v727_v28  ;;  %v672_v40 = vmul.f32 0.5, %v664_v31  ;;  %v843_v49 = vmul.f32 %v2710_v51, %v727_v28  ;;  %v2986_v25 = vmul.f32 %v2736_v21, %v953_v2 }
  0xf1   : > { %v993_v57 = vmul.f32 %v2770_v10, %v2951_v30  ;;  %v914_v62 = vadd.f32 %v878_v56, %v807_v7  ;;  %v915_v33 = vadd.f32 %v880_v60, %v808_v6  ;;  %v994_v45 = vmul.f32 %v2770_v10, %v2971_v26  ;;  %v2267_v6 = vld [vmem:[%s3481_s5] sm:$0xff] }
  0xf2   : > { %v680_v32 = vmul.f32 %v672_v40, %v2873_v63  ;;  %v788_v52 = vrot.slane %v772_v34, 1  ;;  %v2268_v63 = vld [vmem:[%s3481_s5 + $0x8] sm:$0xff]  ;;  %v979_v34 = vadd.f32 %v963_v29, %v913_v11  ;;  %v881_v40 = vrot.slane %v843_v49, 2  ;;  %v1041_v11 = vld [vmem:[#allocation2 + $0x38] sm:$0x1] }
  0xf3   : > { %v965_v56 = vmul.f32 %v2736_v21, %v2971_v26  ;;  %1609 = vmatpush.bf16.msra.mxu2 %v2268_v63  ;;  %v1009_v29 = vrot.slane %v993_v57, 1  ;;  %v980_v60 = vadd.f32 %v2907_v23, %v914_v62  ;;  %v1010_v63 = vrot.slane %v994_v45, 1  ;;  %v1042_v57 = vld [vmem:[#allocation2 + $0x44] sm:$0x1] }
  0xf4   : > { %v688_v37 = vpack.c.bf16 %v680_v32, %v680_v32  ;;  %v1040_v32 = vld [vmem:[#allocation2 + $0x2c] sm:$0x1]  ;;  %v809_v43 = vadd.f32 %v788_v52, %v2840_v35 }
  0xf5   : > { %v2390_v36 = vpop.eup %2389  ;;  %v712_v31 = vld [vmem:[#allocation2 + $0x4c] sm:$0xf]  ;;  %v3024_v62 = vadd.f32 %v1009_v29, %v978_v24 }
  0xf6   : > { %v933_v42 = vld [vmem:[#allocation2 + $0x4c] sm:$0xf]  ;;  %v665_v14 = vadd.f32 1.0, %v2390_v36  ;;  %v729_v55 = vunpack.c.l.bf16 %v712_v31  ;;  %697 = vst [vmem:[#allocation2 + $0x58] sm:$0xf] %v688_v37  ;;  %v744_v36 = vmul.f32 %v2715_v53, %v727_v28  ;;  %v3007_v28 = vadd.f32 %v1007_v5, %v2932_v22 }
  0xf7   : > { %v2990_v61 = vunpack.c.l.bf16 %v933_v42  ;;  %v3502_v42 = vrot.slane %v2829_v1, 2  ;;  %v916_v5 = vadd.f32 %v881_v40, %v809_v43  ;;  %1610 = vmatpush.bf16.msra.mxu2 %v2267_v6  ;;  %v3026_v43 = vadd.f32 %v1009_v29, %v979_v34 }
  0xf8   : > { %v673_v41 = vmul.f32 0.5, %v665_v14  ;;  %v773_v2 = vmul.f32 %v2701_v38, %v729_v55  ;;  %v1008_v14 = vrot.slane %v2928_v58, 1  ;;  %v810_v49 = vadd.f32 %v788_v52, %v744_v36 }
  0xf9   : > { %v845_v35 = vmul.f32 %v2710_v51, %v729_v55  ;;  %v883_v37 = vsel %vm865_vm6, %v881_v40, %v3502_v42  ;;  %v995_v58 = vmul.f32 %v2770_v10, %v2990_v61  ;;  %v967_v22 = vmul.f32 %v2736_v21, %v2990_v61  ;;  %v1044_v40 = vld [vmem:[#allocation2 + $0x5c] sm:$0x1] }
  0xfa   : > { %v681_v7 = vmul.f32 %v673_v41, %v2924_v3  ;;  %v1049_v3 = vunpack.c.l.bf16 %v1040_v32  ;;  %v789_v8 = vrot.slane %v773_v2, 1  ;;  %v981_v52 = vadd.f32 %v965_v56, %v915_v33  ;;  %v1043_v41 = vld [vmem:[#allocation2 + $0x50] sm:$0x1] }
  0xfb   : > { %v3019_v23 = vadd.f32 %v1008_v14, %v2935_v19  ;;  %v3022_v1 = vadd.f32 %v1008_v14, %v2945_v4  ;;  %v1050_v32 = vunpack.c.l.bf16 %v1041_v11  ;;  %v884_v36 = vrot.slane %v845_v35, 2  ;;  %v1045_v4 = vld [vmem:[#allocation2 + $0x68] sm:$0x1] }
  0xfc   : > { %v689_v31 = vpack.c.bf16 %v681_v7, %v681_v7  ;;  %v917_v2 = vadd.f32 %v883_v37, %v810_v49  ;;  %v1051_v7 = vunpack.c.l.bf16 %v1042_v57  ;;  %v746_v56 = vmul.f32 %v2715_v53, %v729_v55 }
  0xfd   : > { %v714_v45 = vld [vmem:[#allocation2 + $0x58] sm:$0xf]  ;;  %v1011_v19 = vrot.slane %v995_v58, 1  ;;  %v811_v24 = vadd.f32 %v789_v8, %v2896_v13  ;;  %v982_v14 = vadd.f32 %v2910_v46, %v916_v5  ;;  %v3033_v42 = vadd.f32 %v1010_v63, %v981_v52 }
  0xfe   : > { %698 = vst [vmem:[#allocation2 + $0x64] sm:$0xf] %v689_v31  ;;  %v731_v33 = vunpack.c.l.bf16 %v714_v45  ;;  %v935_v6 = vld [vmem:[#allocation2 + $0x58] sm:$0xf]  ;;  %v3029_v31 = vadd.f32 %v1010_v63, %v980_v60  ;;  %v983_v11 = vadd.f32 %v967_v22, %v917_v2  ;;  %v812_v29 = vadd.f32 %v789_v8, %v746_v56 }
  0xff   : > { %v1052_v35 = vunpack.c.l.bf16 %v1043_v41  ;;  %v3503_v55 = vrot.slane %v2899_v16, 2  ;;  %v952_v60 = vunpack.c.l.bf16 %v935_v6  ;;  %v1053_v58 = vunpack.c.l.bf16 %v1044_v40 }
 0x100   : > { %v774_v34 = vmul.f32 %v2701_v38, %v731_v33  ;;  %v847_v49 = vmul.f32 %v2710_v51, %v731_v33  ;;  %v1054_v57 = vunpack.c.l.bf16 %v1045_v4  ;;  %v3040_v13 = vadd.f32 %v1011_v19, %v982_v14 }
 0x101   : > { %v886_v37 = vsel %vm865_vm6, %v884_v36, %v3503_v55  ;;  %v3044_v46 = vmul.f32 %v2749_v44, %v2890_v18  ;;  %v1061_v38 = vmul.f32 %v2749_v44, %v1049_v3  ;;  %v918_v8 = vadd.f32 %v884_v36, %v811_v24 }
 0x102   : > { %v790_v45 = vrot.slane %v774_v34, 1  ;;  %v887_v63 = vrot.slane %v847_v49, 2  ;;  %v3047_v5 = vadd.f32 %v1011_v19, %v983_v11  ;;  %v3051_v16 = vmul.f32 %v2749_v44, %v2951_v30 }
 0x103   : > { %v748_v22 = vmul.f32 %v2715_v53, %v731_v33  ;;  %v919_v52 = vadd.f32 %v886_v37, %v812_v29  ;;  %v1088_v2 = vrot.slane %v2822_v17, 2  ;;  %v969_v18 = vmul.f32 %v2736_v21, %v952_v60 }
 0x104   : > { %v1063_v40 = vmul.f32 %v2749_v44, %v1050_v32  ;;  %v3059_v3 = vmul.f32 %v2749_v44, %v2971_v26  ;;  %v1065_v36 = vmul.f32 %v2749_v44, %v1051_v7  ;;  %v813_v56 = vadd.f32 %v790_v45, %v2960_v50 }
 0x105   : > { %v937_v51 = vld [vmem:[#allocation2 + $0x64] sm:$0xf]  ;;  %v814_v30 = vadd.f32 %v790_v45, %v748_v22  ;;  %v996_v6 = vmul.f32 %v2770_v10, %v952_v60  ;;  %v3066_v53 = vmul.f32 %v2749_v44, %v2990_v61  ;;  %v3504_v17 = vrot.slane %v2954_v27, 2 }
 0x106   : > { %v954_v41 = vunpack.c.l.bf16 %v937_v51  ;;  %v984_v32 = vadd.f32 %v2979_v54, %v918_v8  ;;  %v1067_v26 = vmul.f32 %v2749_v44, %v1052_v35  ;;  %v1069_v19 = vmul.f32 %v2749_v44, %v1053_v58 }
 0x107   : > { %v889_v33 = vsel %vm865_vm6, %v887_v63, %v3504_v17  ;;  %v1068_v4 = vmul.f32 %v2749_v44, %v952_v60  ;;  %v1071_v24 = vmul.f32 %v2749_v44, %v1054_v57  ;;  %v985_v61 = vadd.f32 %v969_v18, %v919_v52 }
 0x108   : > { %v971_v7 = vmul.f32 %v2736_v21, %v954_v41  ;;  %v997_v50 = vmul.f32 %v2770_v10, %v954_v41  ;;  %v1089_v14 = vrot.slane %v2783_v20, 2  ;;  %v1091_v27 = vrot.slane %v2864_v15, 2 }
 0x109   : > { %v1092_v11 = vrot.slane %v2796_v39, 2  ;;  %v920_v54 = vadd.f32 %v887_v63, %v813_v56  ;;  %v921_v34 = vadd.f32 %v889_v33, %v814_v30  ;;  %v1012_v29 = vrot.slane %v996_v6, 1  ;;  %v1145_v30 = vld [vmem:[#allocation2 + $0x18] sm:$0x8]  ;;  %v1147_v6 = vld [vmem:[#allocation2 + $0x24] sm:$0x8] }
 0x10a   : > { %v1070_v49 = vmul.f32 %v2749_v44, %v954_v41  ;;  %v1094_v21 = vrot.slane %v3044_v46, 2  ;;  %v1095_v35 = vrot.slane %v1061_v38, 2  ;;  %v1097_v10 = vrot.slane %v3051_v16, 2 }
 0x10b   : > { %v1098_v55 = vrot.slane %v1063_v40, 2  ;;  %v987_v37 = vadd.f32 %v971_v7, %v921_v34  ;;  %v1013_v60 = vrot.slane %v997_v50, 1  ;;  %v1100_v58 = vrot.slane %v3059_v3, 2  ;;  %v1152_v7 = vld [vmem:[#allocation2 + $0x40] sm:$0xf] }
 0x10c   : > { %v1101_v20 = vrot.slane %v1065_v36, 2  ;;  %v1103_v15 = vrot.slane %v3066_v53, 2  ;;  %v1104_v57 = vrot.slane %v1067_v26, 2  ;;  %v1106_v39 = vrot.slane %v1068_v4, 2  ;;  %v1149_v26 = vld [vmem:[#allocation2 + $0x30] sm:$0x8] }
 0x10d   : > { %v1107_v45 = vrot.slane %v1069_v19, 2  ;;  %v986_v63 = vadd.f32 %v2986_v25, %v920_v54  ;;  %v1090_v44 = vsel %vm865_vm6, %v1088_v2, %v1089_v14  ;;  %v1109_v8 = vrot.slane %v1070_v49, 2  ;;  %v1151_v19 = vld [vmem:[#allocation2 + $0x3c] sm:$0x8]  ;;  %v1159_v54 = vld [vmem:[#allocation2 + $0x6c] sm:$0x8] }
 0x10e   : > { %v1110_v46 = vrot.slane %v1071_v24, 2  ;;  %v1034_v38 = vadd.f32 %v1012_v29, %v984_v32  ;;  %v1035_v51 = vadd.f32 %v1012_v29, %v985_v61  ;;  %v1093_v16 = vsel %vm865_vm6, %v1091_v27, %v1092_v11  ;;  %v1155_v24 = vld [vmem:[#allocation2 + $0x54] sm:$0x8]  ;;  %v1157_v61 = vld [vmem:[#allocation2 + $0x60] sm:$0x8] }
 0x10f   : > { %v1096_v22 = vsel %vm865_vm6, %v1094_v21, %v1095_v35  ;;  %v1036_v52 = vadd.f32 %v1013_v60, %v986_v63  ;;  %v1037_v41 = vadd.f32 %v1013_v60, %v987_v37  ;;  %v1099_v18 = vsel %vm865_vm6, %v1097_v10, %v1098_v55  ;;  %v1156_v11 = vld [vmem:[#allocation2 + $0x58] sm:$0xf]  ;;  %v2369_v49 = vld [vmem:[%s3479_s3 + $0x6] ss:$0 sm:$0xff] }
 0x110   : > { %v1102_v40 = vsel %vm865_vm6, %v1100_v58, %v1101_v20  ;;  %v1105_v3 = vsel %vm865_vm6, %v1103_v15, %v1104_v57  ;;  %v1108_v25 = vsel %vm865_vm6, %v1106_v39, %v1107_v45  ;;  %v1128_v36 = vadd.f32 %v1088_v2, %v2849_v47  ;;  %v1153_v2 = vld [vmem:[#allocation2 + $0x48] sm:$0x8] }
 0x111   : > { %v1129_v56 = vadd.f32 %v1090_v44, %v2851_v48  ;;  %v1111_v53 = vsel %vm865_vm6, %v1109_v8, %v1110_v46  ;;  %v1130_v17 = vadd.f32 %v1091_v27, %v2949_v12  ;;  %v1131_v33 = vadd.f32 %v1093_v16, %v3007_v28  ;;  %v1154_v27 = vld [vmem:[#allocation2 + $0x4c] sm:$0xf] }
 0x112   : > { %v1132_v32 = vadd.f32 %v1094_v21, %v3019_v23  ;;  %v1133_v50 = vadd.f32 %v1096_v22, %v3022_v1  ;;  %v1134_v4 = vadd.f32 %v1097_v10, %v3024_v62  ;;  %v1135_v47 = vadd.f32 %v1099_v18, %v3026_v43  ;;  %v1158_v62 = vld [vmem:[#allocation2 + $0x64] sm:$0xf]  ;;  %v1160_v43 = vld [vmem:[#allocation2 + $0x70] sm:$0xf] }
 0x113   : > { %v1136_v48 = vadd.f32 %v1100_v58, %v3029_v31  ;;  %v1137_v12 = vadd.f32 %v1102_v40, %v3033_v42  ;;  %v1138_v28 = vadd.f32 %v1103_v15, %v3040_v13  ;;  %v1139_v23 = vadd.f32 %v1105_v3, %v3047_v5 }
 0x114   : > { %v1140_v14 = vadd.f32 %v1106_v39, %v1034_v38  ;;  %v1141_v1 = vadd.f32 %v1108_v25, %v1035_v51  ;;  %v3107_v34 = vadd.f32 %v1109_v8, %v1036_v52  ;;  %v1162_v29 = vunpack.c.l.bf16 %v1145_v30  ;;  %v2370_v51 = vld [vmem:[%s3479_s3 + $0x7] ss:$0 sm:$0xff] }
 0x115   : > { %v1164_v31 = vunpack.c.l.bf16 %v1147_v6  ;;  %v1143_v42 = vadd.f32 %v1111_v53, %v1037_v41  ;;  %v1166_v21 = vunpack.c.l.bf16 %v1149_v26  ;;  %v1168_v13 = vunpack.c.l.bf16 %v1151_v19 }
 0x116   : > { %v3112_v35 = vunpack.c.l.bf16 %v1152_v7  ;;  %v1170_v5 = vunpack.c.l.bf16 %v1153_v2  ;;  %v3114_v10 = vunpack.c.l.bf16 %v1154_v27  ;;  %v1172_v55 = vunpack.c.l.bf16 %v1155_v24 }
 0x117   : > { %v3116_v37 = vunpack.c.l.bf16 %v1156_v11  ;;  %v1174_v60 = vunpack.c.l.bf16 %v1157_v61  ;;  %v3118_v58 = vunpack.c.l.bf16 %v1158_v62  ;;  %v1176_v20 = vunpack.c.l.bf16 %v1159_v54 }
 0x118   : > { %v3120_v15 = vunpack.c.l.bf16 %v1160_v43  ;;  %v1179_v57 = vmul.f32 %v2369_v49, %v1162_v29  ;;  %v1180_v39 = vmul.f32 %v2369_v49, %v2854_v9  ;;  %v1181_v45 = vmul.f32 %v2369_v49, %v1164_v31 }
 0x119   : > { %v1182_v63 = vmul.f32 %v2369_v49, %v2902_v59  ;;  %v1183_v44 = vmul.f32 %v2369_v49, %v1166_v21  ;;  %v1184_v8 = vmul.f32 %v2369_v49, %v2956_v0  ;;  %v1185_v46 = vmul.f32 %v2369_v49, %v1168_v13  ;;  %v1263_v21 = vld [vmem:[#allocation2 + $0x38] sm:$0x1] }
 0x11a   : > { %v1186_v38 = vmul.f32 %v2369_v49, %v3112_v35  ;;  %v1187_v16 = vmul.f32 %v2369_v49, %v1170_v5  ;;  %v1188_v22 = vmul.f32 %v2369_v49, %v3114_v10  ;;  %v1189_v52 = vmul.f32 %v2369_v49, %v1172_v55 }
 0x11b   : > { %v1190_v41 = vmul.f32 %v2369_v49, %v3116_v37  ;;  %v1191_v18 = vmul.f32 %v2369_v49, %v1174_v60  ;;  %v1192_v40 = vmul.f32 %v2369_v49, %v3118_v58  ;;  %v1193_v3 = vmul.f32 %v2369_v49, %v1176_v20 }
 0x11c   : > { %v1194_v25 = vmul.f32 %v2369_v49, %v3120_v15  ;;  %v1195_v30 = vadd.f32 %v1179_v57, %v1128_v36  ;;  %v1196_v6 = vadd.f32 %v1180_v39, %v1129_v56  ;;  %v1197_v53 = vadd.f32 %v1181_v45, %v1130_v17  ;;  %v1261_v56 = vld [vmem:[#allocation2 + $0x20] sm:$0x1]  ;;  %v1262_v17 = vld [vmem:[#allocation2 + $0x2c] sm:$0x1]  ;;  %v1264_v57 = vld [vmem:[#allocation2 + $0x44] sm:$0x1] }
 0x11d   : > { %v1198_v26 = vadd.f32 %v1182_v63, %v1131_v33  ;;  %v1199_v19 = vadd.f32 %v1183_v44, %v1132_v32  ;;  %v1200_v7 = vadd.f32 %v1184_v8, %v1133_v50  ;;  %v1213_v2 = vmul.f32 %v2370_v51, %v2854_v9  ;;  %v1265_v39 = vld [vmem:[#allocation2 + $0x50] sm:$0x1] }
 0x11e   : > { %v1214_v24 = vmul.f32 %v2370_v51, %v2902_v59  ;;  %v1201_v61 = vadd.f32 %v1185_v46, %v1134_v4  ;;  %v1202_v27 = vadd.f32 %v1186_v38, %v1135_v47  ;;  %v1203_v11 = vadd.f32 %v1187_v16, %v1136_v48  ;;  %v3145_v4 = vld [vmem:[%s3479_s3 + $0x8] ss:$0 sm:$0xff] }
 0x11f   : > { %v1204_v54 = vadd.f32 %v1188_v22, %v1137_v12  ;;  %v1215_v62 = vmul.f32 %v2370_v51, %v2956_v0  ;;  %v1216_v43 = vmul.f32 %v2370_v51, %v3112_v35  ;;  %v1217_v29 = vmul.f32 %v2370_v51, %v3114_v10 }
 0x120   : > { %v1218_v36 = vmul.f32 %v2370_v51, %v3116_v37  ;;  %v1205_v33 = vadd.f32 %v1189_v52, %v1138_v28  ;;  %v1206_v32 = vadd.f32 %v1190_v41, %v1139_v23  ;;  %v1207_v50 = vadd.f32 %v1191_v18, %v1140_v14 }
 0x121   : > { %v3140_v31 = vmul.f32 %v2370_v51, %v3118_v58  ;;  %v3147_v47 = vadd.f32 %v1192_v40, %v1141_v1  ;;  %v3150_v48 = vmul.f32 %v2370_v51, %v3120_v15  ;;  %v1229_v12 = vrot.slane %v1213_v2, 1  ;;  %v1266_v51 = vld [vmem:[#allocation2 + $0x5c] sm:$0x1] }
 0x122   : > { %v1230_v49 = vrot.slane %v1214_v24, 1  ;;  %v3153_v28 = vadd.f32 %v1193_v3, %v3107_v34  ;;  %v3155_v23 = vadd.f32 %v1194_v25, %v1143_v42  ;;  %v1270_v14 = vunpack.c.l.bf16 %v1261_v56 }
 0x123   : > { %v1271_v13 = vunpack.c.l.bf16 %v1262_v17  ;;  %v1231_v5 = vrot.slane %v1215_v62, 1  ;;  %v1232_v55 = vrot.slane %v1216_v43, 1  ;;  %v1233_v60 = vrot.slane %v1217_v29, 1  ;;  %v1268_v43 = vld [vmem:[#allocation2 + $0x74] sm:$0x1] }
 0x124   : > { %v1234_v20 = vrot.slane %v1218_v36, 1  ;;  %v1235_v1 = vrot.slane %v3140_v31, 1  ;;  %v1272_v45 = vunpack.c.l.bf16 %v1263_v21  ;;  %v1279_v63 = vmul.f32 %v3145_v4, %v2854_v9  ;;  %v1267_v9 = vld [vmem:[#allocation2 + $0x68] sm:$0x1] }
 0x125   : > { %v1280_v44 = vmul.f32 %v3145_v4, %v1270_v14  ;;  %v1236_v34 = vrot.slane %v3150_v48, 1  ;;  %v1245_v42 = vadd.f32 %v1229_v12, %v1195_v30  ;;  %v1246_v8 = vadd.f32 %v1229_v12, %v1196_v6 }
 0x126   : > { %v1247_v46 = vadd.f32 %v1230_v49, %v1197_v53  ;;  %v1248_v38 = vadd.f32 %v1230_v49, %v1198_v26  ;;  %v1273_v16 = vunpack.c.l.bf16 %v1264_v57  ;;  %v1281_v22 = vmul.f32 %v3145_v4, %v2902_v59 }
 0x127   : > { %v1282_v52 = vmul.f32 %v3145_v4, %v1271_v13  ;;  %v1249_v41 = vadd.f32 %v1231_v5, %v1199_v19  ;;  %v1250_v18 = vadd.f32 %v1231_v5, %v1200_v7  ;;  %v1251_v40 = vadd.f32 %v1232_v55, %v1201_v61 }
 0x128   : > { %v1274_v3 = vunpack.c.l.bf16 %v1265_v39  ;;  %v1283_v25 = vmul.f32 %v3145_v4, %v2956_v0  ;;  %v1284_v30 = vmul.f32 %v3145_v4, %v1272_v45  ;;  %v1311_v6 = vrot.slane %v1279_v63, 2 }
 0x129   : > { %v1312_v53 = vrot.slane %v1280_v44, 2  ;;  %v1252_v26 = vadd.f32 %v1232_v55, %v1202_v27  ;;  %v1253_v2 = vadd.f32 %v1233_v60, %v1203_v11  ;;  %v1254_v24 = vadd.f32 %v1233_v60, %v1204_v54 }
 0x12a   : > { %v1275_v62 = vunpack.c.l.bf16 %v1266_v51  ;;  %v1285_v59 = vmul.f32 %v3145_v4, %v3112_v35  ;;  %v1286_v19 = vmul.f32 %v3145_v4, %v1273_v16  ;;  %v1314_v7 = vrot.slane %v1281_v22, 2 }
 0x12b   : > { %v1315_v61 = vrot.slane %v1282_v52, 2  ;;  %v1255_v29 = vadd.f32 %v1234_v20, %v1205_v33  ;;  %v1256_v36 = vadd.f32 %v1234_v20, %v1206_v32  ;;  %v1276_v56 = vunpack.c.l.bf16 %v1267_v9 }
 0x12c   : > { %v1287_v0 = vmul.f32 %v3145_v4, %v3114_v10  ;;  %v1288_v17 = vmul.f32 %v3145_v4, %v1274_v3  ;;  %v1313_v27 = vsel %vm865_vm6, %v1311_v6, %v1312_v53  ;;  %v1317_v11 = vrot.slane %v1283_v25, 2  ;;  %v3182_v10 = vld [vmem:[%s3480_s4] ss:$0 sm:$0xff] }
 0x12d   : > { %v1318_v54 = vrot.slane %v1284_v30, 2  ;;  %v1257_v31 = vadd.f32 %v1235_v1, %v1207_v50  ;;  %v1277_v12 = vunpack.c.l.bf16 %v1268_v43  ;;  %v1289_v35 = vmul.f32 %v3145_v4, %v3116_v37 }
 0x12e   : > { %v1290_v49 = vmul.f32 %v3145_v4, %v1275_v62  ;;  %v1316_v33 = vsel %vm865_vm6, %v1314_v7, %v1315_v61  ;;  %v1320_v32 = vrot.slane %v1285_v59, 2  ;;  %v1321_v21 = vrot.slane %v1286_v19, 2 }
 0x12f   : > { %v1351_v14 = vadd.f32 %v1311_v6, %v1245_v42  ;;  %v1258_v13 = vadd.f32 %v1235_v1, %v3147_v47  ;;  %v1291_v50 = vmul.f32 %v3145_v4, %v3118_v58  ;;  %v1292_v5 = vmul.f32 %v3145_v4, %v1276_v56 }
 0x130   : > { %v1352_v37 = vadd.f32 %v1313_v27, %v1246_v8  ;;  %v1319_v55 = vsel %vm865_vm6, %v1317_v11, %v1318_v54  ;;  %v1323_v60 = vrot.slane %v1287_v0, 2  ;;  %v1324_v20 = vrot.slane %v1288_v17, 2 }
 0x131   : > { %v1353_v57 = vadd.f32 %v1314_v7, %v1247_v46  ;;  %v1293_v39 = vmul.f32 %v3145_v4, %v3120_v15  ;;  %v1294_v45 = vmul.f32 %v3145_v4, %v1277_v12  ;;  %v1326_v63 = vrot.slane %v1289_v35, 2 }
 0x132   : > { %v1354_v44 = vadd.f32 %v1316_v33, %v1248_v38  ;;  %v1322_v47 = vsel %vm865_vm6, %v1320_v32, %v1321_v21  ;;  %v1327_v1 = vrot.slane %v1290_v49, 2  ;;  %v1355_v42 = vadd.f32 %v1317_v11, %v1249_v41 }
 0x133   : > { %v3194_v58 = vadd.f32 %v3182_v10, %v1351_v14  ;;  %v1259_v8 = vadd.f32 %v1236_v34, %v3153_v28  ;;  %v1329_v51 = vrot.slane %v1291_v50, 2  ;;  %v1356_v46 = vadd.f32 %v1319_v55, %v1250_v18 }
 0x134   : > { %v3200_v16 = vadd.f32 %v3182_v10, %v1352_v37  ;;  %v1325_v15 = vsel %vm865_vm6, %v1323_v60, %v1324_v20  ;;  %v1330_v4 = vrot.slane %v1292_v5, 2  ;;  %v1357_v38 = vadd.f32 %v1320_v32, %v1251_v40 }
 0x135   : > { %v3204_v22 = vadd.f32 %v3182_v10, %v1353_v57  ;;  %v1332_v52 = vrot.slane %v1293_v39, 2  ;;  %v1333_v41 = vrot.slane %v1294_v45, 2  ;;  %v1358_v3 = vadd.f32 %v1322_v47, %v1252_v26 }
 0x136   : > { %v3207_v9 = vadd.f32 %v3182_v10, %v1354_v44  ;;  %v1328_v28 = vsel %vm865_vm6, %v1326_v63, %v1327_v1  ;;  %v1359_v25 = vadd.f32 %v1323_v60, %v1253_v2  ;;  %v3211_v18 = vadd.f32 %v3182_v10, %v1355_v42 }
 0x137   : > { %v1387_v30 = vmul.f32 0.5, %v3194_v58  ;;  %v1260_v40 = vadd.f32 %v1236_v34, %v3155_v23  ;;  %v1360_v6 = vadd.f32 %v1325_v15, %v1254_v24  ;;  %v3218_v53 = vadd.f32 %v3182_v10, %v1356_v46 }
 0x138   : > { %v1388_v26 = vmul.f32 0.5, %v3200_v16  ;;  %v1331_v62 = vsel %vm865_vm6, %v1329_v51, %v1330_v4  ;;  %v1361_v43 = vadd.f32 %v1326_v63, %v1255_v29  ;;  %v3223_v2 = vadd.f32 %v3182_v10, %v1357_v38 }
 0x139   : > { %v1389_v59 = vmul.f32 0.5, %v3204_v22  ;;  %v1334_v19 = vsel %vm865_vm6, %v1332_v52, %v1333_v41  ;;  %v1362_v7 = vadd.f32 %v1328_v28, %v1256_v36  ;;  %v3228_v48 = vadd.f32 %v3182_v10, %v1358_v3 }
 0x13a   : > { %v1390_v23 = vmul.f32 0.5, %v3207_v9  ;;  %v1363_v34 = vadd.f32 %v1329_v51, %v1257_v31  ;;  %v3232_v24 = vadd.f32 %v3182_v10, %v1359_v25  ;;  %v1391_v61 = vmul.f32 0.5, %v3211_v18 }
 0x13b   : > { %2391 = vtanh.f32 %v1387_v30  ;;  %v1364_v29 = vadd.f32 %v1331_v62, %v1258_v13  ;;  %v3236_v56 = vadd.f32 %v3182_v10, %v1360_v6  ;;  %v1392_v0 = vmul.f32 0.5, %v3218_v53 }
 0x13c   : > { %2393 = vtanh.f32 %v1388_v26  ;;  %v1365_v36 = vadd.f32 %v1332_v52, %v1259_v8  ;;  %v3240_v17 = vadd.f32 %v3182_v10, %v1361_v43  ;;  %v1393_v27 = vmul.f32 0.5, %v3223_v2 }
 0x13d   : > { %2395 = vtanh.f32 %v1389_v59  ;;  %v1366_v11 = vadd.f32 %v1334_v19, %v1260_v40  ;;  %v3244_v54 = vadd.f32 %v3182_v10, %v1362_v7  ;;  %v1394_v31 = vmul.f32 0.5, %v3228_v48 }
 0x13e   : > { %2397 = vtanh.f32 %v1390_v23  ;;  %v3248_v12 = vadd.f32 %v3182_v10, %v1363_v34  ;;  %v1395_v35 = vmul.f32 0.5, %v3232_v24  ;;  %v3252_v49 = vadd.f32 %v3182_v10, %v1364_v29 }
 0x13f   : > { %2399 = vtanh.f32 %v1391_v61  ;;  %v1396_v33 = vmul.f32 0.5, %v3236_v56  ;;  %v3256_v21 = vadd.f32 %v3182_v10, %v1365_v36  ;;  %v1397_v14 = vmul.f32 0.5, %v3240_v17 }
 0x140   : > { %2401 = vtanh.f32 %v1392_v0  ;;  %v3260_v50 = vadd.f32 %v3182_v10, %v1366_v11  ;;  %v1398_v5 = vmul.f32 0.5, %v3244_v54  ;;  %v1399_v60 = vmul.f32 0.5, %v3248_v12 }
 0x141   : > { %v2392_v32 = vpop.eup %2391  ;;  %2403 = vtanh.f32 %v1393_v27  ;;  %v1400_v57 = vmul.f32 0.5, %v3252_v49  ;;  %v1401_v44 = vmul.f32 0.5, %v3256_v21 }
 0x142   : > { %v2394_v13 = vpop.eup %2393  ;;  %2405 = vtanh.f32 %v1394_v31  ;;  %v1419_v37 = vadd.f32 1.0, %v2392_v32  ;;  %v1402_v42 = vmul.f32 0.5, %v3260_v50 }
 0x143   : > { %v2396_v55 = vpop.eup %2395  ;;  %2407 = vtanh.f32 %v1395_v35  ;;  %v1420_v39 = vadd.f32 1.0, %v2394_v13 }
 0x144   : > { %v2398_v20 = vpop.eup %2397  ;;  %2409 = vtanh.f32 %v1396_v33  ;;  %v1421_v45 = vadd.f32 1.0, %v2396_v55  ;;  %v1435_v47 = vmul.f32 0.5, %v1419_v37 }
 0x145   : > { %v2400_v63 = vpop.eup %2399  ;;  %2411 = vtanh.f32 %v1397_v14  ;;  %v1422_v10 = vadd.f32 1.0, %v2398_v20  ;;  %v1436_v41 = vmul.f32 0.5, %v1420_v39 }
 0x146   : > { %v2402_v1 = vpop.eup %2401  ;;  %2413 = vtanh.f32 %v1398_v5  ;;  %v1423_v8 = vadd.f32 1.0, %v2400_v63  ;;  %v1437_v15 = vmul.f32 0.5, %v1421_v45  ;;  %v1451_v40 = vmul.f32 %v1435_v47, %v3194_v58 }
 0x147   : > { %v2404_v51 = vpop.eup %2403  ;;  %2415 = vtanh.f32 %v1399_v60  ;;  %v1424_v46 = vadd.f32 1.0, %v2402_v1  ;;  %v1438_v4 = vmul.f32 0.5, %v1422_v10  ;;  %v1452_v0 = vmul.f32 %v1436_v41, %v3200_v16  ;;  %v2281_v41 = vld [vmem:[%s3483_s7 + $0x30] sm:$0xff] }
 0x148   : > { %v2406_v38 = vpop.eup %2405  ;;  %2417 = vtanh.f32 %v1400_v57  ;;  %v1425_v52 = vadd.f32 1.0, %v2404_v51  ;;  %v1439_v3 = vmul.f32 0.5, %v1423_v8  ;;  %v1453_v7 = vmul.f32 %v1437_v15, %v3204_v22 }
 0x149   : > { %v2408_v28 = vpop.eup %2407  ;;  %2419 = vtanh.f32 %v1401_v44  ;;  %v1426_v25 = vadd.f32 1.0, %v2406_v38  ;;  %v1440_v30 = vmul.f32 0.5, %v1424_v46  ;;  %v1454_v23 = vmul.f32 %v1438_v4, %v3207_v9 }
 0x14a   : > { %v2410_v6 = vpop.eup %2409  ;;  %2421 = vtanh.f32 %v1402_v42  ;;  %v1427_v26 = vadd.f32 1.0, %v2408_v28  ;;  %v1441_v62 = vmul.f32 0.5, %v1425_v52  ;;  %v1455_v36 = vmul.f32 %v1439_v3, %v3211_v18 }
 0x14b   : > { %v2412_v43 = vpop.eup %2411  ;;  %v1428_v59 = vadd.f32 1.0, %v2410_v6  ;;  %v1442_v19 = vmul.f32 0.5, %v1426_v25  ;;  %v1456_v31 = vmul.f32 %v1440_v30, %v3218_v53  ;;  %v1484_v35 = vrot.slane %v1451_v40, 7 }
 0x14c   : > { %v2414_v34 = vpop.eup %2413  ;;  %v1429_v61 = vadd.f32 1.0, %v2412_v43  ;;  %v1443_v29 = vmul.f32 0.5, %v1427_v26  ;;  %v1457_v22 = vmul.f32 %v1441_v62, %v3223_v2  ;;  %v1487_v55 = vrot.slane %v1453_v7, 7 }
 0x14d   : > { %v2416_v27 = vpop.eup %2415  ;;  %v1430_v58 = vadd.f32 1.0, %v2414_v34  ;;  %v1444_v11 = vmul.f32 0.5, %v1428_v59  ;;  %v1458_v9 = vmul.f32 %v1442_v19, %v3228_v48  ;;  %v1488_v16 = vrot.slane %v1454_v23, 7 }
 0x14e   : > { %v2418_v33 = vpop.eup %2417  ;;  %v1431_v32 = vadd.f32 1.0, %v2416_v27  ;;  %v1445_v14 = vmul.f32 0.5, %v1429_v61  ;;  %v1459_v57 = vmul.f32 %v1443_v29, %v3232_v24  ;;  %v1485_v39 = vrot.slane %v1452_v0, 7 }
 0x14f   : > { %v2420_v13 = vpop.eup %2419  ;;  %v1432_v5 = vadd.f32 1.0, %v2418_v33  ;;  %v1446_v37 = vmul.f32 0.5, %v1430_v58  ;;  %v1460_v63 = vmul.f32 %v1444_v11, %v3236_v56  ;;  %v1490_v44 = vrot.slane %v1455_v36, 7  ;;  %v2282_v56 = vld [vmem:[%s3483_s7 + $0x38] sm:$0xff] }
 0x150   : > { %v2422_v60 = vpop.eup %2421  ;;  %v1433_v18 = vadd.f32 1.0, %v2420_v13  ;;  %v1447_v20 = vmul.f32 0.5, %v1431_v32  ;;  %v1461_v2 = vmul.f32 %v1445_v14, %v3240_v17  ;;  %v1491_v47 = vrot.slane %v1456_v31, 7  ;;  %1687 = vmatpush.bf16.msrb.mxu2 %v2282_v56  ;;  %v2285_v56 = vld [vmem:[%s3485_s9 + $0x10] sm:$0xff] }
 0x151   : > { %v1434_v53 = vadd.f32 1.0, %v2422_v60  ;;  %v1448_v45 = vmul.f32 0.5, %v1432_v5  ;;  %v1462_v48 = vmul.f32 %v1446_v37, %v3244_v54  ;;  %v3280_v42 = vsel %vm480_vm3, %v1487_v55, %v1488_v16  ;;  %v2279_v37 = vld [vmem:[%s3483_s7 + $0x20] sm:$0xff]  ;;  %v2278_v55 = vld [vmem:[%s3483_s7 + $0x18] sm:$0xff]  ;;  %v2289_v60 = vld [vmem:[%s3485_s9 + $0x30] sm:$0xff] }
 0x152   : > { %v1449_v10 = vmul.f32 0.5, %v1433_v18  ;;  %v1493_v8 = vrot.slane %v1457_v22, 7  ;;  %v1494_v51 = vrot.slane %v1458_v9, 7  ;;  %v1463_v24 = vmul.f32 %v1447_v20, %v3248_v12  ;;  %v2290_v16 = vld [vmem:[%s3485_s9 + $0x38] sm:$0xff]  ;;  %v2277_v18 = vld [vmem:[%s3483_s7 + $0x10] sm:$0xff]  ;;  %v2288_v20 = vld [vmem:[%s3485_s9 + $0x28] sm:$0xff] }
 0x153   : > { %v1450_v1 = vmul.f32 0.5, %v1434_v53  ;;  %v3284_v46 = vsel %vm480_vm3, %v1484_v35, %v1485_v39  ;;  %v1464_v17 = vmul.f32 %v1448_v45, %v3252_v49  ;;  %v3291_v54 = vsel %vm480_vm3, %v1490_v44, %v1491_v47  ;;  %1785 = vmatpush.bf16.msra.mxu3 %v2290_v16  ;;  %v1554_v39 = vld [vmem:[%s3482_s6] sm:$0x1] }
 0x154   : > { %v1496_v15 = vrot.slane %v1459_v57, 7  ;;  %v1497_v4 = vrot.slane %v1460_v63, 7  ;;  %v1465_v38 = vmul.f32 %v1449_v10, %v3256_v21  ;;  %v1499_v52 = vrot.slane %v1461_v2, 7  ;;  %1688 = vmatpush.bf16.msrb.mxu2 %v2281_v41  ;;  %v2276_v57 = vld [vmem:[%s3483_s7 + $0x8] sm:$0xff]  ;;  %v2275_v45 = vld [vmem:[%s3483_s7] sm:$0xff] }
 0x155   : > { %v1516_v12 = vadd.f32 %v3280_v42, %v3284_v46  ;;  %v1466_v3 = vmul.f32 %v1450_v1, %v3260_v50  ;;  %v3301_v49 = vsel %vm480_vm3, %v1493_v8, %v1494_v51  ;;  %v1500_v28 = vrot.slane %v1462_v48, 7  ;;  %v2280_v50 = vld [vmem:[%s3483_s7 + $0x28] sm:$0xff]  ;;  %v2287_v51 = vld [vmem:[%s3485_s9 + $0x20] sm:$0xff] }
 0x156   : > { %v2510_v30 = vmov 64.0   ;;  %v3305_v21 = vsel %vm480_vm3, %v1496_v15, %v1497_v4  ;;  %v1502_v40 = vrot.slane %v1463_v24, 7  ;;  %v1503_v6 = vrot.slane %v1464_v17, 7  ;;  %v2286_v24 = vld [vmem:[%s3485_s9 + $0x18] sm:$0xff]  ;;  %v2284_v17 = vld [vmem:[%s3485_s9 + $0x8] sm:$0xff]  ;;  %v2283_v4 = vld [vmem:[%s3485_s9] sm:$0xff] }
 0x157   : > { %v1517_v25 = vadd.f32 %v1516_v12, %v3291_v54  ;;  %2423 = vrcp.f32 %v2510_v30  ;;  %v3312_v62 = vsel %vm480_vm3, %v1499_v52, %v1500_v28  ;;  %v1505_v43 = vrot.slane %v1465_v38, 7  ;;  %1786 = vmatpush.bf16.msra.mxu3 %v2289_v60  ;;  %v1638_v15 = vld [vmem:[%s3484_s8] sm:$0x1] }
 0x158   : > { %v1506_v59 = vrot.slane %v1466_v3, 7  ;;  %v3316_v7 = vsel %vm480_vm3, %v1502_v40, %v1503_v6  ;;  %1689 = vmatpush.bf16.msrb.mxu2 %v2280_v50 }
 0x159   : > { %v1518_v26 = vadd.f32 %v1517_v25, %v3301_v49 }
 0x15a   : > { %v3320_v61 = vsel %vm480_vm3, %v1505_v43, %v1506_v59 }
 0x15b   : > { %v1519_v19 = vadd.f32 %v1518_v26, %v3305_v21  ;;  %1787 = vmatpush.bf16.msra.mxu3 %v2288_v20 }
 0x15c   : > { %1690 = vmatpush.bf16.msrb.mxu2 %v2279_v37  ;;  %v2316_v37 = vld [vmem:[%s2660_s14 + $0x8] sm:$0xff]  }
 0x15d   : > { %v2424_v23 = vpop.eup %2423  ;;  %v1520_v34 = vadd.f32 %v1519_v19, %v3312_v62  ;;  %v2298_v19 = vld [vmem:[%s3487_s11 + $0x38] sm:$0xff]  ;;  %v2306_v16 = vunpack.c.l.bf16 %v2316_v37  ;;  %v2307_v60 = vunpack.c.h.bf16 %v2316_v37 }
 0x15e   : > { %v1530_v29 = vmul.f32 64.0, %v2424_v23  ;;  %vm1534_vm7 = vweird.f32 %v2424_v23  ;;  %1910 = vmatpush.bf16.msra.mxu1 %v2298_v19 }
 0x15f   : > { %v1521_v0 = vadd.f32 %v1520_v34, %v3316_v7  ;;  %1788 = vmatpush.bf16.msra.mxu3 %v2287_v51 }
 0x160   : > { %v1531_v36 = vsub.f32 1.0, %v1530_v29  ;;  %1691 = vmatpush.bf16.msrb.mxu2 %v2278_v55 }
 0x161   : > { %v1522_v27 = vadd.f32 %v1521_v0, %v3320_v61 }
 0x162   : > { %v1532_v11 = vmul.f32 %v2424_v23, %v1531_v36 }
 0x163   : > { %v1523_v58 = vrot.slane %v1522_v27, 4  ;;  %1789 = vmatpush.bf16.msra.mxu3 %v2286_v24 }
 0x164   : > { %v1533_v33 = vadd.f32 %v2424_v23, %v1532_v11  ;;  %1692 = vmatpush.bf16.msrb.mxu2 %v2277_v18  ;;  %v2301_v11 = vld [vmem:[%s2660_s14] sm:$0xff]  }
 0x165   : > { %v1524_v31 = vadd.f32 %v1523_v58, %v1522_v27  ;;  %v2292_v27 = vld [vmem:[%s3487_s11 + $0x8] sm:$0xff]  ;;  %v2373_v58 = vld [vmem:[%s3486_s10] ss:$0 sm:$0xff] }
 0x166   : > { %v1535_v22 = vsel %vm1534_vm7, %v2424_v23, %v1533_v33  ;;  %v2297_v23 = vld [vmem:[%s3487_s11 + $0x30] sm:$0xff]  ;;  %v2303_v33 = vunpack.c.h.bf16 %v2301_v11 }
 0x167   : > { %v1525_v35 = vrot.slane %v1524_v31, 2  ;;  %1790 = vmatpush.bf16.msra.mxu3 %v2285_v56  ;;  %1911 = vmatpush.bf16.msra.mxu1 %v2297_v23  ;;  %v2318_v56 = vld [vmem:[%s2660_s14 + $0x18] sm:$0xff]  }
 0x168   : > { %1693 = vmatpush.bf16.msrb.mxu2 %v2276_v57 }
 0x169   : > { %v1526_v32 = vadd.f32 %v1525_v35, %v1524_v31  ;;  %v2302_v35 = vunpack.c.l.bf16 %v2301_v11 }
 0x16b   : > { %v1527_v14 = vrot.slane %v1526_v32, 1  ;;  %1791 = vmatpush.bf16.msra.mxu3 %v2284_v17 }
 0x16c   : > { %1694 = vmatpush.bf16.msrb.mxu2 %v2275_v45 }
 0x16d   : > { %v1528_v9 = vadd.f32 %v1527_v14, %v1526_v32 }
 0x16f   : > { %v1536_v13 = vmul.f32 %v1535_v22, %v1528_v9  ;;  %1792 = vmatpush.bf16.msra.mxu3 %v2283_v4  ;;  %v2315_v4 = vunpack.c.h.bf16 %v2318_v56 }
 0x171   : > { %v1537_v5 = vpack.c.bf16 %v1536_v13, %v1536_v13 }
 0x173   : > { %1611 = vmatmul.bf16.vlgmr.msra.gmra.mxu2 %v1537_v5 }
 0x1f6   : > { %v1612_v53 = vpop.f32.mrf.mxu2 }
 0x1f7   : > { %v1613_v63 = vadd.f32 %v1612_v53, %v1554_v39 }
 0x1f9   : > { %v1616_v44 = vmul.f32 0.5, %v1613_v63 }
 0x1fb   : > { %2425 = vtanh.f32 %v1616_v44 }
 0x1fe   : > { %v1614_v10 = vpop.f32.mrf.mxu2 }
 0x201   : > { %v2426_v2 = vpop.eup %2425 }
 0x202   : > { %v1618_v48 = vadd.f32 1.0, %v2426_v2 }
 0x204   : > { %v1619_v47 = vmul.f32 0.5, %v1618_v48 }
 0x206   : > { %v1620_v1 = vmul.f32 %v1619_v47, %v1613_v63  ;;  %v2317_v63 = vld [vmem:[%s2660_s14 + $0x10] sm:$0xff]   ;;  %s431_s14 = sand.u32 1, %s2499_s26  }
 0x207   : > { %v2310_v10 = vunpack.c.l.bf16 %v2317_v63  ;;  %v2311_v2 = vunpack.c.h.bf16 %v2317_v63  ;;  %s2070_s24 = sshll.u32 %s431_s14, 6  ;;  %s1989_s29 = scalar_lea.sflag [#allocation4], %s431_s14 }
 0x208   : > { %v1621_v8 = vpack.c.bf16 %v1620_v1, %v1620_v1  ;;  %s3419_s30 = scalar_lea.vmem [#allocation3], %s2070_s24 }
 0x209   : > { %s2001_s27 = sshll.u32 %s3419_s30, 4  ;;  %s2002_s27 = int_to_ptr.vmem [resolvable:$true] %s2001_s27 }
 0x20a   : > { %1695 = vmatmul.bf16.vlgmr.msrb.gmra.mxu2 %v1621_v8 }
 0x28d   : > { %v1696_v38 = vpop.f32.mrf.mxu2 }
 0x28e   : > { %v1697_v52 = vadd.f32 %v1696_v38, %v1638_v15  ;;  %v2314_v15 = vunpack.c.l.bf16 %v2318_v56 }
 0x290   : > { %v1700_v12 = vmul.f32 0.5, %v1697_v52 }
 0x292   : > { %2427 = vtanh.f32 %v1700_v12 }
 0x295   : > { %v1698_v41 = vpop.f32.mrf.mxu2 }
 0x298   : > { %v2428_v3 = vpop.eup %2427 }
 0x299   : > { %v1702_v28 = vadd.f32 1.0, %v2428_v3 }
 0x29b   : > { %v1703_v25 = vmul.f32 0.5, %v1702_v28  ;;  %v3411_v28 = vld [vmem:[%s3488_s12] ss:$0 sm:$0xff] }
 0x29d   : > { %v1704_v30 = vperm.slane %v1703_v25, 0 }
 0x29f   : > { %v1705_v40 = vmul.f32 %v1704_v30, %v3284_v46  ;;  %v1706_v6 = vmul.f32 %v1704_v30, %v3280_v42  ;;  %v1707_v50 = vmul.f32 %v1704_v30, %v3291_v54  ;;  %v1708_v43 = vmul.f32 %v1704_v30, %v3301_v49  ;;  %v2296_v42 = vld [vmem:[%s3487_s11 + $0x28] sm:$0xff]  ;;  %v2295_v49 = vld [vmem:[%s3487_s11 + $0x20] sm:$0xff] }
 0x2a0   : > { %v1709_v46 = vmul.f32 %v1704_v30, %v3305_v21  ;;  %v1710_v54 = vmul.f32 %v1704_v30, %v3312_v62  ;;  %1912 = vmatpush.bf16.msra.mxu1 %v2296_v42  ;;  %v1711_v29 = vmul.f32 %v1704_v30, %v3316_v7  ;;  %v1712_v0 = vmul.f32 %v1704_v30, %v3320_v61  ;;  %v2294_v21 = vld [vmem:[%s3487_s11 + $0x18] sm:$0xff]  ;;  %v2293_v62 = vld [vmem:[%s3487_s11 + $0x10] sm:$0xff]  ;;  %v2291_v7 = vld [vmem:[%s3487_s11] sm:$0xff] }
 0x2a1   : > { %v1713_v26 = vpack.c.bf16 %v1706_v6, %v1705_v40  ;;  %v1714_v59 = vpack.c.bf16 %v1708_v43, %v1707_v50 }
 0x2a2   : > { %v1715_v34 = vpack.c.bf16 %v1710_v54, %v1709_v46  ;;  %v1716_v36 = vpack.c.bf16 %v1712_v0, %v1711_v29 }
 0x2a3   : > { %1793 = vmatmul.bf16.vlgmr.msra.gmra.mxu3 %v1713_v26 }
 0x2a4   : > { %1913 = vmatpush.bf16.msra.mxu1 %v2295_v49 }
 0x2a8   : > { %1914 = vmatpush.bf16.msra.mxu1 %v2294_v21 }
 0x2ac   : > { %1915 = vmatpush.bf16.msra.mxu1 %v2293_v62 }
 0x2b0   : > { %1916 = vmatpush.bf16.msra.mxu1 %v2292_v27 }
 0x2b3   : > { %1798 = vmatmul.bf16.gmra.mxu3 %v1714_v59 }
 0x2b4   : > { %1917 = vmatpush.bf16.msra.mxu1 %v2291_v7 }
 0x2c3   : > { %1803 = vmatmul.bf16.gmra.mxu3 %v1715_v34 }
 0x2d3   : > { %1808 = vmatmul.bf16.gmra.mxu3 %v1716_v36 }
 0x326   : > { %v1794_v61 = vpop.f32.mrf.mxu3 }
 0x327   : > { %v1795_v31 = vadd.f32 %v2373_v58, %v1794_v61 }
 0x329   : > { %v1830_v22 = vadd.f32 %v2302_v35, %v1795_v31 }
 0x32e   : > { %v1796_v32 = vpop.f32.mrf.mxu3 }
 0x32f   : > { %v1797_v14 = vadd.f32 %v2373_v58, %v1796_v32 }
 0x331   : > { %v1831_v9 = vadd.f32 %v2303_v33, %v1797_v14 }
 0x333   : > { %v1838_v13 = vpack.c.bf16 %v1831_v9, %v1830_v22 }
 0x335   : > { %1918 = vmatmul.bf16.vlgmr.msra.gmra.mxu1 %v1838_v13 }
 0x336   : > { %v1799_v5 = vpop.f32.mrf.mxu3 }
 0x337   : > { %v1800_v55 = vadd.f32 %v2373_v58, %v1799_v5 }
 0x339   : > { %v1832_v57 = vadd.f32 %v2306_v16, %v1800_v55 }
 0x33e   : > { %v1801_v18 = vpop.f32.mrf.mxu3 }
 0x33f   : > { %v1802_v20 = vadd.f32 %v2373_v58, %v1801_v18 }
 0x341   : > { %v1833_v39 = vadd.f32 %v2307_v60, %v1802_v20 }
 0x343   : > { %v1839_v53 = vpack.c.bf16 %v1833_v39, %v1832_v57 }
 0x345   : > { %1923 = vmatmul.bf16.gmra.mxu1 %v1839_v53 }
 0x346   : > { %v1804_v45 = vpop.f32.mrf.mxu3 }
 0x347   : > { %v1805_v44 = vadd.f32 %v2373_v58, %v1804_v45 }
 0x349   : > { %v1834_v1 = vadd.f32 %v2310_v10, %v1805_v44 }
 0x34e   : > { %v1806_v48 = vpop.f32.mrf.mxu3 }
 0x34f   : > { %v1807_v47 = vadd.f32 %v2373_v58, %v1806_v48 }
 0x351   : > { %v1835_v8 = vadd.f32 %v2311_v2, %v1807_v47 }
 0x353   : > { %v1840_v51 = vpack.c.bf16 %v1835_v8, %v1834_v1 }
 0x355   : > { %1928 = vmatmul.bf16.gmra.mxu1 %v1840_v51 }
 0x356   : > { %v1809_v24 = vpop.f32.mrf.mxu3 }
 0x357   : > { %v1810_v17 = vadd.f32 %v2373_v58, %v1809_v24 }
 0x359   : > { %v1836_v12 = vadd.f32 %v2314_v15, %v1810_v17 }
 0x35e   : > { %v1811_v38 = vpop.f32.mrf.mxu3 }
 0x35f   : > { %v1812_v52 = vadd.f32 %v2373_v58, %v1811_v38 }
 0x361   : > { %v1837_v41 = vadd.f32 %v2315_v4, %v1812_v52 }
 0x363   : > { %v1841_v3 = vpack.c.bf16 %v1837_v41, %v1836_v12 }
 0x365   : > { %1933 = vmatmul.bf16.gmra.mxu1 %v1841_v3 }
 0x3b2   : > { %v1919_v25 = vpop.f32.mrf.mxu1 }
 0x3b3   : > { %v1920_v30 = vadd.f32 %v3411_v28, %v1919_v25 }
 0x3b5   : > { %v1939_v40 = vmul.f32 0.5, %v1920_v30 }
 0x3b7   : > { %2429 = vtanh.f32 %v1939_v40 }
 0x3ba   : > { %v1921_v6 = vpop.f32.mrf.mxu1 }
 0x3bb   : > { %v1922_v26 = vadd.f32 %v3411_v28, %v1921_v6 }
 0x3bd   : > { %v2430_v50 = vpop.eup %2429  ;;  %v1940_v43 = vmul.f32 0.5, %v1922_v26 }
 0x3be   : > { %v1955_v59 = vadd.f32 1.0, %v2430_v50 }
 0x3bf   : > { %2431 = vtanh.f32 %v1940_v43 }
 0x3c0   : > { %v1963_v19 = vmul.f32 0.5, %v1955_v59 }
 0x3c2   : > { %v1971_v23 = vmul.f32 %v1963_v19, %v1920_v30  ;;  %v1924_v42 = vpop.f32.mrf.mxu1 }
 0x3c3   : > { %v1925_v46 = vadd.f32 %v3411_v28, %v1924_v42 }
 0x3c4   : > { %1980 = vst.msk [vmem:[%s3419_s30] sm:$0xff] %vm1979_vm8, %v1971_v23 }
 0x3c5   : > { %v2432_v54 = vpop.eup %2431  ;;  %v1941_v49 = vmul.f32 0.5, %v1925_v46 }
 0x3c6   : > { %v1956_v34 = vadd.f32 1.0, %v2432_v54 }
 0x3c7   : > { %2433 = vtanh.f32 %v1941_v49 }
 0x3c8   : > { %v1964_v29 = vmul.f32 0.5, %v1956_v34 }
 0x3ca   : > { %v1972_v0 = vmul.f32 %v1964_v29, %v1922_v26  ;;  %v1926_v36 = vpop.f32.mrf.mxu1 }
 0x3cb   : > { %v1927_v21 = vadd.f32 %v3411_v28, %v1926_v36 }
 0x3cc   : > { %1981 = vst.msk [vmem:[%s3419_s30 + $0x8] sm:$0xff] %vm1979_vm8, %v1972_v0 }
 0x3cd   : > { %v2434_v62 = vpop.eup %2433  ;;  %v1942_v27 = vmul.f32 0.5, %v1927_v21 }
 0x3ce   : > { %v1957_v7 = vadd.f32 1.0, %v2434_v62 }
 0x3cf   : > { %2435 = vtanh.f32 %v1942_v27 }
 0x3d0   : > { %v1965_v61 = vmul.f32 0.5, %v1957_v7 }
 0x3d2   : > { %v1973_v58 = vmul.f32 %v1965_v61, %v1925_v46  ;;  %v1929_v11 = vpop.f32.mrf.mxu1 }
 0x3d3   : > { %v1930_v31 = vadd.f32 %v3411_v28, %v1929_v11 }
 0x3d4   : > { %1982 = vst.msk [vmem:[%s3419_s30 + $0x10] sm:$0xff] %vm1979_vm8, %v1973_v58 }
 0x3d5   : > { %v2436_v35 = vpop.eup %2435  ;;  %v1943_v33 = vmul.f32 0.5, %v1930_v31 }
 0x3d6   : > { %v1958_v32 = vadd.f32 1.0, %v2436_v35 }
 0x3d7   : > { %2437 = vtanh.f32 %v1943_v33 }
 0x3d8   : > { %v1966_v14 = vmul.f32 0.5, %v1958_v32 }
 0x3da   : > { %v1974_v22 = vmul.f32 %v1966_v14, %v1927_v21  ;;  %v1931_v9 = vpop.f32.mrf.mxu1 }
 0x3db   : > { %v1932_v13 = vadd.f32 %v3411_v28, %v1931_v9 }
 0x3dc   : > { %1983 = vst.msk [vmem:[%s3419_s30 + $0x18] sm:$0xff] %vm1979_vm8, %v1974_v22 }
 0x3dd   : > { %v2438_v5 = vpop.eup %2437  ;;  %v1944_v37 = vmul.f32 0.5, %v1932_v13 }
 0x3de   : > { %v1959_v55 = vadd.f32 1.0, %v2438_v5 }
 0x3df   : > { %2439 = vtanh.f32 %v1944_v37 }
 0x3e0   : > { %v1967_v16 = vmul.f32 0.5, %v1959_v55 }
 0x3e2   : > { %v1975_v60 = vmul.f32 %v1967_v16, %v1930_v31  ;;  %v1934_v18 = vpop.f32.mrf.mxu1 }
 0x3e3   : > { %v1935_v20 = vadd.f32 %v3411_v28, %v1934_v18 }
 0x3e4   : > { %1984 = vst.msk [vmem:[%s3419_s30 + $0x20] sm:$0xff] %vm1979_vm8, %v1975_v60 }
 0x3e5   : > { %v2440_v57 = vpop.eup %2439  ;;  %v1945_v39 = vmul.f32 0.5, %v1935_v20 }
 0x3e6   : > { %v1960_v53 = vadd.f32 1.0, %v2440_v57 }
 0x3e7   : > { %2441 = vtanh.f32 %v1945_v39 }
 0x3e8   : > { %v1968_v45 = vmul.f32 0.5, %v1960_v53 }
 0x3ea   : > { %v1976_v63 = vmul.f32 %v1968_v45, %v1932_v13  ;;  %v1936_v44 = vpop.f32.mrf.mxu1 }
 0x3eb   : > { %v1937_v10 = vadd.f32 %v3411_v28, %v1936_v44 }
 0x3ec   : > { %1985 = vst.msk [vmem:[%s3419_s30 + $0x28] sm:$0xff] %vm1979_vm8, %v1976_v63 }
 0x3ed   : > { %v2442_v2 = vpop.eup %2441  ;;  %v1946_v48 = vmul.f32 0.5, %v1937_v10 }
 0x3ee   : > { %v1961_v47 = vadd.f32 1.0, %v2442_v2 }
 0x3ef   : > { %2443 = vtanh.f32 %v1946_v48 }
 0x3f0   : > { %v1969_v1 = vmul.f32 0.5, %v1961_v47 }
 0x3f2   : > { %v1977_v8 = vmul.f32 %v1969_v1, %v1935_v20 }
 0x3f4   : > { %1986 = vst.msk [vmem:[%s3419_s30 + $0x30] sm:$0xff] %vm1979_vm8, %v1977_v8 }
 0x3f5   : > { %v2444_v51 = vpop.eup %2443 }
 0x3f6   : > { %v1962_v24 = vadd.f32 1.0, %v2444_v51 }
 0x3f8   : > { %v1970_v56 = vmul.f32 0.5, %v1962_v24 }
 0x3fa   : > { %v1978_v17 = vmul.f32 %v1970_v56, %v1937_v10 }
 0x3fc   : > { %1987 = vst.msk [vmem:[%s3419_s30 + $0x38] sm:$0xff] %vm1979_vm8, %v1978_v17 }
 0x3fd   : > { %2472 = shalt.err (!%p2469_p3)
}
 0x3fe   : > { %s2511_s14 = smov 128   ;;  %s2512_s30 = smov 8  }
 0x3ff   : > { %2319 = dma.vmem_to_hbm [thread:$0]  (%p2621_p5), %s2002_s27, 1024, %s2004_s17, %s1989_s29, %s2511_s14, %s2511_s14, %s2512_s30  }
 0x400 PF: > { %p2325_p4 = scmp.ge.s32.totalorder %s2507_s28, 2  ;;  %s2018_s24 = sand.u32 1, %s2495_s25  }
 0x401   : > { %s2019_s15 = scalar_lea.sflag [#allocation4], %s2018_s24 }
 0x402   : > { %p2322_p7 = pnand %p2325_p4, %p2625_p6 }
 0x404   : > { %p2323_p8 = pneg %p2322_p7 }
 0x406   : > { %2490 = dma.done.wait (%p2323_p8), %s2019_s15, 1024  }
 0x407   : > { %2492 = vsyncadd (%p2323_p8), %s2019_s15, 4294966272  ;;  %s3505_s28 = sld [smem:[#allocation7_spill]]  ;;  %s3508_s25 = smov %s2499_s26 }
 0x408   : > { %s3506_s22 = sld [smem:[#allocation6_spill]] }
 0x409   : > { %s3507_s27 = sld [smem:[#allocation8_spill]] }
 0x40d   : > { %p23_p9 = scmp.ge.s32.totalorder %s3505_s28, 4  }
 0x40e   : > { %s3509_s26 = smov %s3506_s22 }
 0x40f   :  { %25 = sbr.rel (!%p23_p9) target bundleno = 3 (0x3), region = 110 }
 0x414   :  { %2025 = vsyncpa [#allocation4], 1 }
 0x415   :  { %2027 = vsyncpa [#allocation4 + $0x1], 1 }

// kernel: efficientdet_v1_forward.5
= control target key start
LH: loop header
LB: loop body
LE: loop exit
PB: predicated region body
PF: predicated region fallthrough
CT: control target
= control target key end

     0   :  { %s4255_s30 = smov 0   ;;  %s8310_s0 = inlined_call_operand.vmem [shape: bf16[2,16,16,128], index: 0, kind: input, shape index: {}]   ;;  %s8311_s1 = inlined_call_operand.vmem [shape: f32[9,128], index: 1, kind: input, shape index: {}]   ;;  %s8312_s2 = inlined_call_operand.vmem [shape: f32[1,128], index: 2, kind: input, shape index: {}]   ;;  %s8313_s3 = inlined_call_operand.vmem [shape: bf16[128,128], index: 3, kind: input, shape index: {}]   ;;  %s8314_s4 = inlined_call_operand.vmem [shape: f32[1,128], index: 4, kind: input, shape index: {}]   ;;  %s8315_s5 = inlined_call_operand.vmem [shape: bf16[128,128], index: 5, kind: input, shape index: {}]   ;;  %s8316_s6 = inlined_call_operand.vmem [shape: f32[1,128], index: 6, kind: input, shape index: {}]   ;;  %s8317_s7 = inlined_call_operand.vmem [shape: bf16[128,128], index: 7, kind: input, shape index: {}]   ;;  %s8318_s8 = inlined_call_operand.vmem [shape: f32[1,128], index: 8, kind: input, shape index: {}]   ;;  %s8319_s9 = inlined_call_operand.vmem [shape: bf16[2,16,16,128], index: 9, kind: output, shape index: {}]  }
   0x1 LB: > { %s3741_s10 = sadd.s32 4294967295, %s4201_s30   ;;  %p3745_p0 = scmp.ge.s32.totalorder %s4201_s30, 1  ;;  %s4201_s30 = sphi %s4255_s30, %s19_s30  }
   0x2   : > { %p287_p1 = scmp.lt.s32.totalorder %s4201_s30, 3 }
   0x4   : > { %p288_p2 = pnand %p3745_p0, %p287_p1 }
   0x6   : > { %291 = sbr.rel (%p288_p2) target bundleno = 1274 (0x4fa), region = 56 }
   0xb   : > { %v3857_v0 = vld [vmem:[%s8313_s3 + $0x38] sm:$0xff]  ;;  %v4203_v1 = vmov 0   ;;  %v3856_v2 = vld [vmem:[%s8313_s3 + $0x30] sm:$0xff]  ;;  %vm343_vm0 = vcmask 1043459   ;;  %vm344_vm1 = vsmask.f32 7950 }
   0xc   : > { %334 = vst [vmem:[#allocation2] sm:$0xf] %v4203_v1  ;;  %3219 = vmatpush.bf16.msra.mxu0 %v3857_v0  ;;  %v349_v3 = vld [vmem:[#allocation2 + $0x10] sm:$0x8]  ;;  %v352_v4 = vld [vmem:[#allocation2 + $0x20] sm:$0x8]  ;;  %vm4269_vm2 = vmand %vm343_vm0, %vm344_vm1 }
   0xd   : > { %335 = vst [vmem:[#allocation2 + $0x4] sm:$0xf] %v4203_v1  ;;  %v3855_v6 = vld [vmem:[%s8313_s3 + $0x28] sm:$0xff]  ;;  %v350_v7 = vsel %vm4269_vm2, 0, %v349_v3  ;;  %v355_v8 = vld [vmem:[#allocation2 + $0x30] sm:$0x8] }
   0xe   : > { %336 = vst [vmem:[#allocation2 + $0x8] sm:$0xf] %v4203_v1  ;;  %v353_v9 = vsel %vm4269_vm2, 0, %v352_v4  ;;  %v358_v10 = vld [vmem:[#allocation2 + $0x40] sm:$0x8]  ;;  %v356_v14 = vsel %vm4269_vm2, 0, %v355_v8 }
   0xf   : > { %337 = vst [vmem:[#allocation2 + $0xc] sm:$0xf] %v4203_v1  ;;  %v361_v12 = vld [vmem:[#allocation2 + $0x50] sm:$0x8]  ;;  %v364_v15 = vld [vmem:[#allocation2 + $0x60] sm:$0x8] }
  0x10   : > { %339 = vst [vmem:[#allocation2 + $0x110] sm:$0xf] %v4203_v1  ;;  %3220 = vmatpush.bf16.msra.mxu0 %v3856_v2  ;;  %v3854_v16 = vld [vmem:[%s8313_s3 + $0x20] sm:$0xff]  ;;  %v359_v17 = vsel %vm4269_vm2, 0, %v358_v10  ;;  %v367_v18 = vld [vmem:[#allocation2 + $0x70] sm:$0x8] }
  0x11   : > { %340 = vst [vmem:[#allocation2 + $0x114] sm:$0xf] %v4203_v1  ;;  %v362_v19 = vsel %vm4269_vm2, 0, %v361_v12  ;;  %v370_v20 = vld [vmem:[#allocation2 + $0x80] sm:$0x8]  ;;  %v365_v21 = vsel %vm4269_vm2, 0, %v364_v15 }
  0x12   : > { %341 = vst [vmem:[#allocation2 + $0x118] sm:$0xf] %v4203_v1  ;;  %v373_v22 = vld [vmem:[#allocation2 + $0x90] sm:$0x8]  ;;  %v368_v23 = vsel %vm4269_vm2, 0, %v367_v18  ;;  %v3853_v25 = vld [vmem:[%s8313_s3 + $0x18] sm:$0xff] }
  0x13   : > { %342 = vst [vmem:[#allocation2 + $0x11c] sm:$0xf] %v4203_v1  ;;  %v346_v11 = vld [vmem:[#allocation2] sm:$0x8]  ;;  %v371_v26 = vsel %vm4269_vm2, 0, %v370_v20  ;;  %v374_v28 = vsel %vm4269_vm2, 0, %v373_v22 }
  0x14   : > { %v347_v13 = vsel %vm4269_vm2, 0, %v346_v11  ;;  %351 = vst [vmem:[#allocation2 + $0x10] sm:$0x8] %v350_v7  ;;  %3221 = vmatpush.bf16.msra.mxu0 %v3855_v6  ;;  %v376_v24 = vld [vmem:[#allocation2 + $0xa0] sm:$0x8]  ;;  %v3852_v34 = vld [vmem:[%s8313_s3 + $0x10] sm:$0xff] }
  0x15   : > { %348 = vst [vmem:[#allocation2] sm:$0x8] %v347_v13  ;;  %v379_v27 = vld [vmem:[#allocation2 + $0xb0] sm:$0x8]  ;;  %v382_v29 = vld [vmem:[#allocation2 + $0xc0] sm:$0x8] }
  0x16   : > { %354 = vst [vmem:[#allocation2 + $0x20] sm:$0x8] %v353_v9  ;;  %v377_v30 = vsel %vm4269_vm2, 0, %v376_v24  ;;  %v385_v31 = vld [vmem:[#allocation2 + $0xd0] sm:$0x8]  ;;  %v380_v32 = vsel %vm4269_vm2, 0, %v379_v27 }
  0x17   : > { %357 = vst [vmem:[#allocation2 + $0x30] sm:$0x8] %v356_v14  ;;  %v388_v33 = vld [vmem:[#allocation2 + $0xe0] sm:$0x8]  ;;  %v383_v35 = vsel %vm4269_vm2, 0, %v382_v29  ;;  %v386_v37 = vsel %vm4269_vm2, 0, %v385_v31 }
  0x18   : > { %360 = vst [vmem:[#allocation2 + $0x40] sm:$0x8] %v359_v17  ;;  %3222 = vmatpush.bf16.msra.mxu0 %v3854_v16  ;;  %v391_v36 = vld [vmem:[#allocation2 + $0xf0] sm:$0x8]  ;;  %v394_v38 = vld [vmem:[#allocation2 + $0x100] sm:$0x8] }
  0x19   : > { %363 = vst [vmem:[#allocation2 + $0x50] sm:$0x8] %v362_v19  ;;  %vm400_vm3 = vcmask 1040384   ;;  %v3851_v39 = vld [vmem:[%s8313_s3 + $0x8] sm:$0xff]  ;;  %v389_v40 = vsel %vm4269_vm2, 0, %v388_v33  ;;  %v392_v42 = vsel %vm4269_vm2, 0, %v391_v36 }
  0x1a   : > { %366 = vst [vmem:[#allocation2 + $0x60] sm:$0x8] %v365_v21  ;;  %v397_v41 = vld [vmem:[#allocation2 + $0x110] sm:$0x8]  ;;  %v395_v43 = vsel %vm4269_vm2, 0, %v394_v38  ;;  %v3850_v53 = vld [vmem:[%s8313_s3] sm:$0xff] }
  0x1b   : > { %369 = vst [vmem:[#allocation2 + $0x70] sm:$0x8] %v368_v23  ;;  %vm401_vm4 = vsmask.f32 256  ;;  %v403_v45 = vld [vmem:[#allocation2 + $0xc] sm:$0x1] }
  0x1c   : > { %372 = vst [vmem:[#allocation2 + $0x80] sm:$0x8] %v371_v26  ;;  %3223 = vmatpush.bf16.msra.mxu0 %v3853_v25  ;;  %vm4323_vm5 = vmand %vm400_vm3, %vm401_vm4  ;;  %v406_v46 = vld [vmem:[#allocation2 + $0x1c] sm:$0x1]  ;;  %v398_v47 = vsel %vm4269_vm2, 0, %v397_v41  ;;  %p4342_p3 = scmp.lt.s32.totalorder %s3741_s10, 1 }
  0x1d   : > { %375 = vst [vmem:[#allocation2 + $0x90] sm:$0x8] %v374_v28  ;;  %v409_v48 = vld [vmem:[#allocation2 + $0x2c] sm:$0x1]  ;;  %v404_v49 = vsel %vm4323_vm5, 0, %v403_v45  ;;  %v407_v51 = vsel %vm4323_vm5, 0, %v406_v46 }
  0x1e   : > { %378 = vst [vmem:[#allocation2 + $0xa0] sm:$0x8] %v377_v30  ;;  %v412_v50 = vld [vmem:[#allocation2 + $0x3c] sm:$0x1]  ;;  %v415_v52 = vld [vmem:[#allocation2 + $0x4c] sm:$0x1] }
  0x1f   : > { %381 = vst [vmem:[#allocation2 + $0xb0] sm:$0x8] %v380_v32  ;;  %v410_v54 = vsel %vm4323_vm5, 0, %v409_v48  ;;  %v418_v55 = vld [vmem:[#allocation2 + $0x5c] sm:$0x1]  ;;  %v413_v56 = vsel %vm4323_vm5, 0, %v412_v50 }
  0x20   : > { %384 = vst [vmem:[#allocation2 + $0xc0] sm:$0x8] %v383_v35  ;;  %3224 = vmatpush.bf16.msra.mxu0 %v3852_v34  ;;  %v421_v57 = vld [vmem:[#allocation2 + $0x6c] sm:$0x1]  ;;  %v416_v58 = vsel %vm4323_vm5, 0, %v415_v52  ;;  %v419_v60 = vsel %vm4323_vm5, 0, %v418_v55 }
  0x21   : > { %387 = vst [vmem:[#allocation2 + $0xd0] sm:$0x8] %v386_v37  ;;  %v424_v59 = vld [vmem:[#allocation2 + $0x7c] sm:$0x1]  ;;  %v427_v61 = vld [vmem:[#allocation2 + $0x8c] sm:$0x1] }
  0x22   : > { %390 = vst [vmem:[#allocation2 + $0xe0] sm:$0x8] %v389_v40  ;;  %v422_v62 = vsel %vm4323_vm5, 0, %v421_v57  ;;  %v430_v63 = vld [vmem:[#allocation2 + $0x9c] sm:$0x1]  ;;  %v425_v0 = vsel %vm4323_vm5, 0, %v424_v59 }
  0x23   : > { %393 = vst [vmem:[#allocation2 + $0xf0] sm:$0x8] %v392_v42  ;;  %v433_v1 = vld [vmem:[#allocation2 + $0xac] sm:$0x1]  ;;  %s9644_s10 = smov (!%p4342_p3, %s3741_s10), 1  ;;  %v428_v2 = vsel %vm4323_vm5, 0, %v427_v61 }
  0x24   : > { %396 = vst [vmem:[#allocation2 + $0x100] sm:$0x8] %v395_v43  ;;  %3225 = vmatpush.bf16.msra.mxu0 %v3851_v39  ;;  %v436_v3 = vld [vmem:[#allocation2 + $0xbc] sm:$0x1]  ;;  %v431_v4 = vsel %vm4323_vm5, 0, %v430_v63  ;;  %v434_v6 = vsel %vm4323_vm5, 0, %v433_v1 }
  0x25   : > { %399 = vst [vmem:[#allocation2 + $0x110] sm:$0x8] %v398_v47  ;;  %v439_v5 = vld [vmem:[#allocation2 + $0xcc] sm:$0x1]  ;;  %v442_v7 = vld [vmem:[#allocation2 + $0xdc] sm:$0x1] }
  0x26   : > { %405 = vst [vmem:[#allocation2 + $0xc] sm:$0x1] %v404_v49  ;;  %v437_v8 = vsel %vm4323_vm5, 0, %v436_v3  ;;  %v445_v9 = vld [vmem:[#allocation2 + $0xec] sm:$0x1]  ;;  %s3848_s28 = sshll.u32 %s9644_s10, 7 }
  0x27   : > { %408 = vst [vmem:[#allocation2 + $0x1c] sm:$0x1] %v407_v51  ;;  %v440_v10 = vsel %vm4323_vm5, 0, %v439_v5  ;;  %v448_v11 = vld [vmem:[#allocation2 + $0xfc] sm:$0x1]  ;;  %v443_v12 = vsel %vm4323_vm5, 0, %v442_v7  ;;  %s4380_s12 = scalar_lea.vmem %s8310_s0, %s3848_s28  ;;  %s8249_s22 = scalar_lea.vmem %s8319_s9, %s3848_s28 }
  0x28   : > { %411 = vst [vmem:[#allocation2 + $0x2c] sm:$0x1] %v410_v54  ;;  %3226 = vmatpush.bf16.msra.mxu0 %v3850_v53  ;;  %v451_v13 = vld [vmem:[#allocation2 + $0x10c] sm:$0x1]  ;;  %v446_v14 = vsel %vm4323_vm5, 0, %v445_v9  ;;  %v449_v16 = vsel %vm4323_vm5, 0, %v448_v11 }
  0x29   : > { %414 = vst [vmem:[#allocation2 + $0x3c] sm:$0x1] %v413_v56  ;;  %v454_v15 = vld [vmem:[#allocation2 + $0x11c] sm:$0x1]  ;;  %v452_v17 = vsel %vm4323_vm5, 0, %v451_v13  ;;  %v457_v19 = vld [vmem:[%s4380_s12] sm:$0xff]  }
  0x2a   : > { %417 = vst [vmem:[#allocation2 + $0x4c] sm:$0x1] %v416_v58  ;;  %v455_v18 = vsel %vm4323_vm5, 0, %v454_v15  ;;  %v459_v20 = vld [vmem:[%s4380_s12 + $0x8] sm:$0xff]   ;;  %v461_v21 = vld [vmem:[%s4380_s12 + $0x10] sm:$0xff]   ;;  %v463_v22 = vld [vmem:[%s4380_s12 + $0x18] sm:$0xff]  }
  0x2b   : > { %420 = vst [vmem:[#allocation2 + $0x5c] sm:$0x1] %v419_v60  ;;  %v465_v23 = vld [vmem:[%s4380_s12 + $0x20] sm:$0xff]   ;;  %v467_v24 = vld [vmem:[%s4380_s12 + $0x28] sm:$0xff]   ;;  %v469_v25 = vld [vmem:[%s4380_s12 + $0x30] sm:$0xff]   ;;  %vm782_vm6 = vcmask 1046528  }
  0x2c   : > { %423 = vst [vmem:[#allocation2 + $0x6c] sm:$0x1] %v422_v62  ;;  %v471_v26 = vld [vmem:[%s4380_s12 + $0x38] sm:$0xff]   ;;  %v473_v27 = vld [vmem:[%s4380_s12 + $0x40] sm:$0xff]   ;;  %v475_v28 = vld [vmem:[%s4380_s12 + $0x48] sm:$0xff]   ;;  %vm1057_vm7 = vcmask 1045504  }
  0x2d   : > { %426 = vst [vmem:[#allocation2 + $0x7c] sm:$0x1] %v425_v0  ;;  %v477_v29 = vld [vmem:[%s4380_s12 + $0x50] sm:$0xff]   ;;  %v479_v30 = vld [vmem:[%s4380_s12 + $0x58] sm:$0xff]   ;;  %v481_v31 = vld [vmem:[%s4380_s12 + $0x60] sm:$0xff]  }
  0x2e   : > { %429 = vst [vmem:[#allocation2 + $0x8c] sm:$0x1] %v428_v2  ;;  %v483_v32 = vld [vmem:[%s4380_s12 + $0x68] sm:$0xff]   ;;  %v485_v33 = vld [vmem:[%s4380_s12 + $0x70] sm:$0xff]   ;;  %v487_v34 = vld [vmem:[%s4380_s12 + $0x78] sm:$0xff]  }
  0x2f   : > { %432 = vst [vmem:[#allocation2 + $0x9c] sm:$0x1] %v431_v4  ;;  %v522_v35 = vld [vmem:[#allocation2] sm:$0x8]  ;;  %v523_v36 = vld [vmem:[#allocation2 + $0x4] sm:$0xff]  }
  0x30   : > { %435 = vst [vmem:[#allocation2 + $0xac] sm:$0x1] %v434_v6  ;;  %v525_v37 = vld [vmem:[#allocation2 + $0x10] sm:$0x8]  ;;  %v528_v38 = vld [vmem:[#allocation2 + $0x20] sm:$0x8]  ;;  %v4404_v50 = vunpack.c.l.bf16 %v523_v36  ;;  %v4406_v51 = vunpack.c.h.bf16 %v523_v36  ;;  %v571_v54 = vunpack.c.l.bf16 %v522_v35 }
  0x31   : > { %438 = vst [vmem:[#allocation2 + $0xbc] sm:$0x1] %v437_v8  ;;  %v531_v39 = vld [vmem:[#allocation2 + $0x30] sm:$0x8]  ;;  %v534_v40 = vld [vmem:[#allocation2 + $0x40] sm:$0x8]  ;;  %v574_v55 = vunpack.c.l.bf16 %v525_v37  ;;  %v577_v56 = vunpack.c.l.bf16 %v528_v38 }
  0x32   : > { %441 = vst [vmem:[#allocation2 + $0xcc] sm:$0x1] %v440_v10  ;;  %v537_v41 = vld [vmem:[#allocation2 + $0x50] sm:$0x8]  ;;  %v540_v42 = vld [vmem:[#allocation2 + $0x60] sm:$0x8]  ;;  %v580_v57 = vunpack.c.l.bf16 %v531_v39  ;;  %v583_v59 = vunpack.c.l.bf16 %v534_v40 }
  0x33   : > { %444 = vst [vmem:[#allocation2 + $0xdc] sm:$0x1] %v443_v12  ;;  %v543_v43 = vld [vmem:[#allocation2 + $0x70] sm:$0x8]  ;;  %v546_v44 = vld [vmem:[#allocation2 + $0x80] sm:$0x8]  ;;  %v586_v60 = vunpack.c.l.bf16 %v537_v41  ;;  %v589_v61 = vunpack.c.l.bf16 %v540_v42 }
  0x34   : > { %447 = vst [vmem:[#allocation2 + $0xec] sm:$0x1] %v446_v14  ;;  %v549_v45 = vld [vmem:[#allocation2 + $0x90] sm:$0x8]  ;;  %v552_v46 = vld [vmem:[#allocation2 + $0xa0] sm:$0x8]  ;;  %v592_v62 = vunpack.c.l.bf16 %v543_v43  ;;  %v595_v63 = vunpack.c.l.bf16 %v546_v44 }
  0x35   : > { %450 = vst [vmem:[#allocation2 + $0xfc] sm:$0x1] %v449_v16  ;;  %v555_v47 = vld [vmem:[#allocation2 + $0xb0] sm:$0x8]  ;;  %v558_v48 = vld [vmem:[#allocation2 + $0xc0] sm:$0x8]  ;;  %v598_v0 = vunpack.c.l.bf16 %v549_v45  ;;  %v601_v1 = vunpack.c.l.bf16 %v552_v46 }
  0x36   : > { %453 = vst [vmem:[#allocation2 + $0x10c] sm:$0x1] %v452_v17  ;;  %v561_v49 = vld [vmem:[#allocation2 + $0xd0] sm:$0x8]  ;;  %v4408_v52 = vld [vmem:[#allocation2 + $0xe0] sm:$0x8]  ;;  %v604_v2 = vunpack.c.l.bf16 %v555_v47  ;;  %v607_v3 = vunpack.c.l.bf16 %v558_v48 }
  0x37   : > { %456 = vst [vmem:[#allocation2 + $0x11c] sm:$0x1] %v455_v18  ;;  %v4410_v53 = vld [vmem:[#allocation2 + $0xf0] sm:$0x8]  ;;  %v4415_v58 = vld [vmem:[%s8311_s1] ss:$0 sm:$0xff]  ;;  %v610_v4 = vunpack.c.l.bf16 %v561_v49 }
  0x38   : > { %490 = vst [vmem:[#allocation2 + $0x14] sm:$0xff] %v457_v19   ;;  %v4420_v8 = vmul.f32 %v4415_v58, %v571_v54  ;;  %v4424_v9 = vmul.f32 %v4415_v58, %v4404_v50  ;;  %v4428_v10 = vmul.f32 %v4415_v58, %v4406_v51  ;;  %v4431_v11 = vmul.f32 %v4415_v58, %v574_v55 }
  0x39   : > { %492 = vst [vmem:[#allocation2 + $0x24] sm:$0xff] %v459_v20   ;;  %v4434_v13 = vmul.f32 %v4415_v58, %v577_v56  ;;  %v4437_v14 = vmul.f32 %v4415_v58, %v580_v57  ;;  %v4440_v15 = vmul.f32 %v4415_v58, %v583_v59  ;;  %v4443_v16 = vmul.f32 %v4415_v58, %v586_v60 }
  0x3a   : > { %494 = vst [vmem:[#allocation2 + $0x34] sm:$0xff] %v461_v21   ;;  %v4446_v18 = vmul.f32 %v4415_v58, %v589_v61  ;;  %v4449_v19 = vmul.f32 %v4415_v58, %v592_v62  ;;  %v4452_v20 = vmul.f32 %v4415_v58, %v595_v63  ;;  %v4455_v21 = vmul.f32 %v4415_v58, %v598_v0 }
  0x3b   : > { %496 = vst [vmem:[#allocation2 + $0x44] sm:$0xff] %v463_v22  }
  0x3c   : > { %498 = vst [vmem:[#allocation2 + $0x54] sm:$0xff] %v465_v23  }
  0x3d   : > { %500 = vst [vmem:[#allocation2 + $0x64] sm:$0xff] %v467_v24  }
  0x3e   : > { %502 = vst [vmem:[#allocation2 + $0x74] sm:$0xff] %v469_v25   ;;  %v4462_v25 = vmul.f32 %v4415_v58, %v601_v1 }
  0x3f   : > { %504 = vst [vmem:[#allocation2 + $0x84] sm:$0xff] %v471_v26   ;;  %v526_v7 = vld [vmem:[#allocation2 + $0x14] sm:$0xff]   ;;  %v4465_v26 = vmul.f32 %v4415_v58, %v604_v2 }
  0x40   : > { %506 = vst [vmem:[#allocation2 + $0x94] sm:$0xff] %v473_v27   ;;  %v529_v12 = vld [vmem:[#allocation2 + $0x24] sm:$0xff]   ;;  %v4457_v23 = vunpack.c.l.bf16 %v526_v7  ;;  %v4459_v24 = vunpack.c.h.bf16 %v526_v7 }
  0x41   : > { %508 = vst [vmem:[#allocation2 + $0xa4] sm:$0xff] %v475_v28   ;;  %v532_v17 = vld [vmem:[#allocation2 + $0x34] sm:$0xff]   ;;  %v4467_v28 = vunpack.c.l.bf16 %v529_v12 }
  0x42   : > { %510 = vst [vmem:[#allocation2 + $0xb4] sm:$0xff] %v477_v29   ;;  %v535_v22 = vld [vmem:[#allocation2 + $0x44] sm:$0xff]   ;;  %v4469_v29 = vunpack.c.h.bf16 %v529_v12  ;;  %v4483_v35 = vmul.f32 %v4415_v58, %v4457_v23  ;;  %v4487_v36 = vmul.f32 %v4415_v58, %v4459_v24 }
  0x43   : > { %512 = vst [vmem:[#allocation2 + $0xc4] sm:$0xff] %v479_v30   ;;  %v538_v27 = vld [vmem:[#allocation2 + $0x54] sm:$0xff]   ;;  %v4472_v30 = vmul.f32 %v4415_v58, %v607_v3  ;;  %v4489_v38 = vunpack.c.l.bf16 %v535_v22  ;;  %v4491_v39 = vunpack.c.h.bf16 %v535_v22  ;;  %v4495_v40 = vmul.f32 %v4415_v58, %v4467_v28 }
  0x44   : > { %514 = vst [vmem:[#allocation2 + $0xd4] sm:$0xff] %v481_v31   ;;  %v4475_v31 = vmul.f32 %v4415_v58, %v610_v4  ;;  %v4499_v41 = vmul.f32 %v4415_v58, %v4469_v29  ;;  %v4501_v43 = vunpack.c.l.bf16 %v538_v27  ;;  %v4503_v44 = vunpack.c.h.bf16 %v538_v27 }
  0x45   : > { %516 = vst [vmem:[#allocation2 + $0xe4] sm:$0xff] %v483_v32   ;;  %v541_v32 = vld [vmem:[#allocation2 + $0x64] sm:$0xff]   ;;  %v544_v37 = vld [vmem:[#allocation2 + $0x74] sm:$0xff]   ;;  %v4519_v54 = vmul.f32 %v4415_v58, %v4489_v38  ;;  %v4523_v55 = vmul.f32 %v4415_v58, %v4491_v39 }
  0x46   : > { %518 = vst [vmem:[#allocation2 + $0xf4] sm:$0xff] %v485_v33   ;;  %v4477_v33 = vunpack.c.l.bf16 %v532_v17  ;;  %v547_v42 = vld [vmem:[#allocation2 + $0x84] sm:$0xff]   ;;  %v4513_v48 = vunpack.c.l.bf16 %v541_v32  ;;  %v4515_v49 = vunpack.c.h.bf16 %v541_v32  ;;  %v4525_v57 = vunpack.c.l.bf16 %v544_v37 }
  0x47   : > { %520 = vst [vmem:[#allocation2 + $0x104] sm:$0xff] %v487_v34   ;;  %v4479_v34 = vunpack.c.h.bf16 %v532_v17  ;;  %v550_v47 = vld [vmem:[#allocation2 + $0x94] sm:$0xff]   ;;  %v4527_v59 = vunpack.c.h.bf16 %v544_v37  ;;  %v4531_v60 = vmul.f32 %v4415_v58, %v4501_v43  ;;  %v4535_v61 = vmul.f32 %v4415_v58, %v4503_v44 }
  0x48   : > { %8529 = vst [vmem:[#allocation3_spill] sm:$0xff] %v4404_v50  ;;  %v4507_v45 = vmul.f32 %v4415_v58, %v4477_v33  ;;  %v553_v56 = vld [vmem:[#allocation2 + $0xa4] sm:$0xff]   ;;  %v4537_v63 = vunpack.c.l.bf16 %v547_v42  ;;  %v4539_v0 = vunpack.c.h.bf16 %v547_v42  ;;  %v4543_v1 = vmul.f32 %v4415_v58, %v4513_v48 }
  0x49   : > { %8530 = vst [vmem:[#allocation4_spill] sm:$0xff] %v4406_v51  ;;  %v4511_v46 = vmul.f32 %v4415_v58, %v4479_v34  ;;  %v556_v62 = vld [vmem:[#allocation2 + $0xb4] sm:$0xff]   ;;  %v4547_v2 = vmul.f32 %v4415_v58, %v4515_v49  ;;  %v4549_v4 = vunpack.c.l.bf16 %v550_v47  ;;  %v4551_v7 = vunpack.c.h.bf16 %v550_v47 }
  0x4a   : > { %8531 = vst [vmem:[#allocation5_spill] sm:$0xff] %v4440_v15  ;;  %v559_v3 = vld [vmem:[#allocation2 + $0xc4] sm:$0xff]   ;;  %v4555_v12 = vmul.f32 %v4415_v58, %v4525_v57  ;;  %v4559_v17 = vmul.f32 %v4415_v58, %v4527_v59  ;;  %v4561_v27 = vunpack.c.l.bf16 %v553_v56  ;;  %v4563_v32 = vunpack.c.h.bf16 %v553_v56 }
  0x4b   : > { %8532 = vst [vmem:[#allocation6_spill] sm:$0xff] %v4443_v16  ;;  %v562_v22 = vld [vmem:[#allocation2 + $0xd4] sm:$0xff]   ;;  %v4567_v37 = vmul.f32 %v4415_v58, %v4537_v63  ;;  %v4571_v42 = vmul.f32 %v4415_v58, %v4539_v0  ;;  %v4573_v6 = vunpack.c.l.bf16 %v556_v62  ;;  %v4575_v5 = vunpack.c.h.bf16 %v556_v62 }
  0x4c   : > { %8533 = vst [vmem:[#allocation7_spill] sm:$0xff] %v4446_v18  ;;  %v565_v47 = vld [vmem:[#allocation2 + $0xe4] sm:$0xff]   ;;  %v4583_v56 = vmul.f32 %v4415_v58, %v4551_v7  ;;  %v4595_v62 = vmul.f32 %v4415_v58, %v4563_v32 }
  0x4d   : > { %8534 = vst [vmem:[#allocation8_spill] sm:$0xff] %v4449_v19  ;;  %v8597_v19 = vunpack.c.l.bf16 %v4410_v53 }
  0x4e   : > { %8535 = vst [vmem:[#allocation9_spill] sm:$0xff] %v4452_v20  ;;  %v4614_v20 = vunpack.c.h.bf16 %v565_v47 }
  0x4f   : > { %8536 = vst [vmem:[#allocation10_spill] sm:$0xff] %v4455_v21  ;;  %v4591_v21 = vmul.f32 %v4415_v58, %v4561_v27 }
  0x50   : > { %8537 = vst [vmem:[#allocation11_spill] sm:$0xff] %v4457_v23 }
  0x51   : > { %8538 = vst [vmem:[#allocation12_spill] sm:$0xff] %v4459_v24 }
  0x52   : > { %8539 = vst [vmem:[#allocation13_spill] sm:$0xff] %v4462_v25  ;;  %v4587_v25 = vunpack.c.h.bf16 %v559_v3 }
  0x53   : > { %8540 = vst [vmem:[#allocation14_spill] sm:$0xff] %v4465_v26  ;;  %v4585_v26 = vunpack.c.l.bf16 %v559_v3  ;;  %v4607_v3 = vmul.f32 %v4415_v58, %v4575_v5 }
  0x54   : > { %8541 = vst [vmem:[#allocation15_spill] sm:$0xff] %v4467_v28 }
  0x55   : > { %8542 = vst [vmem:[#allocation16_spill] sm:$0xff] %v4469_v29 }
  0x56   : > { %8543 = vst [vmem:[#allocation17_spill] sm:$0xff] %v4472_v30  ;;  %v568_v30 = vld [vmem:[#allocation2 + $0xf4] sm:$0xff]  }
  0x57   : > { %8544 = vst [vmem:[#allocation18_spill] sm:$0xff] %v4475_v31  ;;  %v4579_v31 = vmul.f32 %v4415_v58, %v4549_v4 }
  0x58   : > { %8545 = vst [vmem:[#allocation19_spill] sm:$0xff] %v4477_v33 }
  0x59   : > { %8546 = vst [vmem:[#allocation20_spill] sm:$0xff] %v4479_v34 }
  0x5a   : > { %8547 = vst [vmem:[#allocation21_spill] sm:$0xff] %v4489_v38 }
  0x5b   : > { %8548 = vst [vmem:[#allocation22_spill] sm:$0xff] %v4491_v39 }
  0x5c   : > { %8549 = vst [vmem:[#allocation23_spill] sm:$0xff] %v4501_v43 }
  0x5d   : > { %8550 = vst [vmem:[#allocation24_spill] sm:$0xff] %v4503_v44 }
  0x5e   : > { %8551 = vst [vmem:[#allocation25_spill] sm:$0xff] %v4507_v45 }
  0x5f   : > { %8552 = vst [vmem:[#allocation26_spill] sm:$0xff] %v4511_v46 }
  0x60   : > { %8553 = vst [vmem:[#allocation27_spill] sm:$0xff] %v4513_v48 }
  0x61   : > { %8554 = vst [vmem:[#allocation28_spill] sm:$0xff] %v4515_v49 }
  0x62   : > { %8555 = vst [vmem:[#allocation29_spill] sm:$0xff] %v4519_v54 }
  0x63   : > { %8556 = vst [vmem:[#allocation30_spill] sm:$0xff] %v4523_v55 }
  0x64   : > { %8557 = vst [vmem:[#allocation31_spill] sm:$0xff] %v4525_v57 }
  0x65   : > { %8558 = vst [vmem:[#allocation32_spill] sm:$0xff] %v4527_v59 }
  0x66   : > { %8559 = vst [vmem:[#allocation33_spill] sm:$0xff] %v4531_v60 }
  0x67   : > { %8560 = vst [vmem:[#allocation34_spill] sm:$0xff] %v4535_v61 }
  0x68   : > { %8561 = vst [vmem:[#allocation35_spill] sm:$0xff] %v4537_v63 }
  0x69   : > { %8562 = vst [vmem:[#allocation36_spill] sm:$0xff] %v4539_v0 }
  0x6a   : > { %8563 = vst [vmem:[#allocation37_spill] sm:$0xff] %v4543_v1 }
  0x6b   : > { %8564 = vst [vmem:[#allocation38_spill] sm:$0xff] %v4547_v2 }
  0x6c   : > { %8565 = vst [vmem:[#allocation39_spill] sm:$0xff] %v4549_v4 }
  0x6d   : > { %8566 = vst [vmem:[#allocation40_spill] sm:$0xff] %v4551_v7 }
  0x6e   : > { %8567 = vst [vmem:[#allocation41_spill] sm:$0xff] %v4555_v12  ;;  %v8593_v12 = vunpack.c.l.bf16 %v4408_v52 }
  0x6f   : > { %8568 = vst [vmem:[#allocation42_spill] sm:$0xff] %v4559_v17  ;;  %v4626_v17 = vunpack.c.h.bf16 %v568_v30 }
  0x70   : > { %8569 = vst [vmem:[#allocation43_spill] sm:$0xff] %v4561_v27 }
  0x71   : > { %8570 = vst [vmem:[#allocation44_spill] sm:$0xff] %v4563_v32 }
  0x72   : > { %8571 = vst [vmem:[#allocation45_spill] sm:$0xff] %v4567_v37  ;;  %v4612_v37 = vunpack.c.l.bf16 %v565_v47 }
  0x73   : > { %8572 = vst [vmem:[#allocation46_spill] sm:$0xff] %v4571_v42  ;;  %v4597_v42 = vunpack.c.l.bf16 %v562_v22 }
  0x74   : > { %8573 = vst [vmem:[#allocation47_spill] sm:$0xff] %v4573_v6 }
  0x75   : > { %8574 = vst [vmem:[#allocation48_spill] sm:$0xff] %v4575_v5 }
  0x76   : > { %8575 = vst [vmem:[#allocation49_spill] sm:$0xff] %v4579_v31  ;;  %v4599_v31 = vunpack.c.h.bf16 %v562_v22  ;;  %v4618_v22 = vmul.f32 %v4415_v58, %v4585_v26 }
  0x77   : > { %8576 = vst [vmem:[#allocation50_spill] sm:$0xff] %v4583_v56  ;;  %v4603_v56 = vmul.f32 %v4415_v58, %v4573_v6 }
  0x78   : > { %8577 = vst [vmem:[#allocation51_spill] sm:$0xff] %v4585_v26  ;;  %v4634_v47 = vmul.f32 %v4415_v58, %v4599_v31 }
  0x79   : > { %8578 = vst [vmem:[#allocation52_spill] sm:$0xff] %v4587_v25 }
  0x7a   : > { %8579 = vst [vmem:[#allocation53_spill] sm:$0xff] %v4591_v21  ;;  %v4083_v21 = vld [vmem:[%s8311_s1 + $0x1] ss:$0 sm:$0xff] }
  0x7b   : > { %8580 = vst [vmem:[#allocation54_spill] sm:$0xff] %v4595_v62  ;;  %v4622_v62 = vmul.f32 %v4415_v58, %v4587_v25  ;;  %v4669_v53 = vmul.f32 %v4083_v21, %v4457_v23  ;;  %v4690_v23 = vmul.f32 %v4083_v21, %v4491_v39  ;;  %v4711_v39 = vmul.f32 %v4083_v21, %v4537_v63 }
  0x7c   : > { %8581 = vst [vmem:[#allocation55_spill] sm:$0xff] %v4597_v42  ;;  %v4732_v63 = vmul.f32 %v4083_v21, %v4575_v5 }
  0x7d   : > { %8582 = vst [vmem:[#allocation56_spill] sm:$0xff] %v4599_v31  ;;  %v807_v2 = vrot.slane %v4711_v39, 1 }
  0x7e   : > { %8583 = vst [vmem:[#allocation57_spill] sm:$0xff] %v4603_v56  ;;  %v4624_v56 = vunpack.c.l.bf16 %v568_v30  ;;  %v4647_v30 = vmul.f32 %v4415_v58, %v4614_v20 }
  0x7f   : > { %8584 = vst [vmem:[#allocation58_spill] sm:$0xff] %v4607_v3  ;;  %v4630_v3 = vmul.f32 %v4415_v58, %v4597_v42 }
  0x80   : > { %8585 = vst [vmem:[#allocation59_spill] sm:$0xff] %v4612_v37  ;;  %v4656_v52 = vmul.f32 %v4415_v58, %v4624_v56 }
  0x81   : > { %8586 = vst [vmem:[#allocation60_spill] sm:$0xff] %v4614_v20 }
  0x82   : > { %8587 = vst [vmem:[#allocation61_spill] sm:$0xff] %v4618_v22  ;;  %v4639_v22 = vmul.f32 %v4415_v58, %v8593_v12  ;;  %v4660_v12 = vmul.f32 %v4415_v58, %v4626_v17 }
  0x83   : > { %8588 = vst [vmem:[#allocation62_spill] sm:$0xff] %v4622_v62  ;;  %v4643_v62 = vmul.f32 %v4415_v58, %v4612_v37 }
  0x84   : > { %8589 = vst [vmem:[#allocation63_spill] sm:$0xff] %v4624_v56 }
  0x85   : > { %8590 = vst [vmem:[#allocation64_spill] sm:$0xff] %v4626_v17 }
  0x86   : > { %8591 = vst [vmem:[#allocation65_spill] sm:$0xff] %v4630_v3  ;;  %v4652_v3 = vmul.f32 %v4415_v58, %v8597_v19  ;;  %v4672_v19 = vmul.f32 %v4083_v21, %v4459_v24  ;;  %v4681_v58 = vmul.f32 %v4083_v21, %v4477_v33  ;;  %v4693_v24 = vmul.f32 %v4083_v21, %v4501_v43 }
  0x87   : > { %8592 = vst [vmem:[#allocation66_spill] sm:$0xff] %v4634_v47  ;;  %v4702_v33 = vmul.f32 %v4083_v21, %v4515_v49  ;;  %v4714_v43 = vmul.f32 %v4083_v21, %v4539_v0  ;;  %v4723_v49 = vmul.f32 %v4083_v21, %v4561_v27 }
  0x88   : > { %8594 = vst [vmem:[#allocation67_spill] sm:$0xff] %v4639_v22  ;;  %v4666_v22 = vmul.f32 %v4083_v21, %v4406_v51  ;;  %v4687_v51 = vmul.f32 %v4083_v21, %v4489_v38  ;;  %v4708_v38 = vmul.f32 %v4083_v21, %v4527_v59  ;;  %v4729_v59 = vmul.f32 %v4083_v21, %v4573_v6 }
  0x89   : > { %8595 = vst [vmem:[#allocation68_spill] sm:$0xff] %v4643_v62  ;;  %v4663_v62 = vmul.f32 %v4083_v21, %v4404_v50  ;;  %v4684_v50 = vmul.f32 %v4083_v21, %v4479_v34  ;;  %v4705_v34 = vmul.f32 %v4083_v21, %v4525_v57  ;;  %v4726_v57 = vmul.f32 %v4083_v21, %v4563_v32 }
  0x8a   : > { %8596 = vst [vmem:[#allocation69_spill] sm:$0xff] %v4647_v30  ;;  %v4741_v32 = vmul.f32 %v4083_v21, %v4585_v26  ;;  %v4744_v6 = vmul.f32 %v4083_v21, %v4587_v25  ;;  %v792_v5 = vrot.slane %v4681_v58, 1  ;;  %v4764_v25 = vmul.f32 %v4083_v21, %v4626_v17 }
  0x8b   : > { %8598 = vst [vmem:[#allocation70_spill] sm:$0xff] %v4652_v3  ;;  %v4675_v3 = vmul.f32 %v4083_v21, %v4467_v28  ;;  %v4696_v28 = vmul.f32 %v4083_v21, %v4503_v44  ;;  %v4717_v44 = vmul.f32 %v4083_v21, %v4549_v4  ;;  %v783_v0 = vrot.slane %v4663_v62, 1 }
  0x8c   : > { %8599 = vst [vmem:[#allocation71_spill] sm:$0xff] %v4656_v52  ;;  %v4678_v52 = vmul.f32 %v4083_v21, %v4469_v29  ;;  %v4699_v29 = vmul.f32 %v4083_v21, %v4513_v48  ;;  %v4720_v48 = vmul.f32 %v4083_v21, %v4551_v7  ;;  %v784_v4 = vrot.slane %v4666_v22, 1 }
  0x8d   : > { %8600 = vst [vmem:[#allocation72_spill] sm:$0xff] %v4660_v12  ;;  %v786_v12 = vrot.slane %v4669_v53, 1  ;;  %v787_v7 = vrot.slane %v4672_v19, 1  ;;  %v789_v27 = vrot.slane %v4675_v3, 1  ;;  %v793_v62 = vrot.slane %v4684_v50, 1 }
  0x8e   : > { %v790_v30 = vrot.slane %v4678_v52, 1  ;;  %v4749_v22 = vmul.f32 %v4083_v21, %v4597_v42  ;;  %v4752_v53 = vmul.f32 %v4083_v21, %v4599_v31  ;;  %v4755_v3 = vmul.f32 %v4083_v21, %v4612_v37 }
  0x8f   : > { %v4758_v52 = vmul.f32 %v4083_v21, %v4614_v20  ;;  %v4761_v19 = vmul.f32 %v4083_v21, %v4624_v56  ;;  %v785_v50 = vsel %vm782_vm6, %v783_v0, %v784_v4  ;;  %v795_v58 = vrot.slane %v4687_v51, 1 }
  0x90   : > { %v788_v42 = vsel %vm782_vm6, %v786_v12, %v787_v7  ;;  %v791_v31 = vsel %vm782_vm6, %v789_v27, %v790_v30  ;;  %v796_v37 = vrot.slane %v4690_v23, 1  ;;  %v798_v26 = vrot.slane %v4693_v24, 1 }
  0x91   : > { %v794_v20 = vsel %vm782_vm6, %v792_v5, %v793_v62  ;;  %v799_v56 = vrot.slane %v4696_v28, 1  ;;  %v801_v47 = vrot.slane %v4699_v29, 1  ;;  %v802_v21 = vrot.slane %v4702_v33, 1 }
  0x92   : > { %v804_v17 = vrot.slane %v4705_v34, 1  ;;  %v805_v51 = vrot.slane %v4708_v38, 1  ;;  %v808_v1 = vrot.slane %v4714_v43, 1  ;;  %v810_v23 = vrot.slane %v4717_v44, 1 }
  0x93   : > { %v811_v24 = vrot.slane %v4720_v48, 1  ;;  %v813_v18 = vrot.slane %v4723_v49, 1  ;;  %v814_v28 = vrot.slane %v4726_v57, 1  ;;  %v816_v29 = vrot.slane %v4729_v59, 1 }
  0x94   : > { %v817_v33 = vrot.slane %v4732_v63, 1  ;;  %v819_v34 = vrot.slane %v4741_v32, 1  ;;  %v797_v49 = vsel %vm782_vm6, %v795_v58, %v796_v37  ;;  %v800_v57 = vsel %vm782_vm6, %v798_v26, %v799_v56 }
  0x95   : > { %v803_v32 = vsel %vm782_vm6, %v801_v47, %v802_v21  ;;  %v806_v38 = vsel %vm782_vm6, %v804_v17, %v805_v51  ;;  %v809_v39 = vsel %vm782_vm6, %v807_v2, %v808_v1  ;;  %v812_v43 = vsel %vm782_vm6, %v810_v23, %v811_v24 }
  0x96   : > { %v815_v44 = vsel %vm782_vm6, %v813_v18, %v814_v28  ;;  %v818_v48 = vsel %vm782_vm6, %v816_v29, %v817_v33  ;;  %v8601_v61 = vrot.slane %v4744_v6, 1  ;;  %v4806_v59 = vadd.f32 %v783_v0, %v4420_v8 }
  0x97   : > { %v8603_v63 = vrot.slane %v4752_v53, 1  ;;  %v8604_v16 = vrot.slane %v4749_v22, 1  ;;  %v8605_v54 = vrot.slane %v4758_v52, 1  ;;  %v8606_v15 = vrot.slane %v4755_v3, 1 }
  0x98   : > { %v821_v60 = vsel %vm782_vm6, %v819_v34, %v8601_v61  ;;  %8602 = vst [vmem:[#allocation73_spill] sm:$0xff] %v4806_v59  ;;  %v4819_v45 = vadd.f32 %v785_v50, %v4424_v9  ;;  %v4822_v61 = vadd.f32 %v784_v4, %v4428_v10  ;;  %v8607_v8 = vrot.slane %v4764_v25, 1 }
  0x99   : > { %v824_v55 = vsel %vm782_vm6, %v8604_v16, %v8603_v63  ;;  %v827_v46 = vsel %vm782_vm6, %v8606_v15, %v8605_v54  ;;  %v8608_v0 = vrot.slane %v4761_v19, 1  ;;  %v4830_v16 = vadd.f32 %v786_v12, %v4431_v11  ;;  %v8612_v11 = vld [vmem:[#allocation25_spill] sm:$0xff] }
  0x9a   : > { %v4833_v63 = vadd.f32 %v788_v42, %v4483_v35  ;;  %v4836_v15 = vadd.f32 %v787_v7, %v4487_v36  ;;  %v4839_v9 = vadd.f32 %v789_v27, %v4434_v13  ;;  %v4842_v10 = vadd.f32 %v791_v31, %v4495_v40  ;;  %v8614_v35 = vld [vmem:[#allocation26_spill] sm:$0xff]  ;;  %v8616_v36 = vld [vmem:[#allocation5_spill] sm:$0xff] }
  0x9b   : > { %v830_v59 = vsel %vm782_vm6, %v8608_v0, %v8607_v8  ;;  %v4845_v54 = vadd.f32 %v790_v30, %v4499_v41  ;;  %v4848_v4 = vadd.f32 %v792_v5, %v4437_v14  ;;  %v4851_v12 = vadd.f32 %v794_v20, %v8612_v11  ;;  %v8618_v13 = vld [vmem:[#allocation29_spill] sm:$0xff]  ;;  %v8620_v31 = vld [vmem:[#allocation30_spill] sm:$0xff] }
  0x9c   : > { %8609 = vst [vmem:[#allocation74_spill] sm:$0xff] %v4842_v10  ;;  %v4854_v42 = vadd.f32 %v793_v62, %v8614_v35  ;;  %v4857_v7 = vadd.f32 %v795_v58, %v8616_v36  ;;  %v4860_v27 = vadd.f32 %v797_v49, %v8618_v13  ;;  %v4863_v40 = vadd.f32 %v796_v37, %v8620_v31  ;;  %v8622_v41 = vld [vmem:[#allocation6_spill] sm:$0xff]  ;;  %v8624_v5 = vld [vmem:[#allocation33_spill] sm:$0xff]  ;;  %v8628_v62 = vld [vmem:[#allocation7_spill] sm:$0xff] }
  0x9d   : > { %8610 = vst [vmem:[#allocation75_spill] sm:$0xff] %v4845_v54  ;;  %v4866_v30 = vadd.f32 %v798_v26, %v8622_v41  ;;  %v4869_v14 = vadd.f32 %v800_v57, %v8624_v5  ;;  %v8626_v20 = vld [vmem:[#allocation34_spill] sm:$0xff]  ;;  %v4875_v8 = vadd.f32 %v801_v47, %v8628_v62  ;;  %v8630_v58 = vld [vmem:[#allocation37_spill] sm:$0xff]  ;;  %v8634_v37 = vld [vmem:[#allocation8_spill] sm:$0xff] }
  0x9e   : > { %8611 = vst [vmem:[#allocation76_spill] sm:$0xff] %v4848_v4  ;;  %v4872_v50 = vadd.f32 %v799_v56, %v8626_v20  ;;  %v4878_v0 = vadd.f32 %v803_v32, %v8630_v58  ;;  %v8632_v49 = vld [vmem:[#allocation38_spill] sm:$0xff]  ;;  %v4884_v35 = vadd.f32 %v804_v17, %v8634_v37  ;;  %v8636_v26 = vld [vmem:[#allocation41_spill] sm:$0xff]  ;;  %v8725_v4 = vld [vmem:[#allocation59_spill] sm:$0xff] }
  0x9f   : > { %8613 = vst [vmem:[#allocation25_spill] sm:$0xff] %v4851_v12  ;;  %v4881_v11 = vadd.f32 %v802_v21, %v8632_v49  ;;  %v4887_v36 = vadd.f32 %v806_v38, %v8636_v26  ;;  %v8638_v57 = vld [vmem:[#allocation42_spill] sm:$0xff]  ;;  %v8640_v56 = vld [vmem:[#allocation9_spill] sm:$0xff]  ;;  %v8726_v54 = vld [vmem:[#allocation60_spill] sm:$0xff] }
  0xa0   : > { %8615 = vst [vmem:[#allocation26_spill] sm:$0xff] %v4854_v42  ;;  %v4890_v13 = vadd.f32 %v805_v51, %v8638_v57  ;;  %v4893_v31 = vadd.f32 %v807_v2, %v8640_v56  ;;  %v8642_v47 = vld [vmem:[#allocation45_spill] sm:$0xff]  ;;  %v8644_v32 = vld [vmem:[#allocation46_spill] sm:$0xff] }
  0xa1   : > { %8617 = vst [vmem:[#allocation5_spill] sm:$0xff] %v4857_v7  ;;  %v4896_v41 = vadd.f32 %v809_v39, %v8642_v47  ;;  %v4899_v5 = vadd.f32 %v808_v1, %v8644_v32  ;;  %v8646_v21 = vld [vmem:[#allocation10_spill] sm:$0xff]  ;;  %v8648_v17 = vld [vmem:[#allocation49_spill] sm:$0xff]  ;;  %v929_v47 = vld [vmem:[#allocation2 + $0x2c] sm:$0x1] }
  0xa2   : > { %8619 = vst [vmem:[#allocation29_spill] sm:$0xff] %v4860_v27  ;;  %v4902_v20 = vadd.f32 %v810_v23, %v8646_v21  ;;  %v4905_v62 = vadd.f32 %v812_v43, %v8648_v17  ;;  %v8650_v38 = vld [vmem:[#allocation50_spill] sm:$0xff]  ;;  %v8652_v51 = vld [vmem:[#allocation13_spill] sm:$0xff]  ;;  %v927_v23 = vld [vmem:[#allocation2 + $0xc] sm:$0x1] }
  0xa3   : > { %8621 = vst [vmem:[#allocation30_spill] sm:$0xff] %v4863_v40  ;;  %v4908_v58 = vadd.f32 %v811_v24, %v8650_v38  ;;  %v4911_v49 = vadd.f32 %v813_v18, %v8652_v51  ;;  %v8654_v2 = vld [vmem:[#allocation53_spill] sm:$0xff]  ;;  %v8656_v39 = vld [vmem:[#allocation54_spill] sm:$0xff]  ;;  %v931_v51 = vld [vmem:[#allocation2 + $0x4c] sm:$0x1] }
  0xa4   : > { %8623 = vst [vmem:[#allocation6_spill] sm:$0xff] %v4866_v30  ;;  %v4914_v37 = vadd.f32 %v815_v44, %v8654_v2  ;;  %v4917_v26 = vadd.f32 %v814_v28, %v8656_v39  ;;  %v8658_v1 = vld [vmem:[#allocation14_spill] sm:$0xff]  ;;  %v8660_v43 = vld [vmem:[#allocation57_spill] sm:$0xff]  ;;  %v8669_v39 = vrot.slane %v4744_v6, 1  ;;  %v8680_v6 = vrot.slane %v4755_v3, 1 }
  0xa5   : > { %8625 = vst [vmem:[#allocation33_spill] sm:$0xff] %v4869_v14  ;;  %v4920_v57 = vadd.f32 %v816_v29, %v8658_v1  ;;  %v928_v56 = vld [vmem:[#allocation2 + $0x1c] sm:$0x1]  ;;  %v4923_v32 = vadd.f32 %v818_v48, %v8660_v43  ;;  %v8664_v18 = vld [vmem:[#allocation17_spill] sm:$0xff]  ;;  %v8672_v48 = vrot.slane %v4749_v22, 1 }
  0xa6   : > { %8627 = vst [vmem:[#allocation34_spill] sm:$0xff] %v4872_v50  ;;  %v8662_v24 = vld [vmem:[#allocation58_spill] sm:$0xff]  ;;  %v4929_v17 = vadd.f32 %v819_v34, %v8664_v18  ;;  %v8666_v44 = vld [vmem:[#allocation61_spill] sm:$0xff] }
  0xa7   : > { %8629 = vst [vmem:[#allocation7_spill] sm:$0xff] %v4875_v8  ;;  %v4926_v21 = vadd.f32 %v817_v33, %v8662_v24  ;;  %v4932_v38 = vadd.f32 %v821_v60, %v8666_v44  ;;  %v930_v28 = vld [vmem:[#allocation2 + $0x3c] sm:$0x1]  ;;  %v8674_v33 = vld [vmem:[#allocation65_spill] sm:$0xff]  ;;  %v8677_v60 = vrot.slane %v4752_v53, 1  ;;  %v8688_v53 = vrot.slane %v4761_v19, 1 }
  0xa8   : > { %8631 = vst [vmem:[#allocation37_spill] sm:$0xff] %v4878_v0  ;;  %v932_v2 = vld [vmem:[#allocation2 + $0x5c] sm:$0x1]  ;;  %v4945_v24 = vadd.f32 %v824_v55, %v8674_v33  ;;  %v933_v44 = vld [vmem:[#allocation2 + $0x6c] sm:$0x1]  ;;  %v8685_v55 = vrot.slane %v4758_v52, 1 }
  0xa9   : > { %8633 = vst [vmem:[#allocation38_spill] sm:$0xff] %v4881_v11  ;;  %v8668_v29 = vld [vmem:[#allocation62_spill] sm:$0xff]  ;;  %v4983_v19 = vld [vmem:[%s8311_s1 + $0x2] ss:$0 sm:$0xff] }
  0xaa   : > { %8635 = vst [vmem:[#allocation8_spill] sm:$0xff] %v4884_v35  ;;  %v4937_v1 = vadd.f32 %v8669_v39, %v8668_v29  ;;  %v8676_v34 = vld [vmem:[#allocation66_spill] sm:$0xff]  ;;  %v8682_v39 = vld [vmem:[#allocation68_spill] sm:$0xff] }
  0xab   : > { %8637 = vst [vmem:[#allocation41_spill] sm:$0xff] %v4887_v36  ;;  %v4950_v18 = vadd.f32 %v8677_v60, %v8676_v34  ;;  %v4958_v22 = vadd.f32 %v827_v46, %v8682_v39  ;;  %v8687_v33 = vld [vmem:[#allocation70_spill] sm:$0xff]  ;;  %v8693_v46 = vrot.slane %v4764_v25, 1  ;;  %v939_v39 = vld [vmem:[#allocation2 + $0xcc] sm:$0x1]  ;;  %v949_v25 = vunpack.c.l.bf16 %v932_v2 }
  0xac   : > { %8639 = vst [vmem:[#allocation42_spill] sm:$0xff] %v4890_v13  ;;  %v4968_v34 = vadd.f32 %v8688_v53, %v8687_v33  ;;  %v936_v60 = vld [vmem:[#allocation2 + $0x9c] sm:$0x1]  ;;  %v4985_v33 = vld [vmem:[#allocation2 + $0xec] sm:$0x1] }
  0xad   : > { %8641 = vst [vmem:[#allocation9_spill] sm:$0xff] %v4893_v31  ;;  %v4978_v52 = vld [vmem:[#allocation2 + $0xdc] sm:$0x1]  ;;  %v8698_v2 = vld [vmem:[#allocation12_spill] sm:$0xff] }
  0xae   : > { %8643 = vst [vmem:[#allocation45_spill] sm:$0xff] %v4896_v41  ;;  %v4987_v53 = vld [vmem:[#allocation2 + $0xfc] sm:$0x1] }
  0xaf   : > { %8645 = vst [vmem:[#allocation46_spill] sm:$0xff] %v4899_v5 }
  0xb0   : > { %8647 = vst [vmem:[#allocation10_spill] sm:$0xff] %v4902_v20 }
  0xb1   : > { %8649 = vst [vmem:[#allocation49_spill] sm:$0xff] %v4905_v62 }
  0xb2   : > { %8651 = vst [vmem:[#allocation50_spill] sm:$0xff] %v4908_v58 }
  0xb3   : > { %8653 = vst [vmem:[#allocation13_spill] sm:$0xff] %v4911_v49 }
  0xb4   : > { %8655 = vst [vmem:[#allocation53_spill] sm:$0xff] %v4914_v37 }
  0xb5   : > { %8657 = vst [vmem:[#allocation54_spill] sm:$0xff] %v4917_v26 }
  0xb6   : > { %8659 = vst [vmem:[#allocation14_spill] sm:$0xff] %v4920_v57  ;;  %v8671_v57 = vld [vmem:[#allocation18_spill] sm:$0xff] }
  0xb7   : > { %8661 = vst [vmem:[#allocation57_spill] sm:$0xff] %v4923_v32  ;;  %v4942_v43 = vadd.f32 %v8672_v48, %v8671_v57  ;;  %v8684_v57 = vld [vmem:[#allocation69_spill] sm:$0xff]  ;;  %v8695_v32 = vld [vmem:[#allocation3_spill] sm:$0xff] }
  0xb8   : > { %8663 = vst [vmem:[#allocation58_spill] sm:$0xff] %v4926_v21  ;;  %v8679_v21 = vld [vmem:[#allocation67_spill] sm:$0xff]  ;;  %v4963_v48 = vadd.f32 %v8685_v55, %v8684_v57  ;;  %v944_v57 = vunpack.c.l.bf16 %v927_v23  ;;  %v945_v55 = vunpack.c.l.bf16 %v928_v56  ;;  %v956_v56 = vunpack.c.l.bf16 %v939_v39 }
  0xb9   : > { %8665 = vst [vmem:[#allocation17_spill] sm:$0xff] %v4929_v17  ;;  %v935_v17 = vld [vmem:[#allocation2 + $0x8c] sm:$0x1]  ;;  %v4955_v29 = vadd.f32 %v8680_v6, %v8679_v21  ;;  %v4994_v26 = vmul.f32 %v4983_v19, %v8695_v32 }
  0xba   : > { %8667 = vst [vmem:[#allocation61_spill] sm:$0xff] %v4932_v38  ;;  %v934_v38 = vld [vmem:[#allocation2 + $0x7c] sm:$0x1]  ;;  %v8692_v21 = vld [vmem:[#allocation72_spill] sm:$0xff] }
  0xbb   : > { %8670 = vst [vmem:[#allocation62_spill] sm:$0xff] %v4937_v1  ;;  %v4976_v6 = vadd.f32 %v8693_v46, %v8692_v21  ;;  %v950_v21 = vunpack.c.l.bf16 %v933_v44  ;;  %v951_v46 = vunpack.c.l.bf16 %v934_v38  ;;  %v959_v1 = vunpack.c.l.bf16 %v4987_v53  ;;  %v8699_v44 = vld [vmem:[#allocation15_spill] sm:$0xff]  ;;  %v8701_v32 = vld [vmem:[#allocation16_spill] sm:$0xff] }
  0xbc   : > { %8673 = vst [vmem:[#allocation18_spill] sm:$0xff] %v4942_v43  ;;  %v8690_v43 = vld [vmem:[#allocation71_spill] sm:$0xff]  ;;  %v963_v38 = vmul.f32 %v4983_v19, %v944_v57  ;;  %v5012_v39 = vmul.f32 %v4983_v19, %v8701_v32  ;;  %v8703_v53 = vld [vmem:[#allocation20_spill] sm:$0xff] }
  0xbd   : > { %8675 = vst [vmem:[#allocation65_spill] sm:$0xff] %v4945_v24  ;;  %v938_v24 = vld [vmem:[#allocation2 + $0xbc] sm:$0x1]  ;;  %v4971_v3 = vadd.f32 %v830_v59, %v8690_v43  ;;  %v946_v59 = vunpack.c.l.bf16 %v929_v47  ;;  %v947_v43 = vunpack.c.l.bf16 %v930_v28  ;;  %v8696_v47 = vld [vmem:[#allocation4_spill] sm:$0xff]  ;;  %v8702_v57 = vld [vmem:[#allocation19_spill] sm:$0xff] }
  0xbe   : > { %8678 = vst [vmem:[#allocation66_spill] sm:$0xff] %v4950_v18  ;;  %v937_v18 = vld [vmem:[#allocation2 + $0xac] sm:$0x1]  ;;  %v955_v23 = vunpack.c.l.bf16 %v938_v24  ;;  %v962_v28 = vmul.f32 %v4983_v19, %v8696_v47  ;;  %v965_v24 = vmul.f32 %v4983_v19, %v8698_v2  ;;  %v5023_v47 = vmul.f32 %v4983_v19, %v8703_v53 }
  0xbf   : > { %8681 = vst [vmem:[#allocation67_spill] sm:$0xff] %v4955_v29  ;;  %v958_v29 = vunpack.c.l.bf16 %v4985_v33  ;;  %v5019_v33 = vmul.f32 %v4983_v19, %v8702_v57  ;;  %v8706_v57 = vld [vmem:[#allocation23_spill] sm:$0xff]  ;;  %v8707_v53 = vld [vmem:[#allocation24_spill] sm:$0xff]  ;;  %v1069_v12 = vrot.slane %v5012_v39, 2 }
  0xc0   : > { %8683 = vst [vmem:[#allocation68_spill] sm:$0xff] %v4958_v22  ;;  %v957_v22 = vunpack.c.l.bf16 %v4978_v52  ;;  %v5015_v52 = vmul.f32 %v4983_v19, %v946_v59  ;;  %v5041_v37 = vmul.f32 %v4983_v19, %v8706_v57  ;;  %v5045_v49 = vmul.f32 %v4983_v19, %v8707_v53  ;;  %v8710_v57 = vld [vmem:[#allocation31_spill] sm:$0xff]  ;;  %v8711_v53 = vld [vmem:[#allocation32_spill] sm:$0xff] }
  0xc1   : > { %8686 = vst [vmem:[#allocation69_spill] sm:$0xff] %v4963_v48  ;;  %v954_v48 = vunpack.c.l.bf16 %v937_v18  ;;  %v966_v18 = vmul.f32 %v4983_v19, %v945_v55  ;;  %v5026_v55 = vmul.f32 %v4983_v19, %v947_v43  ;;  %v5048_v43 = vmul.f32 %v4983_v19, %v949_v25 }
  0xc2   : > { %8689 = vst [vmem:[#allocation70_spill] sm:$0xff] %v4968_v34  ;;  %v953_v34 = vunpack.c.l.bf16 %v936_v60  ;;  %v5008_v60 = vmul.f32 %v4983_v19, %v8699_v44  ;;  %v8705_v44 = vld [vmem:[#allocation22_spill] sm:$0xff]  ;;  %v5063_v20 = vmul.f32 %v4983_v19, %v8710_v57  ;;  %v5067_v5 = vmul.f32 %v4983_v19, %v8711_v53  ;;  %v8714_v57 = vld [vmem:[#allocation39_spill] sm:$0xff]  ;;  %v8716_v53 = vld [vmem:[#allocation40_spill] sm:$0xff] }
  0xc3   : > { %8691 = vst [vmem:[#allocation71_spill] sm:$0xff] %v4971_v3  ;;  %v948_v3 = vunpack.c.l.bf16 %v931_v51  ;;  %v5034_v32 = vmul.f32 %v4983_v19, %v8705_v44  ;;  %v8709_v44 = vld [vmem:[#allocation28_spill] sm:$0xff]  ;;  %v5070_v25 = vmul.f32 %v4983_v19, %v951_v46  ;;  %v5085_v13 = vmul.f32 %v4983_v19, %v8714_v57  ;;  %v8719_v57 = vld [vmem:[#allocation47_spill] sm:$0xff] }
  0xc4   : > { %8694 = vst [vmem:[#allocation72_spill] sm:$0xff] %v4976_v6  ;;  %v952_v6 = vunpack.c.l.bf16 %v935_v17  ;;  %v8697_v17 = vld [vmem:[#allocation11_spill] sm:$0xff]  ;;  %v5056_v62 = vmul.f32 %v4983_v19, %v8709_v44  ;;  %v8713_v44 = vld [vmem:[#allocation36_spill] sm:$0xff]  ;;  %v5089_v36 = vmul.f32 %v4983_v19, %v8716_v53  ;;  %v5092_v46 = vmul.f32 %v4983_v19, %v953_v34 }
  0xc5   : > { %v5001_v51 = vmul.f32 %v4983_v19, %v8697_v17  ;;  %8700 = vst [vmem:[#allocation3_spill] sm:$0xff] %v5008_v60  ;;  %v8704_v17 = vld [vmem:[#allocation21_spill] sm:$0xff]  ;;  %v5037_v59 = vmul.f32 %v4983_v19, %v948_v3  ;;  %v5059_v3 = vmul.f32 %v4983_v19, %v950_v21  ;;  %v5078_v31 = vmul.f32 %v4983_v19, %v8713_v44  ;;  %v8718_v44 = vld [vmem:[#allocation44_spill] sm:$0xff] }
  0xc6   : > { %v5030_v2 = vmul.f32 %v4983_v19, %v8704_v17  ;;  %v8708_v17 = vld [vmem:[#allocation27_spill] sm:$0xff]  ;;  %v5081_v21 = vmul.f32 %v4983_v19, %v952_v6  ;;  %8715 = vst [vmem:[#allocation4_spill] sm:$0xff] %v5085_v13  ;;  %v5100_v11 = vmul.f32 %v4983_v19, %v8718_v44  ;;  %v5103_v6 = vmul.f32 %v4983_v19, %v954_v48  ;;  %v8720_v53 = vld [vmem:[#allocation48_spill] sm:$0xff] }
  0xc7   : > { %v5052_v58 = vmul.f32 %v4983_v19, %v8708_v17  ;;  %v8712_v17 = vld [vmem:[#allocation35_spill] sm:$0xff]  ;;  %v5107_v0 = vmul.f32 %v4983_v19, %v8719_v57  ;;  %v5111_v8 = vmul.f32 %v4983_v19, %v8720_v53  ;;  %v5114_v34 = vmul.f32 %v4983_v19, %v955_v23  ;;  %v8722_v44 = vld [vmem:[#allocation52_spill] sm:$0xff] }
  0xc8   : > { %v5074_v41 = vmul.f32 %v4983_v19, %v8712_v17  ;;  %v8717_v17 = vld [vmem:[#allocation43_spill] sm:$0xff]  ;;  %v5122_v14 = vmul.f32 %v4983_v19, %v8722_v44  ;;  %v5125_v48 = vmul.f32 %v4983_v19, %v956_v56  ;;  %v8724_v53 = vld [vmem:[#allocation56_spill] sm:$0xff]  ;;  %v8352_v23 = vrot.slane %v4994_v26, 2 }
  0xc9   : > { %v5096_v35 = vmul.f32 %v4983_v19, %v8717_v17  ;;  %v8721_v17 = vld [vmem:[#allocation51_spill] sm:$0xff]  ;;  %v5133_v40 = vmul.f32 %v4983_v19, %v8724_v53  ;;  %v1059_v27 = vrot.slane %v962_v28, 2  ;;  %v8353_v7 = vrot.slane %v5001_v51, 2  ;;  %v8728_v56 = vld [vmem:[#allocation64_spill] sm:$0xff] }
  0xca   : > { %v5118_v50 = vmul.f32 %v4983_v19, %v8721_v17  ;;  %v8723_v57 = vld [vmem:[#allocation55_spill] sm:$0xff]  ;;  %v1061_v17 = vrot.slane %v963_v38, 2  ;;  %v1064_v42 = vrot.slane %v965_v24, 2  ;;  %v1066_v44 = vrot.slane %v966_v18, 2 }
  0xcb   : > { %v5129_v30 = vmul.f32 %v4983_v19, %v8723_v57  ;;  %v5140_v57 = vmul.f32 %v4983_v19, %v957_v22  ;;  %v5144_v53 = vmul.f32 %v4983_v19, %v8725_v4  ;;  %v5148_v28 = vmul.f32 %v4983_v19, %v8726_v54  ;;  %v8727_v24 = vld [vmem:[#allocation63_spill] sm:$0xff] }
  0xcc   : > { %v5151_v38 = vmul.f32 %v4983_v19, %v958_v29  ;;  %v5155_v18 = vmul.f32 %v4983_v19, %v8727_v24  ;;  %v5159_v39 = vmul.f32 %v4983_v19, %v8728_v56  ;;  %v5162_v22 = vmul.f32 %v4983_v19, %v959_v1 }
  0xcd   : > { %v1071_v4 = vrot.slane %v5015_v52, 2  ;;  %v5168_v54 = vsel %vm1057_vm7, %v8352_v23, %v1059_v27  ;;  %v5171_v29 = vsel %vm1057_vm7, %v1059_v27, %v1061_v17  ;;  %v5176_v24 = vsel %vm1057_vm7, %v8353_v7, %v1064_v42 }
  0xce   : > { %v5180_v1 = vsel %vm1057_vm7, %v1064_v42, %v1066_v44  ;;  %v8729_v19 = vrot.slane %v5008_v60, 2  ;;  %v1074_v23 = vrot.slane %v5023_v47, 2  ;;  %v1076_v27 = vrot.slane %v5026_v55, 2 }
  0xcf   : > { %v1079_v10 = vrot.slane %v5034_v32, 2  ;;  %v1081_v7 = vrot.slane %v5037_v59, 2  ;;  %v1084_v42 = vrot.slane %v5045_v49, 2  ;;  %v1086_v44 = vrot.slane %v5048_v43, 2 }
  0xd0   : > { %v5185_v52 = vsel %vm1057_vm7, %v8729_v19, %v1069_v12  ;;  %v1089_v19 = vrot.slane %v5056_v62, 2  ;;  %v1091_v47 = vrot.slane %v5059_v3, 2  ;;  %v1094_v17 = vrot.slane %v5067_v5, 2 }
  0xd1   : > { %v1096_v32 = vrot.slane %v5070_v25, 2  ;;  %v1072_v59 = vsel %vm1057_vm7, %v1069_v12, %v1071_v4  ;;  %v1099_v49 = vrot.slane %v5078_v31, 2  ;;  %v1101_v43 = vrot.slane %v5081_v21, 2 }
  0xd2   : > { %v8730_v60 = vrot.slane %v5019_v33, 2  ;;  %v1077_v3 = vsel %vm1057_vm7, %v1074_v23, %v1076_v27  ;;  %v1104_v5 = vrot.slane %v5089_v36, 2  ;;  %v8731_v25 = vrot.slane %v5030_v2, 2 }
  0xd3   : > { %v1082_v4 = vsel %vm1057_vm7, %v1079_v10, %v1081_v7  ;;  %v8732_v31 = vrot.slane %v5041_v37, 2  ;;  %v1087_v56 = vsel %vm1057_vm7, %v1084_v42, %v1086_v44  ;;  %v1092_v27 = vsel %vm1057_vm7, %v1089_v19, %v1091_v47 }
  0xd4   : > { %v1075_v62 = vsel %vm1057_vm7, %v8730_v60, %v1074_v23  ;;  %v1080_v12 = vsel %vm1057_vm7, %v8731_v25, %v1079_v10  ;;  %v8733_v60 = vrot.slane %v5052_v58, 2  ;;  %v8734_v36 = vrot.slane %v5063_v20, 2 }
  0xd5   : > { %v1085_v21 = vsel %vm1057_vm7, %v8732_v31, %v1084_v42  ;;  %v1097_v25 = vsel %vm1057_vm7, %v1094_v17, %v1096_v32  ;;  %v8735_v10 = vrot.slane %v5074_v41, 2  ;;  %v1102_v31 = vsel %vm1057_vm7, %v1099_v49, %v1101_v43 }
  0xd6   : > { %v1090_v23 = vsel %vm1057_vm7, %v8733_v60, %v1089_v19  ;;  %v1095_v55 = vsel %vm1057_vm7, %v8734_v36, %v1094_v17  ;;  %v1106_v42 = vrot.slane %v5092_v46, 2  ;;  %v1108_v44 = vrot.slane %v5096_v35, 2 }
  0xd7   : > { %v1100_v7 = vsel %vm1057_vm7, %v8735_v10, %v1099_v49  ;;  %v8736_v60 = vrot.slane %v5085_v13, 2  ;;  %v1109_v47 = vrot.slane %v5100_v11, 2  ;;  %v1111_v36 = vrot.slane %v5103_v6, 2  ;;  %v8737_v13 = vld [vmem:[#allocation73_spill] sm:$0xff] }
  0xd8   : > { %v1113_v17 = vrot.slane %v5107_v0, 2  ;;  %v1114_v32 = vrot.slane %v5111_v8, 2  ;;  %v1116_v10 = vrot.slane %v5114_v34, 2  ;;  %v1118_v49 = vrot.slane %v5118_v50, 2 }
  0xd9   : > { %v1105_v19 = vsel %vm1057_vm7, %v8736_v60, %v1104_v5  ;;  %v1119_v46 = vrot.slane %v5122_v14, 2  ;;  %v1121_v35 = vrot.slane %v5125_v48, 2  ;;  %v1123_v43 = vrot.slane %v5129_v30, 2 }
  0xda   : > { %v1124_v60 = vrot.slane %v5133_v40, 2  ;;  %v1126_v11 = vrot.slane %v5140_v57, 2  ;;  %v1107_v6 = vsel %vm1057_vm7, %v1104_v5, %v1106_v42  ;;  %v1129_v8 = vrot.slane %v5148_v28, 2 }
  0xdb   : > { %v1131_v34 = vrot.slane %v5151_v38, 2  ;;  %v1110_v50 = vsel %vm1057_vm7, %v1108_v44, %v1109_v47  ;;  %v1134_v48 = vrot.slane %v5159_v39, 2  ;;  %v1136_v30 = vrot.slane %v5162_v22, 2 }
  0xdc   : > { %v1112_v40 = vsel %vm1057_vm7, %v1109_v47, %v1111_v36  ;;  %v1115_v57 = vsel %vm1057_vm7, %v1113_v17, %v1114_v32  ;;  %v1117_v5 = vsel %vm1057_vm7, %v1114_v32, %v1116_v10  ;;  %v1120_v42 = vsel %vm1057_vm7, %v1118_v49, %v1119_v46 }
  0xdd   : > { %v1122_v28 = vsel %vm1057_vm7, %v1119_v46, %v1121_v35  ;;  %v1125_v38 = vsel %vm1057_vm7, %v1123_v43, %v1124_v60  ;;  %v1127_v0 = vsel %vm1057_vm7, %v1124_v60, %v1126_v11  ;;  %v8738_v14 = vrot.slane %v4994_v26, 2 }
  0xde   : > { %v8739_v22 = vrot.slane %v5144_v53, 2  ;;  %v1132_v36 = vsel %vm1057_vm7, %v1129_v8, %v1131_v34  ;;  %v5273_v32 = vadd.f32 %v5168_v54, %v4819_v45  ;;  %v5277_v10 = vadd.f32 %v5171_v29, %v4822_v61  ;;  %v8742_v61 = vld [vmem:[#allocation3_spill] sm:$0xff] }
  0xdf   : > { %v5265_v39 = vadd.f32 %v8738_v14, %v8737_v13  ;;  %v8740_v46 = vrot.slane %v5155_v18, 2  ;;  %v1137_v13 = vsel %vm1057_vm7, %v1134_v48, %v1136_v30  ;;  %v8741_v35 = vrot.slane %v5001_v51, 2  ;;  %v8746_v51 = vld [vmem:[#allocation75_spill] sm:$0xff]  ;;  %v8748_v14 = vld [vmem:[#allocation76_spill] sm:$0xff] }
  0xe0   : > { %v1130_v47 = vsel %vm1057_vm7, %v8739_v22, %v1129_v8  ;;  %v5290_v11 = vadd.f32 %v5176_v24, %v4833_v63  ;;  %v5294_v45 = vadd.f32 %v5180_v1, %v4836_v15  ;;  %v8743_v54 = vrot.slane %v8742_v61, 2  ;;  %v8744_v8 = vld [vmem:[#allocation74_spill] sm:$0xff] }
  0xe1   : > { %v1135_v26 = vsel %vm1057_vm7, %v8740_v46, %v1134_v48  ;;  %v5286_v60 = vadd.f32 %v8741_v35, %v4830_v16  ;;  %v5303_v34 = vadd.f32 %v5185_v52, %v8744_v8  ;;  %v5306_v16 = vadd.f32 %v1072_v59, %v8746_v51  ;;  %v8751_v48 = vld [vmem:[#allocation25_spill] sm:$0xff]  ;;  %v8753_v1 = vld [vmem:[#allocation26_spill] sm:$0xff] }
  0xe2   : > { %v5299_v29 = vadd.f32 %v8743_v54, %v4839_v9  ;;  %v8749_v63 = vrot.slane %v5019_v33, 2  ;;  %v5314_v15 = vadd.f32 %v1075_v62, %v8751_v48  ;;  %v5317_v30 = vadd.f32 %v1077_v3, %v8753_v1  ;;  %v8755_v9 = vld [vmem:[#allocation5_spill] sm:$0xff]  ;;  %v8760_v59 = vld [vmem:[#allocation30_spill] sm:$0xff] }
  0xe3   : > { %8745 = vst [vmem:[#allocation11_spill] sm:$0xff] %v5303_v34  ;;  %v8756_v22 = vrot.slane %v5030_v2, 2  ;;  %v8758_v52 = vld [vmem:[#allocation29_spill] sm:$0xff]  ;;  %v5328_v61 = vadd.f32 %v1082_v4, %v8760_v59  ;;  %v8762_v33 = vld [vmem:[#allocation6_spill] sm:$0xff]  ;;  %v8763_v54 = vrot.slane %v5041_v37, 2  ;;  %v8769_v2 = vld [vmem:[#allocation7_spill] sm:$0xff] }
  0xe4   : > { %8747 = vst [vmem:[#allocation12_spill] sm:$0xff] %v5306_v16  ;;  %v5311_v24 = vadd.f32 %v8749_v63, %v8748_v14  ;;  %v5325_v35 = vadd.f32 %v1080_v12, %v8758_v52  ;;  %v8765_v62 = vld [vmem:[#allocation33_spill] sm:$0xff]  ;;  %v8767_v3 = vld [vmem:[#allocation34_spill] sm:$0xff]  ;;  %v8770_v63 = vrot.slane %v5052_v58, 2  ;;  %v8776_v37 = vld [vmem:[#allocation8_spill] sm:$0xff] }
  0xe5   : > { %8752 = vst [vmem:[#allocation16_spill] sm:$0xff] %v5314_v15  ;;  %v5322_v46 = vadd.f32 %v8756_v22, %v8755_v9  ;;  %v5333_v8 = vadd.f32 %v8763_v54, %v8762_v33  ;;  %v5336_v51 = vadd.f32 %v1085_v21, %v8765_v62  ;;  %v5339_v14 = vadd.f32 %v1087_v56, %v8767_v3  ;;  %v8772_v12 = vld [vmem:[#allocation37_spill] sm:$0xff]  ;;  %v8774_v4 = vld [vmem:[#allocation38_spill] sm:$0xff] }
  0xe6   : > { %8750 = vst [vmem:[#allocation15_spill] sm:$0xff] %v5311_v24  ;;  %v5344_v48 = vadd.f32 %v8770_v63, %v8769_v2  ;;  %v5347_v1 = vadd.f32 %v1090_v23, %v8772_v12  ;;  %v5350_v9 = vadd.f32 %v1092_v27, %v8774_v4  ;;  %v8777_v22 = vrot.slane %v5063_v20, 2  ;;  %v8779_v21 = vld [vmem:[#allocation41_spill] sm:$0xff]  ;;  %v8781_v56 = vld [vmem:[#allocation42_spill] sm:$0xff]  ;;  %v8791_v63 = vld [vmem:[#allocation4_spill] sm:$0xff] }
  0xe7   : > { %8754 = vst [vmem:[#allocation19_spill] sm:$0xff] %v5317_v30  ;;  %v5358_v59 = vadd.f32 %v1095_v55, %v8779_v21  ;;  %v5361_v33 = vadd.f32 %v1097_v25, %v8781_v56  ;;  %v8783_v58 = vld [vmem:[#allocation9_spill] sm:$0xff]  ;;  %v8784_v54 = vrot.slane %v5074_v41, 2  ;;  %v8788_v27 = vld [vmem:[#allocation46_spill] sm:$0xff]  ;;  %v8792_v12 = vrot.slane %v8791_v63, 2 }
  0xe8   : > { %8757 = vst [vmem:[#allocation20_spill] sm:$0xff] %v5322_v46  ;;  %v5355_v52 = vadd.f32 %v8777_v22, %v8776_v37  ;;  %v8786_v23 = vld [vmem:[#allocation45_spill] sm:$0xff]  ;;  %v5372_v2 = vadd.f32 %v1102_v31, %v8788_v27  ;;  %v8790_v20 = vld [vmem:[#allocation10_spill] sm:$0xff] }
  0xe9   : > { %8759 = vst [vmem:[#allocation21_spill] sm:$0xff] %v5325_v35  ;;  %v5366_v62 = vadd.f32 %v8784_v54, %v8783_v58  ;;  %v5369_v3 = vadd.f32 %v1100_v7, %v8786_v23  ;;  %v5377_v4 = vadd.f32 %v8792_v12, %v8790_v20  ;;  %v8794_v55 = vld [vmem:[#allocation49_spill] sm:$0xff]  ;;  %v8796_v25 = vld [vmem:[#allocation50_spill] sm:$0xff] }
  0xea   : > { %8761 = vst [vmem:[#allocation22_spill] sm:$0xff] %v5328_v61  ;;  %v5380_v37 = vadd.f32 %v1105_v19, %v8794_v55  ;;  %v5383_v22 = vadd.f32 %v1107_v6, %v8796_v25  ;;  %v8798_v41 = vld [vmem:[#allocation13_spill] sm:$0xff]  ;;  %v8802_v58 = vld [vmem:[#allocation54_spill] sm:$0xff] }
  0xeb   : > { %8764 = vst [vmem:[#allocation23_spill] sm:$0xff] %v5333_v8  ;;  %v5386_v21 = vadd.f32 %v1108_v44, %v8798_v41  ;;  %v8800_v56 = vld [vmem:[#allocation53_spill] sm:$0xff]  ;;  %v5392_v31 = vadd.f32 %v1112_v40, %v8802_v58  ;;  %v8804_v54 = vld [vmem:[#allocation14_spill] sm:$0xff] }
  0xec   : > { %8766 = vst [vmem:[#allocation24_spill] sm:$0xff] %v5336_v51  ;;  %v5389_v7 = vadd.f32 %v1110_v50, %v8800_v56  ;;  %v5395_v23 = vadd.f32 %v1113_v17, %v8804_v54  ;;  %v8806_v27 = vld [vmem:[#allocation57_spill] sm:$0xff]  ;;  %v8808_v19 = vld [vmem:[#allocation58_spill] sm:$0xff]  ;;  %v1238_v54 = vld [vmem:[#allocation2 + $0x24] sm:$0xff]  }
  0xed   : > { %8768 = vst [vmem:[#allocation27_spill] sm:$0xff] %v5339_v14  ;;  %v5398_v20 = vadd.f32 %v1115_v57, %v8806_v27  ;;  %v5401_v63 = vadd.f32 %v1117_v5, %v8808_v19  ;;  %v8810_v6 = vld [vmem:[#allocation17_spill] sm:$0xff]  ;;  %v8814_v25 = vld [vmem:[#allocation62_spill] sm:$0xff]  ;;  %v5420_v5 = vld [vmem:[#allocation2 + $0x20] sm:$0x8] }
  0xee   : > { %8771 = vst [vmem:[#allocation28_spill] sm:$0xff] %v5344_v48  ;;  %v5404_v12 = vadd.f32 %v1118_v49, %v8810_v6  ;;  %v5406_v44 = vld [vmem:[#allocation2 + $0x10] sm:$0x8]  ;;  %v5412_v40 = vadd.f32 %v1122_v28, %v8814_v25  ;;  %v8816_v41 = vld [vmem:[#allocation18_spill] sm:$0xff]  ;;  %v8822_v19 = vld [vmem:[#allocation67_spill] sm:$0xff]  ;;  %v8869_v34 = vunpack.c.l.bf16 %v5420_v5 }
  0xef   : > { %8773 = vst [vmem:[#allocation31_spill] sm:$0xff] %v5347_v1  ;;  %v8812_v55 = vld [vmem:[#allocation61_spill] sm:$0xff]  ;;  %v5415_v17 = vadd.f32 %v1123_v43, %v8816_v41  ;;  %v8820_v49 = vld [vmem:[#allocation66_spill] sm:$0xff]  ;;  %v8825_v28 = vld [vmem:[#allocation68_spill] sm:$0xff] }
  0xf0   : > { %8775 = vst [vmem:[#allocation32_spill] sm:$0xff] %v5350_v9  ;;  %v5409_v50 = vadd.f32 %v1120_v42, %v8812_v55  ;;  %v8818_v56 = vld [vmem:[#allocation65_spill] sm:$0xff]  ;;  %v5423_v27 = vadd.f32 %v1127_v0, %v8820_v49  ;;  %v8823_v42 = vrot.slane %v5144_v53, 2  ;;  %v5431_v55 = vadd.f32 %v1130_v47, %v8825_v28  ;;  %v8832_v0 = vld [vmem:[#allocation71_spill] sm:$0xff]  ;;  %v8834_v53 = vld [vmem:[#allocation72_spill] sm:$0xff] }
  0xf1   : > { %8778 = vst [vmem:[#allocation35_spill] sm:$0xff] %v5355_v52  ;;  %v5418_v57 = vadd.f32 %v1125_v38, %v8818_v56  ;;  %v1235_v58 = vld [vmem:[#allocation2 + $0x14] sm:$0xff]   ;;  %v5436_v38 = vld [vmem:[#allocation2 + $0x30] sm:$0x8]  ;;  %v5444_v49 = vadd.f32 %v1135_v26, %v8832_v0  ;;  %v1244_v47 = vld [vmem:[#allocation2 + $0x44] sm:$0xff]  }
  0xf2   : > { %8780 = vst [vmem:[#allocation36_spill] sm:$0xff] %v5358_v59  ;;  %v5428_v6 = vadd.f32 %v8823_v42, %v8822_v19  ;;  %v8827_v43 = vld [vmem:[#allocation69_spill] sm:$0xff]  ;;  %v8829_v56 = vld [vmem:[#allocation70_spill] sm:$0xff]  ;;  %v5447_v19 = vadd.f32 %v1137_v13, %v8834_v53  ;;  %v5449_v42 = vld [vmem:[#allocation2 + $0x40] sm:$0x8]  ;;  %v5465_v53 = vunpack.c.h.bf16 %v1238_v54 }
  0xf3   : > { %8782 = vst [vmem:[#allocation39_spill] sm:$0xff] %v5361_v33  ;;  %v5434_v25 = vadd.f32 %v1132_v36, %v8827_v43  ;;  %v1241_v41 = vld [vmem:[#allocation2 + $0x34] sm:$0xff]   ;;  %v5451_v28 = vld [vmem:[#allocation2 + $0x50] sm:$0x8]  ;;  %v5533_v14 = vld [vmem:[#allocation2 + $0x100] sm:$0x8]  ;;  %v8871_v5 = vunpack.c.l.bf16 %v5449_v42 }
  0xf4   : > { %8785 = vst [vmem:[#allocation40_spill] sm:$0xff] %v5366_v62  ;;  %v1247_v43 = vld [vmem:[#allocation2 + $0x54] sm:$0xff]   ;;  %v5463_v13 = vld [vmem:[#allocation2 + $0x70] sm:$0x8]  ;;  %v5468_v36 = vunpack.c.l.bf16 %v1241_v41  ;;  %v5510_v62 = vld [vmem:[#allocation2 + $0xe0] sm:$0x8] }
  0xf5   : > { %8787 = vst [vmem:[#allocation43_spill] sm:$0xff] %v5369_v3  ;;  %v1253_v0 = vld [vmem:[#allocation2 + $0x74] sm:$0xff]   ;;  %v5519_v9 = vld [vmem:[#allocation2 + $0xf0] sm:$0x8]  ;;  %v1322_v35 = vunpack.c.l.bf16 %v5510_v62 }
  0xf6   : > { %8789 = vst [vmem:[#allocation44_spill] sm:$0xff] %v5372_v2  ;;  %v1265_v26 = vld [vmem:[#allocation2 + $0xb4] sm:$0xff]   ;;  %v1325_v15 = vunpack.c.l.bf16 %v5519_v9 }
  0xf7   : > { %8793 = vst [vmem:[#allocation47_spill] sm:$0xff] %v5377_v4  ;;  %v1271_v3 = vld [vmem:[#allocation2 + $0xd4] sm:$0xff]   ;;  %v5526_v48 = vunpack.c.h.bf16 %v1265_v26 }
  0xf8   : > { %8795 = vst [vmem:[#allocation48_spill] sm:$0xff] %v5380_v37  ;;  %v1268_v37 = vld [vmem:[#allocation2 + $0xc4] sm:$0xff]   ;;  %v5541_v61 = vunpack.c.l.bf16 %v1271_v3 }
  0xf9   : > { %8797 = vst [vmem:[#allocation51_spill] sm:$0xff] %v5383_v22  ;;  %v5500_v22 = vld [vmem:[#allocation2 + $0xc0] sm:$0x8]  ;;  %v5536_v8 = vunpack.c.l.bf16 %v1268_v37 }
  0xfa   : > { %8799 = vst [vmem:[#allocation52_spill] sm:$0xff] %v5386_v21  ;;  %v5498_v21 = vunpack.c.h.bf16 %v1253_v0  ;;  %v1316_v51 = vunpack.c.l.bf16 %v5500_v22 }
  0xfb   : > { %8801 = vst [vmem:[#allocation55_spill] sm:$0xff] %v5389_v7 }
  0xfc   : > { %8803 = vst [vmem:[#allocation56_spill] sm:$0xff] %v5392_v31  ;;  %v5491_v31 = vld [vmem:[#allocation2 + $0xb0] sm:$0x8] }
  0xfd   : > { %8805 = vst [vmem:[#allocation59_spill] sm:$0xff] %v5395_v23 }
  0xfe   : > { %8807 = vst [vmem:[#allocation60_spill] sm:$0xff] %v5398_v20 }
  0xff   : > { %8809 = vst [vmem:[#allocation63_spill] sm:$0xff] %v5401_v63  ;;  %v5484_v63 = vunpack.c.l.bf16 %v1247_v43 }
 0x100   : > { %8811 = vst [vmem:[#allocation64_spill] sm:$0xff] %v5404_v12  ;;  %v5482_v12 = vld [vmem:[#allocation2 + $0xa0] sm:$0x8] }
 0x101   : > { %8813 = vst [vmem:[#allocation73_spill] sm:$0xff] %v5409_v50  ;;  %v1259_v50 = vld [vmem:[#allocation2 + $0x94] sm:$0xff]   ;;  %v1310_v59 = vunpack.c.l.bf16 %v5482_v12  ;;  %v1280_v12 = vld [vmem:[#allocation2 + $0x104] sm:$0xff]  }
 0x102   : > { %8815 = vst [vmem:[#allocation3_spill] sm:$0xff] %v5412_v40  ;;  %v5479_v40 = vunpack.c.h.bf16 %v1244_v47  ;;  %v5512_v33 = vunpack.c.l.bf16 %v1259_v50  ;;  %v5556_v16 = vunpack.c.l.bf16 %v1280_v12 }
 0x103   : > { %8817 = vst [vmem:[#allocation74_spill] sm:$0xff] %v5415_v17 }
 0x104   : > { %8819 = vst [vmem:[#allocation75_spill] sm:$0xff] %v5418_v57  ;;  %v8830_v57 = vrot.slane %v5155_v18, 2  ;;  %v5456_v18 = vunpack.c.l.bf16 %v1235_v58 }
 0x105   : > { %8821 = vst [vmem:[#allocation76_spill] sm:$0xff] %v5423_v27  ;;  %v5477_v27 = vunpack.c.l.bf16 %v1244_v47  ;;  %v1301_v47 = vunpack.c.l.bf16 %v5463_v13  ;;  %v1274_v13 = vld [vmem:[#allocation2 + $0xe4] sm:$0xff]  }
 0x106   : > { %8824 = vst [vmem:[#allocation25_spill] sm:$0xff] %v5428_v6  ;;  %v5441_v17 = vadd.f32 %v8830_v57, %v8829_v56  ;;  %v5458_v57 = vunpack.c.h.bf16 %v1235_v58  ;;  %v5461_v56 = vunpack.c.l.bf16 %v1238_v54  ;;  %v1256_v6 = vld [vmem:[#allocation2 + $0x84] sm:$0xff]   ;;  %v5474_v58 = vld [vmem:[#allocation2 + $0x90] sm:$0x8]  ;;  %v5496_v54 = vunpack.c.l.bf16 %v1253_v0 }
 0x107   : > { %8826 = vst [vmem:[#allocation26_spill] sm:$0xff] %v5431_v55  ;;  %v1250_v55 = vld [vmem:[#allocation2 + $0x64] sm:$0xff]   ;;  %v5505_v4 = vunpack.c.l.bf16 %v1256_v6  ;;  %v5507_v2 = vunpack.c.h.bf16 %v1256_v6  ;;  %v5514_v0 = vunpack.c.h.bf16 %v1259_v50  ;;  %v1313_v6 = vunpack.c.l.bf16 %v5491_v31  ;;  %v5531_v50 = vld [vmem:[%s8311_s1 + $0x3] ss:$0 sm:$0xff] }
 0x108   : > { %8828 = vst [vmem:[#allocation5_spill] sm:$0xff] %v5434_v25  ;;  %v5454_v25 = vld [vmem:[#allocation2 + $0x60] sm:$0x8]  ;;  %v5489_v23 = vunpack.c.l.bf16 %v1250_v55  ;;  %v5493_v7 = vunpack.c.h.bf16 %v1250_v55  ;;  %v1307_v55 = vunpack.c.l.bf16 %v5474_v58  ;;  %v5524_v58 = vunpack.c.l.bf16 %v1265_v26 }
 0x109   : > { %8831 = vst [vmem:[#allocation29_spill] sm:$0xff] %v5441_v17  ;;  %v5472_v17 = vld [vmem:[#allocation2 + $0x80] sm:$0x8]  ;;  %v1298_v20 = vunpack.c.l.bf16 %v5454_v25  ;;  %v5543_v26 = vunpack.c.h.bf16 %v1271_v3  ;;  %v5546_v46 = vunpack.c.l.bf16 %v1274_v13  ;;  %v5548_v30 = vunpack.c.h.bf16 %v1274_v13 }
 0x10a   : > { %8833 = vst [vmem:[#allocation30_spill] sm:$0xff] %v5444_v49  ;;  %v5470_v49 = vunpack.c.h.bf16 %v1241_v41  ;;  %v5486_v41 = vunpack.c.h.bf16 %v1247_v43  ;;  %v5502_v43 = vld [vmem:[#allocation2 + $0xd0] sm:$0x8]  ;;  %v1304_v25 = vunpack.c.l.bf16 %v5472_v17  ;;  %v1277_v17 = vld [vmem:[#allocation2 + $0xf4] sm:$0xff]   ;;  %v8868_v3 = vunpack.c.l.bf16 %v5406_v44 }
 0x10b   : > { %8835 = vst [vmem:[#allocation6_spill] sm:$0xff] %v5447_v19  ;;  %v1262_v19 = vld [vmem:[#allocation2 + $0xa4] sm:$0xff]   ;;  %v1319_v31 = vunpack.c.l.bf16 %v5502_v43  ;;  %v5551_v24 = vunpack.c.l.bf16 %v1277_v17  ;;  %v5553_v22 = vunpack.c.h.bf16 %v1277_v17  ;;  %v5558_v43 = vunpack.c.h.bf16 %v1280_v12 }
 0x10c   : > { %8836 = vst [vmem:[#allocation33_spill] sm:$0xff] %v5456_v18  ;;  %v5517_v52 = vunpack.c.l.bf16 %v1262_v19  ;;  %v5521_v1 = vunpack.c.h.bf16 %v1262_v19  ;;  %v5538_v19 = vunpack.c.h.bf16 %v1268_v37  ;;  %v1328_v37 = vunpack.c.l.bf16 %v5533_v14 }
 0x10d   : > { %8837 = vst [vmem:[#allocation34_spill] sm:$0xff] %v5458_v57  ;;  %v1332_v62 = vmul.f32 %v5531_v50, %v8868_v3  ;;  %v1333_v13 = vmul.f32 %v5531_v50, %v5456_v18  ;;  %v1334_v9 = vmul.f32 %v5531_v50, %v5458_v57  ;;  %v1335_v17 = vmul.f32 %v5531_v50, %v8869_v34 }
 0x10e   : > { %8838 = vst [vmem:[#allocation7_spill] sm:$0xff] %v5461_v56  ;;  %v1336_v14 = vmul.f32 %v5531_v50, %v5461_v56  ;;  %v1337_v12 = vmul.f32 %v5531_v50, %v5465_v53  ;;  %v8870_v44 = vunpack.c.l.bf16 %v5436_v38  ;;  %v1339_v18 = vmul.f32 %v5531_v50, %v5468_v36 }
 0x10f   : > { %8839 = vst [vmem:[#allocation37_spill] sm:$0xff] %v5465_v53  ;;  %v1340_v57 = vmul.f32 %v5531_v50, %v5470_v49  ;;  %v1341_v34 = vmul.f32 %v5531_v50, %v8871_v5  ;;  %v1342_v56 = vmul.f32 %v5531_v50, %v5477_v27  ;;  %v1343_v53 = vmul.f32 %v5531_v50, %v5479_v40 }
 0x110   : > { %8840 = vst [vmem:[#allocation38_spill] sm:$0xff] %v5468_v36  ;;  %v1338_v3 = vmul.f32 %v5531_v50, %v8870_v44  ;;  %v8872_v38 = vunpack.c.l.bf16 %v5451_v28  ;;  %v1345_v36 = vmul.f32 %v5531_v50, %v5484_v63  ;;  %v1347_v42 = vmul.f32 %v5531_v50, %v1298_v20 }
 0x111   : > { %8841 = vst [vmem:[#allocation8_spill] sm:$0xff] %v5470_v49  ;;  %v1346_v49 = vmul.f32 %v5531_v50, %v5486_v41  ;;  %v1348_v5 = vmul.f32 %v5531_v50, %v5489_v23  ;;  %v1351_v28 = vmul.f32 %v5531_v50, %v5496_v54  ;;  %v1355_v20 = vmul.f32 %v5531_v50, %v5507_v2 }
 0x112   : > { %8842 = vst [vmem:[#allocation41_spill] sm:$0xff] %v5477_v27  ;;  %v1344_v44 = vmul.f32 %v5531_v50, %v8872_v38  ;;  %v1349_v27 = vmul.f32 %v5531_v50, %v5493_v7  ;;  %v1352_v38 = vmul.f32 %v5531_v50, %v5498_v21 }
 0x113   : > { %8843 = vst [vmem:[#allocation42_spill] sm:$0xff] %v5479_v40  ;;  %v1350_v40 = vmul.f32 %v5531_v50, %v1301_v47  ;;  %v1358_v47 = vmul.f32 %v5531_v50, %v5514_v0 }
 0x114   : > { %8844 = vst [vmem:[#allocation9_spill] sm:$0xff] %v5484_v63  ;;  %v1353_v63 = vmul.f32 %v5531_v50, %v1304_v25  ;;  %v1361_v25 = vmul.f32 %v5531_v50, %v5521_v1 }
 0x115   : > { %8845 = vst [vmem:[#allocation45_spill] sm:$0xff] %v5486_v41  ;;  %v1354_v41 = vmul.f32 %v5531_v50, %v5505_v4 }
 0x116   : > { %8846 = vst [vmem:[#allocation46_spill] sm:$0xff] %v5489_v23  ;;  %v1356_v23 = vmul.f32 %v5531_v50, %v1307_v55  ;;  %v1364_v55 = vmul.f32 %v5531_v50, %v5526_v48 }
 0x117   : > { %8847 = vst [vmem:[#allocation10_spill] sm:$0xff] %v5493_v7  ;;  %v1357_v7 = vmul.f32 %v5531_v50, %v5512_v33 }
 0x118   : > { %8848 = vst [vmem:[#allocation4_spill] sm:$0xff] %v5496_v54  ;;  %v1359_v54 = vmul.f32 %v5531_v50, %v1310_v59  ;;  %v1367_v59 = vmul.f32 %v5531_v50, %v5538_v19 }
 0x119   : > { %8849 = vst [vmem:[#allocation49_spill] sm:$0xff] %v5498_v21  ;;  %v1360_v21 = vmul.f32 %v5531_v50, %v5517_v52 }
 0x11a   : > { %8850 = vst [vmem:[#allocation50_spill] sm:$0xff] %v5505_v4  ;;  %v1362_v4 = vmul.f32 %v5531_v50, %v1313_v6  ;;  %v1370_v6 = vmul.f32 %v5531_v50, %v5543_v26 }
 0x11b   : > { %8851 = vst [vmem:[#allocation13_spill] sm:$0xff] %v5507_v2  ;;  %v1363_v2 = vmul.f32 %v5531_v50, %v5524_v58 }
 0x11c   : > { %8852 = vst [vmem:[#allocation53_spill] sm:$0xff] %v5512_v33  ;;  %v1365_v33 = vmul.f32 %v5531_v50, %v1316_v51  ;;  %v1373_v51 = vmul.f32 %v5531_v50, %v5548_v30 }
 0x11d   : > { %8853 = vst [vmem:[#allocation54_spill] sm:$0xff] %v5514_v0  ;;  %v1366_v0 = vmul.f32 %v5531_v50, %v5536_v8 }
 0x11e   : > { %8854 = vst [vmem:[#allocation14_spill] sm:$0xff] %v5517_v52  ;;  %v1368_v52 = vmul.f32 %v5531_v50, %v1319_v31  ;;  %v1376_v31 = vmul.f32 %v5531_v50, %v5553_v22 }
 0x11f   : > { %8855 = vst [vmem:[#allocation57_spill] sm:$0xff] %v5521_v1  ;;  %v1369_v1 = vmul.f32 %v5531_v50, %v5541_v61 }
 0x120   : > { %8856 = vst [vmem:[#allocation58_spill] sm:$0xff] %v5524_v58  ;;  %v1371_v58 = vmul.f32 %v5531_v50, %v1322_v35  ;;  %v1379_v35 = vmul.f32 %v5531_v50, %v5558_v43 }
 0x121   : > { %8857 = vst [vmem:[#allocation17_spill] sm:$0xff] %v5526_v48  ;;  %v1372_v48 = vmul.f32 %v5531_v50, %v5546_v46 }
 0x122   : > { %8858 = vst [vmem:[#allocation61_spill] sm:$0xff] %v5536_v8  ;;  %v1374_v8 = vmul.f32 %v5531_v50, %v1325_v15  ;;  %v5657_v15 = vadd.f32 %v1334_v9, %v5277_v10  ;;  %v8875_v10 = vld [vmem:[#allocation15_spill] sm:$0xff] }
 0x123   : > { %8859 = vst [vmem:[#allocation62_spill] sm:$0xff] %v5538_v19  ;;  %v1375_v19 = vmul.f32 %v5531_v50, %v5551_v24  ;;  %v5678_v9 = vadd.f32 %v1341_v34, %v8875_v10  ;;  %v8887_v34 = vld [vmem:[#allocation24_spill] sm:$0xff] }
 0x124   : > { %8860 = vst [vmem:[#allocation18_spill] sm:$0xff] %v5541_v61  ;;  %v1377_v61 = vmul.f32 %v5531_v50, %v1328_v37  ;;  %v5663_v37 = vadd.f32 %v1336_v14, %v5290_v11  ;;  %v8877_v11 = vld [vmem:[#allocation19_spill] sm:$0xff]  ;;  %v5699_v10 = vadd.f32 %v1348_v5, %v8887_v34 }
 0x125   : > { %8861 = vst [vmem:[#allocation65_spill] sm:$0xff] %v5543_v26  ;;  %v1378_v26 = vmul.f32 %v5531_v50, %v5556_v16  ;;  %v5669_v50 = vadd.f32 %v1338_v3, %v5299_v29  ;;  %v5684_v14 = vadd.f32 %v1343_v53, %v8877_v11  ;;  %v8881_v29 = vld [vmem:[#allocation21_spill] sm:$0xff]  ;;  %v8891_v53 = vld [vmem:[#allocation28_spill] sm:$0xff]  ;;  %v8901_v5 = vld [vmem:[#allocation39_spill] sm:$0xff] }
 0x126   : > { %8862 = vst [vmem:[#allocation66_spill] sm:$0xff] %v5546_v46  ;;  %v5651_v46 = vadd.f32 %v1332_v62, %v5265_v39  ;;  %v8873_v39 = vld [vmem:[#allocation11_spill] sm:$0xff]  ;;  %v5690_v3 = vadd.f32 %v1345_v36, %v8881_v29  ;;  %v5705_v11 = vadd.f32 %v1350_v40, %v8891_v53  ;;  %v8895_v36 = vld [vmem:[#allocation32_spill] sm:$0xff]  ;;  %v5720_v34 = vadd.f32 %v1355_v20, %v8901_v5 }
 0x127   : > { %8863 = vst [vmem:[#allocation67_spill] sm:$0xff] %v5548_v30  ;;  %v5654_v30 = vadd.f32 %v1333_v13, %v5273_v32  ;;  %v5672_v62 = vadd.f32 %v1339_v18, %v8873_v39  ;;  %v8874_v32 = vld [vmem:[#allocation12_spill] sm:$0xff]  ;;  %v8883_v18 = vld [vmem:[#allocation22_spill] sm:$0xff]  ;;  %v5711_v29 = vadd.f32 %v1352_v38, %v8895_v36  ;;  %v8905_v40 = vld [vmem:[#allocation43_spill] sm:$0xff] }
 0x128   : > { %8864 = vst [vmem:[#allocation68_spill] sm:$0xff] %v5551_v24  ;;  %v5660_v24 = vadd.f32 %v1335_v17, %v5286_v60  ;;  %v5675_v13 = vadd.f32 %v1340_v57, %v8874_v32  ;;  %v8876_v60 = vld [vmem:[#allocation16_spill] sm:$0xff]  ;;  %v5693_v39 = vadd.f32 %v1346_v49, %v8883_v18  ;;  %v8885_v57 = vld [vmem:[#allocation23_spill] sm:$0xff]  ;;  %v5726_v53 = vadd.f32 %v1357_v7, %v8905_v40 }
 0x129   : > { %8865 = vst [vmem:[#allocation69_spill] sm:$0xff] %v5553_v22  ;;  %v5681_v17 = vadd.f32 %v1342_v56, %v8876_v60  ;;  %v5696_v32 = vadd.f32 %v1347_v42, %v8885_v57  ;;  %v8889_v56 = vld [vmem:[#allocation27_spill] sm:$0xff]  ;;  %v8899_v42 = vld [vmem:[#allocation36_spill] sm:$0xff] }
 0x12a   : > { %8866 = vst [vmem:[#allocation70_spill] sm:$0xff] %v5556_v16  ;;  %v5666_v16 = vadd.f32 %v1337_v12, %v5294_v45  ;;  %v8879_v45 = vld [vmem:[#allocation20_spill] sm:$0xff]  ;;  %v5702_v60 = vadd.f32 %v1349_v27, %v8889_v56  ;;  %v8897_v49 = vld [vmem:[#allocation35_spill] sm:$0xff]  ;;  %v5717_v57 = vadd.f32 %v1354_v41, %v8899_v42 }
 0x12b   : > { %8867 = vst [vmem:[#allocation71_spill] sm:$0xff] %v5558_v43  ;;  %v5687_v12 = vadd.f32 %v1344_v44, %v8879_v45  ;;  %v8893_v44 = vld [vmem:[#allocation31_spill] sm:$0xff]  ;;  %v5714_v18 = vadd.f32 %v1353_v63, %v8897_v49  ;;  %v8903_v27 = vld [vmem:[#allocation40_spill] sm:$0xff] }
 0x12c   : > { %8878 = vst [vmem:[#allocation72_spill] sm:$0xff] %v5684_v14  ;;  %v5708_v45 = vadd.f32 %v1351_v28, %v8893_v44  ;;  %v5723_v56 = vadd.f32 %v1356_v23, %v8903_v27  ;;  %v8907_v28 = vld [vmem:[#allocation44_spill] sm:$0xff]  ;;  %v8909_v38 = vld [vmem:[#allocation47_spill] sm:$0xff] }
 0x12d   : > { %8880 = vst [vmem:[#allocation11_spill] sm:$0xff] %v5687_v12  ;;  %v5729_v44 = vadd.f32 %v1358_v47, %v8907_v28  ;;  %v5732_v36 = vadd.f32 %v1359_v54, %v8909_v38  ;;  %v8911_v63 = vld [vmem:[#allocation48_spill] sm:$0xff]  ;;  %v8913_v41 = vld [vmem:[#allocation51_spill] sm:$0xff] }
 0x12e   : > { %8882 = vst [vmem:[#allocation12_spill] sm:$0xff] %v5690_v3  ;;  %v5735_v49 = vadd.f32 %v1360_v21, %v8911_v63  ;;  %v5738_v42 = vadd.f32 %v1361_v25, %v8913_v41  ;;  %v8915_v20 = vld [vmem:[#allocation52_spill] sm:$0xff]  ;;  %v8917_v23 = vld [vmem:[#allocation55_spill] sm:$0xff] }
 0x12f   : > { %8884 = vst [vmem:[#allocation15_spill] sm:$0xff] %v5693_v39  ;;  %v5741_v5 = vadd.f32 %v1362_v4, %v8915_v20  ;;  %v5744_v27 = vadd.f32 %v1363_v2, %v8917_v23  ;;  %v8919_v7 = vld [vmem:[#allocation56_spill] sm:$0xff]  ;;  %v4086_v54 = vld [vmem:[%s8311_s1 + $0x4] ss:$0 sm:$0xff]  ;;  %v8929_v2 = vld [vmem:[#allocation73_spill] sm:$0xff] }
 0x130   : > { %8886 = vst [vmem:[#allocation16_spill] sm:$0xff] %v5696_v32  ;;  %v5747_v40 = vadd.f32 %v1364_v55, %v8919_v7  ;;  %v8921_v47 = vld [vmem:[#allocation59_spill] sm:$0xff]  ;;  %v8923_v21 = vld [vmem:[#allocation60_spill] sm:$0xff]  ;;  %v5765_v20 = vadd.f32 %v1369_v1, %v8929_v2  ;;  %v8933_v7 = vld [vmem:[#allocation74_spill] sm:$0xff] }
 0x131   : > { %8888 = vst [vmem:[#allocation19_spill] sm:$0xff] %v5699_v10  ;;  %v5753_v28 = vadd.f32 %v1365_v33, %v8921_v47  ;;  %v5756_v38 = vadd.f32 %v1366_v0, %v8923_v21  ;;  %v8925_v25 = vld [vmem:[#allocation63_spill] sm:$0xff]  ;;  %v8927_v4 = vld [vmem:[#allocation64_spill] sm:$0xff]  ;;  %v8943_v1 = vld [vmem:[#allocation5_spill] sm:$0xff] }
 0x132   : > { %8890 = vst [vmem:[#allocation20_spill] sm:$0xff] %v5702_v60  ;;  %v5759_v63 = vadd.f32 %v1367_v59, %v8925_v25  ;;  %v5762_v41 = vadd.f32 %v1368_v52, %v8927_v4  ;;  %v8931_v55 = vld [vmem:[#allocation3_spill] sm:$0xff]  ;;  %v8937_v0 = vld [vmem:[#allocation76_spill] sm:$0xff]  ;;  %v8939_v59 = vld [vmem:[#allocation25_spill] sm:$0xff]  ;;  %v5786_v2 = vadd.f32 %v1376_v31, %v8943_v1 }
 0x133   : > { %8892 = vst [vmem:[#allocation21_spill] sm:$0xff] %v5705_v11  ;;  %v5768_v23 = vadd.f32 %v1370_v6, %v8931_v55  ;;  %v8935_v33 = vld [vmem:[#allocation75_spill] sm:$0xff]  ;;  %v5777_v21 = vadd.f32 %v1373_v51, %v8937_v0  ;;  %v5780_v25 = vadd.f32 %v1374_v8, %v8939_v59  ;;  %v8941_v52 = vld [vmem:[#allocation26_spill] sm:$0xff]  ;;  %v8945_v6 = vld [vmem:[#allocation29_spill] sm:$0xff] }
 0x134   : > { %8894 = vst [vmem:[#allocation22_spill] sm:$0xff] %v5708_v45  ;;  %v5774_v47 = vadd.f32 %v1372_v48, %v8935_v33  ;;  %v5783_v4 = vadd.f32 %v1375_v19, %v8941_v52  ;;  %v5789_v55 = vadd.f32 %v1377_v61, %v8945_v6  ;;  %v8949_v48 = vld [vmem:[#allocation6_spill] sm:$0xff]  ;;  %v8951_v51 = vld [vmem:[#allocation33_spill] sm:$0xff]  ;;  %v8953_v19 = vld [vmem:[#allocation7_spill] sm:$0xff] }
 0x135   : > { %8896 = vst [vmem:[#allocation23_spill] sm:$0xff] %v5711_v29  ;;  %v5795_v33 = vadd.f32 %v1379_v35, %v8949_v48  ;;  %v5798_v0 = vmul.f32 %v4086_v54, %v8951_v51  ;;  %v8952_v8 = vld [vmem:[#allocation34_spill] sm:$0xff]  ;;  %v5804_v52 = vmul.f32 %v4086_v54, %v8953_v19  ;;  %v8954_v31 = vld [vmem:[#allocation37_spill] sm:$0xff] }
 0x136   : > { %8898 = vst [vmem:[#allocation24_spill] sm:$0xff] %v5714_v18  ;;  %v5801_v59 = vmul.f32 %v4086_v54, %v8952_v8  ;;  %v5807_v1 = vmul.f32 %v4086_v54, %v8954_v31  ;;  %v8955_v61 = vld [vmem:[#allocation38_spill] sm:$0xff]  ;;  %v8957_v35 = vld [vmem:[#allocation41_spill] sm:$0xff] }
 0x137   : > { %8900 = vst [vmem:[#allocation27_spill] sm:$0xff] %v5717_v57  ;;  %v5810_v6 = vmul.f32 %v4086_v54, %v8955_v61  ;;  %v5816_v48 = vmul.f32 %v4086_v54, %v8957_v35  ;;  %v8958_v51 = vld [vmem:[#allocation42_spill] sm:$0xff]  ;;  %v8959_v8 = vld [vmem:[#allocation9_spill] sm:$0xff] }
 0x138   : > { %8902 = vst [vmem:[#allocation28_spill] sm:$0xff] %v5720_v34  ;;  %v8960_v19 = vld [vmem:[#allocation45_spill] sm:$0xff]  ;;  %v8961_v31 = vld [vmem:[#allocation46_spill] sm:$0xff] }
 0x139   : > { %8904 = vst [vmem:[#allocation31_spill] sm:$0xff] %v5723_v56  ;;  %v8962_v61 = vld [vmem:[#allocation10_spill] sm:$0xff]  ;;  %v8964_v35 = vld [vmem:[#allocation49_spill] sm:$0xff] }
 0x13a   : > { %8906 = vst [vmem:[#allocation32_spill] sm:$0xff] %v5726_v53 }
 0x13b   : > { %8908 = vst [vmem:[#allocation35_spill] sm:$0xff] %v5729_v44  ;;  %v8978_v44 = vld [vmem:[#allocation66_spill] sm:$0xff] }
 0x13c   : > { %8910 = vst [vmem:[#allocation36_spill] sm:$0xff] %v5732_v36  ;;  %v8976_v36 = vld [vmem:[#allocation65_spill] sm:$0xff] }
 0x13d   : > { %8912 = vst [vmem:[#allocation39_spill] sm:$0xff] %v5735_v49  ;;  %v1497_v49 = vrot.slane %v5804_v52, 1  ;;  %v8982_v52 = vld [vmem:[#allocation70_spill] sm:$0xff] }
 0x13e   : > { %8914 = vst [vmem:[#allocation40_spill] sm:$0xff] %v5738_v42 }
 0x13f   : > { %8916 = vst [vmem:[#allocation43_spill] sm:$0xff] %v5741_v5 }
 0x140   : > { %8918 = vst [vmem:[#allocation44_spill] sm:$0xff] %v5744_v27 }
 0x141   : > { %8920 = vst [vmem:[#allocation47_spill] sm:$0xff] %v5747_v40  ;;  %v5771_v40 = vadd.f32 %v1371_v58, %v8933_v7  ;;  %v8947_v58 = vld [vmem:[#allocation30_spill] sm:$0xff] }
 0x142   : > { %8922 = vst [vmem:[#allocation48_spill] sm:$0xff] %v5753_v28  ;;  %v5792_v7 = vadd.f32 %v1378_v26, %v8947_v58  ;;  %v8956_v26 = vld [vmem:[#allocation8_spill] sm:$0xff] }
 0x143   : > { %8924 = vst [vmem:[#allocation51_spill] sm:$0xff] %v5756_v38  ;;  %v5813_v58 = vmul.f32 %v4086_v54, %v8956_v26  ;;  %v8963_v26 = vld [vmem:[#allocation4_spill] sm:$0xff] }
 0x144   : > { %8926 = vst [vmem:[#allocation52_spill] sm:$0xff] %v5759_v63 }
 0x145   : > { %8928 = vst [vmem:[#allocation55_spill] sm:$0xff] %v5762_v41  ;;  %v1501_v53 = vrot.slane %v5813_v58, 1 }
 0x146   : > { %8930 = vst [vmem:[#allocation56_spill] sm:$0xff] %v5765_v20 }
 0x147   : > { %8932 = vst [vmem:[#allocation59_spill] sm:$0xff] %v5768_v23 }
 0x148   : > { %8934 = vst [vmem:[#allocation60_spill] sm:$0xff] %v5771_v40 }
 0x149   : > { %8936 = vst [vmem:[#allocation63_spill] sm:$0xff] %v5774_v47 }
 0x14a   : > { %8938 = vst [vmem:[#allocation64_spill] sm:$0xff] %v5777_v21  ;;  %v5837_v21 = vmul.f32 %v4086_v54, %v8964_v35  ;;  %v8971_v35 = vld [vmem:[#allocation58_spill] sm:$0xff] }
 0x14b   : > { %8940 = vst [vmem:[#allocation73_spill] sm:$0xff] %v5780_v25  ;;  %v5834_v25 = vmul.f32 %v4086_v54, %v8963_v26  ;;  %v8970_v26 = vld [vmem:[#allocation57_spill] sm:$0xff]  ;;  %v5858_v38 = vmul.f32 %v4086_v54, %v8971_v35  ;;  %v1498_v35 = vrot.slane %v5807_v1, 1  ;;  %v5894_v1 = vmul.f32 %v4086_v54, %v8982_v52 }
 0x14c   : > { %8942 = vst [vmem:[#allocation3_spill] sm:$0xff] %v5783_v4  ;;  %v5831_v4 = vmul.f32 %v4086_v54, %v8962_v61  ;;  %v8969_v61 = vld [vmem:[#allocation14_spill] sm:$0xff]  ;;  %v5855_v63 = vmul.f32 %v4086_v54, %v8970_v26  ;;  %v1495_v26 = vrot.slane %v5801_v59, 1  ;;  %v5891_v59 = vmul.f32 %v4086_v54, %v5553_v22 }
 0x14d   : > { %8944 = vst [vmem:[#allocation74_spill] sm:$0xff] %v5786_v2  ;;  %v5828_v2 = vmul.f32 %v4086_v54, %v8961_v31  ;;  %v8968_v31 = vld [vmem:[#allocation54_spill] sm:$0xff]  ;;  %v5852_v41 = vmul.f32 %v4086_v54, %v8969_v61  ;;  %v1494_v61 = vrot.slane %v5798_v0, 1  ;;  %v8981_v0 = vld [vmem:[#allocation68_spill] sm:$0xff]  ;;  %v1524_v45 = vrot.slane %v5858_v38, 1 }
 0x14e   : > { %8946 = vst [vmem:[#allocation75_spill] sm:$0xff] %v5789_v55  ;;  %v5825_v55 = vmul.f32 %v4086_v54, %v8960_v19  ;;  %v8967_v19 = vld [vmem:[#allocation53_spill] sm:$0xff]  ;;  %v5849_v20 = vmul.f32 %v4086_v54, %v8968_v31  ;;  %v8975_v31 = vld [vmem:[#allocation18_spill] sm:$0xff]  ;;  %v5888_v34 = vmul.f32 %v4086_v54, %v8981_v0  ;;  %v1499_v0 = vsel %vm782_vm6, %v1497_v49, %v1498_v35 }
 0x14f   : > { %8948 = vst [vmem:[#allocation76_spill] sm:$0xff] %v5792_v7  ;;  %v5822_v7 = vmul.f32 %v4086_v54, %v8959_v8  ;;  %v8966_v8 = vld [vmem:[#allocation13_spill] sm:$0xff]  ;;  %v5846_v23 = vmul.f32 %v4086_v54, %v8967_v19  ;;  %v8974_v19 = vld [vmem:[#allocation62_spill] sm:$0xff]  ;;  %v5870_v42 = vmul.f32 %v4086_v54, %v8975_v31  ;;  %v8979_v31 = vld [vmem:[#allocation67_spill] sm:$0xff]  ;;  %v1509_v22 = vrot.slane %v5828_v2, 1 }
 0x150   : > { %8950 = vst [vmem:[#allocation25_spill] sm:$0xff] %v5795_v33  ;;  %v5819_v33 = vmul.f32 %v4086_v54, %v8958_v51  ;;  %v8965_v51 = vld [vmem:[#allocation50_spill] sm:$0xff]  ;;  %v5843_v40 = vmul.f32 %v4086_v54, %v8966_v8  ;;  %v8973_v8 = vld [vmem:[#allocation61_spill] sm:$0xff]  ;;  %v5867_v5 = vmul.f32 %v4086_v54, %v8974_v19  ;;  %v1500_v19 = vrot.slane %v5810_v6, 1 }
 0x151   : > { %v5840_v47 = vmul.f32 %v4086_v54, %v8965_v51  ;;  %v8972_v51 = vld [vmem:[#allocation17_spill] sm:$0xff]  ;;  %v5864_v27 = vmul.f32 %v4086_v54, %v8973_v8  ;;  %v5880_v8 = vmul.f32 %v4086_v54, %v8978_v44  ;;  %v5885_v56 = vmul.f32 %v4086_v54, %v8979_v31 }
 0x152   : > { %v5861_v28 = vmul.f32 %v4086_v54, %v8972_v51  ;;  %v5877_v51 = vmul.f32 %v4086_v54, %v8976_v36  ;;  %v5897_v36 = vmul.f32 %v4086_v54, %v5558_v43  ;;  %v1503_v44 = vrot.slane %v5816_v48, 1 }
 0x153   : > { %8980 = vst [vmem:[#allocation5_spill] sm:$0xff] %v5885_v56  ;;  %v1504_v6 = vrot.slane %v5819_v33, 1  ;;  %v1506_v58 = vrot.slane %v5822_v7, 1  ;;  %v1496_v31 = vsel %vm782_vm6, %v1494_v61, %v1495_v26  ;;  %v1507_v57 = vrot.slane %v5825_v55, 1 }
 0x154   : > { %8977 = vst [vmem:[#allocation26_spill] sm:$0xff] %v5877_v51  ;;  %v1502_v52 = vsel %vm782_vm6, %v1500_v19, %v1501_v53  ;;  %v1510_v18 = vrot.slane %v5831_v4, 1  ;;  %v1512_v54 = vrot.slane %v5834_v25, 1  ;;  %v1513_v48 = vrot.slane %v5837_v21, 1 }
 0x155   : > { %v1515_v33 = vrot.slane %v5840_v47, 1  ;;  %v1516_v7 = vrot.slane %v5843_v40, 1  ;;  %v1518_v43 = vrot.slane %v5846_v23, 1  ;;  %v1519_v29 = vrot.slane %v5849_v20, 1 }
 0x156   : > { %v1521_v55 = vrot.slane %v5852_v41, 1  ;;  %v1522_v2 = vrot.slane %v5855_v63, 1  ;;  %v1525_v4 = vrot.slane %v5861_v28, 1  ;;  %v1527_v25 = vrot.slane %v5864_v27, 1 }
 0x157   : > { %v1528_v21 = vrot.slane %v5867_v5, 1  ;;  %v1530_v47 = vrot.slane %v5870_v42, 1  ;;  %v1505_v23 = vsel %vm782_vm6, %v1503_v44, %v1504_v6  ;;  %v1508_v20 = vsel %vm782_vm6, %v1506_v58, %v1507_v57 }
 0x158   : > { %v1533_v41 = vrot.slane %v5880_v8, 1  ;;  %v1511_v42 = vsel %vm782_vm6, %v1509_v22, %v1510_v18  ;;  %v1514_v40 = vsel %vm782_vm6, %v1512_v54, %v1513_v48  ;;  %v1517_v11 = vsel %vm782_vm6, %v1515_v33, %v1516_v7 }
 0x159   : > { %v1520_v60 = vsel %vm782_vm6, %v1518_v43, %v1519_v29  ;;  %v1523_v8 = vsel %vm782_vm6, %v1521_v55, %v1522_v2  ;;  %v1526_v63 = vsel %vm782_vm6, %v1524_v45, %v1525_v4  ;;  %v1529_v38 = vsel %vm782_vm6, %v1527_v25, %v1528_v21 }
 0x15a   : > { %v8983_v28 = vrot.slane %v5877_v51, 1  ;;  %v8984_v5 = vrot.slane %v5885_v56, 1  ;;  %v5944_v32 = vadd.f32 %v1494_v61, %v5651_v46  ;;  %v5947_v39 = vadd.f32 %v1496_v31, %v5654_v30 }
 0x15b   : > { %v5950_v3 = vadd.f32 %v1495_v26, %v5657_v15  ;;  %v8985_v12 = vrot.slane %v5891_v59, 1  ;;  %v8986_v14 = vrot.slane %v5888_v34, 1  ;;  %v8988_v56 = vrot.slane %v5894_v1, 1 }
 0x15c   : > { %v1532_v27 = vsel %vm782_vm6, %v1530_v47, %v8983_v28  ;;  %v1535_v10 = vsel %vm782_vm6, %v1533_v41, %v8984_v5  ;;  %v8987_v28 = vrot.slane %v5897_v36, 1  ;;  %v5963_v46 = vadd.f32 %v1497_v49, %v5660_v24 }
 0x15d   : > { %v1538_v51 = vsel %vm782_vm6, %v8986_v14, %v8985_v12  ;;  %v5966_v30 = vadd.f32 %v1499_v0, %v5663_v37  ;;  %v5969_v15 = vadd.f32 %v1498_v35, %v5666_v16  ;;  %v5972_v31 = vadd.f32 %v1500_v19, %v5669_v50  ;;  %v8994_v37 = vld [vmem:[#allocation72_spill] sm:$0xff]  ;;  %v8996_v16 = vld [vmem:[#allocation11_spill] sm:$0xff]  ;;  %v9008_v0 = vld [vmem:[#allocation21_spill] sm:$0xff] }
 0x15e   : > { %v1541_v5 = vsel %vm782_vm6, %v8988_v56, %v8987_v28  ;;  %v5975_v14 = vadd.f32 %v1502_v52, %v5672_v62  ;;  %v5978_v12 = vadd.f32 %v1501_v53, %v5675_v13  ;;  %v5981_v56 = vadd.f32 %v1503_v44, %v5678_v9  ;;  %v8998_v50 = vld [vmem:[#allocation12_spill] sm:$0xff]  ;;  %v9000_v62 = vld [vmem:[#allocation15_spill] sm:$0xff] }
 0x15f   : > { %8989 = vst [vmem:[#allocation29_spill] sm:$0xff] %v5972_v31  ;;  %v5984_v24 = vadd.f32 %v1505_v23, %v5681_v17  ;;  %v5987_v49 = vadd.f32 %v1504_v6, %v8994_v37  ;;  %v5990_v61 = vadd.f32 %v1506_v58, %v8996_v16  ;;  %v5993_v19 = vadd.f32 %v1508_v20, %v8998_v50  ;;  %v9002_v13 = vld [vmem:[#allocation16_spill] sm:$0xff]  ;;  %v9004_v9 = vld [vmem:[#allocation19_spill] sm:$0xff]  ;;  %v9010_v6 = vld [vmem:[#allocation22_spill] sm:$0xff] }
 0x160   : > { %8990 = vst [vmem:[#allocation30_spill] sm:$0xff] %v5975_v14  ;;  %v5996_v26 = vadd.f32 %v1507_v57, %v9000_v62  ;;  %v5999_v53 = vadd.f32 %v1509_v22, %v9002_v13  ;;  %v6002_v44 = vadd.f32 %v1511_v42, %v9004_v9  ;;  %v9006_v17 = vld [vmem:[#allocation20_spill] sm:$0xff]  ;;  %v6008_v52 = vadd.f32 %v1512_v54, %v9008_v0  ;;  %v9012_v23 = vld [vmem:[#allocation23_spill] sm:$0xff] }
 0x161   : > { %8991 = vst [vmem:[#allocation6_spill] sm:$0xff] %v5978_v12  ;;  %v6005_v35 = vadd.f32 %v1510_v18, %v9006_v17  ;;  %v6011_v58 = vadd.f32 %v1514_v40, %v9010_v6  ;;  %v6014_v20 = vadd.f32 %v1513_v48, %v9012_v23  ;;  %v9014_v57 = vld [vmem:[#allocation24_spill] sm:$0xff]  ;;  %v9016_v22 = vld [vmem:[#allocation27_spill] sm:$0xff] }
 0x162   : > { %8992 = vst [vmem:[#allocation77_spill] sm:$0xff] %v5981_v56  ;;  %v6017_v28 = vadd.f32 %v1515_v33, %v9014_v57  ;;  %v6020_v37 = vadd.f32 %v1517_v11, %v9016_v22  ;;  %v9018_v42 = vld [vmem:[#allocation28_spill] sm:$0xff]  ;;  %v9020_v18 = vld [vmem:[#allocation31_spill] sm:$0xff] }
 0x163   : > { %8993 = vst [vmem:[#allocation78_spill] sm:$0xff] %v5984_v24  ;;  %v6023_v16 = vadd.f32 %v1516_v7, %v9018_v42  ;;  %v6026_v50 = vadd.f32 %v1518_v43, %v9020_v18  ;;  %v9022_v54 = vld [vmem:[#allocation32_spill] sm:$0xff]  ;;  %v9024_v40 = vld [vmem:[#allocation35_spill] sm:$0xff] }
 0x164   : > { %8995 = vst [vmem:[#allocation72_spill] sm:$0xff] %v5987_v49  ;;  %v6029_v62 = vadd.f32 %v1520_v60, %v9022_v54  ;;  %v6032_v13 = vadd.f32 %v1519_v29, %v9024_v40  ;;  %v9026_v48 = vld [vmem:[#allocation36_spill] sm:$0xff]  ;;  %v9028_v33 = vld [vmem:[#allocation39_spill] sm:$0xff]  ;;  %v1638_v29 = vld [vmem:[#allocation2 + $0x1c] sm:$0x1] }
 0x165   : > { %8997 = vst [vmem:[#allocation11_spill] sm:$0xff] %v5990_v61  ;;  %v6035_v9 = vadd.f32 %v1521_v55, %v9026_v48  ;;  %v6038_v17 = vadd.f32 %v1523_v8, %v9028_v33  ;;  %v9030_v11 = vld [vmem:[#allocation40_spill] sm:$0xff]  ;;  %v9032_v7 = vld [vmem:[#allocation43_spill] sm:$0xff]  ;;  %v1640_v48 = vld [vmem:[#allocation2 + $0x3c] sm:$0x1] }
 0x166   : > { %8999 = vst [vmem:[#allocation12_spill] sm:$0xff] %v5993_v19  ;;  %v6041_v0 = vadd.f32 %v1522_v2, %v9030_v11  ;;  %v6044_v6 = vadd.f32 %v1524_v45, %v9032_v7  ;;  %v9034_v43 = vld [vmem:[#allocation44_spill] sm:$0xff]  ;;  %v9036_v60 = vld [vmem:[#allocation47_spill] sm:$0xff]  ;;  %v1642_v33 = vld [vmem:[#allocation2 + $0x5c] sm:$0x1] }
 0x167   : > { %9001 = vst [vmem:[#allocation15_spill] sm:$0xff] %v5996_v26  ;;  %v6047_v23 = vadd.f32 %v1526_v63, %v9034_v43  ;;  %v6050_v57 = vadd.f32 %v1525_v4, %v9036_v60  ;;  %v1639_v22 = vld [vmem:[#allocation2 + $0x2c] sm:$0x1]  ;;  %v9040_v18 = vld [vmem:[#allocation51_spill] sm:$0xff]  ;;  %v9049_v43 = vld [vmem:[#allocation26_spill] sm:$0xff] }
 0x168   : > { %9003 = vst [vmem:[#allocation16_spill] sm:$0xff] %v5999_v53  ;;  %v9038_v42 = vld [vmem:[#allocation48_spill] sm:$0xff]  ;;  %v6056_v8 = vadd.f32 %v1529_v38, %v9040_v18  ;;  %v9044_v40 = vld [vmem:[#allocation55_spill] sm:$0xff]  ;;  %v9050_v60 = vrot.slane %v9049_v43, 1 }
 0x169   : > { %9005 = vst [vmem:[#allocation19_spill] sm:$0xff] %v6002_v44  ;;  %v6053_v55 = vadd.f32 %v1527_v25, %v9038_v42  ;;  %v9042_v54 = vld [vmem:[#allocation52_spill] sm:$0xff]  ;;  %v6062_v45 = vadd.f32 %v1530_v47, %v9044_v40  ;;  %v9048_v7 = vld [vmem:[#allocation59_spill] sm:$0xff]  ;;  %v1644_v47 = vld [vmem:[#allocation2 + $0x7c] sm:$0x1] }
 0x16a   : > { %9007 = vst [vmem:[#allocation20_spill] sm:$0xff] %v6005_v35  ;;  %v6059_v2 = vadd.f32 %v1528_v21, %v9042_v54  ;;  %v1641_v63 = vld [vmem:[#allocation2 + $0x4c] sm:$0x1]  ;;  %v6070_v25 = vadd.f32 %v9050_v60, %v9048_v7  ;;  %v9054_v18 = vld [vmem:[#allocation63_spill] sm:$0xff] }
 0x16b   : > { %9009 = vst [vmem:[#allocation21_spill] sm:$0xff] %v6008_v52  ;;  %v9046_v11 = vld [vmem:[#allocation56_spill] sm:$0xff]  ;;  %v6076_v21 = vadd.f32 %v1535_v10, %v9054_v18  ;;  %v9063_v7 = vld [vmem:[#allocation3_spill] sm:$0xff]  ;;  %v9066_v10 = vrot.slane %v5891_v59, 1  ;;  %v1646_v18 = vld [vmem:[#allocation2 + $0x9c] sm:$0x1] }
 0x16c   : > { %9011 = vst [vmem:[#allocation22_spill] sm:$0xff] %v6011_v58  ;;  %v6065_v4 = vadd.f32 %v1532_v27, %v9046_v11  ;;  %v9052_v42 = vld [vmem:[#allocation60_spill] sm:$0xff]  ;;  %v9060_v27 = vld [vmem:[#allocation73_spill] sm:$0xff]  ;;  %v9061_v11 = vrot.slane %v5888_v34, 1  ;;  %v6089_v60 = vadd.f32 %v1538_v51, %v9063_v7  ;;  %v9074_v51 = vrot.slane %v5897_v36, 1  ;;  %v9108_v56 = vld [vmem:[#allocation71_spill] sm:$0xff] }
 0x16d   : > { %9013 = vst [vmem:[#allocation23_spill] sm:$0xff] %v6014_v20  ;;  %v6073_v38 = vadd.f32 %v1533_v41, %v9052_v42  ;;  %v1643_v54 = vld [vmem:[#allocation2 + $0x6c] sm:$0x1]  ;;  %v9065_v41 = vld [vmem:[#allocation74_spill] sm:$0xff]  ;;  %v1659_v36 = vunpack.c.l.bf16 %v1642_v33 }
 0x16e   : > { %9015 = vst [vmem:[#allocation24_spill] sm:$0xff] %v6017_v28  ;;  %v1645_v40 = vld [vmem:[#allocation2 + $0x8c] sm:$0x1]  ;;  %v6086_v43 = vadd.f32 %v9061_v11, %v9060_v27  ;;  %v6094_v42 = vadd.f32 %v9066_v10, %v9065_v41  ;;  %v9073_v27 = vld [vmem:[#allocation25_spill] sm:$0xff]  ;;  %v1650_v59 = vld [vmem:[#allocation2 + $0xdc] sm:$0x1]  ;;  %v1655_v41 = vunpack.c.l.bf16 %v1638_v29 }
 0x16f   : > { %9017 = vst [vmem:[#allocation27_spill] sm:$0xff] %v6020_v37  ;;  %v6107_v11 = vadd.f32 %v9074_v51, %v9073_v27  ;;  %v1649_v7 = vld [vmem:[#allocation2 + $0xcc] sm:$0x1]  ;;  %v6112_v10 = vld [vmem:[%s8311_s1 + $0x5] ss:$0 sm:$0xff]  ;;  %v1660_v27 = vunpack.c.l.bf16 %v1643_v54  ;;  %v1661_v51 = vunpack.c.l.bf16 %v1644_v47 }
 0x170   : > { %9019 = vst [vmem:[#allocation28_spill] sm:$0xff] %v6023_v16  ;;  %v1674_v33 = vmul.f32 %v6112_v10, %v1655_v41  ;;  %v9078_v54 = vld [vmem:[#allocation7_spill] sm:$0xff]  ;;  %v9083_v41 = vld [vmem:[#allocation41_spill] sm:$0xff] }
 0x171   : > { %9021 = vst [vmem:[#allocation31_spill] sm:$0xff] %v6026_v50 }
 0x172   : > { %9023 = vst [vmem:[#allocation32_spill] sm:$0xff] %v6029_v62 }
 0x173   : > { %9025 = vst [vmem:[#allocation35_spill] sm:$0xff] %v6032_v13 }
 0x174   : > { %9027 = vst [vmem:[#allocation36_spill] sm:$0xff] %v6035_v9 }
 0x175   : > { %9029 = vst [vmem:[#allocation39_spill] sm:$0xff] %v6038_v17 }
 0x176   : > { %9031 = vst [vmem:[#allocation40_spill] sm:$0xff] %v6041_v0 }
 0x177   : > { %9033 = vst [vmem:[#allocation43_spill] sm:$0xff] %v6044_v6 }
 0x178   : > { %9035 = vst [vmem:[#allocation44_spill] sm:$0xff] %v6047_v23  ;;  %v9076_v23 = vld [vmem:[#allocation33_spill] sm:$0xff] }
 0x179   : > { %9037 = vst [vmem:[#allocation47_spill] sm:$0xff] %v6050_v57 }
 0x17a   : > { %9039 = vst [vmem:[#allocation48_spill] sm:$0xff] %v6053_v55 }
 0x17b   : > { %9041 = vst [vmem:[#allocation51_spill] sm:$0xff] %v6056_v8 }
 0x17c   : > { %9043 = vst [vmem:[#allocation52_spill] sm:$0xff] %v6059_v2  ;;  %v9057_v2 = vld [vmem:[#allocation5_spill] sm:$0xff] }
 0x17d   : > { %9045 = vst [vmem:[#allocation55_spill] sm:$0xff] %v6062_v45  ;;  %v9056_v45 = vld [vmem:[#allocation64_spill] sm:$0xff]  ;;  %v9058_v8 = vrot.slane %v9057_v2, 1 }
 0x17e   : > { %9047 = vst [vmem:[#allocation56_spill] sm:$0xff] %v6065_v4 }
 0x17f   : > { %9051 = vst [vmem:[#allocation59_spill] sm:$0xff] %v6070_v25  ;;  %v6081_v55 = vadd.f32 %v9058_v8, %v9056_v45  ;;  %v9068_v25 = vld [vmem:[#allocation75_spill] sm:$0xff]  ;;  %v9069_v8 = vrot.slane %v5894_v1, 1  ;;  %v9071_v45 = vld [vmem:[#allocation76_spill] sm:$0xff]  ;;  %v6116_v1 = vld [vmem:[#allocation2 + $0xfc] sm:$0x1] }
 0x180   : > { %9053 = vst [vmem:[#allocation26_spill] sm:$0xff] %v6073_v38  ;;  %v1648_v38 = vld [vmem:[#allocation2 + $0xbc] sm:$0x1]  ;;  %v6102_v34 = vadd.f32 %v1541_v5, %v9071_v45  ;;  %v1656_v5 = vunpack.c.l.bf16 %v1639_v22  ;;  %v1658_v45 = vunpack.c.l.bf16 %v1641_v63  ;;  %v1669_v4 = vunpack.c.l.bf16 %v6116_v1 }
 0x181   : > { %9055 = vst [vmem:[#allocation60_spill] sm:$0xff] %v6076_v21  ;;  %v1647_v21 = vld [vmem:[#allocation2 + $0xac] sm:$0x1]  ;;  %v6099_v2 = vadd.f32 %v9069_v8, %v9068_v25  ;;  %v1657_v8 = vunpack.c.l.bf16 %v1640_v48  ;;  %v6125_v22 = vmul.f32 %v6112_v10, %v9076_v23  ;;  %v9077_v48 = vld [vmem:[#allocation34_spill] sm:$0xff]  ;;  %v6150_v1 = vmul.f32 %v6112_v10, %v9083_v41 }
 0x182   : > { %9059 = vst [vmem:[#allocation63_spill] sm:$0xff] %v6081_v55  ;;  %v6118_v25 = vld [vmem:[#allocation2 + $0x10c] sm:$0x1]  ;;  %v1664_v29 = vunpack.c.l.bf16 %v1647_v21  ;;  %v1673_v63 = vmul.f32 %v6112_v10, %v9077_v48  ;;  %v9079_v21 = vld [vmem:[#allocation37_spill] sm:$0xff]  ;;  %v9087_v41 = vld [vmem:[#allocation46_spill] sm:$0xff] }
 0x183   : > { %9062 = vst [vmem:[#allocation64_spill] sm:$0xff] %v6086_v43  ;;  %v1667_v43 = vunpack.c.l.bf16 %v1650_v59  ;;  %v1670_v57 = vunpack.c.l.bf16 %v6118_v25  ;;  %v1676_v47 = vmul.f32 %v6112_v10, %v9079_v21  ;;  %v9082_v23 = vld [vmem:[#allocation8_spill] sm:$0xff]  ;;  %v6146_v59 = vmul.f32 %v6112_v10, %v1657_v8  ;;  %v9084_v25 = vld [vmem:[#allocation42_spill] sm:$0xff] }
 0x184   : > { %9064 = vst [vmem:[#allocation5_spill] sm:$0xff] %v6089_v60  ;;  %v1666_v60 = vunpack.c.l.bf16 %v1649_v7  ;;  %v6143_v7 = vmul.f32 %v6112_v10, %v9082_v23  ;;  %v6154_v48 = vmul.f32 %v6112_v10, %v9084_v25  ;;  %v6168_v8 = vmul.f32 %v6112_v10, %v1659_v36  ;;  %v9088_v25 = vld [vmem:[#allocation10_spill] sm:$0xff] }
 0x185   : > { %9067 = vst [vmem:[#allocation73_spill] sm:$0xff] %v6094_v42  ;;  %v6114_v42 = vld [vmem:[#allocation2 + $0xec] sm:$0x1]  ;;  %v6172_v6 = vmul.f32 %v6112_v10, %v9087_v41  ;;  %v6176_v0 = vmul.f32 %v6112_v10, %v9088_v25  ;;  %v6190_v36 = vmul.f32 %v6112_v10, %v1661_v51  ;;  %v9091_v41 = vld [vmem:[#allocation50_spill] sm:$0xff]  ;;  %v9092_v25 = vld [vmem:[#allocation13_spill] sm:$0xff]  ;;  %v1769_v19 = vrot.slane %v1673_v63, 2 }
 0x186   : > { %9070 = vst [vmem:[#allocation3_spill] sm:$0xff] %v6099_v2  ;;  %v1665_v2 = vunpack.c.l.bf16 %v1648_v38  ;;  %v1668_v55 = vunpack.c.l.bf16 %v6114_v42  ;;  %v6132_v38 = vmul.f32 %v6112_v10, %v9078_v54  ;;  %v9080_v42 = vld [vmem:[#allocation38_spill] sm:$0xff]  ;;  %v9085_v54 = vld [vmem:[#allocation9_spill] sm:$0xff]  ;;  %v6194_v13 = vmul.f32 %v6112_v10, %v9091_v41 }
 0x187   : > { %9072 = vst [vmem:[#allocation74_spill] sm:$0xff] %v6102_v34  ;;  %v1663_v34 = vunpack.c.l.bf16 %v1646_v18  ;;  %v6139_v18 = vmul.f32 %v6112_v10, %v9080_v42  ;;  %v6161_v21 = vmul.f32 %v6112_v10, %v9085_v54  ;;  %v9086_v42 = vld [vmem:[#allocation45_spill] sm:$0xff]  ;;  %v9089_v54 = vld [vmem:[#allocation4_spill] sm:$0xff]  ;;  %v6198_v62 = vmul.f32 %v6112_v10, %v9092_v25  ;;  %v9095_v41 = vld [vmem:[#allocation14_spill] sm:$0xff] }
 0x188   : > { %9075 = vst [vmem:[#allocation75_spill] sm:$0xff] %v6107_v11  ;;  %v1662_v11 = vunpack.c.l.bf16 %v1645_v40  ;;  %v1677_v40 = vmul.f32 %v6112_v10, %v1656_v5  ;;  %v6157_v5 = vmul.f32 %v6112_v10, %v1658_v45  ;;  %v6165_v23 = vmul.f32 %v6112_v10, %v9086_v42  ;;  %v9090_v42 = vld [vmem:[#allocation49_spill] sm:$0xff] }
 0x189   : > { %9081 = vst [vmem:[#allocation76_spill] sm:$0xff] %v6139_v18  ;;  %v6179_v45 = vmul.f32 %v6112_v10, %v1660_v27  ;;  %v6183_v17 = vmul.f32 %v6112_v10, %v9089_v54  ;;  %v6187_v9 = vmul.f32 %v6112_v10, %v9090_v42  ;;  %v9093_v54 = vld [vmem:[#allocation53_spill] sm:$0xff]  ;;  %v9094_v42 = vld [vmem:[#allocation54_spill] sm:$0xff]  ;;  %v6212_v51 = vmul.f32 %v6112_v10, %v1663_v34 }
 0x18a   : > { %v6201_v27 = vmul.f32 %v6112_v10, %v1662_v11  ;;  %v6205_v50 = vmul.f32 %v6112_v10, %v9093_v54  ;;  %v6209_v16 = vmul.f32 %v6112_v10, %v9094_v42  ;;  %v6216_v37 = vmul.f32 %v6112_v10, %v9095_v41  ;;  %v9096_v25 = vld [vmem:[#allocation57_spill] sm:$0xff]  ;;  %v9097_v54 = vld [vmem:[#allocation58_spill] sm:$0xff] }
 0x18b   : > { %v6220_v28 = vmul.f32 %v6112_v10, %v9096_v25  ;;  %v6223_v11 = vmul.f32 %v6112_v10, %v1664_v29  ;;  %v6227_v20 = vmul.f32 %v6112_v10, %v9097_v54  ;;  %v9098_v42 = vld [vmem:[#allocation17_spill] sm:$0xff]  ;;  %v6234_v34 = vmul.f32 %v6112_v10, %v1665_v2  ;;  %v9100_v25 = vld [vmem:[#allocation62_spill] sm:$0xff] }
 0x18c   : > { %v6231_v58 = vmul.f32 %v6112_v10, %v9098_v42  ;;  %v9099_v41 = vld [vmem:[#allocation61_spill] sm:$0xff]  ;;  %v6242_v35 = vmul.f32 %v6112_v10, %v9100_v25  ;;  %v6245_v29 = vmul.f32 %v6112_v10, %v1666_v60  ;;  %v9101_v54 = vld [vmem:[#allocation18_spill] sm:$0xff]  ;;  %v6256_v2 = vmul.f32 %v6112_v10, %v1667_v43 }
 0x18d   : > { %v6238_v52 = vmul.f32 %v6112_v10, %v9099_v41  ;;  %v6249_v44 = vmul.f32 %v6112_v10, %v9101_v54  ;;  %v9102_v42 = vld [vmem:[#allocation65_spill] sm:$0xff]  ;;  %v9103_v41 = vld [vmem:[#allocation66_spill] sm:$0xff]  ;;  %v1771_v60 = vrot.slane %v1674_v33, 2  ;;  %v1774_v49 = vrot.slane %v1676_v47, 2  ;;  %v9104_v54 = vld [vmem:[#allocation67_spill] sm:$0xff] }
 0x18e   : > { %v6253_v53 = vmul.f32 %v6112_v10, %v9102_v42  ;;  %v6260_v26 = vmul.f32 %v6112_v10, %v9103_v41  ;;  %v6266_v24 = vmul.f32 %v6112_v10, %v9104_v54  ;;  %v1776_v42 = vrot.slane %v1677_v40, 2  ;;  %v9105_v41 = vld [vmem:[#allocation68_spill] sm:$0xff]  ;;  %v9106_v63 = vld [vmem:[#allocation69_spill] sm:$0xff]  ;;  %v9107_v54 = vld [vmem:[#allocation70_spill] sm:$0xff] }
 0x18f   : > { %v1779_v43 = vrot.slane %v6143_v7, 2  ;;  %v6271_v12 = vmul.f32 %v6112_v10, %v1668_v55  ;;  %v6275_v25 = vmul.f32 %v6112_v10, %v9105_v41  ;;  %v6279_v33 = vmul.f32 %v6112_v10, %v9106_v63 }
 0x190   : > { %v6282_v47 = vmul.f32 %v6112_v10, %v1669_v4  ;;  %v6286_v40 = vmul.f32 %v6112_v10, %v9107_v54  ;;  %v6290_v7 = vmul.f32 %v6112_v10, %v9108_v56  ;;  %v6293_v55 = vmul.f32 %v6112_v10, %v1670_v57 }
 0x191   : > { %v1781_v41 = vrot.slane %v6146_v59, 2  ;;  %v9109_v61 = vrot.slane %v6125_v22, 2  ;;  %v6302_v4 = vsel %vm1057_vm7, %v1769_v19, %v1771_v60  ;;  %v9110_v54 = vrot.slane %v6132_v38, 2 }
 0x192   : > { %v6311_v57 = vsel %vm1057_vm7, %v1774_v49, %v1776_v42  ;;  %v9111_v10 = vrot.slane %v6139_v18, 2  ;;  %v1789_v31 = vrot.slane %v6165_v23, 2  ;;  %v1796_v42 = vrot.slane %v6179_v45, 2 }
 0x193   : > { %v6299_v63 = vsel %vm1057_vm7, %v9109_v61, %v1769_v19  ;;  %v6307_v14 = vsel %vm1057_vm7, %v9110_v54, %v1774_v49  ;;  %v1784_v61 = vrot.slane %v6154_v48, 2  ;;  %v1786_v19 = vrot.slane %v6157_v5, 2 }
 0x194   : > { %v6316_v59 = vsel %vm1057_vm7, %v9111_v10, %v1779_v43  ;;  %v1791_v54 = vrot.slane %v6168_v8, 2  ;;  %v1794_v49 = vrot.slane %v6176_v0, 2  ;;  %v1799_v10 = vrot.slane %v6187_v9, 2 }
 0x195   : > { %v1801_v48 = vrot.slane %v6190_v36, 2  ;;  %v1804_v60 = vrot.slane %v6198_v62, 2  ;;  %v1806_v23 = vrot.slane %v6201_v27, 2  ;;  %v1782_v8 = vsel %vm1057_vm7, %v1779_v43, %v1781_v41 }
 0x196   : > { %v1809_v0 = vrot.slane %v6209_v16, 2  ;;  %v1811_v45 = vrot.slane %v6212_v51, 2  ;;  %v9112_v18 = vrot.slane %v6150_v1, 2  ;;  %v1787_v36 = vsel %vm1057_vm7, %v1784_v61, %v1786_v19 }
 0x197   : > { %v1814_v62 = vrot.slane %v6220_v28, 2  ;;  %v9113_v27 = vrot.slane %v6161_v21, 2  ;;  %v1792_v41 = vsel %vm1057_vm7, %v1789_v31, %v1791_v54  ;;  %v9114_v16 = vrot.slane %v6172_v6, 2 }
 0x198   : > { %v1785_v9 = vsel %vm1057_vm7, %v9112_v18, %v1784_v61  ;;  %v1797_v56 = vsel %vm1057_vm7, %v1794_v49, %v1796_v42  ;;  %v9115_v18 = vrot.slane %v6183_v17, 2  ;;  %v1802_v19 = vsel %vm1057_vm7, %v1799_v10, %v1801_v48 }
 0x199   : > { %v1790_v43 = vsel %vm1057_vm7, %v9113_v27, %v1789_v31  ;;  %v1795_v51 = vsel %vm1057_vm7, %v9114_v16, %v1794_v49  ;;  %v9116_v28 = vrot.slane %v6194_v13, 2  ;;  %v1807_v27 = vsel %vm1057_vm7, %v1804_v60, %v1806_v23 }
 0x19a   : > { %v1800_v61 = vsel %vm1057_vm7, %v9115_v18, %v1799_v10  ;;  %v9117_v31 = vrot.slane %v6205_v50, 2  ;;  %v1812_v16 = vsel %vm1057_vm7, %v1809_v0, %v1811_v45  ;;  %v1816_v49 = vrot.slane %v6223_v11, 2 }
 0x19b   : > { %v1805_v5 = vsel %vm1057_vm7, %v9116_v28, %v1804_v60  ;;  %v1818_v42 = vrot.slane %v6227_v20, 2  ;;  %v9118_v18 = vrot.slane %v6216_v37, 2  ;;  %v1819_v48 = vrot.slane %v6231_v58, 2 }
 0x19c   : > { %v1810_v54 = vsel %vm1057_vm7, %v9117_v31, %v1809_v0  ;;  %v1821_v28 = vrot.slane %v6234_v34, 2  ;;  %v1823_v60 = vrot.slane %v6238_v52, 2  ;;  %v1824_v23 = vrot.slane %v6242_v35, 2 }
 0x19d   : > { %v1815_v10 = vsel %vm1057_vm7, %v9118_v18, %v1814_v62  ;;  %v1826_v31 = vrot.slane %v6245_v29, 2  ;;  %v1828_v0 = vrot.slane %v6249_v44, 2  ;;  %v1829_v11 = vrot.slane %v6253_v53, 2 }
 0x19e   : > { %v1831_v20 = vrot.slane %v6256_v2, 2  ;;  %v1833_v45 = vrot.slane %v6260_v26, 2  ;;  %v1834_v18 = vrot.slane %v6266_v24, 2  ;;  %v1836_v58 = vrot.slane %v6271_v12, 2 }
 0x19f   : > { %v1817_v34 = vsel %vm1057_vm7, %v1814_v62, %v1816_v49  ;;  %v1839_v35 = vrot.slane %v6279_v33, 2  ;;  %v1841_v29 = vrot.slane %v6282_v47, 2  ;;  %v1820_v44 = vsel %vm1057_vm7, %v1818_v42, %v1819_v48 }
 0x1a0   : > { %v1844_v2 = vrot.slane %v6290_v7, 2  ;;  %v1846_v26 = vrot.slane %v6293_v55, 2  ;;  %v1822_v24 = vsel %vm1057_vm7, %v1819_v48, %v1821_v28  ;;  %v1825_v12 = vsel %vm1057_vm7, %v1823_v60, %v1824_v23 }
 0x1a1   : > { %v1827_v62 = vsel %vm1057_vm7, %v1824_v23, %v1826_v31  ;;  %v1830_v49 = vsel %vm1057_vm7, %v1828_v0, %v1829_v11  ;;  %v1832_v33 = vsel %vm1057_vm7, %v1829_v11, %v1831_v20  ;;  %v1835_v47 = vsel %vm1057_vm7, %v1833_v45, %v1834_v18 }
 0x1a2   : > { %v1837_v52 = vsel %vm1057_vm7, %v1834_v18, %v1836_v58  ;;  %v9119_v53 = vrot.slane %v6125_v22, 2  ;;  %v9120_v55 = vrot.slane %v6275_v25, 2  ;;  %v1842_v28 = vsel %vm1057_vm7, %v1839_v35, %v1841_v29  ;;  %v9126_v29 = vld [vmem:[#allocation30_spill] sm:$0xff] }
 0x1a3   : > { %v6404_v23 = vadd.f32 %v6299_v63, %v5947_v39  ;;  %v6408_v31 = vadd.f32 %v6302_v4, %v5950_v3  ;;  %v9121_v11 = vrot.slane %v6286_v40, 2  ;;  %v9122_v20 = vrot.slane %v6132_v38, 2  ;;  %v9123_v3 = vld [vmem:[#allocation29_spill] sm:$0xff]  ;;  %v9124_v63 = vld [vmem:[#allocation76_spill] sm:$0xff]  ;;  %v9128_v38 = vld [vmem:[#allocation6_spill] sm:$0xff] }
 0x1a4   : > { %v6396_v7 = vadd.f32 %v9119_v53, %v5944_v32  ;;  %v1840_v48 = vsel %vm1057_vm7, %v9120_v55, %v1839_v35  ;;  %v1847_v32 = vsel %vm1057_vm7, %v1844_v2, %v1846_v26  ;;  %v6421_v58 = vadd.f32 %v6307_v14, %v5966_v30  ;;  %v9133_v26 = vld [vmem:[#allocation78_spill] sm:$0xff] }
 0x1a5   : > { %v1845_v22 = vsel %vm1057_vm7, %v9121_v11, %v1844_v2  ;;  %v6417_v18 = vadd.f32 %v9122_v20, %v5963_v46  ;;  %v6425_v39 = vadd.f32 %v6311_v57, %v5969_v15  ;;  %v9125_v4 = vrot.slane %v9124_v63, 2  ;;  %v9130_v2 = vld [vmem:[#allocation77_spill] sm:$0xff]  ;;  %v9135_v57 = vld [vmem:[#allocation72_spill] sm:$0xff]  ;;  %v9137_v11 = vld [vmem:[#allocation11_spill] sm:$0xff] }
 0x1a6   : > { %v6434_v53 = vadd.f32 %v6316_v59, %v9126_v29  ;;  %v6437_v46 = vadd.f32 %v1782_v8, %v9128_v38  ;;  %v9131_v30 = vrot.slane %v6150_v1, 2  ;;  %v6445_v15 = vadd.f32 %v1785_v9, %v9133_v26  ;;  %v9140_v59 = vld [vmem:[#allocation12_spill] sm:$0xff]  ;;  %v9142_v8 = vld [vmem:[#allocation15_spill] sm:$0xff] }
 0x1a7   : > { %v6430_v35 = vadd.f32 %v9125_v4, %v9123_v3  ;;  %v6448_v55 = vadd.f32 %v1787_v36, %v9135_v57  ;;  %v9138_v20 = vrot.slane %v6161_v21, 2  ;;  %v6456_v63 = vadd.f32 %v1790_v43, %v9140_v59  ;;  %v9144_v1 = vld [vmem:[#allocation16_spill] sm:$0xff]  ;;  %v9147_v9 = vld [vmem:[#allocation19_spill] sm:$0xff]  ;;  %v9151_v21 = vld [vmem:[#allocation21_spill] sm:$0xff] }
 0x1a8   : > { %9127 = vst [vmem:[#allocation25_spill] sm:$0xff] %v6434_v53  ;;  %v6442_v14 = vadd.f32 %v9131_v30, %v9130_v2  ;;  %v6459_v4 = vadd.f32 %v1792_v41, %v9142_v8  ;;  %v9145_v29 = vrot.slane %v6172_v6, 2  ;;  %v6467_v2 = vadd.f32 %v1795_v51, %v9147_v9  ;;  %v9149_v36 = vld [vmem:[#allocation20_spill] sm:$0xff]  ;;  %v9154_v43 = vld [vmem:[#allocation22_spill] sm:$0xff]  ;;  %v9156_v41 = vld [vmem:[#allocation23_spill] sm:$0xff] }
 0x1a9   : > { %9129 = vst [vmem:[#allocation33_spill] sm:$0xff] %v6437_v46  ;;  %v6453_v3 = vadd.f32 %v9138_v20, %v9137_v11  ;;  %v6470_v30 = vadd.f32 %v1797_v56, %v9149_v36  ;;  %v9152_v26 = vrot.slane %v6183_v17, 2  ;;  %v6478_v11 = vadd.f32 %v1800_v61, %v9154_v43  ;;  %v9158_v6 = vld [vmem:[#allocation24_spill] sm:$0xff]  ;;  %v9161_v51 = vld [vmem:[#allocation27_spill] sm:$0xff] }
 0x1aa   : > { %9132 = vst [vmem:[#allocation34_spill] sm:$0xff] %v6442_v14  ;;  %v6464_v38 = vadd.f32 %v9145_v29, %v9144_v1  ;;  %v6481_v20 = vadd.f32 %v1802_v19, %v9156_v41  ;;  %v9159_v59 = vrot.slane %v6194_v13, 2  ;;  %v6489_v1 = vadd.f32 %v1805_v5, %v9161_v51  ;;  %v9163_v56 = vld [vmem:[#allocation28_spill] sm:$0xff]  ;;  %v9165_v17 = vld [vmem:[#allocation31_spill] sm:$0xff] }
 0x1ab   : > { %9134 = vst [vmem:[#allocation7_spill] sm:$0xff] %v6445_v15  ;;  %v6475_v57 = vadd.f32 %v9152_v26, %v9151_v21  ;;  %v6492_v29 = vadd.f32 %v1807_v27, %v9163_v56  ;;  %v9166_v9 = vrot.slane %v6205_v50, 2  ;;  %v9168_v61 = vld [vmem:[#allocation32_spill] sm:$0xff]  ;;  %v9170_v19 = vld [vmem:[#allocation35_spill] sm:$0xff]  ;;  %v9173_v43 = vrot.slane %v6216_v37, 2 }
 0x1ac   : > { %9136 = vst [vmem:[#allocation37_spill] sm:$0xff] %v6448_v55  ;;  %v6486_v8 = vadd.f32 %v9159_v59, %v9158_v6  ;;  %v6500_v21 = vadd.f32 %v1810_v54, %v9168_v61  ;;  %v6503_v26 = vadd.f32 %v1812_v16, %v9170_v19  ;;  %v9172_v13 = vld [vmem:[#allocation36_spill] sm:$0xff]  ;;  %v9175_v5 = vld [vmem:[#allocation39_spill] sm:$0xff] }
 0x1ad   : > { %9139 = vst [vmem:[#allocation38_spill] sm:$0xff] %v6453_v3  ;;  %v6497_v36 = vadd.f32 %v9166_v9, %v9165_v17  ;;  %v6508_v41 = vadd.f32 %v9173_v43, %v9172_v13  ;;  %v6511_v6 = vadd.f32 %v1815_v10, %v9175_v5  ;;  %v9177_v27 = vld [vmem:[#allocation40_spill] sm:$0xff]  ;;  %v9179_v50 = vld [vmem:[#allocation43_spill] sm:$0xff] }
 0x1ae   : > { %9141 = vst [vmem:[#allocation8_spill] sm:$0xff] %v6456_v63  ;;  %v6514_v59 = vadd.f32 %v1817_v34, %v9177_v27  ;;  %v6517_v51 = vadd.f32 %v1818_v42, %v9179_v50  ;;  %v9181_v56 = vld [vmem:[#allocation44_spill] sm:$0xff]  ;;  %v9183_v17 = vld [vmem:[#allocation47_spill] sm:$0xff]  ;;  %v9197_v50 = vld [vmem:[#allocation26_spill] sm:$0xff] }
 0x1af   : > { %9143 = vst [vmem:[#allocation41_spill] sm:$0xff] %v6459_v4  ;;  %v6520_v54 = vadd.f32 %v1820_v44, %v9181_v56  ;;  %v6523_v16 = vadd.f32 %v1822_v24, %v9183_v17  ;;  %v9185_v9 = vld [vmem:[#allocation48_spill] sm:$0xff]  ;;  %v9187_v37 = vld [vmem:[#allocation51_spill] sm:$0xff] }
 0x1b0   : > { %9146 = vst [vmem:[#allocation42_spill] sm:$0xff] %v6464_v38  ;;  %v6526_v61 = vadd.f32 %v1823_v60, %v9185_v9  ;;  %v6529_v19 = vadd.f32 %v1825_v12, %v9187_v37  ;;  %v9189_v10 = vld [vmem:[#allocation52_spill] sm:$0xff]  ;;  %v9191_v34 = vld [vmem:[#allocation55_spill] sm:$0xff]  ;;  %v6546_v60 = vadd.f32 %v1833_v45, %v9197_v50  ;;  %v1949_v9 = vld [vmem:[#allocation2 + $0x34] sm:$0xff]  }
 0x1b1   : > { %9148 = vst [vmem:[#allocation9_spill] sm:$0xff] %v6467_v2  ;;  %v6532_v13 = vadd.f32 %v1827_v62, %v9189_v10  ;;  %v6535_v43 = vadd.f32 %v1828_v0, %v9191_v34  ;;  %v6537_v42 = vld [vmem:[#allocation2 + $0x20] sm:$0x8]  ;;  %v9193_v5 = vld [vmem:[#allocation56_spill] sm:$0xff]  ;;  %v6551_v62 = vld [vmem:[#allocation2 + $0x30] sm:$0x8] }
 0x1b2   : > { %9150 = vst [vmem:[#allocation45_spill] sm:$0xff] %v6470_v30  ;;  %v6540_v44 = vadd.f32 %v1830_v49, %v9193_v5  ;;  %v9195_v27 = vld [vmem:[#allocation59_spill] sm:$0xff]  ;;  %v9199_v56 = vld [vmem:[#allocation60_spill] sm:$0xff]  ;;  %v9204_v49 = vrot.slane %v6275_v25, 2  ;;  %v9208_v45 = vld [vmem:[#allocation73_spill] sm:$0xff]  ;;  %v9250_v53 = vunpack.c.l.bf16 %v6551_v62 }
 0x1b3   : > { %9153 = vst [vmem:[#allocation46_spill] sm:$0xff] %v6475_v57  ;;  %v6543_v24 = vadd.f32 %v1832_v33, %v9195_v27  ;;  %v6549_v12 = vadd.f32 %v1835_v47, %v9199_v56  ;;  %v1946_v17 = vld [vmem:[#allocation2 + $0x24] sm:$0xff]   ;;  %v9206_v33 = vld [vmem:[#allocation5_spill] sm:$0xff]  ;;  %v6565_v27 = vadd.f32 %v1842_v28, %v9208_v45  ;;  %v6567_v47 = vld [vmem:[#allocation2 + $0x40] sm:$0x8] }
 0x1b4   : > { %9155 = vst [vmem:[#allocation10_spill] sm:$0xff] %v6478_v11  ;;  %v9201_v0 = vld [vmem:[#allocation63_spill] sm:$0xff]  ;;  %v9203_v10 = vld [vmem:[#allocation64_spill] sm:$0xff]  ;;  %v6562_v5 = vadd.f32 %v1840_v48, %v9206_v33  ;;  %v1955_v48 = vld [vmem:[#allocation2 + $0x54] sm:$0xff]  }
 0x1b5   : > { %9157 = vst [vmem:[#allocation4_spill] sm:$0xff] %v6481_v20  ;;  %v6554_v37 = vadd.f32 %v1837_v52, %v9201_v0  ;;  %v6559_v34 = vadd.f32 %v9204_v49, %v9203_v10  ;;  %v1952_v50 = vld [vmem:[#allocation2 + $0x44] sm:$0xff]   ;;  %v9213_v52 = vld [vmem:[#allocation74_spill] sm:$0xff]  ;;  %v6580_v49 = vld [vmem:[#allocation2 + $0x50] sm:$0x8] }
 0x1b6   : > { %9160 = vst [vmem:[#allocation49_spill] sm:$0xff] %v6486_v8  ;;  %v9210_v56 = vld [vmem:[#allocation3_spill] sm:$0xff]  ;;  %v6575_v0 = vadd.f32 %v1845_v22, %v9213_v52  ;;  %v6599_v28 = vunpack.c.l.bf16 %v1952_v50  ;;  %v6664_v30 = vld [vmem:[#allocation2 + $0x110] sm:$0x8]  ;;  %v9252_v62 = vunpack.c.l.bf16 %v6580_v49 }
 0x1b7   : > { %9162 = vst [vmem:[#allocation50_spill] sm:$0xff] %v6489_v1  ;;  %v9215_v25 = vld [vmem:[#allocation75_spill] sm:$0xff] }
 0x1b8   : > { %9164 = vst [vmem:[#allocation13_spill] sm:$0xff] %v6492_v29  ;;  %v6578_v10 = vadd.f32 %v1847_v32, %v9215_v25  ;;  %v6582_v33 = vld [vmem:[#allocation2 + $0x60] sm:$0x8]  ;;  %v1958_v45 = vld [vmem:[#allocation2 + $0x64] sm:$0xff]   ;;  %v6596_v25 = vunpack.c.h.bf16 %v1949_v9 }
 0x1b9   : > { %9167 = vst [vmem:[#allocation53_spill] sm:$0xff] %v6497_v36  ;;  %v6594_v32 = vld [vmem:[#allocation2 + $0x80] sm:$0x8]  ;;  %v1964_v52 = vld [vmem:[#allocation2 + $0x84] sm:$0xff]   ;;  %v6641_v36 = vld [vmem:[#allocation2 + $0xf0] sm:$0x8] }
 0x1ba   : > { %9169 = vst [vmem:[#allocation54_spill] sm:$0xff] %v6500_v21  ;;  %v1976_v22 = vld [vmem:[#allocation2 + $0xc4] sm:$0xff]   ;;  %v6650_v20 = vld [vmem:[#allocation2 + $0x100] sm:$0x8]  ;;  %v2033_v63 = vunpack.c.l.bf16 %v6641_v36 }
 0x1bb   : > { %9171 = vst [vmem:[#allocation14_spill] sm:$0xff] %v6503_v26  ;;  %v1982_v21 = vld [vmem:[#allocation2 + $0xe4] sm:$0xff]   ;;  %v6657_v57 = vunpack.c.h.bf16 %v1976_v22  ;;  %v2036_v15 = vunpack.c.l.bf16 %v6650_v20 }
 0x1bc   : > { %9174 = vst [vmem:[#allocation57_spill] sm:$0xff] %v6508_v41  ;;  %v6672_v4 = vunpack.c.l.bf16 %v1982_v21 }
 0x1bd   : > { %9176 = vst [vmem:[#allocation58_spill] sm:$0xff] %v6511_v6  ;;  %v1979_v6 = vld [vmem:[#allocation2 + $0xd4] sm:$0xff]  }
 0x1be   : > { %9178 = vst [vmem:[#allocation17_spill] sm:$0xff] %v6514_v59  ;;  %v6631_v59 = vld [vmem:[#allocation2 + $0xd0] sm:$0x8]  ;;  %v6667_v38 = vunpack.c.l.bf16 %v1979_v6 }
 0x1bf   : > { %9180 = vst [vmem:[#allocation61_spill] sm:$0xff] %v6517_v51  ;;  %v6629_v51 = vunpack.c.h.bf16 %v1964_v52  ;;  %v2027_v2 = vunpack.c.l.bf16 %v6631_v59 }
 0x1c0   : > { %9182 = vst [vmem:[#allocation62_spill] sm:$0xff] %v6520_v54 }
 0x1c1   : > { %9184 = vst [vmem:[#allocation18_spill] sm:$0xff] %v6523_v16  ;;  %v6622_v16 = vld [vmem:[#allocation2 + $0xc0] sm:$0x8] }
 0x1c2   : > { %9186 = vst [vmem:[#allocation65_spill] sm:$0xff] %v6526_v61 }
 0x1c3   : > { %9188 = vst [vmem:[#allocation66_spill] sm:$0xff] %v6529_v19 }
 0x1c4   : > { %9190 = vst [vmem:[#allocation67_spill] sm:$0xff] %v6532_v13  ;;  %v6615_v13 = vunpack.c.l.bf16 %v1958_v45 }
 0x1c5   : > { %9192 = vst [vmem:[#allocation68_spill] sm:$0xff] %v6535_v43  ;;  %v6613_v43 = vld [vmem:[#allocation2 + $0xb0] sm:$0x8] }
 0x1c6   : > { %9194 = vst [vmem:[#allocation69_spill] sm:$0xff] %v6540_v44  ;;  %v1970_v44 = vld [vmem:[#allocation2 + $0xa4] sm:$0xff]   ;;  %v2021_v1 = vunpack.c.l.bf16 %v6613_v43  ;;  %v1991_v43 = vld [vmem:[#allocation2 + $0x114] sm:$0xff]  }
 0x1c7   : > { %9196 = vst [vmem:[#allocation70_spill] sm:$0xff] %v6543_v24  ;;  %v6610_v24 = vunpack.c.h.bf16 %v1955_v48  ;;  %v6643_v29 = vunpack.c.l.bf16 %v1970_v44  ;;  %v6687_v46 = vunpack.c.l.bf16 %v1991_v43 }
 0x1c8   : > { %9198 = vst [vmem:[#allocation71_spill] sm:$0xff] %v6546_v60 }
 0x1c9   : > { %9200 = vst [vmem:[#allocation29_spill] sm:$0xff] %v6549_v12  ;;  %v9211_v12 = vrot.slane %v6286_v40, 2  ;;  %v6587_v40 = vunpack.c.l.bf16 %v1946_v17 }
 0x1ca   : > { %9202 = vst [vmem:[#allocation76_spill] sm:$0xff] %v6554_v37  ;;  %v6608_v37 = vunpack.c.l.bf16 %v1955_v48  ;;  %v2012_v48 = vunpack.c.l.bf16 %v6594_v32  ;;  %v1985_v32 = vld [vmem:[#allocation2 + $0xf4] sm:$0xff]  }
 0x1cb   : > { %9205 = vst [vmem:[#allocation30_spill] sm:$0xff] %v6559_v34  ;;  %v6572_v60 = vadd.f32 %v9211_v12, %v9210_v56  ;;  %v6589_v12 = vunpack.c.h.bf16 %v1946_v17  ;;  %v6592_v56 = vunpack.c.l.bf16 %v1949_v9  ;;  %v1967_v34 = vld [vmem:[#allocation2 + $0x94] sm:$0xff]   ;;  %v6605_v17 = vld [vmem:[#allocation2 + $0xa0] sm:$0x8]  ;;  %v6627_v9 = vunpack.c.l.bf16 %v1964_v52 }
 0x1cc   : > { %9207 = vst [vmem:[#allocation6_spill] sm:$0xff] %v6562_v5  ;;  %v1961_v5 = vld [vmem:[#allocation2 + $0x74] sm:$0xff]   ;;  %v6636_v41 = vunpack.c.l.bf16 %v1967_v34  ;;  %v6638_v26 = vunpack.c.h.bf16 %v1967_v34  ;;  %v6645_v52 = vunpack.c.h.bf16 %v1970_v44  ;;  %v2024_v34 = vunpack.c.l.bf16 %v6622_v16  ;;  %v6662_v44 = vld [vmem:[%s8311_s1 + $0x6] ss:$0 sm:$0xff] }
 0x1cd   : > { %9209 = vst [vmem:[#allocation77_spill] sm:$0xff] %v6565_v27  ;;  %v6585_v27 = vld [vmem:[#allocation2 + $0x70] sm:$0x8]  ;;  %v6620_v61 = vunpack.c.l.bf16 %v1961_v5  ;;  %v6624_v54 = vunpack.c.h.bf16 %v1961_v5  ;;  %v2018_v5 = vunpack.c.l.bf16 %v6605_v17  ;;  %v6655_v17 = vunpack.c.l.bf16 %v1976_v22 }
 0x1ce   : > { %9212 = vst [vmem:[#allocation78_spill] sm:$0xff] %v6572_v60  ;;  %v6603_v60 = vld [vmem:[#allocation2 + $0x90] sm:$0x8]  ;;  %v2009_v19 = vunpack.c.l.bf16 %v6585_v27  ;;  %v6674_v22 = vunpack.c.h.bf16 %v1982_v21  ;;  %v6677_v3 = vunpack.c.l.bf16 %v1985_v32  ;;  %v6679_v55 = vunpack.c.h.bf16 %v1985_v32 }
 0x1cf   : > { %9214 = vst [vmem:[#allocation72_spill] sm:$0xff] %v6575_v0  ;;  %v6601_v0 = vunpack.c.h.bf16 %v1952_v50  ;;  %v6617_v50 = vunpack.c.h.bf16 %v1958_v45  ;;  %v6633_v45 = vld [vmem:[#allocation2 + $0xe0] sm:$0x8]  ;;  %v2015_v27 = vunpack.c.l.bf16 %v6603_v60  ;;  %v1988_v60 = vld [vmem:[#allocation2 + $0x104] sm:$0xff]   ;;  %v9249_v21 = vunpack.c.l.bf16 %v6537_v42 }
 0x1d0   : > { %9216 = vst [vmem:[#allocation11_spill] sm:$0xff] %v6578_v10  ;;  %v1973_v10 = vld [vmem:[#allocation2 + $0xb4] sm:$0xff]   ;;  %v2030_v16 = vunpack.c.l.bf16 %v6633_v45  ;;  %v6682_v14 = vunpack.c.l.bf16 %v1988_v60  ;;  %v6684_v59 = vunpack.c.h.bf16 %v1988_v60  ;;  %v6689_v45 = vunpack.c.h.bf16 %v1991_v43 }
 0x1d1   : > { %9217 = vst [vmem:[#allocation12_spill] sm:$0xff] %v6587_v40  ;;  %v6648_v8 = vunpack.c.l.bf16 %v1973_v10  ;;  %v6652_v11 = vunpack.c.h.bf16 %v1973_v10  ;;  %v6669_v10 = vunpack.c.h.bf16 %v1979_v6  ;;  %v2039_v6 = vunpack.c.l.bf16 %v6664_v30 }
 0x1d2   : > { %9218 = vst [vmem:[#allocation15_spill] sm:$0xff] %v6589_v12  ;;  %v2043_v36 = vmul.f32 %v6662_v44, %v9249_v21  ;;  %v2044_v32 = vmul.f32 %v6662_v44, %v6587_v40  ;;  %v2045_v20 = vmul.f32 %v6662_v44, %v6589_v12  ;;  %v2046_v60 = vmul.f32 %v6662_v44, %v9250_v53 }
 0x1d3   : > { %9219 = vst [vmem:[#allocation16_spill] sm:$0xff] %v6592_v56  ;;  %v2047_v30 = vmul.f32 %v6662_v44, %v6592_v56  ;;  %v2048_v43 = vmul.f32 %v6662_v44, %v6596_v25  ;;  %v9251_v42 = vunpack.c.l.bf16 %v6567_v47  ;;  %v2050_v40 = vmul.f32 %v6662_v44, %v6599_v28 }
 0x1d4   : > { %9220 = vst [vmem:[#allocation19_spill] sm:$0xff] %v6596_v25  ;;  %v2051_v12 = vmul.f32 %v6662_v44, %v6601_v0  ;;  %v2052_v53 = vmul.f32 %v6662_v44, %v9252_v62  ;;  %v2053_v56 = vmul.f32 %v6662_v44, %v6608_v37  ;;  %v2054_v25 = vmul.f32 %v6662_v44, %v6610_v24 }
 0x1d5   : > { %9221 = vst [vmem:[#allocation20_spill] sm:$0xff] %v6599_v28  ;;  %v2049_v21 = vmul.f32 %v6662_v44, %v9251_v42  ;;  %v9253_v47 = vunpack.c.l.bf16 %v6582_v33  ;;  %v2056_v28 = vmul.f32 %v6662_v44, %v6615_v13  ;;  %v2058_v49 = vmul.f32 %v6662_v44, %v2009_v19 }
 0x1d6   : > { %9222 = vst [vmem:[#allocation21_spill] sm:$0xff] %v6601_v0  ;;  %v2057_v0 = vmul.f32 %v6662_v44, %v6617_v50  ;;  %v2059_v62 = vmul.f32 %v6662_v44, %v6620_v61  ;;  %v2062_v33 = vmul.f32 %v6662_v44, %v6627_v9  ;;  %v2066_v19 = vmul.f32 %v6662_v44, %v6638_v26 }
 0x1d7   : > { %9223 = vst [vmem:[#allocation22_spill] sm:$0xff] %v6608_v37  ;;  %v2055_v42 = vmul.f32 %v6662_v44, %v9253_v47  ;;  %v2060_v37 = vmul.f32 %v6662_v44, %v6624_v54  ;;  %v2063_v47 = vmul.f32 %v6662_v44, %v6629_v51 }
 0x1d8   : > { %9224 = vst [vmem:[#allocation23_spill] sm:$0xff] %v6610_v24  ;;  %v2061_v24 = vmul.f32 %v6662_v44, %v2012_v48  ;;  %v2069_v48 = vmul.f32 %v6662_v44, %v6645_v52 }
 0x1d9   : > { %9225 = vst [vmem:[#allocation24_spill] sm:$0xff] %v6615_v13  ;;  %v2064_v13 = vmul.f32 %v6662_v44, %v2015_v27  ;;  %v2072_v27 = vmul.f32 %v6662_v44, %v6652_v11 }
 0x1da   : > { %9226 = vst [vmem:[#allocation27_spill] sm:$0xff] %v6617_v50  ;;  %v2065_v50 = vmul.f32 %v6662_v44, %v6636_v41 }
 0x1db   : > { %9227 = vst [vmem:[#allocation28_spill] sm:$0xff] %v6620_v61  ;;  %v2067_v61 = vmul.f32 %v6662_v44, %v2018_v5  ;;  %v2075_v5 = vmul.f32 %v6662_v44, %v6657_v57 }
 0x1dc   : > { %9228 = vst [vmem:[#allocation31_spill] sm:$0xff] %v6624_v54  ;;  %v2068_v54 = vmul.f32 %v6662_v44, %v6643_v29 }
 0x1dd   : > { %9229 = vst [vmem:[#allocation32_spill] sm:$0xff] %v6627_v9  ;;  %v2070_v9 = vmul.f32 %v6662_v44, %v2021_v1  ;;  %v2078_v1 = vmul.f32 %v6662_v44, %v6669_v10 }
 0x1de   : > { %9230 = vst [vmem:[#allocation35_spill] sm:$0xff] %v6629_v51  ;;  %v2071_v51 = vmul.f32 %v6662_v44, %v6648_v8 }
 0x1df   : > { %9231 = vst [vmem:[#allocation36_spill] sm:$0xff] %v6636_v41  ;;  %v2073_v41 = vmul.f32 %v6662_v44, %v2024_v34  ;;  %v2081_v34 = vmul.f32 %v6662_v44, %v6674_v22 }
 0x1e0   : > { %9232 = vst [vmem:[#allocation39_spill] sm:$0xff] %v6638_v26  ;;  %v2074_v26 = vmul.f32 %v6662_v44, %v6655_v17 }
 0x1e1   : > { %9233 = vst [vmem:[#allocation40_spill] sm:$0xff] %v6643_v29  ;;  %v2076_v29 = vmul.f32 %v6662_v44, %v2027_v2  ;;  %v2084_v2 = vmul.f32 %v6662_v44, %v6679_v55 }
 0x1e2   : > { %9234 = vst [vmem:[#allocation43_spill] sm:$0xff] %v6645_v52  ;;  %v2077_v52 = vmul.f32 %v6662_v44, %v6667_v38 }
 0x1e3   : > { %9235 = vst [vmem:[#allocation44_spill] sm:$0xff] %v6648_v8  ;;  %v2079_v8 = vmul.f32 %v6662_v44, %v2030_v16  ;;  %v2087_v16 = vmul.f32 %v6662_v44, %v6684_v59 }
 0x1e4   : > { %9236 = vst [vmem:[#allocation47_spill] sm:$0xff] %v6652_v11  ;;  %v2080_v11 = vmul.f32 %v6662_v44, %v6672_v4 }
 0x1e5   : > { %9237 = vst [vmem:[#allocation48_spill] sm:$0xff] %v6655_v17  ;;  %v2082_v17 = vmul.f32 %v6662_v44, %v2033_v63  ;;  %v2090_v63 = vmul.f32 %v6662_v44, %v6689_v45 }
 0x1e6   : > { %9238 = vst [vmem:[#allocation51_spill] sm:$0xff] %v6657_v57  ;;  %v2083_v57 = vmul.f32 %v6662_v44, %v6677_v3 }
 0x1e7   : > { %9239 = vst [vmem:[#allocation52_spill] sm:$0xff] %v6667_v38  ;;  %v2085_v38 = vmul.f32 %v6662_v44, %v2036_v15  ;;  %v6788_v15 = vadd.f32 %v2045_v20, %v6408_v31  ;;  %v9256_v31 = vld [vmem:[#allocation34_spill] sm:$0xff] }
 0x1e8   : > { %9240 = vst [vmem:[#allocation55_spill] sm:$0xff] %v6669_v10  ;;  %v2086_v10 = vmul.f32 %v6662_v44, %v6682_v14  ;;  %v6809_v20 = vadd.f32 %v2052_v53, %v9256_v31  ;;  %v9268_v53 = vld [vmem:[#allocation9_spill] sm:$0xff] }
 0x1e9   : > { %9241 = vst [vmem:[#allocation56_spill] sm:$0xff] %v6672_v4  ;;  %v2088_v4 = vmul.f32 %v6662_v44, %v2039_v6  ;;  %v6794_v6 = vadd.f32 %v2047_v30, %v6421_v58  ;;  %v9258_v58 = vld [vmem:[#allocation37_spill] sm:$0xff]  ;;  %v6830_v31 = vadd.f32 %v2059_v62, %v9268_v53 }
 0x1ea   : > { %9242 = vst [vmem:[#allocation59_spill] sm:$0xff] %v6674_v22  ;;  %v2089_v22 = vmul.f32 %v6662_v44, %v6687_v46  ;;  %v6800_v44 = vadd.f32 %v2049_v21, %v6430_v35  ;;  %v6815_v30 = vadd.f32 %v2054_v25, %v9258_v58  ;;  %v9262_v35 = vld [vmem:[#allocation8_spill] sm:$0xff]  ;;  %v9272_v25 = vld [vmem:[#allocation46_spill] sm:$0xff]  ;;  %v9282_v62 = vld [vmem:[#allocation13_spill] sm:$0xff] }
 0x1eb   : > { %9243 = vst [vmem:[#allocation26_spill] sm:$0xff] %v6677_v3  ;;  %v6782_v3 = vadd.f32 %v2043_v36, %v6396_v7  ;;  %v9254_v7 = vld [vmem:[#allocation25_spill] sm:$0xff]  ;;  %v6821_v21 = vadd.f32 %v2056_v28, %v9262_v35  ;;  %v6836_v58 = vadd.f32 %v2061_v24, %v9272_v25  ;;  %v9276_v28 = vld [vmem:[#allocation4_spill] sm:$0xff]  ;;  %v6851_v53 = vadd.f32 %v2066_v19, %v9282_v62  ;;  %v9286_v24 = vld [vmem:[#allocation54_spill] sm:$0xff] }
 0x1ec   : > { %9244 = vst [vmem:[#allocation60_spill] sm:$0xff] %v6679_v55  ;;  %v6785_v55 = vadd.f32 %v2044_v32, %v6404_v23  ;;  %v6803_v36 = vadd.f32 %v2050_v40, %v9254_v7  ;;  %v9255_v23 = vld [vmem:[#allocation33_spill] sm:$0xff]  ;;  %v6842_v35 = vadd.f32 %v2063_v47, %v9276_v28  ;;  %v6857_v25 = vadd.f32 %v2068_v54, %v9286_v24  ;;  %v9300_v54 = vld [vmem:[#allocation18_spill] sm:$0xff] }
 0x1ed   : > { %9245 = vst [vmem:[#allocation63_spill] sm:$0xff] %v6682_v14  ;;  %v6791_v14 = vadd.f32 %v2046_v60, %v6417_v18  ;;  %v6806_v32 = vadd.f32 %v2051_v12, %v9255_v23  ;;  %v9257_v18 = vld [vmem:[#allocation7_spill] sm:$0xff]  ;;  %v9264_v40 = vld [vmem:[#allocation41_spill] sm:$0xff]  ;;  %v9266_v12 = vld [vmem:[#allocation42_spill] sm:$0xff]  ;;  %v6878_v24 = vadd.f32 %v2075_v5, %v9300_v54 }
 0x1ee   : > { %9246 = vst [vmem:[#allocation64_spill] sm:$0xff] %v6684_v59  ;;  %v6812_v60 = vadd.f32 %v2053_v56, %v9257_v18  ;;  %v6824_v7 = vadd.f32 %v2057_v0, %v9264_v40  ;;  %v6827_v23 = vadd.f32 %v2058_v49, %v9266_v12  ;;  %v9270_v56 = vld [vmem:[#allocation45_spill] sm:$0xff]  ;;  %v9280_v49 = vld [vmem:[#allocation50_spill] sm:$0xff]  ;;  %v9314_v54 = vld [vmem:[#allocation71_spill] sm:$0xff] }
 0x1ef   : > { %9247 = vst [vmem:[#allocation5_spill] sm:$0xff] %v6687_v46  ;;  %v6797_v46 = vadd.f32 %v2048_v43, %v6425_v39  ;;  %v9260_v39 = vld [vmem:[#allocation38_spill] sm:$0xff]  ;;  %v6833_v18 = vadd.f32 %v2060_v37, %v9270_v56  ;;  %v9278_v0 = vld [vmem:[#allocation49_spill] sm:$0xff]  ;;  %v6848_v12 = vadd.f32 %v2065_v50, %v9280_v49 }
 0x1f0   : > { %9248 = vst [vmem:[#allocation73_spill] sm:$0xff] %v6689_v45  ;;  %v6818_v43 = vadd.f32 %v2055_v42, %v9260_v39  ;;  %v9274_v42 = vld [vmem:[#allocation10_spill] sm:$0xff]  ;;  %v6845_v40 = vadd.f32 %v2064_v13, %v9278_v0  ;;  %v9284_v37 = vld [vmem:[#allocation53_spill] sm:$0xff] }
 0x1f1   : > { %9259 = vst [vmem:[#allocation3_spill] sm:$0xff] %v6815_v30  ;;  %v6839_v39 = vadd.f32 %v2062_v33, %v9274_v42  ;;  %v6854_v56 = vadd.f32 %v2067_v61, %v9284_v37  ;;  %v9288_v33 = vld [vmem:[#allocation14_spill] sm:$0xff]  ;;  %v9290_v47 = vld [vmem:[#allocation57_spill] sm:$0xff] }
 0x1f2   : > { %9261 = vst [vmem:[#allocation74_spill] sm:$0xff] %v6818_v43  ;;  %v6860_v42 = vadd.f32 %v2069_v48, %v9288_v33  ;;  %v6863_v28 = vadd.f32 %v2070_v9, %v9290_v47  ;;  %v9292_v13 = vld [vmem:[#allocation58_spill] sm:$0xff]  ;;  %v9294_v50 = vld [vmem:[#allocation17_spill] sm:$0xff]  ;;  %v4089_v9 = vld [vmem:[%s8311_s1 + $0x7] ss:$0 sm:$0xff] }
 0x1f3   : > { %9263 = vst [vmem:[#allocation75_spill] sm:$0xff] %v6821_v21  ;;  %v6866_v0 = vadd.f32 %v2071_v51, %v9292_v13  ;;  %v6869_v49 = vadd.f32 %v2072_v27, %v9294_v50  ;;  %v9296_v19 = vld [vmem:[#allocation61_spill] sm:$0xff]  ;;  %v9298_v61 = vld [vmem:[#allocation62_spill] sm:$0xff]  ;;  %v9306_v27 = vld [vmem:[#allocation67_spill] sm:$0xff] }
 0x1f4   : > { %9265 = vst [vmem:[#allocation25_spill] sm:$0xff] %v6824_v7  ;;  %v6872_v62 = vadd.f32 %v2073_v41, %v9296_v19  ;;  %v6875_v37 = vadd.f32 %v2074_v26, %v9298_v61  ;;  %v9302_v48 = vld [vmem:[#allocation65_spill] sm:$0xff]  ;;  %v9304_v51 = vld [vmem:[#allocation66_spill] sm:$0xff]  ;;  %v6890_v13 = vadd.f32 %v2078_v1, %v9306_v27  ;;  %v9308_v41 = vld [vmem:[#allocation68_spill] sm:$0xff] }
 0x1f5   : > { %9267 = vst [vmem:[#allocation33_spill] sm:$0xff] %v6827_v23  ;;  %v6884_v33 = vadd.f32 %v2076_v29, %v9302_v48  ;;  %v6887_v47 = vadd.f32 %v2077_v52, %v9304_v51  ;;  %v6893_v50 = vadd.f32 %v2079_v8, %v9308_v41  ;;  %v9310_v26 = vld [vmem:[#allocation69_spill] sm:$0xff]  ;;  %v9312_v5 = vld [vmem:[#allocation70_spill] sm:$0xff]  ;;  %v9318_v52 = vld [vmem:[#allocation76_spill] sm:$0xff] }
 0x1f6   : > { %9269 = vst [vmem:[#allocation34_spill] sm:$0xff] %v6830_v31  ;;  %v6896_v19 = vadd.f32 %v2080_v11, %v9310_v26  ;;  %v6899_v61 = vadd.f32 %v2081_v34, %v9312_v5  ;;  %v9316_v29 = vld [vmem:[#allocation29_spill] sm:$0xff]  ;;  %v6908_v51 = vadd.f32 %v2084_v2, %v9318_v52  ;;  %v9320_v1 = vld [vmem:[#allocation30_spill] sm:$0xff]  ;;  %v9332_v2 = vld [vmem:[#allocation12_spill] sm:$0xff] }
 0x1f7   : > { %9271 = vst [vmem:[#allocation7_spill] sm:$0xff] %v6833_v18  ;;  %v6905_v48 = vadd.f32 %v2083_v57, %v9316_v29  ;;  %v6911_v27 = vadd.f32 %v2085_v38, %v9320_v1  ;;  %v9322_v8 = vld [vmem:[#allocation6_spill] sm:$0xff]  ;;  %v9324_v11 = vld [vmem:[#allocation77_spill] sm:$0xff]  ;;  %v9330_v57 = vld [vmem:[#allocation11_spill] sm:$0xff]  ;;  %v6929_v52 = vmul.f32 %v4089_v9, %v9332_v2 }
 0x1f8   : > { %9273 = vst [vmem:[#allocation37_spill] sm:$0xff] %v6836_v58  ;;  %v6914_v41 = vadd.f32 %v2086_v10, %v9322_v8  ;;  %v6917_v26 = vadd.f32 %v2087_v16, %v9324_v11  ;;  %v9326_v34 = vld [vmem:[#allocation78_spill] sm:$0xff]  ;;  %v6926_v29 = vadd.f32 %v2090_v63, %v9330_v57  ;;  %v9333_v38 = vld [vmem:[#allocation15_spill] sm:$0xff]  ;;  %v9334_v10 = vld [vmem:[#allocation16_spill] sm:$0xff] }
 0x1f9   : > { %9275 = vst [vmem:[#allocation38_spill] sm:$0xff] %v6839_v39  ;;  %v6920_v5 = vadd.f32 %v2088_v4, %v9326_v34  ;;  %v6932_v1 = vmul.f32 %v4089_v9, %v9333_v38  ;;  %v6935_v8 = vmul.f32 %v4089_v9, %v9334_v10  ;;  %v9335_v16 = vld [vmem:[#allocation19_spill] sm:$0xff]  ;;  %v9336_v4 = vld [vmem:[#allocation20_spill] sm:$0xff]  ;;  %v9338_v63 = vld [vmem:[#allocation22_spill] sm:$0xff] }
 0x1fa   : > { %9277 = vst [vmem:[#allocation8_spill] sm:$0xff] %v6842_v35  ;;  %v6938_v11 = vmul.f32 %v4089_v9, %v9335_v16  ;;  %v6941_v34 = vmul.f32 %v4089_v9, %v9336_v4  ;;  %v6947_v57 = vmul.f32 %v4089_v9, %v9338_v63  ;;  %v9339_v2 = vld [vmem:[#allocation23_spill] sm:$0xff]  ;;  %v9340_v38 = vld [vmem:[#allocation24_spill] sm:$0xff] }
 0x1fb   : > { %9279 = vst [vmem:[#allocation41_spill] sm:$0xff] %v6845_v40  ;;  %v9341_v10 = vld [vmem:[#allocation27_spill] sm:$0xff]  ;;  %v9342_v16 = vld [vmem:[#allocation28_spill] sm:$0xff] }
 0x1fc   : > { %9281 = vst [vmem:[#allocation42_spill] sm:$0xff] %v6848_v12  ;;  %v9343_v4 = vld [vmem:[#allocation31_spill] sm:$0xff] }
 0x1fd   : > { %9283 = vst [vmem:[#allocation9_spill] sm:$0xff] %v6851_v53  ;;  %v9345_v63 = vld [vmem:[#allocation35_spill] sm:$0xff] }
 0x1fe   : > { %9285 = vst [vmem:[#allocation45_spill] sm:$0xff] %v6854_v56 }
 0x1ff   : > { %9287 = vst [vmem:[#allocation46_spill] sm:$0xff] %v6857_v25 }
 0x200   : > { %9289 = vst [vmem:[#allocation10_spill] sm:$0xff] %v6860_v42  ;;  %v9359_v42 = vld [vmem:[#allocation26_spill] sm:$0xff] }
 0x201   : > { %9291 = vst [vmem:[#allocation4_spill] sm:$0xff] %v6863_v28  ;;  %v9357_v28 = vld [vmem:[#allocation59_spill] sm:$0xff] }
 0x202   : > { %9293 = vst [vmem:[#allocation49_spill] sm:$0xff] %v6866_v0  ;;  %v2208_v0 = vrot.slane %v6935_v8, 1  ;;  %v9363_v8 = vld [vmem:[#allocation5_spill] sm:$0xff] }
 0x203   : > { %9295 = vst [vmem:[#allocation50_spill] sm:$0xff] %v6869_v49 }
 0x204   : > { %9297 = vst [vmem:[#allocation13_spill] sm:$0xff] %v6872_v62 }
 0x205   : > { %9299 = vst [vmem:[#allocation53_spill] sm:$0xff] %v6875_v37 }
 0x206   : > { %9301 = vst [vmem:[#allocation54_spill] sm:$0xff] %v6878_v24  ;;  %v6902_v24 = vadd.f32 %v2082_v17, %v9314_v54  ;;  %v9328_v17 = vld [vmem:[#allocation72_spill] sm:$0xff] }
 0x207   : > { %9303 = vst [vmem:[#allocation14_spill] sm:$0xff] %v6884_v33  ;;  %v6923_v54 = vadd.f32 %v2089_v22, %v9328_v17  ;;  %v9337_v22 = vld [vmem:[#allocation21_spill] sm:$0xff] }
 0x208   : > { %9305 = vst [vmem:[#allocation57_spill] sm:$0xff] %v6887_v47  ;;  %v6944_v17 = vmul.f32 %v4089_v9, %v9337_v22  ;;  %v9344_v22 = vld [vmem:[#allocation32_spill] sm:$0xff] }
 0x209   : > { %9307 = vst [vmem:[#allocation58_spill] sm:$0xff] %v6890_v13 }
 0x20a   : > { %9309 = vst [vmem:[#allocation17_spill] sm:$0xff] %v6893_v50  ;;  %v2212_v25 = vrot.slane %v6944_v17, 1 }
 0x20b   : > { %9311 = vst [vmem:[#allocation61_spill] sm:$0xff] %v6896_v19 }
 0x20c   : > { %9313 = vst [vmem:[#allocation62_spill] sm:$0xff] %v6899_v61 }
 0x20d   : > { %9315 = vst [vmem:[#allocation18_spill] sm:$0xff] %v6902_v24 }
 0x20e   : > { %9317 = vst [vmem:[#allocation65_spill] sm:$0xff] %v6905_v48 }
 0x20f   : > { %9319 = vst [vmem:[#allocation66_spill] sm:$0xff] %v6908_v51  ;;  %v6968_v51 = vmul.f32 %v4089_v9, %v9345_v63  ;;  %v9352_v63 = vld [vmem:[#allocation48_spill] sm:$0xff] }
 0x210   : > { %9321 = vst [vmem:[#allocation67_spill] sm:$0xff] %v6911_v27  ;;  %v6965_v27 = vmul.f32 %v4089_v9, %v9344_v22  ;;  %v9351_v22 = vld [vmem:[#allocation47_spill] sm:$0xff]  ;;  %v6989_v47 = vmul.f32 %v4089_v9, %v9352_v63  ;;  %v2209_v63 = vrot.slane %v6938_v11, 1  ;;  %v7025_v11 = vmul.f32 %v4089_v9, %v9363_v8 }
 0x211   : > { %9323 = vst [vmem:[#allocation68_spill] sm:$0xff] %v6914_v41  ;;  %v6962_v41 = vmul.f32 %v4089_v9, %v9343_v4  ;;  %v9350_v4 = vld [vmem:[#allocation44_spill] sm:$0xff]  ;;  %v6986_v13 = vmul.f32 %v4089_v9, %v9351_v22  ;;  %v2206_v22 = vrot.slane %v6932_v1, 1  ;;  %v7022_v1 = vmul.f32 %v4089_v9, %v6684_v59 }
 0x212   : > { %9325 = vst [vmem:[#allocation69_spill] sm:$0xff] %v6917_v26  ;;  %v6959_v26 = vmul.f32 %v4089_v9, %v9342_v16  ;;  %v9349_v16 = vld [vmem:[#allocation43_spill] sm:$0xff]  ;;  %v6983_v50 = vmul.f32 %v4089_v9, %v9350_v4  ;;  %v2205_v4 = vrot.slane %v6929_v52, 1  ;;  %v2235_v39 = vrot.slane %v6989_v47, 1 }
 0x213   : > { %9327 = vst [vmem:[#allocation70_spill] sm:$0xff] %v6920_v5  ;;  %v6956_v5 = vmul.f32 %v4089_v9, %v9341_v10  ;;  %v9348_v10 = vld [vmem:[#allocation40_spill] sm:$0xff]  ;;  %v6980_v19 = vmul.f32 %v4089_v9, %v9349_v16  ;;  %v9362_v52 = vld [vmem:[#allocation63_spill] sm:$0xff]  ;;  %v2221_v40 = vrot.slane %v6962_v41, 1  ;;  %v7081_v21 = vadd.f32 %v2206_v22, %v6788_v15 }
 0x214   : > { %9329 = vst [vmem:[#allocation71_spill] sm:$0xff] %v6923_v54  ;;  %v6953_v54 = vmul.f32 %v4089_v9, %v9340_v38  ;;  %v9347_v38 = vld [vmem:[#allocation39_spill] sm:$0xff]  ;;  %v6977_v61 = vmul.f32 %v4089_v9, %v9348_v10  ;;  %v9356_v16 = vld [vmem:[#allocation56_spill] sm:$0xff]  ;;  %v7019_v53 = vmul.f32 %v4089_v9, %v9362_v52  ;;  %v2210_v52 = vsel %vm782_vm6, %v2208_v0, %v2209_v63 }
 0x215   : > { %9331 = vst [vmem:[#allocation29_spill] sm:$0xff] %v6926_v29  ;;  %v6950_v29 = vmul.f32 %v4089_v9, %v9339_v2  ;;  %v9346_v2 = vld [vmem:[#allocation36_spill] sm:$0xff]  ;;  %v6974_v24 = vmul.f32 %v4089_v9, %v9347_v38  ;;  %v9355_v10 = vld [vmem:[#allocation55_spill] sm:$0xff]  ;;  %v7001_v49 = vmul.f32 %v4089_v9, %v9356_v16  ;;  %v2218_v12 = vrot.slane %v6956_v5, 1 }
 0x216   : > { %v6971_v48 = vmul.f32 %v4089_v9, %v9346_v2  ;;  %v9353_v2 = vld [vmem:[#allocation51_spill] sm:$0xff]  ;;  %v9354_v38 = vld [vmem:[#allocation52_spill] sm:$0xff]  ;;  %v6998_v62 = vmul.f32 %v4089_v9, %v9355_v10  ;;  %v2211_v10 = vrot.slane %v6941_v34, 1  ;;  %v2217_v17 = vrot.slane %v6953_v54, 1 }
 0x217   : > { %v6992_v33 = vmul.f32 %v4089_v9, %v9353_v2  ;;  %v6995_v37 = vmul.f32 %v4089_v9, %v9354_v38  ;;  %v7008_v2 = vmul.f32 %v4089_v9, %v9357_v28  ;;  %v7011_v38 = vmul.f32 %v4089_v9, %v9359_v42  ;;  %v9360_v16 = vld [vmem:[#allocation60_spill] sm:$0xff] }
 0x218   : > { %v7016_v56 = vmul.f32 %v4089_v9, %v9360_v16  ;;  %v7028_v28 = vmul.f32 %v4089_v9, %v6689_v45  ;;  %v2214_v42 = vrot.slane %v6947_v57, 1  ;;  %v2215_v34 = vrot.slane %v6950_v29, 1 }
 0x219   : > { %9358 = vst [vmem:[#allocation76_spill] sm:$0xff] %v7008_v2  ;;  %v2207_v16 = vsel %vm782_vm6, %v2205_v4, %v2206_v22  ;;  %v2220_v59 = vrot.slane %v6959_v26, 1  ;;  %v2213_v8 = vsel %vm782_vm6, %v2211_v10, %v2212_v25  ;;  %v2223_v9 = vrot.slane %v6965_v27, 1 }
 0x21a   : > { %9361 = vst [vmem:[#allocation30_spill] sm:$0xff] %v7016_v56  ;;  %v2224_v57 = vrot.slane %v6968_v51, 1  ;;  %v2226_v29 = vrot.slane %v6971_v48, 1  ;;  %v2227_v54 = vrot.slane %v6974_v24, 1  ;;  %v2229_v45 = vrot.slane %v6977_v61, 1 }
 0x21b   : > { %v2230_v35 = vrot.slane %v6980_v19, 1  ;;  %v2232_v5 = vrot.slane %v6983_v50, 1  ;;  %v2233_v26 = vrot.slane %v6986_v13, 1  ;;  %v2236_v41 = vrot.slane %v6992_v33, 1 }
 0x21c   : > { %v2238_v27 = vrot.slane %v6995_v37, 1  ;;  %v2239_v51 = vrot.slane %v6998_v62, 1  ;;  %v2241_v48 = vrot.slane %v7001_v49, 1  ;;  %v2216_v61 = vsel %vm782_vm6, %v2214_v42, %v2215_v34 }
 0x21d   : > { %v2219_v19 = vsel %vm782_vm6, %v2217_v17, %v2218_v12  ;;  %v2244_v50 = vrot.slane %v7011_v38, 1  ;;  %v2222_v49 = vsel %vm782_vm6, %v2220_v59, %v2221_v40  ;;  %v2225_v24 = vsel %vm782_vm6, %v2223_v9, %v2224_v57 }
 0x21e   : > { %v2228_v58 = vsel %vm782_vm6, %v2226_v29, %v2227_v54  ;;  %v2231_v18 = vsel %vm782_vm6, %v2229_v45, %v2230_v35  ;;  %v2234_v38 = vsel %vm782_vm6, %v2232_v5, %v2233_v26  ;;  %v2237_v13 = vsel %vm782_vm6, %v2235_v39, %v2236_v41 }
 0x21f   : > { %v2240_v47 = vsel %vm782_vm6, %v2238_v27, %v2239_v51  ;;  %v9364_v33 = vrot.slane %v7008_v2, 1  ;;  %v9365_v62 = vrot.slane %v7016_v56, 1  ;;  %v7075_v23 = vadd.f32 %v2205_v4, %v6782_v3 }
 0x220   : > { %v7078_v7 = vadd.f32 %v2207_v16, %v6785_v55  ;;  %v9366_v43 = vrot.slane %v7022_v1, 1  ;;  %v9367_v30 = vrot.slane %v7019_v53, 1  ;;  %v9369_v56 = vrot.slane %v7025_v11, 1 }
 0x221   : > { %v2243_v37 = vsel %vm782_vm6, %v2241_v48, %v9364_v33  ;;  %v2246_v31 = vsel %vm782_vm6, %v2244_v50, %v9365_v62  ;;  %v9368_v33 = vrot.slane %v7028_v28, 1  ;;  %v7094_v3 = vadd.f32 %v2208_v0, %v6791_v14 }
 0x222   : > { %v2249_v2 = vsel %vm782_vm6, %v9367_v30, %v9366_v43  ;;  %v7097_v55 = vadd.f32 %v2210_v52, %v6794_v6  ;;  %v7100_v15 = vadd.f32 %v2209_v63, %v6797_v46  ;;  %v7103_v16 = vadd.f32 %v2211_v10, %v6800_v44  ;;  %v9375_v6 = vld [vmem:[#allocation3_spill] sm:$0xff]  ;;  %v9377_v46 = vld [vmem:[#allocation74_spill] sm:$0xff]  ;;  %v9389_v52 = vld [vmem:[#allocation37_spill] sm:$0xff] }
 0x223   : > { %v2252_v62 = vsel %vm782_vm6, %v9369_v56, %v9368_v33  ;;  %v7106_v30 = vadd.f32 %v2213_v8, %v6803_v36  ;;  %v7109_v43 = vadd.f32 %v2212_v25, %v6806_v32  ;;  %v7112_v56 = vadd.f32 %v2214_v42, %v6809_v20  ;;  %v9379_v44 = vld [vmem:[#allocation75_spill] sm:$0xff]  ;;  %v9381_v36 = vld [vmem:[#allocation25_spill] sm:$0xff]  ;;  %v9385_v20 = vld [vmem:[#allocation34_spill] sm:$0xff] }
 0x224   : > { %9370 = vst [vmem:[#allocation6_spill] sm:$0xff] %v7103_v16  ;;  %v7115_v14 = vadd.f32 %v2216_v61, %v6812_v60  ;;  %v7118_v0 = vadd.f32 %v2215_v34, %v9375_v6  ;;  %v7121_v4 = vadd.f32 %v2217_v17, %v9377_v46  ;;  %v7124_v10 = vadd.f32 %v2219_v19, %v9379_v44  ;;  %v9383_v32 = vld [vmem:[#allocation33_spill] sm:$0xff]  ;;  %v9387_v60 = vld [vmem:[#allocation7_spill] sm:$0xff]  ;;  %v9391_v34 = vld [vmem:[#allocation38_spill] sm:$0xff] }
 0x225   : > { %9371 = vst [vmem:[#allocation77_spill] sm:$0xff] %v7106_v30  ;;  %v7127_v22 = vadd.f32 %v2218_v12, %v9381_v36  ;;  %v7130_v25 = vadd.f32 %v2220_v59, %v9383_v32  ;;  %v7133_v42 = vadd.f32 %v2222_v49, %v9385_v20  ;;  %v7136_v63 = vadd.f32 %v2221_v40, %v9387_v60  ;;  %v9393_v61 = vld [vmem:[#allocation8_spill] sm:$0xff]  ;;  %v9395_v12 = vld [vmem:[#allocation41_spill] sm:$0xff]  ;;  %v9397_v59 = vld [vmem:[#allocation42_spill] sm:$0xff] }
 0x226   : > { %9372 = vst [vmem:[#allocation78_spill] sm:$0xff] %v7109_v43  ;;  %v7139_v8 = vadd.f32 %v2223_v9, %v9389_v52  ;;  %v7142_v17 = vadd.f32 %v2225_v24, %v9391_v34  ;;  %v7145_v19 = vadd.f32 %v2224_v57, %v9393_v61  ;;  %v7148_v33 = vadd.f32 %v2226_v29, %v9395_v12  ;;  %v9399_v49 = vld [vmem:[#allocation9_spill] sm:$0xff]  ;;  %v9403_v9 = vld [vmem:[#allocation46_spill] sm:$0xff]  ;;  %v9407_v57 = vld [vmem:[#allocation4_spill] sm:$0xff] }
 0x227   : > { %9373 = vst [vmem:[#allocation72_spill] sm:$0xff] %v7112_v56  ;;  %v7151_v6 = vadd.f32 %v2228_v58, %v9397_v59  ;;  %v7154_v46 = vadd.f32 %v2227_v54, %v9399_v49  ;;  %v9401_v40 = vld [vmem:[#allocation45_spill] sm:$0xff]  ;;  %v7160_v36 = vadd.f32 %v2231_v18, %v9403_v9  ;;  %v9405_v24 = vld [vmem:[#allocation10_spill] sm:$0xff]  ;;  %v7166_v20 = vadd.f32 %v2232_v5, %v9407_v57  ;;  %v2351_v57 = vld [vmem:[#allocation2 + $0x4c] sm:$0x1] }
 0x228   : > { %9374 = vst [vmem:[#allocation11_spill] sm:$0xff] %v7115_v14  ;;  %v7157_v44 = vadd.f32 %v2229_v45, %v9401_v40  ;;  %v7163_v32 = vadd.f32 %v2230_v35, %v9405_v24  ;;  %v9409_v29 = vld [vmem:[#allocation49_spill] sm:$0xff]  ;;  %v9411_v58 = vld [vmem:[#allocation50_spill] sm:$0xff]  ;;  %v2349_v35 = vld [vmem:[#allocation2 + $0x2c] sm:$0x1] }
 0x229   : > { %9376 = vst [vmem:[#allocation3_spill] sm:$0xff] %v7118_v0  ;;  %v7169_v60 = vadd.f32 %v2234_v38, %v9409_v29  ;;  %v7172_v52 = vadd.f32 %v2233_v26, %v9411_v58  ;;  %v9413_v54 = vld [vmem:[#allocation13_spill] sm:$0xff]  ;;  %v9417_v18 = vld [vmem:[#allocation54_spill] sm:$0xff]  ;;  %v2353_v29 = vld [vmem:[#allocation2 + $0x6c] sm:$0x1] }
 0x22a   : > { %9378 = vst [vmem:[#allocation74_spill] sm:$0xff] %v7121_v4  ;;  %v7175_v34 = vadd.f32 %v2235_v39, %v9413_v54  ;;  %v9415_v45 = vld [vmem:[#allocation53_spill] sm:$0xff]  ;;  %v7181_v12 = vadd.f32 %v2236_v41, %v9417_v18  ;;  %v2350_v59 = vld [vmem:[#allocation2 + $0x3c] sm:$0x1] }
 0x22b   : > { %9380 = vst [vmem:[#allocation75_spill] sm:$0xff] %v7124_v10  ;;  %v7178_v61 = vadd.f32 %v2237_v13, %v9415_v45  ;;  %v9419_v49 = vld [vmem:[#allocation14_spill] sm:$0xff]  ;;  %v9421_v40 = vld [vmem:[#allocation57_spill] sm:$0xff]  ;;  %v9430_v45 = vld [vmem:[#allocation76_spill] sm:$0xff] }
 0x22c   : > { %9382 = vst [vmem:[#allocation25_spill] sm:$0xff] %v7127_v22  ;;  %v7184_v5 = vadd.f32 %v2238_v27, %v9419_v49  ;;  %v7187_v38 = vadd.f32 %v2240_v47, %v9421_v40  ;;  %v9423_v9 = vld [vmem:[#allocation58_spill] sm:$0xff]  ;;  %v9425_v24 = vld [vmem:[#allocation17_spill] sm:$0xff]  ;;  %v9431_v18 = vrot.slane %v9430_v45, 1 }
 0x22d   : > { %9384 = vst [vmem:[#allocation33_spill] sm:$0xff] %v7130_v25  ;;  %v7190_v26 = vadd.f32 %v2239_v51, %v9423_v9  ;;  %v7193_v39 = vadd.f32 %v2241_v48, %v9425_v24  ;;  %v2352_v13 = vld [vmem:[#allocation2 + $0x5c] sm:$0x1]  ;;  %v9427_v58 = vld [vmem:[#allocation61_spill] sm:$0xff]  ;;  %v2355_v48 = vld [vmem:[#allocation2 + $0x8c] sm:$0x1] }
 0x22e   : > { %9386 = vst [vmem:[#allocation34_spill] sm:$0xff] %v7133_v42  ;;  %v7196_v41 = vadd.f32 %v2243_v37, %v9427_v58  ;;  %v9429_v54 = vld [vmem:[#allocation62_spill] sm:$0xff]  ;;  %v9435_v40 = vld [vmem:[#allocation65_spill] sm:$0xff]  ;;  %v9441_v37 = vld [vmem:[#allocation67_spill] sm:$0xff]  ;;  %v9442_v58 = vrot.slane %v7019_v53, 1 }
 0x22f   : > { %9388 = vst [vmem:[#allocation7_spill] sm:$0xff] %v7136_v63  ;;  %v7201_v27 = vadd.f32 %v9431_v18, %v9429_v54  ;;  %v9433_v49 = vld [vmem:[#allocation18_spill] sm:$0xff]  ;;  %v7207_v51 = vadd.f32 %v2246_v31, %v9435_v40  ;;  %v9444_v54 = vld [vmem:[#allocation68_spill] sm:$0xff]  ;;  %v9447_v31 = vrot.slane %v7022_v1, 1  ;;  %v9492_v56 = vld [vmem:[#allocation73_spill] sm:$0xff] }
 0x230   : > { %9390 = vst [vmem:[#allocation37_spill] sm:$0xff] %v7139_v8  ;;  %v7204_v47 = vadd.f32 %v2244_v50, %v9433_v49  ;;  %v2354_v9 = vld [vmem:[#allocation2 + $0x7c] sm:$0x1]  ;;  %v7217_v45 = vadd.f32 %v9442_v58, %v9441_v37  ;;  %v7220_v18 = vadd.f32 %v2249_v2, %v9444_v54  ;;  %v9446_v50 = vld [vmem:[#allocation69_spill] sm:$0xff]  ;;  %v2357_v40 = vld [vmem:[#allocation2 + $0xac] sm:$0x1] }
 0x231   : > { %9392 = vst [vmem:[#allocation38_spill] sm:$0xff] %v7142_v17  ;;  %v2356_v24 = vld [vmem:[#allocation2 + $0x9c] sm:$0x1]  ;;  %v7225_v49 = vadd.f32 %v9447_v31, %v9446_v50  ;;  %v9454_v37 = vld [vmem:[#allocation29_spill] sm:$0xff]  ;;  %v9455_v2 = vrot.slane %v7028_v28, 1  ;;  %v2366_v50 = vunpack.c.l.bf16 %v2349_v35  ;;  %v2370_v28 = vunpack.c.l.bf16 %v2353_v29 }
 0x232   : > { %9394 = vst [vmem:[#allocation8_spill] sm:$0xff] %v7145_v19  ;;  %v2360_v54 = vld [vmem:[#allocation2 + $0xdc] sm:$0x1]  ;;  %v2361_v1 = vld [vmem:[#allocation2 + $0xec] sm:$0x1] }
 0x233   : > { %9396 = vst [vmem:[#allocation41_spill] sm:$0xff] %v7148_v33  ;;  %v7238_v58 = vadd.f32 %v9455_v2, %v9454_v37  ;;  %v7243_v31 = vld [vmem:[%s8311_s1 + $0x8] ss:$0 sm:$0xff]  ;;  %v2371_v37 = vunpack.c.l.bf16 %v2354_v9  ;;  %v2372_v2 = vunpack.c.l.bf16 %v2355_v48 }
 0x234   : > { %9398 = vst [vmem:[#allocation42_spill] sm:$0xff] %v7151_v6  ;;  %v2385_v29 = vmul.f32 %v7243_v31, %v2366_v50  ;;  %v9459_v9 = vld [vmem:[#allocation16_spill] sm:$0xff]  ;;  %v9464_v50 = vld [vmem:[#allocation22_spill] sm:$0xff] }
 0x235   : > { %9400 = vst [vmem:[#allocation9_spill] sm:$0xff] %v7154_v46 }
 0x236   : > { %9402 = vst [vmem:[#allocation45_spill] sm:$0xff] %v7157_v44 }
 0x237   : > { %9404 = vst [vmem:[#allocation46_spill] sm:$0xff] %v7160_v36 }
 0x238   : > { %9406 = vst [vmem:[#allocation10_spill] sm:$0xff] %v7163_v32 }
 0x239   : > { %9408 = vst [vmem:[#allocation4_spill] sm:$0xff] %v7166_v20 }
 0x23a   : > { %9410 = vst [vmem:[#allocation49_spill] sm:$0xff] %v7169_v60 }
 0x23b   : > { %9412 = vst [vmem:[#allocation50_spill] sm:$0xff] %v7172_v52 }
 0x23c   : > { %9414 = vst [vmem:[#allocation13_spill] sm:$0xff] %v7175_v34 }
 0x23d   : > { %9416 = vst [vmem:[#allocation53_spill] sm:$0xff] %v7178_v61  ;;  %v9457_v61 = vld [vmem:[#allocation12_spill] sm:$0xff] }
 0x23e   : > { %9418 = vst [vmem:[#allocation54_spill] sm:$0xff] %v7181_v12 }
 0x23f   : > { %9420 = vst [vmem:[#allocation14_spill] sm:$0xff] %v7184_v5 }
 0x240   : > { %9422 = vst [vmem:[#allocation57_spill] sm:$0xff] %v7187_v38 }
 0x241   : > { %9424 = vst [vmem:[#allocation58_spill] sm:$0xff] %v7190_v26  ;;  %v9438_v26 = vld [vmem:[#allocation30_spill] sm:$0xff] }
 0x242   : > { %9426 = vst [vmem:[#allocation17_spill] sm:$0xff] %v7193_v39  ;;  %v9437_v39 = vld [vmem:[#allocation66_spill] sm:$0xff]  ;;  %v9439_v38 = vrot.slane %v9438_v26, 1 }
 0x243   : > { %9428 = vst [vmem:[#allocation61_spill] sm:$0xff] %v7196_v41 }
 0x244   : > { %9432 = vst [vmem:[#allocation62_spill] sm:$0xff] %v7201_v27  ;;  %v7212_v5 = vadd.f32 %v9439_v38, %v9437_v39  ;;  %v9449_v27 = vld [vmem:[#allocation70_spill] sm:$0xff]  ;;  %v9450_v38 = vrot.slane %v7025_v11, 1  ;;  %v9452_v39 = vld [vmem:[#allocation71_spill] sm:$0xff]  ;;  %v7247_v11 = vld [vmem:[#allocation2 + $0x10c] sm:$0x1] }
 0x245   : > { %9434 = vst [vmem:[#allocation76_spill] sm:$0xff] %v7204_v47  ;;  %v2359_v47 = vld [vmem:[#allocation2 + $0xcc] sm:$0x1]  ;;  %v7233_v53 = vadd.f32 %v2252_v62, %v9452_v39  ;;  %v2367_v62 = vunpack.c.l.bf16 %v2350_v59  ;;  %v2369_v39 = vunpack.c.l.bf16 %v2352_v13  ;;  %v2380_v41 = vunpack.c.l.bf16 %v7247_v11 }
 0x246   : > { %9436 = vst [vmem:[#allocation18_spill] sm:$0xff] %v7207_v51  ;;  %v2358_v51 = vld [vmem:[#allocation2 + $0xbc] sm:$0x1]  ;;  %v7230_v26 = vadd.f32 %v9450_v38, %v9449_v27  ;;  %v2368_v38 = vunpack.c.l.bf16 %v2351_v57  ;;  %v7256_v59 = vmul.f32 %v7243_v31, %v9457_v61  ;;  %v9458_v57 = vld [vmem:[#allocation15_spill] sm:$0xff]  ;;  %v9463_v61 = vld [vmem:[#allocation21_spill] sm:$0xff]  ;;  %v7281_v11 = vmul.f32 %v7243_v31, %v9464_v50 }
 0x247   : > { %9440 = vst [vmem:[#allocation65_spill] sm:$0xff] %v7212_v5  ;;  %v7249_v27 = vld [vmem:[#allocation2 + $0x11c] sm:$0x1]  ;;  %v2375_v35 = vunpack.c.l.bf16 %v2358_v51  ;;  %v2384_v13 = vmul.f32 %v7243_v31, %v9458_v57  ;;  %v9460_v51 = vld [vmem:[#allocation19_spill] sm:$0xff]  ;;  %v9468_v50 = vld [vmem:[#allocation28_spill] sm:$0xff] }
 0x248   : > { %9443 = vst [vmem:[#allocation66_spill] sm:$0xff] %v7217_v45  ;;  %v2378_v45 = vunpack.c.l.bf16 %v2361_v1  ;;  %v2381_v12 = vunpack.c.l.bf16 %v7249_v27  ;;  %v2387_v48 = vmul.f32 %v7243_v31, %v9460_v51  ;;  %v7277_v1 = vmul.f32 %v7243_v31, %v2368_v38  ;;  %v9465_v27 = vld [vmem:[#allocation23_spill] sm:$0xff] }
 0x249   : > { %9445 = vst [vmem:[#allocation30_spill] sm:$0xff] %v7220_v18  ;;  %v2377_v18 = vunpack.c.l.bf16 %v2360_v54  ;;  %v7274_v54 = vmul.f32 %v7243_v31, %v9463_v61  ;;  %v7285_v57 = vmul.f32 %v7243_v31, %v9465_v27  ;;  %v7299_v38 = vmul.f32 %v7243_v31, %v2370_v28  ;;  %v9469_v27 = vld [vmem:[#allocation31_spill] sm:$0xff] }
 0x24a   : > { %9448 = vst [vmem:[#allocation67_spill] sm:$0xff] %v7225_v49  ;;  %v7245_v49 = vld [vmem:[#allocation2 + $0xfc] sm:$0x1]  ;;  %v7303_v34 = vmul.f32 %v7243_v31, %v9468_v50  ;;  %v7307_v52 = vmul.f32 %v7243_v31, %v9469_v27  ;;  %v7321_v28 = vmul.f32 %v7243_v31, %v2372_v2  ;;  %v9472_v50 = vld [vmem:[#allocation36_spill] sm:$0xff]  ;;  %v9474_v27 = vld [vmem:[#allocation39_spill] sm:$0xff]  ;;  %v2480_v10 = vrot.slane %v2384_v13, 2 }
 0x24b   : > { %9451 = vst [vmem:[#allocation68_spill] sm:$0xff] %v7230_v26  ;;  %v2376_v26 = vunpack.c.l.bf16 %v2359_v47  ;;  %v2379_v5 = vunpack.c.l.bf16 %v7245_v49  ;;  %v7263_v47 = vmul.f32 %v7243_v31, %v9459_v9  ;;  %v9461_v49 = vld [vmem:[#allocation20_spill] sm:$0xff]  ;;  %v7325_v32 = vmul.f32 %v7243_v31, %v9472_v50 }
 0x24c   : > { %9453 = vst [vmem:[#allocation69_spill] sm:$0xff] %v7233_v53  ;;  %v2374_v53 = vunpack.c.l.bf16 %v2357_v40  ;;  %v7270_v40 = vmul.f32 %v7243_v31, %v9461_v49  ;;  %v9466_v9 = vld [vmem:[#allocation24_spill] sm:$0xff]  ;;  %v9467_v49 = vld [vmem:[#allocation27_spill] sm:$0xff]  ;;  %v7329_v36 = vmul.f32 %v7243_v31, %v9474_v27  ;;  %v2485_v0 = vrot.slane %v2387_v48, 2 }
 0x24d   : > { %9456 = vst [vmem:[#allocation70_spill] sm:$0xff] %v7238_v58  ;;  %v2373_v58 = vunpack.c.l.bf16 %v2356_v24  ;;  %v2388_v24 = vmul.f32 %v7243_v31, %v2367_v62  ;;  %v7288_v62 = vmul.f32 %v7243_v31, %v2369_v39  ;;  %v7292_v51 = vmul.f32 %v7243_v31, %v9466_v9  ;;  %v9470_v9 = vld [vmem:[#allocation32_spill] sm:$0xff]  ;;  %v9480_v27 = vld [vmem:[#allocation47_spill] sm:$0xff] }
 0x24e   : > { %9462 = vst [vmem:[#allocation71_spill] sm:$0xff] %v7270_v40  ;;  %v7296_v61 = vmul.f32 %v7243_v31, %v9467_v49  ;;  %v7310_v39 = vmul.f32 %v7243_v31, %v2371_v37  ;;  %v7314_v60 = vmul.f32 %v7243_v31, %v9470_v9  ;;  %v9471_v49 = vld [vmem:[#allocation35_spill] sm:$0xff]  ;;  %v9475_v9 = vld [vmem:[#allocation40_spill] sm:$0xff]  ;;  %v7343_v2 = vmul.f32 %v7243_v31, %v2374_v53 }
 0x24f   : > { %v7318_v20 = vmul.f32 %v7243_v31, %v9471_v49  ;;  %9473 = vst [vmem:[#allocation29_spill] sm:$0xff] %v7325_v32  ;;  %v7332_v37 = vmul.f32 %v7243_v31, %v2373_v58  ;;  %v7336_v44 = vmul.f32 %v7243_v31, %v9475_v9  ;;  %v9477_v49 = vld [vmem:[#allocation43_spill] sm:$0xff]  ;;  %v9478_v50 = vld [vmem:[#allocation44_spill] sm:$0xff]  ;;  %v7351_v33 = vmul.f32 %v7243_v31, %v9480_v27 }
 0x250   : > { %v7340_v46 = vmul.f32 %v7243_v31, %v9477_v49  ;;  %v7347_v6 = vmul.f32 %v7243_v31, %v9478_v50  ;;  %v7354_v58 = vmul.f32 %v7243_v31, %v2375_v35  ;;  %v9481_v9 = vld [vmem:[#allocation48_spill] sm:$0xff]  ;;  %v9482_v49 = vld [vmem:[#allocation51_spill] sm:$0xff]  ;;  %v7365_v53 = vmul.f32 %v7243_v31, %v2376_v26 }
 0x251   : > { %9476 = vst [vmem:[#allocation12_spill] sm:$0xff] %v7336_v44  ;;  %v7358_v19 = vmul.f32 %v7243_v31, %v9481_v9  ;;  %v7362_v17 = vmul.f32 %v7243_v31, %v9482_v49  ;;  %v9483_v50 = vld [vmem:[#allocation52_spill] sm:$0xff]  ;;  %v9484_v27 = vld [vmem:[#allocation55_spill] sm:$0xff]  ;;  %v7376_v35 = vmul.f32 %v7243_v31, %v2377_v18  ;;  %v7387_v26 = vmul.f32 %v7243_v31, %v2378_v45 }
 0x252   : > { %9479 = vst [vmem:[#allocation15_spill] sm:$0xff] %v7347_v6  ;;  %v7369_v8 = vmul.f32 %v7243_v31, %v9483_v50  ;;  %v7373_v63 = vmul.f32 %v7243_v31, %v9484_v27  ;;  %v9485_v9 = vld [vmem:[#allocation56_spill] sm:$0xff]  ;;  %v9486_v49 = vld [vmem:[#allocation59_spill] sm:$0xff]  ;;  %v9487_v50 = vld [vmem:[#allocation26_spill] sm:$0xff]  ;;  %v2482_v18 = vrot.slane %v2385_v29, 2  ;;  %v2490_v45 = vrot.slane %v7274_v54, 2 }
 0x253   : > { %v7380_v42 = vmul.f32 %v7243_v31, %v9485_v9  ;;  %v7384_v25 = vmul.f32 %v7243_v31, %v9486_v49  ;;  %v7391_v22 = vmul.f32 %v7243_v31, %v9487_v50  ;;  %v9488_v9 = vld [vmem:[#allocation60_spill] sm:$0xff]  ;;  %v2487_v49 = vrot.slane %v2388_v24, 2  ;;  %v9489_v50 = vld [vmem:[#allocation63_spill] sm:$0xff] }
 0x254   : > { %v7397_v14 = vmul.f32 %v7243_v31, %v9488_v9  ;;  %v7402_v43 = vmul.f32 %v7243_v31, %v2379_v5  ;;  %v7406_v27 = vmul.f32 %v7243_v31, %v9489_v50  ;;  %v9490_v13 = vld [vmem:[#allocation64_spill] sm:$0xff]  ;;  %v7413_v48 = vmul.f32 %v7243_v31, %v2380_v41  ;;  %v9491_v9 = vld [vmem:[#allocation5_spill] sm:$0xff] }
 0x255   : > { %v7410_v29 = vmul.f32 %v7243_v31, %v9490_v13  ;;  %v7417_v24 = vmul.f32 %v7243_v31, %v9491_v9  ;;  %v7421_v54 = vmul.f32 %v7243_v31, %v9492_v56  ;;  %v7424_v5 = vmul.f32 %v7243_v31, %v2381_v12 }
 0x256   : > { %v2492_v50 = vrot.slane %v7277_v1, 2  ;;  %v9493_v4 = vrot.slane %v7256_v59, 2  ;;  %v7433_v41 = vsel %vm1057_vm7, %v2480_v10, %v2482_v18  ;;  %v9494_v9 = vrot.slane %v7263_v47, 2 }
 0x257   : > { %v7442_v12 = vsel %vm1057_vm7, %v2485_v0, %v2487_v49  ;;  %v9495_v31 = vrot.slane %v7270_v40, 2  ;;  %v2500_v16 = vrot.slane %v7296_v61, 2  ;;  %v2507_v49 = vrot.slane %v7310_v39, 2 }
 0x258   : > { %v7430_v13 = vsel %vm1057_vm7, %v9493_v4, %v2480_v10  ;;  %v7438_v30 = vsel %vm1057_vm7, %v9494_v9, %v2485_v0  ;;  %v2495_v4 = vrot.slane %v7285_v57, 2  ;;  %v2497_v10 = vrot.slane %v7288_v62, 2 }
 0x259   : > { %v7447_v1 = vsel %vm1057_vm7, %v9495_v31, %v2490_v45  ;;  %v2502_v9 = vrot.slane %v7299_v38, 2  ;;  %v2505_v0 = vrot.slane %v7307_v52, 2  ;;  %v2510_v31 = vrot.slane %v7318_v20, 2 }
 0x25a   : > { %v2512_v57 = vrot.slane %v7321_v28, 2  ;;  %v2515_v18 = vrot.slane %v7329_v36, 2  ;;  %v2517_v61 = vrot.slane %v7332_v37, 2  ;;  %v2493_v38 = vsel %vm1057_vm7, %v2490_v45, %v2492_v50 }
 0x25b   : > { %v2520_v52 = vrot.slane %v7340_v46, 2  ;;  %v2522_v39 = vrot.slane %v7343_v2, 2  ;;  %v9496_v40 = vrot.slane %v7281_v11, 2  ;;  %v2498_v28 = vsel %vm1057_vm7, %v2495_v4, %v2497_v10 }
 0x25c   : > { %v2525_v36 = vrot.slane %v7351_v33, 2  ;;  %v9497_v37 = vrot.slane %v7292_v51, 2  ;;  %v2503_v50 = vsel %vm1057_vm7, %v2500_v16, %v2502_v9  ;;  %v9498_v46 = vrot.slane %v7303_v34, 2 }
 0x25d   : > { %v2496_v20 = vsel %vm1057_vm7, %v9496_v40, %v2495_v4  ;;  %v2508_v56 = vsel %vm1057_vm7, %v2505_v0, %v2507_v49  ;;  %v9499_v40 = vrot.slane %v7314_v60, 2  ;;  %v2513_v10 = vsel %vm1057_vm7, %v2510_v31, %v2512_v57 }
 0x25e   : > { %v2501_v45 = vsel %vm1057_vm7, %v9497_v37, %v2500_v16  ;;  %v2506_v2 = vsel %vm1057_vm7, %v9498_v46, %v2505_v0  ;;  %v9500_v33 = vrot.slane %v7325_v32, 2  ;;  %v2518_v37 = vsel %vm1057_vm7, %v2515_v18, %v2517_v61  ;;  %v9518_v32 = vld [vmem:[#allocation33_spill] sm:$0xff] }
 0x25f   : > { %v2511_v4 = vsel %vm1057_vm7, %v9499_v40, %v2510_v31  ;;  %v9501_v16 = vrot.slane %v7336_v44, 2  ;;  %v2523_v46 = vsel %vm1057_vm7, %v2520_v52, %v2522_v39  ;;  %v2527_v0 = vrot.slane %v7354_v58, 2  ;;  %v9516_v44 = vld [vmem:[#allocation75_spill] sm:$0xff] }
 0x260   : > { %v2516_v62 = vsel %vm1057_vm7, %v9500_v33, %v2515_v18  ;;  %v2529_v49 = vrot.slane %v7358_v19, 2  ;;  %v9502_v40 = vrot.slane %v7347_v6, 2  ;;  %v2530_v57 = vrot.slane %v7362_v17, 2  ;;  %v9513_v6 = vld [vmem:[#allocation3_spill] sm:$0xff] }
 0x261   : > { %v2521_v9 = vsel %vm1057_vm7, %v9501_v16, %v2520_v52  ;;  %v2532_v33 = vrot.slane %v7365_v53, 2  ;;  %v2534_v18 = vrot.slane %v7369_v8, 2  ;;  %v2535_v61 = vrot.slane %v7373_v63, 2 }
 0x262   : > { %v2526_v31 = vsel %vm1057_vm7, %v9502_v40, %v2525_v36  ;;  %v2537_v16 = vrot.slane %v7376_v35, 2  ;;  %v2539_v52 = vrot.slane %v7380_v42, 2  ;;  %v2540_v58 = vrot.slane %v7384_v25, 2 }
 0x263   : > { %v2542_v19 = vrot.slane %v7387_v26, 2  ;;  %v2544_v39 = vrot.slane %v7391_v22, 2  ;;  %v2545_v40 = vrot.slane %v7397_v14, 2  ;;  %v2547_v17 = vrot.slane %v7402_v43, 2 }
 0x264   : > { %v2528_v53 = vsel %vm1057_vm7, %v2525_v36, %v2527_v0  ;;  %v2549_v8 = vrot.slane %v7406_v27, 2  ;;  %v2550_v63 = vrot.slane %v7410_v29, 2  ;;  %v2552_v35 = vrot.slane %v7413_v48, 2 }
 0x265   : > { %v2531_v42 = vsel %vm1057_vm7, %v2529_v49, %v2530_v57  ;;  %v2554_v25 = vrot.slane %v7417_v24, 2  ;;  %v2555_v26 = vrot.slane %v7421_v54, 2  ;;  %v2557_v22 = vrot.slane %v7424_v5, 2 }
 0x266   : > { %v2533_v14 = vsel %vm1057_vm7, %v2530_v57, %v2532_v33  ;;  %v2536_v43 = vsel %vm1057_vm7, %v2534_v18, %v2535_v61  ;;  %v2538_v36 = vsel %vm1057_vm7, %v2535_v61, %v2537_v16  ;;  %v2541_v27 = vsel %vm1057_vm7, %v2539_v52, %v2540_v58 }
 0x267   : > { %v2543_v29 = vsel %vm1057_vm7, %v2540_v58, %v2542_v19  ;;  %v2546_v48 = vsel %vm1057_vm7, %v2544_v39, %v2545_v40  ;;  %v2548_v0 = vsel %vm1057_vm7, %v2545_v40, %v2547_v17  ;;  %v9503_v24 = vrot.slane %v7256_v59, 2  ;;  %v9505_v17 = vld [vmem:[#allocation6_spill] sm:$0xff] }
 0x268   : > { %v2551_v5 = vsel %vm1057_vm7, %v2549_v8, %v2550_v63  ;;  %v2553_v57 = vsel %vm1057_vm7, %v2550_v63, %v2552_v35  ;;  %v2608_v33 = vadd.f32 %v7430_v13, %v7078_v7  ;;  %v2609_v61 = vadd.f32 %v7433_v41, %v7081_v21  ;;  %v9506_v63 = vld [vmem:[#allocation71_spill] sm:$0xff]  ;;  %v9508_v35 = vld [vmem:[#allocation77_spill] sm:$0xff]  ;;  %v9509_v41 = vld [vmem:[#allocation78_spill] sm:$0xff] }
 0x269   : > { %v2607_v54 = vadd.f32 %v9503_v24, %v7075_v23  ;;  %v2556_v16 = vsel %vm1057_vm7, %v2554_v25, %v2555_v26  ;;  %v2558_v58 = vsel %vm1057_vm7, %v2555_v26, %v2557_v22  ;;  %v9504_v19 = vrot.slane %v7263_v47, 2  ;;  %v9510_v26 = vld [vmem:[#allocation72_spill] sm:$0xff] }
 0x26a   : > { %v2611_v23 = vadd.f32 %v7438_v30, %v7097_v55  ;;  %v2612_v59 = vadd.f32 %v7442_v12, %v7100_v15  ;;  %v9507_v7 = vrot.slane %v9506_v63, 2  ;;  %v2614_v21 = vadd.f32 %v7447_v1, %v9508_v35  ;;  %v9514_v30 = vld [vmem:[#allocation74_spill] sm:$0xff] }
 0x26b   : > { %v2610_v40 = vadd.f32 %v9504_v19, %v7094_v3  ;;  %v2615_v24 = vadd.f32 %v2493_v38, %v9509_v41  ;;  %v9511_v22 = vrot.slane %v7281_v11, 2  ;;  %v9512_v3 = vld [vmem:[#allocation11_spill] sm:$0xff]  ;;  %v2618_v55 = vadd.f32 %v2498_v28, %v9513_v6  ;;  %v9520_v35 = vld [vmem:[#allocation34_spill] sm:$0xff] }
 0x26c   : > { %v2613_v13 = vadd.f32 %v9507_v7, %v9505_v17  ;;  %v2617_v19 = vadd.f32 %v2496_v20, %v9512_v3  ;;  %v9515_v15 = vrot.slane %v7292_v51, 2  ;;  %v2620_v63 = vadd.f32 %v2501_v45, %v9516_v44  ;;  %v9517_v17 = vld [vmem:[#allocation25_spill] sm:$0xff]  ;;  %v9521_v11 = vld [vmem:[#allocation7_spill] sm:$0xff]  ;;  %v9524_v28 = vld [vmem:[#allocation38_spill] sm:$0xff] }
 0x26d   : > { %v2616_v47 = vadd.f32 %v9511_v22, %v9510_v26  ;;  %v2621_v7 = vadd.f32 %v2503_v50, %v9517_v17  ;;  %v9519_v1 = vrot.slane %v7303_v34, 2  ;;  %v2623_v41 = vadd.f32 %v2506_v2, %v9520_v35  ;;  %v9522_v22 = vld [vmem:[#allocation37_spill] sm:$0xff]  ;;  %v9525_v51 = vld [vmem:[#allocation8_spill] sm:$0xff]  ;;  %v9529_v17 = vld [vmem:[#allocation42_spill] sm:$0xff] }
 0x26e   : > { %v2619_v12 = vadd.f32 %v9515_v15, %v9514_v30  ;;  %v2624_v26 = vadd.f32 %v2508_v56, %v9521_v11  ;;  %v9523_v20 = vrot.slane %v7314_v60, 2  ;;  %v2626_v3 = vadd.f32 %v2511_v4, %v9524_v28  ;;  %v9526_v15 = vld [vmem:[#allocation41_spill] sm:$0xff]  ;;  %v9532_v35 = vld [vmem:[#allocation12_spill] sm:$0xff]  ;;  %v9534_v60 = vld [vmem:[#allocation46_spill] sm:$0xff] }
 0x26f   : > { %v2622_v38 = vadd.f32 %v9519_v1, %v9518_v32  ;;  %v2627_v30 = vadd.f32 %v2513_v10, %v9525_v51  ;;  %v9527_v44 = vld [vmem:[#allocation29_spill] sm:$0xff]  ;;  %v2629_v34 = vadd.f32 %v2516_v62, %v9529_v17  ;;  %v9533_v11 = vrot.slane %v9532_v35, 2  ;;  %v9536_v28 = vld [vmem:[#allocation4_spill] sm:$0xff]  ;;  %v9537_v10 = vld [vmem:[#allocation15_spill] sm:$0xff] }
 0x270   : > { %v2625_v6 = vadd.f32 %v9523_v20, %v9522_v22  ;;  %v9528_v45 = vrot.slane %v9527_v44, 2  ;;  %v9530_v1 = vld [vmem:[#allocation9_spill] sm:$0xff]  ;;  %v2632_v20 = vadd.f32 %v2521_v9, %v9534_v60  ;;  %v9535_v22 = vld [vmem:[#allocation10_spill] sm:$0xff]  ;;  %v9538_v51 = vrot.slane %v9537_v10, 2  ;;  %v7589_v60 = vld [vmem:[%s8312_s2] ss:$0 sm:$0xff] }
 0x271   : > { %v2630_v32 = vadd.f32 %v2518_v37, %v9530_v1  ;;  %v9531_v2 = vld [vmem:[#allocation45_spill] sm:$0xff]  ;;  %v2633_v4 = vadd.f32 %v2523_v46, %v9535_v22  ;;  %v9540_v17 = vld [vmem:[#allocation50_spill] sm:$0xff]  ;;  %9544 = vst [vmem:[#allocation16_spill] sm:$0xff] %v7589_v60 }
 0x272   : > { %v2628_v50 = vadd.f32 %v9528_v45, %v9526_v15  ;;  %v2631_v56 = vadd.f32 %v9533_v11, %v9531_v2  ;;  %v2634_v44 = vadd.f32 %v9538_v51, %v9536_v28  ;;  %v9539_v15 = vld [vmem:[#allocation49_spill] sm:$0xff]  ;;  %v2636_v62 = vadd.f32 %v2528_v53, %v9540_v17  ;;  %v9543_v11 = vld [vmem:[#allocation54_spill] sm:$0xff] }
 0x273   : > { %v2635_v45 = vadd.f32 %v2526_v31, %v9539_v15  ;;  %v9541_v1 = vld [vmem:[#allocation13_spill] sm:$0xff]  ;;  %v2639_v9 = vadd.f32 %v2533_v14, %v9543_v11  ;;  %v9545_v46 = vld [vmem:[#allocation14_spill] sm:$0xff] }
 0x274   : > { %v2637_v37 = vadd.f32 %v2529_v49, %v9541_v1  ;;  %v9542_v35 = vld [vmem:[#allocation53_spill] sm:$0xff]  ;;  %v2640_v22 = vadd.f32 %v2534_v18, %v9545_v46  ;;  %v9547_v51 = vld [vmem:[#allocation58_spill] sm:$0xff] }
 0x275   : > { %v2638_v2 = vadd.f32 %v2531_v42, %v9542_v35  ;;  %v9546_v10 = vld [vmem:[#allocation57_spill] sm:$0xff]  ;;  %v2642_v15 = vadd.f32 %v2538_v36, %v9547_v51  ;;  %v9550_v49 = vld [vmem:[#allocation62_spill] sm:$0xff]  ;;  %v9551_v42 = vld [vmem:[#allocation76_spill] sm:$0xff] }
 0x276   : > { %v2641_v28 = vadd.f32 %v2536_v43, %v9546_v10  ;;  %v9548_v31 = vld [vmem:[#allocation17_spill] sm:$0xff]  ;;  %v2645_v35 = vadd.f32 %v2543_v29, %v9550_v49  ;;  %v2646_v11 = vadd.f32 %v2544_v39, %v9551_v42  ;;  %v9552_v14 = vld [vmem:[#allocation18_spill] sm:$0xff] }
 0x277   : > { %v2643_v17 = vadd.f32 %v2539_v52, %v9548_v31  ;;  %v9549_v53 = vld [vmem:[#allocation61_spill] sm:$0xff]  ;;  %v2647_v60 = vadd.f32 %v2546_v48, %v9552_v14  ;;  %v9554_v10 = vld [vmem:[#allocation66_spill] sm:$0xff]  ;;  %v9556_v31 = vld [vmem:[#allocation67_spill] sm:$0xff] }
 0x278   : > { %v2644_v1 = vadd.f32 %v2541_v27, %v9549_v53  ;;  %v9553_v18 = vld [vmem:[#allocation65_spill] sm:$0xff]  ;;  %v2649_v43 = vadd.f32 %v2549_v8, %v9554_v10  ;;  %v9555_v36 = vld [vmem:[#allocation30_spill] sm:$0xff]  ;;  %v2651_v52 = vadd.f32 %v2553_v57, %v9556_v31  ;;  %v9557_v27 = vld [vmem:[#allocation68_spill] sm:$0xff] }
 0x279   : > { %v2648_v46 = vadd.f32 %v2548_v0, %v9553_v18  ;;  %v2650_v51 = vadd.f32 %v2551_v5, %v9555_v36  ;;  %v2652_v53 = vadd.f32 %v2554_v25, %v9557_v27  ;;  %v9558_v29 = vld [vmem:[#allocation69_spill] sm:$0xff]  ;;  %v9559_v39 = vld [vmem:[#allocation70_spill] sm:$0xff]  ;;  %v9560_v14 = vld [vmem:[#allocation16_spill] sm:$0xff] }
 0x27a   : > { %v2653_v49 = vadd.f32 %v2556_v16, %v9558_v29  ;;  %v2654_v42 = vadd.f32 %v2558_v58, %v9559_v39  ;;  %v7607_v48 = vadd.f32 %v9560_v14, %v2607_v54  ;;  %v7610_v0 = vadd.f32 %v9560_v14, %v2608_v33 }
 0x27b   : > { %v7613_v18 = vadd.f32 %v9560_v14, %v2609_v61  ;;  %v7616_v8 = vadd.f32 %v9560_v14, %v2610_v40  ;;  %v7619_v5 = vadd.f32 %v9560_v14, %v2611_v23  ;;  %v7622_v25 = vadd.f32 %v9560_v14, %v2612_v59 }
 0x27c   : > { %v7625_v57 = vadd.f32 %v9560_v14, %v2613_v13  ;;  %v7628_v54 = vadd.f32 %v9560_v14, %v2614_v21  ;;  %v7631_v33 = vadd.f32 %v9560_v14, %v2615_v24  ;;  %v7634_v61 = vadd.f32 %v9560_v14, %v2616_v47 }
 0x27d   : > { %v7637_v16 = vadd.f32 %v9560_v14, %v2617_v19  ;;  %v7640_v58 = vadd.f32 %v9560_v14, %v2618_v55  ;;  %v7643_v40 = vadd.f32 %v9560_v14, %v2619_v12  ;;  %v7646_v23 = vadd.f32 %v9560_v14, %v2620_v63 }
 0x27e   : > { %v7649_v59 = vadd.f32 %v9560_v14, %v2621_v7  ;;  %v7652_v13 = vadd.f32 %v9560_v14, %v2622_v38  ;;  %v7655_v21 = vadd.f32 %v9560_v14, %v2623_v41  ;;  %v7658_v24 = vadd.f32 %v9560_v14, %v2624_v26 }
 0x27f   : > { %9561 = vst [vmem:[#allocation19_spill] sm:$0xff] %v7640_v58  ;;  %v7661_v47 = vadd.f32 %v9560_v14, %v2625_v6  ;;  %v7664_v19 = vadd.f32 %v9560_v14, %v2626_v3  ;;  %v7667_v55 = vadd.f32 %v9560_v14, %v2627_v30  ;;  %v7670_v12 = vadd.f32 %v9560_v14, %v2628_v50 }
 0x280   : > { %9562 = vst [vmem:[#allocation20_spill] sm:$0xff] %v7643_v40  ;;  %v7673_v63 = vadd.f32 %v9560_v14, %v2629_v34  ;;  %v7676_v7 = vadd.f32 %v9560_v14, %v2630_v32  ;;  %v7679_v38 = vadd.f32 %v9560_v14, %v2631_v56  ;;  %v7682_v41 = vadd.f32 %v9560_v14, %v2632_v20 }
 0x281   : > { %9563 = vst [vmem:[#allocation21_spill] sm:$0xff] %v7649_v59  ;;  %v7685_v26 = vadd.f32 %v9560_v14, %v2633_v4  ;;  %v7688_v6 = vadd.f32 %v9560_v14, %v2634_v44  ;;  %v7691_v3 = vadd.f32 %v9560_v14, %v2635_v45  ;;  %v7694_v30 = vadd.f32 %v9560_v14, %v2636_v62 }
 0x282   : > { %9564 = vst [vmem:[#allocation22_spill] sm:$0xff] %v7655_v21  ;;  %v7697_v50 = vadd.f32 %v9560_v14, %v2637_v37  ;;  %v7700_v34 = vadd.f32 %v9560_v14, %v2638_v2  ;;  %v7703_v32 = vadd.f32 %v9560_v14, %v2639_v9  ;;  %v7706_v56 = vadd.f32 %v9560_v14, %v2640_v22 }
 0x283   : > { %9565 = vst [vmem:[#allocation23_spill] sm:$0xff] %v7658_v24  ;;  %v7709_v20 = vadd.f32 %v9560_v14, %v2641_v28  ;;  %v7712_v4 = vadd.f32 %v9560_v14, %v2642_v15  ;;  %v2707_v44 = vmul.f32 0.5, %v7607_v48  ;;  %v7716_v45 = vadd.f32 %v9560_v14, %v2643_v17 }
 0x284   : > { %9566 = vst [vmem:[#allocation24_spill] sm:$0xff] %v7661_v47  ;;  %v7719_v62 = vadd.f32 %v9560_v14, %v2644_v1  ;;  %v7722_v37 = vadd.f32 %v9560_v14, %v2645_v35  ;;  %v2708_v2 = vmul.f32 0.5, %v7610_v0  ;;  %v7726_v9 = vadd.f32 %v9560_v14, %v2646_v11 }
 0x285   : > { %9567 = vst [vmem:[#allocation27_spill] sm:$0xff] %v7664_v19  ;;  %v7729_v22 = vadd.f32 %v9560_v14, %v2647_v60  ;;  %v7732_v28 = vadd.f32 %v9560_v14, %v2648_v46  ;;  %v2709_v15 = vmul.f32 0.5, %v7613_v18  ;;  %v7736_v17 = vadd.f32 %v9560_v14, %v2649_v43 }
 0x286   : > { %9568 = vst [vmem:[#allocation28_spill] sm:$0xff] %v7667_v55  ;;  %v7739_v1 = vadd.f32 %v9560_v14, %v2650_v51  ;;  %v7742_v35 = vadd.f32 %v9560_v14, %v2651_v52  ;;  %v2710_v11 = vmul.f32 0.5, %v7616_v8  ;;  %v7746_v10 = vadd.f32 %v9560_v14, %v2652_v53 }
 0x287   : > { %9569 = vst [vmem:[#allocation31_spill] sm:$0xff] %v7670_v12  ;;  %v7749_v60 = vadd.f32 %v9560_v14, %v2653_v49  ;;  %v2711_v46 = vmul.f32 0.5, %v7619_v5  ;;  %4093 = vtanh.f32 %v2707_v44  ;;  %v7753_v43 = vadd.f32 %v9560_v14, %v2654_v42 }
 0x288   : > { %9570 = vst [vmem:[#allocation32_spill] sm:$0xff] %v7673_v63  ;;  %v2712_v36 = vmul.f32 0.5, %v7622_v25  ;;  %v2713_v51 = vmul.f32 0.5, %v7625_v57  ;;  %4095 = vtanh.f32 %v2708_v2  ;;  %v2714_v31 = vmul.f32 0.5, %v7628_v54 }
 0x289   : > { %9571 = vst [vmem:[#allocation35_spill] sm:$0xff] %v7676_v7  ;;  %v2715_v52 = vmul.f32 0.5, %v7631_v33  ;;  %v2716_v27 = vmul.f32 0.5, %v7634_v61  ;;  %4097 = vtanh.f32 %v2709_v15  ;;  %v2717_v53 = vmul.f32 0.5, %v7637_v16 }
 0x28a   : > { %9572 = vst [vmem:[#allocation36_spill] sm:$0xff] %v7679_v38  ;;  %v2718_v29 = vmul.f32 0.5, %v7640_v58  ;;  %v2719_v49 = vmul.f32 0.5, %v7643_v40  ;;  %4099 = vtanh.f32 %v2710_v11  ;;  %v2720_v39 = vmul.f32 0.5, %v7646_v23 }
 0x28b   : > { %9573 = vst [vmem:[#allocation39_spill] sm:$0xff] %v7682_v41  ;;  %v2721_v42 = vmul.f32 0.5, %v7649_v59  ;;  %v2722_v14 = vmul.f32 0.5, %v7652_v13  ;;  %4101 = vtanh.f32 %v2711_v46  ;;  %v2723_v44 = vmul.f32 0.5, %v7655_v21 }
 0x28c   : > { %9574 = vst [vmem:[#allocation40_spill] sm:$0xff] %v7685_v26  ;;  %v7768_v2 = vmul.f32 0.5, %v7658_v24  ;;  %v7771_v15 = vmul.f32 0.5, %v7661_v47  ;;  %4103 = vtanh.f32 %v2712_v36  ;;  %v7774_v40 = vmul.f32 0.5, %v7664_v19 }
 0x28d   : > { %9575 = vst [vmem:[#allocation43_spill] sm:$0xff] %v7688_v6  ;;  %v4094_v58 = vpop.eup %4093  ;;  %v7777_v11 = vmul.f32 0.5, %v7667_v55  ;;  %v7780_v59 = vmul.f32 0.5, %v7670_v12  ;;  %4105 = vtanh.f32 %v2713_v51  ;;  %v7783_v21 = vmul.f32 0.5, %v7673_v63 }
 0x28e   : > { %9576 = vst [vmem:[#allocation44_spill] sm:$0xff] %v7691_v3  ;;  %v4096_v46 = vpop.eup %4095  ;;  %v7786_v24 = vmul.f32 0.5, %v7676_v7  ;;  %v7789_v36 = vmul.f32 0.5, %v7679_v38  ;;  %4107 = vtanh.f32 %v2714_v31  ;;  %v7792_v47 = vmul.f32 0.5, %v7682_v41 }
 0x28f   : > { %9577 = vst [vmem:[#allocation47_spill] sm:$0xff] %v7694_v30  ;;  %v4098_v19 = vpop.eup %4097  ;;  %v7795_v55 = vmul.f32 0.5, %v7685_v26  ;;  %v7798_v51 = vmul.f32 0.5, %v7688_v6  ;;  %4109 = vtanh.f32 %v2715_v52  ;;  %v7801_v12 = vmul.f32 0.5, %v7691_v3 }
 0x290   : > { %9578 = vst [vmem:[#allocation48_spill] sm:$0xff] %v7697_v50  ;;  %v4100_v63 = vpop.eup %4099  ;;  %v7804_v7 = vmul.f32 0.5, %v7694_v30  ;;  %v7807_v31 = vmul.f32 0.5, %v7697_v50  ;;  %4111 = vtanh.f32 %v2716_v27  ;;  %v7810_v38 = vmul.f32 0.5, %v7700_v34 }
 0x291   : > { %9579 = vst [vmem:[#allocation51_spill] sm:$0xff] %v7700_v34  ;;  %v4102_v41 = vpop.eup %4101  ;;  %v7813_v26 = vmul.f32 0.5, %v7703_v32  ;;  %v7816_v52 = vmul.f32 0.5, %v7706_v56  ;;  %4113 = vtanh.f32 %v2717_v53  ;;  %v7819_v6 = vmul.f32 0.5, %v7709_v20 }
 0x292   : > { %9580 = vst [vmem:[#allocation52_spill] sm:$0xff] %v7703_v32  ;;  %v4104_v3 = vpop.eup %4103  ;;  %v7822_v30 = vmul.f32 0.5, %v7712_v4  ;;  %v7825_v27 = vmul.f32 0.5, %v7716_v45  ;;  %4115 = vtanh.f32 %v2718_v29  ;;  %v7828_v50 = vmul.f32 0.5, %v7719_v62 }
 0x293   : > { %9581 = vst [vmem:[#allocation55_spill] sm:$0xff] %v7706_v56  ;;  %v4106_v34 = vpop.eup %4105  ;;  %v7831_v32 = vmul.f32 0.5, %v7722_v37  ;;  %4117 = vtanh.f32 %v2719_v49  ;;  %v2803_v53 = vadd.f32 1.0, %v4094_v58  ;;  %v2804_v29 = vadd.f32 1.0, %v4096_v46 }
 0x294   : > { %9582 = vst [vmem:[#allocation56_spill] sm:$0xff] %v7709_v20  ;;  %v4108_v56 = vpop.eup %4107  ;;  %v7834_v20 = vmul.f32 0.5, %v7726_v9  ;;  %4119 = vtanh.f32 %v2720_v39  ;;  %v2805_v58 = vadd.f32 1.0, %v4098_v19  ;;  %v7855_v46 = vmul.f32 0.5, %v7749_v60 }
 0x295   : > { %9583 = vst [vmem:[#allocation59_spill] sm:$0xff] %v7712_v4  ;;  %v7837_v4 = vmul.f32 0.5, %v7729_v22  ;;  %4121 = vtanh.f32 %v2721_v42  ;;  %v2808_v39 = vadd.f32 1.0, %v4104_v3  ;;  %v2809_v19 = vadd.f32 1.0, %v4106_v34 }
 0x296   : > { %9584 = vst [vmem:[#allocation26_spill] sm:$0xff] %v7716_v45  ;;  %v7840_v45 = vmul.f32 0.5, %v7732_v28  ;;  %4123 = vtanh.f32 %v2722_v14  ;;  %v2810_v42 = vadd.f32 1.0, %v4108_v56 }
 0x297   : > { %9585 = vst [vmem:[#allocation60_spill] sm:$0xff] %v7719_v62  ;;  %v7843_v62 = vmul.f32 0.5, %v7736_v17  ;;  %4125 = vtanh.f32 %v2723_v44  ;;  %v2857_v56 = vmul.f32 0.5, %v2809_v19 }
 0x298   : > { %9586 = vst [vmem:[#allocation63_spill] sm:$0xff] %v7722_v37  ;;  %v7846_v37 = vmul.f32 0.5, %v7739_v1  ;;  %4127 = vtanh.f32 %v7768_v2  ;;  %v2856_v2 = vmul.f32 0.5, %v2808_v39 }
 0x299   : > { %9587 = vst [vmem:[#allocation64_spill] sm:$0xff] %v7726_v9  ;;  %v7849_v9 = vmul.f32 0.5, %v7742_v35  ;;  %4129 = vtanh.f32 %v7771_v15 }
 0x29a   : > { %9588 = vst [vmem:[#allocation5_spill] sm:$0xff] %v7729_v22  ;;  %v2806_v22 = vadd.f32 1.0, %v4100_v63  ;;  %4131 = vtanh.f32 %v7774_v40  ;;  %v7874_v19 = vmul.f32 %v2856_v2, %v7622_v25 }
 0x29b   : > { %9589 = vst [vmem:[#allocation73_spill] sm:$0xff] %v7732_v28  ;;  %v7852_v28 = vmul.f32 0.5, %v7746_v10  ;;  %4133 = vtanh.f32 %v7777_v11 }
 0x29c   : > { %9590 = vst [vmem:[#allocation6_spill] sm:$0xff] %v7736_v17  ;;  %v2851_v17 = vmul.f32 0.5, %v2803_v53  ;;  %4135 = vtanh.f32 %v7780_v59 }
 0x29d   : > { %9591 = vst [vmem:[#allocation71_spill] sm:$0xff] %v7739_v1  ;;  %4137 = vtanh.f32 %v7783_v21  ;;  %v9603_v21 = vld [vmem:[#allocation20_spill] sm:$0xff] }
 0x29e   : > { %9592 = vst [vmem:[#allocation77_spill] sm:$0xff] %v7742_v35  ;;  %v7859_v35 = vmul.f32 0.5, %v7753_v43  ;;  %v7863_v3 = vmul.f32 %v2851_v17, %v7607_v48  ;;  %4139 = vtanh.f32 %v7786_v24 }
 0x29f   : > { %9593 = vst [vmem:[#allocation78_spill] sm:$0xff] %v7746_v10 }
 0x2a0   : > { %9594 = vst [vmem:[#allocation72_spill] sm:$0xff] %v7749_v60 }
 0x2a1   : > { %9595 = vst [vmem:[#allocation11_spill] sm:$0xff] %v7825_v27  ;;  %v4110_v27 = vpop.eup %4109  ;;  %4141 = vtanh.f32 %v7789_v36  ;;  %v9604_v36 = vld [vmem:[#allocation21_spill] sm:$0xff] }
 0x2a2   : > { %9596 = vst [vmem:[#allocation3_spill] sm:$0xff] %v7834_v20  ;;  %v4112_v49 = vpop.eup %4111  ;;  %v2811_v63 = vadd.f32 1.0, %v4110_v27  ;;  %4143 = vtanh.f32 %v7792_v47 }
 0x2a3   : > { %9597 = vst [vmem:[#allocation74_spill] sm:$0xff] %v7837_v4  ;;  %v2807_v4 = vadd.f32 1.0, %v4102_v41  ;;  %v4114_v20 = vpop.eup %4113  ;;  %v2853_v41 = vmul.f32 0.5, %v2805_v58  ;;  %v2812_v10 = vadd.f32 1.0, %v4112_v49  ;;  %v2858_v58 = vmul.f32 0.5, %v2810_v42  ;;  %v9602_v42 = vld [vmem:[#allocation19_spill] sm:$0xff] }
 0x2a4   : > { %9598 = vst [vmem:[#allocation75_spill] sm:$0xff] %v7843_v62  ;;  %v4116_v1 = vpop.eup %4115  ;;  %v2813_v14 = vadd.f32 1.0, %v4114_v20  ;;  %4145 = vtanh.f32 %v7795_v55 }
 0x2a5   : > { %9599 = vst [vmem:[#allocation25_spill] sm:$0xff] %v7846_v37  ;;  %v2852_v37 = vmul.f32 0.5, %v2804_v29  ;;  %v4118_v62 = vpop.eup %4117  ;;  %v2855_v60 = vmul.f32 0.5, %v2807_v4  ;;  %v2814_v44 = vadd.f32 1.0, %v4116_v1  ;;  %v2901_v4 = vmul.f32 %v2853_v41, %v7613_v18 }
 0x2a6   : > { %9600 = vst [vmem:[#allocation33_spill] sm:$0xff] %v7852_v28  ;;  %v2854_v28 = vmul.f32 0.5, %v2806_v22  ;;  %v2815_v53 = vadd.f32 1.0, %v4118_v62  ;;  %v2859_v22 = vmul.f32 0.5, %v2811_v63  ;;  %v2860_v20 = vmul.f32 0.5, %v2812_v10 }
 0x2a7   : > { %9601 = vst [vmem:[#allocation34_spill] sm:$0xff] %v7855_v46  ;;  %v4120_v46 = vpop.eup %4119  ;;  %v2900_v27 = vmul.f32 %v2852_v37, %v7610_v0  ;;  %v7870_v48 = vmul.f32 %v2855_v60, %v7619_v5  ;;  %v2861_v0 = vmul.f32 0.5, %v2813_v14  ;;  %v2862_v37 = vmul.f32 0.5, %v2814_v44 }
 0x2a8   : > { %v4122_v34 = vpop.eup %4121  ;;  %v2816_v15 = vadd.f32 1.0, %v4120_v46  ;;  %v2902_v1 = vmul.f32 %v2854_v28, %v7616_v8  ;;  %v2863_v40 = vmul.f32 0.5, %v2815_v53  ;;  %v7877_v18 = vmul.f32 %v2857_v56, %v7625_v57 }
 0x2a9   : > { %v4124_v29 = vpop.eup %4123  ;;  %v2817_v17 = vadd.f32 1.0, %v4122_v34  ;;  %v7881_v5 = vmul.f32 %v2858_v58, %v7628_v54  ;;  %v7884_v28 = vmul.f32 %v2859_v22, %v7631_v33  ;;  %v7888_v25 = vmul.f32 %v2860_v20, %v7634_v61 }
 0x2aa   : > { %v4126_v49 = vpop.eup %4125  ;;  %v2818_v39 = vadd.f32 1.0, %v4124_v29  ;;  %v2864_v11 = vmul.f32 0.5, %v2816_v15  ;;  %v7892_v59 = vmul.f32 %v2861_v0, %v7637_v16  ;;  %v7895_v54 = vmul.f32 %v2862_v37, %v9602_v42  ;;  %v9608_v42 = vld [vmem:[#allocation27_spill] sm:$0xff] }
 0x2ab   : > { %v4128_v62 = vpop.eup %4127  ;;  %v2819_v8 = vadd.f32 1.0, %v4126_v49  ;;  %v2865_v57 = vmul.f32 0.5, %v2817_v17  ;;  %v7899_v41 = vmul.f32 %v2863_v40, %v9603_v21  ;;  %v2996_v44 = vrot.slane %v7863_v3, 7  ;;  %v9606_v17 = vld [vmem:[#allocation23_spill] sm:$0xff] }
 0x2ac   : > { %v4130_v10 = vpop.eup %4129  ;;  %v2820_v60 = vadd.f32 1.0, %v4128_v62  ;;  %v2866_v63 = vmul.f32 0.5, %v2818_v39  ;;  %v2997_v34 = vrot.slane %v2900_v27, 7  ;;  %v2999_v24 = vrot.slane %v2901_v4, 7 }
 0x2ad   : > { %v4132_v46 = vpop.eup %4131  ;;  %v2821_v33 = vadd.f32 1.0, %v4130_v10  ;;  %v2867_v61 = vmul.f32 0.5, %v2819_v8  ;;  %v7904_v2 = vmul.f32 %v2864_v11, %v7646_v23  ;;  %v7908_v29 = vmul.f32 %v2865_v57, %v9604_v36  ;;  %v9605_v23 = vld [vmem:[#allocation22_spill] sm:$0xff]  ;;  %v9607_v8 = vld [vmem:[#allocation24_spill] sm:$0xff] }
 0x2ae   : > { %v4134_v14 = vpop.eup %4133  ;;  %v2822_v16 = vadd.f32 1.0, %v4132_v46  ;;  %v2868_v53 = vmul.f32 0.5, %v2820_v60  ;;  %v3001_v58 = vrot.slane %v2902_v1, 7  ;;  %v3002_v22 = vrot.slane %v7870_v48, 7 }
 0x2af   : > { %v4136_v56 = vpop.eup %4135  ;;  %4147 = vtanh.f32 %v7798_v51  ;;  %v2823_v3 = vadd.f32 1.0, %v4134_v14  ;;  %v2869_v27 = vmul.f32 0.5, %v2821_v33  ;;  %v7913_v47 = vmul.f32 %v2866_v63, %v7652_v13 }
 0x2b0   : > { %v4138_v49 = vpop.eup %4137  ;;  %v7916_v15 = vmul.f32 %v2867_v61, %v9605_v23  ;;  %v7919_v55 = vsel %vm400_vm3, %v2996_v44, %v2997_v34  ;;  %v7922_v20 = vsel %vm400_vm3, %v2997_v34, %v2999_v24  ;;  %v3004_v1 = vrot.slane %v7874_v19, 7  ;;  %v9609_v34 = vld [vmem:[#allocation28_spill] sm:$0xff] }
 0x2b1   : > { %v4140_v4 = vpop.eup %4139  ;;  %4149 = vtanh.f32 %v7801_v12  ;;  %v2824_v51 = vadd.f32 1.0, %v4136_v56  ;;  %v2870_v62 = vmul.f32 0.5, %v2822_v16  ;;  %v7927_v13 = vmul.f32 %v2868_v53, %v9606_v17  ;;  %v9612_v17 = vld [vmem:[#allocation35_spill] sm:$0xff] }
 0x2b2   : > { %v4142_v48 = vpop.eup %4141  ;;  %4151 = vtanh.f32 %v7804_v7  ;;  %v7931_v0 = vsel %vm400_vm3, %v3001_v58, %v3002_v22  ;;  %v3006_v37 = vrot.slane %v7877_v18, 7  ;;  %v3007_v39 = vrot.slane %v7881_v5, 7 }
 0x2b3   : > { %v4144_v40 = vpop.eup %4143  ;;  %v2825_v10 = vadd.f32 1.0, %v4138_v49  ;;  %v2871_v19 = vmul.f32 0.5, %v2823_v3  ;;  %v7936_v60 = vmul.f32 %v2869_v27, %v9607_v8  ;;  %v3108_v12 = vadd.f32 %v7922_v20, %v7919_v55 }
 0x2b4   : > { %v4146_v11 = vpop.eup %4145  ;;  %4153 = vtanh.f32 %v7807_v31  ;;  %v2826_v7 = vadd.f32 1.0, %v4140_v4  ;;  %v7942_v46 = vsel %vm400_vm3, %v3002_v22, %v3004_v1  ;;  %v3009_v18 = vrot.slane %v7884_v28, 7 }
 0x2b5   : > { %v4148_v57 = vpop.eup %4147  ;;  %4155 = vtanh.f32 %v7810_v38  ;;  %v2872_v5 = vmul.f32 0.5, %v2824_v51  ;;  %v7947_v33 = vmul.f32 %v2870_v62, %v9608_v42  ;;  %v3109_v63 = vadd.f32 %v3108_v12, %v7931_v0  ;;  %v9615_v42 = vld [vmem:[#allocation39_spill] sm:$0xff] }
 0x2b6   : > { %v2827_v21 = vadd.f32 1.0, %v4142_v48  ;;  %v7951_v14 = vsel %vm400_vm3, %v3006_v37, %v3007_v39  ;;  %v3011_v31 = vrot.slane %v7888_v25, 7  ;;  %v3012_v61 = vrot.slane %v7892_v59, 7  ;;  %v9610_v59 = vld [vmem:[#allocation31_spill] sm:$0xff] }
 0x2b7   : > { %v4150_v44 = vpop.eup %4149  ;;  %4157 = vtanh.f32 %v7813_v26  ;;  %v2873_v28 = vmul.f32 0.5, %v2825_v10  ;;  %v7957_v38 = vmul.f32 %v2871_v19, %v9609_v34  ;;  %v3110_v24 = vadd.f32 %v3109_v63, %v7942_v46  ;;  %v9613_v19 = vld [vmem:[#allocation36_spill] sm:$0xff] }
 0x2b8   : > { %v4152_v16 = vpop.eup %4151  ;;  %v2828_v53 = vadd.f32 1.0, %v4144_v40  ;;  %v2874_v56 = vmul.f32 0.5, %v2826_v7  ;;  %v7961_v36 = vsel %vm400_vm3, %v3007_v39, %v3009_v18  ;;  %v3014_v58 = vrot.slane %v7895_v54, 7 }
 0x2b9   : > { %4159 = vtanh.f32 %v7816_v52  ;;  %v2829_v25 = vadd.f32 1.0, %v4146_v11  ;;  %v7966_v22 = vmul.f32 %v2872_v5, %v9610_v59  ;;  %v3111_v26 = vadd.f32 %v3110_v24, %v7951_v14  ;;  %v9611_v52 = vld [vmem:[#allocation32_spill] sm:$0xff] }
 0x2ba   : > { %v4154_v49 = vpop.eup %4153  ;;  %v2875_v3 = vmul.f32 0.5, %v2827_v21  ;;  %v7970_v27 = vsel %vm400_vm3, %v3011_v31, %v3012_v61  ;;  %v3016_v4 = vrot.slane %v7899_v41, 7  ;;  %v3017_v23 = vrot.slane %v7904_v2, 7 }
 0x2bb   : > { %v4156_v1 = vpop.eup %4155  ;;  %4161 = vtanh.f32 %v7819_v6  ;;  %v2830_v54 = vadd.f32 1.0, %v4148_v57  ;;  %v7976_v48 = vmul.f32 %v2873_v28, %v9611_v52  ;;  %v3112_v51 = vadd.f32 %v3111_v26, %v7961_v36  ;;  %v9614_v57 = vld [vmem:[#allocation11_spill] sm:$0xff] }
 0x2bc   : > { %v2876_v62 = vmul.f32 0.5, %v2828_v53  ;;  %v7980_v37 = vmul.f32 %v2874_v56, %v9612_v17  ;;  %v7983_v39 = vsel %vm400_vm3, %v3012_v61, %v3014_v58  ;;  %v3019_v41 = vrot.slane %v7908_v29, 7  ;;  %v9617_v58 = vld [vmem:[#allocation43_spill] sm:$0xff] }
 0x2bd   : > { %v4158_v40 = vpop.eup %4157  ;;  %4163 = vtanh.f32 %v7822_v30  ;;  %v2831_v2 = vadd.f32 1.0, %v4150_v44  ;;  %v2877_v6 = vmul.f32 0.5, %v2829_v25  ;;  %v3113_v10 = vadd.f32 %v3112_v51, %v7970_v27  ;;  %v9616_v44 = vld [vmem:[#allocation40_spill] sm:$0xff]  ;;  %v9618_v26 = vld [vmem:[#allocation3_spill] sm:$0xff] }
 0x2be   : > { %v7989_v8 = vmul.f32 %v2875_v3, %v9613_v19  ;;  %v7992_v12 = vsel %vm400_vm3, %v3016_v4, %v3017_v23  ;;  %v3021_v11 = vrot.slane %v7913_v47, 7  ;;  %v3022_v7 = vrot.slane %v7916_v15, 7 }
 0x2bf   : > { %v4160_v18 = vpop.eup %4159  ;;  %4165 = vtanh.f32 %v9614_v57  ;;  %v2832_v29 = vadd.f32 1.0, %v4152_v16  ;;  %v2878_v5 = vmul.f32 0.5, %v2830_v54  ;;  %v3114_v30 = vadd.f32 %v3113_v10, %v7983_v39  ;;  %v9622_v57 = vld [vmem:[#allocation75_spill] sm:$0xff] }
 0x2c0   : > { %4167 = vtanh.f32 %v7828_v50  ;;  %v8000_v63 = vmul.f32 %v2876_v62, %v9615_v42  ;;  %v8003_v21 = vsel %vm400_vm3, %v3017_v23, %v3019_v41  ;;  %v3024_v31 = vrot.slane %v7927_v13, 7  ;;  %v9620_v23 = vld [vmem:[#allocation44_spill] sm:$0xff] }
 0x2c1   : > { %v4162_v47 = vpop.eup %4161  ;;  %v2833_v61 = vadd.f32 1.0, %v4154_v49  ;;  %v2879_v15 = vmul.f32 0.5, %v2831_v2  ;;  %v8007_v28 = vmul.f32 %v2877_v6, %v9616_v44  ;;  %v3115_v34 = vadd.f32 %v3114_v30, %v7992_v12  ;;  %v9625_v44 = vld [vmem:[#allocation51_spill] sm:$0xff] }
 0x2c2   : > { %4169 = vtanh.f32 %v7831_v32  ;;  %v8012_v50 = vsel %vm400_vm3, %v3021_v11, %v3022_v7  ;;  %v3026_v24 = vrot.slane %v7936_v60, 7  ;;  %v3027_v16 = vrot.slane %v7947_v33, 7  ;;  %v9619_v60 = vld [vmem:[#allocation74_spill] sm:$0xff] }
 0x2c3   : > { %v4164_v53 = vpop.eup %4163  ;;  %v2834_v56 = vadd.f32 1.0, %v4156_v1  ;;  %v2880_v13 = vmul.f32 0.5, %v2832_v29  ;;  %v8017_v25 = vmul.f32 %v2878_v5, %v9617_v58  ;;  %v3116_v59 = vadd.f32 %v3115_v34, %v8003_v21  ;;  %v9623_v29 = vld [vmem:[#allocation48_spill] sm:$0xff] }
 0x2c4   : > { %4171 = vtanh.f32 %v9618_v26  ;;  %v2835_v49 = vadd.f32 1.0, %v4158_v40  ;;  %v8022_v32 = vsel %vm400_vm3, %v3022_v7, %v3024_v31  ;;  %v3029_v3 = vrot.slane %v7957_v38, 7  ;;  %v9621_v40 = vld [vmem:[#allocation47_spill] sm:$0xff] }
 0x2c5   : > { %v4166_v4 = vpop.eup %4165  ;;  %4173 = vtanh.f32 %v9619_v60  ;;  %v2881_v33 = vmul.f32 0.5, %v2833_v61  ;;  %v8027_v1 = vmul.f32 %v2879_v15, %v9620_v23  ;;  %v3117_v54 = vadd.f32 %v3116_v59, %v8012_v50  ;;  %v9624_v15 = vld [vmem:[#allocation25_spill] sm:$0xff] }
 0x2c6   : > { %v4168_v52 = vpop.eup %4167  ;;  %v2836_v51 = vadd.f32 1.0, %v4160_v18  ;;  %v8031_v62 = vsel %vm400_vm3, %v3026_v24, %v3027_v16  ;;  %v3031_v17 = vrot.slane %v7966_v22, 7  ;;  %v3032_v41 = vrot.slane %v7976_v48, 7 }
 0x2c7   : > { %4175 = vtanh.f32 %v7840_v45  ;;  %v2882_v38 = vmul.f32 0.5, %v2834_v56  ;;  %v2928_v2 = vmul.f32 %v2880_v13, %v9621_v40  ;;  %v3118_v6 = vadd.f32 %v3117_v54, %v8022_v32  ;;  %v9628_v54 = vld [vmem:[#allocation33_spill] sm:$0xff] }
 0x2c8   : > { %v4170_v10 = vpop.eup %4169  ;;  %v2837_v19 = vadd.f32 1.0, %v4162_v47  ;;  %v2883_v11 = vmul.f32 0.5, %v2835_v49  ;;  %v8039_v7 = vsel %vm400_vm3, %v3027_v16, %v3029_v3  ;;  %v3034_v18 = vrot.slane %v7980_v37, 7  ;;  %v9627_v49 = vld [vmem:[#allocation55_spill] sm:$0xff] }
 0x2c9   : > { %4177 = vtanh.f32 %v9622_v57  ;;  %v2838_v22 = vadd.f32 1.0, %v4164_v53  ;;  %v2929_v48 = vmul.f32 %v2881_v33, %v9623_v29  ;;  %v3119_v45 = vadd.f32 %v3118_v6, %v8031_v62  ;;  %v9626_v53 = vld [vmem:[#allocation52_spill] sm:$0xff] }
 0x2ca   : > { %v4172_v5 = vpop.eup %4171  ;;  %v2884_v30 = vmul.f32 0.5, %v2836_v51  ;;  %v8046_v42 = vsel %vm400_vm3, %v3031_v17, %v3032_v41  ;;  %v3036_v31 = vrot.slane %v7989_v8, 7  ;;  %v3037_v47 = vrot.slane %v8000_v63, 7 }
 0x2cb   : > { %v4174_v61 = vpop.eup %4173  ;;  %4179 = vtanh.f32 %v9624_v15  ;;  %v2839_v37 = vadd.f32 1.0, %v4166_v4  ;;  %v2930_v34 = vmul.f32 %v2882_v38, %v9625_v44  ;;  %v3120_v24 = vadd.f32 %v3119_v45, %v8039_v7 }
 0x2cc   : > { %v2885_v16 = vmul.f32 0.5, %v2837_v19  ;;  %v2931_v56 = vmul.f32 %v2883_v11, %v9626_v53  ;;  %v8055_v13 = vsel %vm400_vm3, %v3032_v41, %v3034_v18  ;;  %v3039_v58 = vrot.slane %v8007_v28, 7  ;;  %v9630_v19 = vld [vmem:[#allocation56_spill] sm:$0xff]  ;;  %v9631_v11 = vld [vmem:[#allocation59_spill] sm:$0xff] }
 0x2cd   : > { %v4176_v59 = vpop.eup %4175  ;;  %4181 = vtanh.f32 %v7849_v9  ;;  %v2840_v8 = vadd.f32 1.0, %v4168_v52  ;;  %v2886_v63 = vmul.f32 0.5, %v2838_v22  ;;  %v3121_v26 = vadd.f32 %v3120_v24, %v8046_v42  ;;  %v9629_v52 = vld [vmem:[#allocation34_spill] sm:$0xff]  ;;  %v9633_v53 = vld [vmem:[#allocation60_spill] sm:$0xff] }
 0x2ce   : > { %v2932_v3 = vmul.f32 %v2884_v30, %v9627_v49  ;;  %v8062_v4 = vsel %vm400_vm3, %v3036_v31, %v3037_v47  ;;  %v3041_v60 = vrot.slane %v8017_v25, 7  ;;  %v3042_v33 = vrot.slane %v8027_v1, 7  ;;  %v9632_v24 = vld [vmem:[#allocation26_spill] sm:$0xff] }
 0x2cf   : > { %v4178_v23 = vpop.eup %4177  ;;  %4183 = vtanh.f32 %v9628_v54  ;;  %v2841_v28 = vadd.f32 1.0, %v4170_v10  ;;  %v2887_v51 = vmul.f32 0.5, %v2839_v37  ;;  %v3122_v9 = vadd.f32 %v3121_v26, %v8055_v13  ;;  %v9635_v54 = vld [vmem:[#allocation64_spill] sm:$0xff] }
 0x2d0   : > { %4185 = vtanh.f32 %v9629_v52  ;;  %v2842_v17 = vadd.f32 1.0, %v4172_v5  ;;  %v8070_v41 = vsel %vm400_vm3, %v3037_v47, %v3039_v58  ;;  %v3044_v38 = vrot.slane %v2928_v2, 7 }
 0x2d1   : > { %v4180_v40 = vpop.eup %4179  ;;  %v2888_v6 = vmul.f32 0.5, %v2840_v8  ;;  %v2933_v25 = vmul.f32 %v2885_v16, %v9630_v19  ;;  %v2934_v1 = vmul.f32 %v2886_v63, %v9631_v11  ;;  %v3123_v18 = vadd.f32 %v3122_v9, %v8062_v4 }
 0x2d2   : > { %v2843_v57 = vadd.f32 1.0, %v4174_v61  ;;  %v8076_v10 = vsel %vm400_vm3, %v3041_v60, %v3042_v33  ;;  %v3046_v22 = vrot.slane %v2929_v48, 7  ;;  %v3047_v29 = vrot.slane %v2930_v34, 7  ;;  %v9634_v60 = vld [vmem:[#allocation63_spill] sm:$0xff] }
 0x2d3   : > { %v4182_v45 = vpop.eup %4181  ;;  %4187 = vtanh.f32 %v7859_v35  ;;  %v2844_v5 = vadd.f32 1.0, %v4176_v59  ;;  %v2889_v30 = vmul.f32 0.5, %v2841_v28  ;;  %v3124_v2 = vadd.f32 %v3123_v18, %v8070_v41 }
 0x2d4   : > { %v2845_v31 = vadd.f32 1.0, %v4178_v23  ;;  %v2890_v47 = vmul.f32 0.5, %v2842_v17  ;;  %v8081_v15 = vsel %vm400_vm3, %v3042_v33, %v3044_v38  ;;  %v3049_v37 = vrot.slane %v2931_v56, 7 }
 0x2d5   : > { %v4184_v44 = vpop.eup %4183  ;;  %v2846_v61 = vadd.f32 1.0, %v4180_v40  ;;  %v2935_v16 = vmul.f32 %v2887_v51, %v9632_v24  ;;  %v2936_v48 = vmul.f32 %v2888_v6, %v9633_v53  ;;  %v3125_v34 = vadd.f32 %v3124_v2, %v8076_v10  ;;  %v9636_v6 = vld [vmem:[#allocation5_spill] sm:$0xff] }
 0x2d6   : > { %v4186_v58 = vpop.eup %4185  ;;  %v2891_v35 = vmul.f32 0.5, %v2843_v57  ;;  %v8087_v59 = vsel %vm400_vm3, %v3046_v22, %v3047_v29  ;;  %v3051_v8 = vrot.slane %v2932_v3, 7  ;;  %v3052_v63 = vrot.slane %v2933_v25, 7  ;;  %v9637_v22 = vld [vmem:[#allocation73_spill] sm:$0xff] }
 0x2d7   : > { %v2847_v26 = vadd.f32 1.0, %v4182_v45  ;;  %v2892_v49 = vmul.f32 0.5, %v2844_v5  ;;  %v2937_v33 = vmul.f32 %v2889_v30, %v9634_v60  ;;  %v3126_v56 = vadd.f32 %v3125_v34, %v8081_v15 }
 0x2d8   : > { %v2893_v23 = vmul.f32 0.5, %v2845_v31  ;;  %v2938_v28 = vmul.f32 %v2890_v47, %v9635_v54  ;;  %v8093_v51 = vsel %vm400_vm3, %v3047_v29, %v3049_v37  ;;  %v3054_v9 = vrot.slane %v2934_v1, 7  ;;  %v9638_v1 = vld [vmem:[#allocation6_spill] sm:$0xff]  ;;  %v9642_v54 = vld [vmem:[#allocation72_spill] sm:$0xff] }
 0x2d9   : > { %v4188_v52 = vpop.eup %4187  ;;  %v2848_v17 = vadd.f32 1.0, %v4184_v44  ;;  %v2849_v38 = vadd.f32 1.0, %v4186_v58  ;;  %v2894_v40 = vmul.f32 0.5, %v2846_v61  ;;  %v3127_v3 = vadd.f32 %v3126_v56, %v8087_v59  ;;  %v9639_v44 = vld [vmem:[#allocation71_spill] sm:$0xff] }
 0x2da   : > { %v2939_v19 = vmul.f32 %v2891_v35, %v9636_v6  ;;  %v8098_v25 = vsel %vm400_vm3, %v3051_v8, %v3052_v63  ;;  %v3056_v11 = vrot.slane %v2935_v16, 7  ;;  %v3057_v18 = vrot.slane %v2936_v48, 7  ;;  %v9640_v35 = vld [vmem:[#allocation77_spill] sm:$0xff] }
 0x2db   : > { %v2895_v57 = vmul.f32 0.5, %v2847_v26  ;;  %v2940_v45 = vmul.f32 %v2892_v49, %v9637_v22  ;;  %v3128_v29 = vadd.f32 %v3127_v3, %v8093_v51  ;;  %v2850_v5 = vadd.f32 1.0, %v4188_v52  ;;  %v9641_v49 = vld [vmem:[#allocation78_spill] sm:$0xff] }
 0x2dc   : > { %v2941_v30 = vmul.f32 %v2893_v23, %v9638_v1  ;;  %v8104_v2 = vsel %vm400_vm3, %v3052_v63, %v3054_v9  ;;  %v3059_v31 = vrot.slane %v2937_v33, 7  ;;  %v2896_v47 = vmul.f32 0.5, %v2848_v17  ;;  %v3865_v23 = vld [vmem:[%s8315_s5 + $0x38] sm:$0xff] }
 0x2dd   : > { %v2897_v37 = vmul.f32 0.5, %v2849_v38  ;;  %v2942_v61 = vmul.f32 %v2894_v40, %v9639_v44  ;;  %v3129_v24 = vadd.f32 %v3128_v29, %v8098_v25  ;;  %v8109_v16 = vsel %vm400_vm3, %v3056_v11, %v3057_v18  ;;  %3303 = vmatpush.bf16.msra.mxu1 %v3865_v23  ;;  %v3864_v40 = vld [vmem:[%s8315_s5 + $0x30] sm:$0xff] }
 0x2de   : > { %v3061_v53 = vrot.slane %v2938_v28, 7  ;;  %v3062_v48 = vrot.slane %v2939_v19, 7  ;;  %v2898_v58 = vmul.f32 0.5, %v2850_v5  ;;  %v2943_v8 = vmul.f32 %v2895_v57, %v9640_v35  ;;  %v3863_v5 = vld [vmem:[%s8315_s5 + $0x28] sm:$0xff] }
 0x2df   : > { %v3130_v34 = vadd.f32 %v3129_v24, %v8104_v2  ;;  %v8114_v63 = vsel %vm400_vm3, %v3057_v18, %v3059_v31  ;;  %v3064_v26 = vrot.slane %v2940_v45, 7  ;;  %v2944_v60 = vmul.f32 %v2896_v47, %v9641_v49 }
 0x2e0   : > { %v4204_v56 = vmov 256.0   ;;  %v2945_v28 = vmul.f32 %v2897_v37, %v9642_v54  ;;  %v8123_v9 = vsel %vm400_vm3, %v3061_v53, %v3062_v48  ;;  %v3066_v52 = vrot.slane %v2941_v30, 7  ;;  %v3862_v54 = vld [vmem:[%s8315_s5 + $0x20] sm:$0xff] }
 0x2e1   : > { %v3131_v33 = vadd.f32 %v3130_v34, %v8109_v16  ;;  %4189 = vrcp.f32 %v4204_v56  ;;  %v3067_v17 = vrot.slane %v2942_v61, 7  ;;  %v2946_v3 = vmul.f32 %v2898_v58, %v7753_v43  ;;  %3304 = vmatpush.bf16.msra.mxu1 %v3864_v40  ;;  %v3873_v40 = vld [vmem:[%s8317_s7 + $0x38] sm:$0xff] }
 0x2e2   : > { %v8131_v6 = vsel %vm400_vm3, %v3062_v48, %v3064_v26  ;;  %v3069_v19 = vrot.slane %v2943_v8, 7  ;;  %v3071_v57 = vrot.slane %v2944_v60, 7  ;;  %v3072_v22 = vrot.slane %v2945_v28, 7  ;;  %v3861_v28 = vld [vmem:[%s8315_s5 + $0x18] sm:$0xff]  ;;  %3437 = vmatpush.bf16.msrb.mxu0 %v3873_v40  ;;  %4049 = vmatpush.bf16.msra.mxu2 %v3873_v40 }
 0x2e3   : > { %v3132_v38 = vadd.f32 %v3131_v33, %v8114_v63  ;;  %v8135_v18 = vsel %vm400_vm3, %v3066_v52, %v3067_v17  ;;  %v3074_v1 = vrot.slane %v2946_v3, 7  ;;  %v3860_v52 = vld [vmem:[%s8315_s5 + $0x10] sm:$0xff]  ;;  %4050 = vmatpush.bf16.msra.mxu3 %v3873_v40 }
 0x2e4   : > { %v8142_v43 = vsel %vm400_vm3, %v3067_v17, %v3069_v19  ;;  %v8146_v31 = vsel %vm400_vm3, %v3071_v57, %v3072_v22  ;;  %v3859_v17 = vld [vmem:[%s8315_s5 + $0x8] sm:$0xff]  ;;  %v3872_v3 = vld [vmem:[%s8317_s7 + $0x30] sm:$0xff] }
 0x2e5   : > { %v3133_v11 = vadd.f32 %v3132_v38, %v8123_v9  ;;  %3305 = vmatpush.bf16.msra.mxu1 %v3863_v5  ;;  %v8150_v44 = vsel %vm400_vm3, %v3072_v22, %v3074_v1  ;;  %v3858_v38 = vld [vmem:[%s8315_s5] sm:$0xff]  ;;  %v3871_v19 = vld [vmem:[%s8317_s7 + $0x28] sm:$0xff] }
 0x2e6   : > { %3438 = vmatpush.bf16.msrb.mxu0 %v3872_v3  ;;  %4052 = vmatpush.bf16.msra.mxu2 %v3872_v3 }
 0x2e7   : > { %v4190_v45 = vpop.eup %4189  ;;  %v3134_v29 = vadd.f32 %v3133_v11, %v8131_v6  ;;  %4053 = vmatpush.bf16.msra.mxu3 %v3872_v3  ;;  %v3170_v11 = vld [vmem:[%s8314_s4] sm:$0x1] }
 0x2e8   : > { %v3146_v47 = vmul.f32 256.0, %v4190_v45  ;;  %vm3150_vm8 = vweird.f32 %v4190_v45 }
 0x2e9   : > { %v3135_v30 = vadd.f32 %v3134_v29, %v8135_v18  ;;  %3306 = vmatpush.bf16.msra.mxu1 %v3862_v54 }
 0x2ea   : > { %v3147_v24 = vsub.f32 1.0, %v3146_v47  ;;  %3439 = vmatpush.bf16.msrb.mxu0 %v3871_v19  ;;  %4055 = vmatpush.bf16.msra.mxu2 %v3871_v19 }
 0x2eb   : > { %v3136_v37 = vadd.f32 %v3135_v30, %v8142_v43  ;;  %4056 = vmatpush.bf16.msra.mxu3 %v3871_v19 }
 0x2ec   : > { %v3148_v34 = vmul.f32 %v4190_v45, %v3147_v24  ;;  %v3869_v24 = vld [vmem:[%s8317_s7 + $0x18] sm:$0xff] }
 0x2ed   : > { %v3137_v61 = vadd.f32 %v3136_v37, %v8146_v31  ;;  %3307 = vmatpush.bf16.msra.mxu1 %v3861_v28 }
 0x2ee   : > { %v3149_v8 = vadd.f32 %v4190_v45, %v3148_v34  ;;  %v3866_v34 = vld [vmem:[%s8317_s7] sm:$0xff] }
 0x2ef   : > { %v3138_v53 = vadd.f32 %v3137_v61, %v8150_v44  ;;  %v3870_v61 = vld [vmem:[%s8317_s7 + $0x20] sm:$0xff] }
 0x2f0   : > { %v3151_v60 = vsel %vm3150_vm8, %v4190_v45, %v3149_v8  ;;  %3440 = vmatpush.bf16.msrb.mxu0 %v3870_v61  ;;  %4058 = vmatpush.bf16.msra.mxu2 %v3870_v61 }
 0x2f1   : > { %v3139_v48 = vrot.slane %v3138_v53, 4  ;;  %3308 = vmatpush.bf16.msra.mxu1 %v3860_v52  ;;  %4059 = vmatpush.bf16.msra.mxu3 %v3870_v61 }
 0x2f3   : > { %v3140_v58 = vadd.f32 %v3139_v48, %v3138_v53  ;;  %v3868_v53 = vld [vmem:[%s8317_s7 + $0x10] sm:$0xff]  ;;  %v3867_v48 = vld [vmem:[%s8317_s7 + $0x8] sm:$0xff] }
 0x2f4   : > { %3441 = vmatpush.bf16.msrb.mxu0 %v3869_v24  ;;  %4061 = vmatpush.bf16.msra.mxu2 %v3869_v24 }
 0x2f5   : > { %v3141_v35 = vrot.slane %v3140_v58, 2  ;;  %3309 = vmatpush.bf16.msra.mxu1 %v3859_v17  ;;  %4062 = vmatpush.bf16.msra.mxu3 %v3869_v24 }
 0x2f7   : > { %v3142_v26 = vadd.f32 %v3141_v35, %v3140_v58  ;;  %v3254_v58 = vld [vmem:[%s8316_s6] sm:$0x1] }
 0x2f8   : > { %3442 = vmatpush.bf16.msrb.mxu0 %v3868_v53  ;;  %4064 = vmatpush.bf16.msra.mxu2 %v3868_v53 }
 0x2f9   : > { %v3143_v49 = vrot.slane %v3142_v26, 1  ;;  %3310 = vmatpush.bf16.msra.mxu1 %v3858_v38  ;;  %4065 = vmatpush.bf16.msra.mxu3 %v3868_v53 }
 0x2fb   : > { %v3144_v33 = vadd.f32 %v3143_v49, %v3142_v26 }
 0x2fc   : > { %3443 = vmatpush.bf16.msrb.mxu0 %v3867_v48  ;;  %4067 = vmatpush.bf16.msra.mxu2 %v3867_v48 }
 0x2fd   : > { %v3152_v56 = vmul.f32 %v3151_v60, %v3144_v33  ;;  %4048 = vmatpush.bf16.msrb.mxu1 %v3873_v40  ;;  %4068 = vmatpush.bf16.msra.mxu3 %v3867_v48 }
 0x2ff   : > { %v3153_v23 = vpack.c.bf16 %v3152_v56, %v3152_v56 }
 0x300   : > { %3444 = vmatpush.bf16.msrb.mxu0 %v3866_v34  ;;  %4070 = vmatpush.bf16.msra.mxu2 %v3866_v34 }
 0x301   : > { %3227 = vmatmul.bf16.vlgmr.msra.gmra.mxu0 %v3153_v23  ;;  %4051 = vmatpush.bf16.msrb.mxu1 %v3872_v3 }
 0x302   : > { %4071 = vmatpush.bf16.msra.mxu3 %v3866_v34 }
 0x305   : > { %4054 = vmatpush.bf16.msrb.mxu1 %v3871_v19 }
 0x309   : > { %4057 = vmatpush.bf16.msrb.mxu1 %v3870_v61 }
 0x30d   : > { %4060 = vmatpush.bf16.msrb.mxu1 %v3869_v24 }
 0x311   : > { %4063 = vmatpush.bf16.msrb.mxu1 %v3868_v53 }
 0x315   : > { %4066 = vmatpush.bf16.msrb.mxu1 %v3867_v48 }
 0x319   : > { %4069 = vmatpush.bf16.msrb.mxu1 %v3866_v34  ;;  %v8234_v34 = vld [vmem:[%s8318_s8] ss:$0 sm:$0xff] }
 0x37e   : > { %v3228_v57 = vpop.f32.mrf.mxu0 }
 0x37f   : > { %v3229_v22 = vadd.f32 %v3228_v57, %v3170_v11 }
 0x381   : > { %v3232_v45 = vmul.f32 0.5, %v3229_v22 }
 0x383   : > { %4191 = vtanh.f32 %v3232_v45 }
 0x386   : > { %v3230_v29 = vpop.f32.mrf.mxu0 }
 0x389   : > { %v4192_v5 = vpop.eup %4191 }
 0x38a   : > { %v3234_v1 = vadd.f32 1.0, %v4192_v5 }
 0x38c   : > { %v3235_v30 = vmul.f32 0.5, %v3234_v1 }
 0x38e   : > { %v3236_v47 = vmul.f32 %v3235_v30, %v3229_v22 }
 0x390   : > { %v3237_v37 = vpack.c.bf16 %v3236_v47, %v3236_v47 }
 0x392   : > { %3311 = vmatmul.bf16.vlgmr.msra.gmra.mxu1 %v3237_v37 }
 0x40f   : > { %v3312_v35 = vpop.f32.mrf.mxu1 }
 0x410   : > { %v3313_v8 = vadd.f32 %v3312_v35, %v3254_v58  ;;  %v4020_v58 = vld [vmem:[%s4380_s12 + $0x18] sm:$0xff]  }
 0x411   : > { %v3888_v35 = vunpack.c.l.bf16 %v4020_v58 }
 0x412   : > { %v3316_v26 = vmul.f32 0.5, %v3313_v8 }
 0x414   : > { %4193 = vtanh.f32 %v3316_v26 }
 0x417   : > { %v3314_v49 = vpop.f32.mrf.mxu1 }
 0x41a   : > { %v4194_v60 = vpop.eup %4193 }
 0x41b   : > { %v3318_v33 = vadd.f32 1.0, %v4194_v60  ;;  %v3889_v60 = vunpack.c.h.bf16 %v4020_v58 }
 0x41d   : > { %v3319_v56 = vmul.f32 0.5, %v3318_v33 }
 0x41f   : > { %v3320_v23 = vperm.slane %v3319_v56, 0 }
 0x421   : > { %v3321_v54 = vmul.f32 %v3320_v23, %v7919_v55  ;;  %v3322_v28 = vmul.f32 %v3320_v23, %v7922_v20  ;;  %v3327_v52 = vmul.f32 %v3320_v23, %v7970_v27  ;;  %v3328_v17 = vmul.f32 %v3320_v23, %v7983_v39 }
 0x422   : > { %v3333_v38 = vmul.f32 %v3320_v23, %v8031_v62  ;;  %v3334_v40 = vmul.f32 %v3320_v23, %v8039_v7  ;;  %v3343_v3 = vmul.f32 %v3320_v23, %v8098_v25  ;;  %v3344_v19 = vmul.f32 %v3320_v23, %v8104_v2 }
 0x423   : > { %v3353_v11 = vpack.c.bf16 %v3322_v28, %v3321_v54  ;;  %v3356_v57 = vpack.c.bf16 %v3328_v17, %v3327_v52  ;;  %v3323_v55 = vmul.f32 %v3320_v23, %v7931_v0  ;;  %v3324_v20 = vmul.f32 %v3320_v23, %v7942_v46  ;;  %v4023_v28 = vld [vmem:[%s4380_s12 + $0x30] sm:$0xff]   ;;  %v4028_v52 = vld [vmem:[%s4380_s12 + $0x58] sm:$0xff]  }
 0x424   : > { %v3359_v22 = vpack.c.bf16 %v3334_v40, %v3333_v38  ;;  %v3364_v45 = vpack.c.bf16 %v3344_v19, %v3343_v3  ;;  %v3329_v27 = vmul.f32 %v3320_v23, %v7992_v12  ;;  %v3330_v39 = vmul.f32 %v3320_v23, %v8003_v21 }
 0x425   : > { %3445 = vmatmul.bf16.vlgmr.msrb.gmra.mxu0 %v3353_v11  ;;  %3460 = vmatmul.bf16.vlgmr.msrb.gmra.mxu1 %v3356_v57  ;;  %v3335_v62 = vmul.f32 %v3320_v23, %v8046_v42  ;;  %v3336_v7 = vmul.f32 %v3320_v23, %v8055_v13  ;;  %v3345_v25 = vmul.f32 %v3320_v23, %v8109_v16  ;;  %v3900_v19 = vunpack.c.l.bf16 %v4023_v28 }
 0x426   : > { %3475 = vmatmul.bf16.vlgmr.msra.gmra.mxu2 %v3359_v22  ;;  %3500 = vmatmul.bf16.vlgmr.msra.gmra.mxu3 %v3364_v45  ;;  %v3346_v2 = vmul.f32 %v3320_v23, %v8114_v63  ;;  %v3354_v29 = vpack.c.bf16 %v3324_v20, %v3323_v55  ;;  %v3357_v5 = vpack.c.bf16 %v3330_v39, %v3329_v27  ;;  %v3920_v11 = vunpack.c.l.bf16 %v4028_v52 }
 0x427   : > { %v3360_v1 = vpack.c.bf16 %v3336_v7, %v3335_v62  ;;  %v3325_v0 = vmul.f32 %v3320_v23, %v7951_v14  ;;  %v3326_v46 = vmul.f32 %v3320_v23, %v7961_v36  ;;  %v3331_v12 = vmul.f32 %v3320_v23, %v8012_v50 }
 0x428   : > { %v3365_v30 = vpack.c.bf16 %v3346_v2, %v3345_v25  ;;  %v3332_v21 = vmul.f32 %v3320_v23, %v8022_v32  ;;  %v3337_v42 = vmul.f32 %v3320_v23, %v8062_v4  ;;  %v3338_v13 = vmul.f32 %v3320_v23, %v8070_v41 }
 0x429   : > { %v3347_v16 = vmul.f32 %v3320_v23, %v8123_v9  ;;  %v3348_v63 = vmul.f32 %v3320_v23, %v8131_v6  ;;  %v3355_v47 = vpack.c.bf16 %v3326_v46, %v3325_v0  ;;  %v3339_v14 = vmul.f32 %v3320_v23, %v8076_v10  ;;  %v4018_v46 = vld [vmem:[%s4380_s12 + $0x8] sm:$0xff]  }
 0x42a   : > { %v3358_v37 = vpack.c.bf16 %v3332_v21, %v3331_v12  ;;  %v3361_v61 = vpack.c.bf16 %v3338_v13, %v3337_v42  ;;  %v3340_v36 = vmul.f32 %v3320_v23, %v8081_v15  ;;  %v3349_v50 = vmul.f32 %v3320_v23, %v8135_v18  ;;  %v4021_v12 = vld [vmem:[%s4380_s12 + $0x20] sm:$0xff]  }
 0x42b   : > { %v3366_v24 = vpack.c.bf16 %v3348_v63, %v3347_v16  ;;  %v3350_v32 = vmul.f32 %v3320_v23, %v8142_v43  ;;  %v3341_v9 = vmul.f32 %v3320_v23, %v8087_v59  ;;  %v3342_v6 = vmul.f32 %v3320_v23, %v8093_v51  ;;  %v3875_v59 = vld [vmem:[%s4380_s12] sm:$0xff]  }
 0x42c   : > { %v3362_v4 = vpack.c.bf16 %v3340_v36, %v3339_v14  ;;  %v3351_v53 = vmul.f32 %v3320_v23, %v8146_v31  ;;  %v3352_v10 = vmul.f32 %v3320_v23, %v8150_v44  ;;  %v3876_v51 = vunpack.c.l.bf16 %v3875_v59 }
 0x42d   : > { %v3367_v41 = vpack.c.bf16 %v3350_v32, %v3349_v50  ;;  %v3363_v48 = vpack.c.bf16 %v3342_v6, %v3341_v9  ;;  %v3877_v49 = vunpack.c.h.bf16 %v3875_v59  ;;  %v3901_v20 = vunpack.c.h.bf16 %v4023_v28  ;;  %v4029_v9 = vld [vmem:[%s4380_s12 + $0x60] sm:$0xff]  }
 0x42e   : > { %v3368_v15 = vpack.c.bf16 %v3352_v10, %v3351_v53  ;;  %v3921_v27 = vunpack.c.h.bf16 %v4028_v52  ;;  %v3880_v13 = vunpack.c.l.bf16 %v4018_v46  ;;  %v3892_v16 = vunpack.c.l.bf16 %v4021_v12  ;;  %v4019_v52 = vld [vmem:[%s4380_s12 + $0x10] sm:$0xff]  }
 0x42f   : > { %v3893_v14 = vunpack.c.h.bf16 %v4021_v12 }
 0x435   : > { %3450 = vmatmul.bf16.gmra.mxu0 %v3354_v29  ;;  %3465 = vmatmul.bf16.gmra.mxu1 %v3357_v5 }
 0x436   : > { %3480 = vmatmul.bf16.gmra.mxu2 %v3360_v1  ;;  %3505 = vmatmul.bf16.gmra.mxu3 %v3365_v30 }
 0x445   : > { %3455 = vmatmul.bf16.gmra.mxu0 %v3355_v47  ;;  %3470 = vmatmul.bf16.gmra.mxu1 %v3358_v37 }
 0x446   : > { %3485 = vmatmul.bf16.gmra.mxu2 %v3361_v61  ;;  %3510 = vmatmul.bf16.gmra.mxu3 %v3366_v24  ;;  %v3881_v24 = vunpack.c.h.bf16 %v4018_v46 }
 0x456   : > { %3490 = vmatmul.bf16.gmra.mxu2 %v3362_v4  ;;  %3515 = vmatmul.bf16.gmra.mxu3 %v3367_v41  ;;  %v4024_v41 = vld [vmem:[%s4380_s12 + $0x38] sm:$0xff]  }
 0x466   : > { %3495 = vmatmul.bf16.gmra.mxu2 %v3363_v48  ;;  %3520 = vmatmul.bf16.gmra.mxu3 %v3368_v15  ;;  %v3904_v15 = vunpack.c.l.bf16 %v4024_v41 }
 0x4a2   : > { %v3446_v18 = vpop.f32.mrf.mxu0  ;;  %v3461_v43 = vpop.f32.mrf.mxu1 }
 0x4a3   : > { %v3447_v31 = vadd.f32 %v8234_v34, %v3446_v18  ;;  %v3462_v44 = vadd.f32 %v8234_v34, %v3461_v43  ;;  %v3924_v18 = vunpack.c.l.bf16 %v4029_v9 }
 0x4a5   : > { %v3590_v17 = vadd.f32 %v3876_v51, %v3447_v31  ;;  %v3596_v38 = vadd.f32 %v3888_v35, %v3462_v44  ;;  %v3905_v35 = vunpack.c.h.bf16 %v4024_v41  ;;  %v3925_v31 = vunpack.c.h.bf16 %v4029_v9 }
 0x4a9   : > { %v3476_v8 = vpop.f32.mrf.mxu2  ;;  %v3501_v26 = vpop.f32.mrf.mxu3 }
 0x4aa   : > { %v3448_v33 = vpop.f32.mrf.mxu0  ;;  %v3463_v56 = vpop.f32.mrf.mxu1  ;;  %v3477_v45 = vadd.f32 %v8234_v34, %v3476_v8  ;;  %v3502_v55 = vadd.f32 %v8234_v34, %v3501_v26 }
 0x4ab   : > { %v3449_v23 = vadd.f32 %v8234_v34, %v3448_v33  ;;  %v3464_v54 = vadd.f32 %v8234_v34, %v3463_v56 }
 0x4ac   : > { %v3602_v5 = vadd.f32 %v3900_v19, %v3477_v45  ;;  %v3612_v1 = vadd.f32 %v3920_v11, %v3502_v55  ;;  %v3885_v55 = vunpack.c.h.bf16 %v4019_v52 }
 0x4ad   : > { %v3591_v40 = vadd.f32 %v3877_v49, %v3449_v23  ;;  %v3597_v3 = vadd.f32 %v3889_v60, %v3464_v54 }
 0x4af   : > { %v3941_v57 = vpack.c.bf16 %v3591_v40, %v3590_v17  ;;  %v3956_v22 = vpack.c.bf16 %v3597_v3, %v3596_v38  ;;  %v4022_v17 = vld [vmem:[%s4380_s12 + $0x28] sm:$0xff]   ;;  %v3884_v3 = vunpack.c.l.bf16 %v4019_v52  ;;  %v4032_v52 = vld [vmem:[%s4380_s12 + $0x78] sm:$0xff]  }
 0x4b0   : > { %v3896_v19 = vunpack.c.l.bf16 %v4022_v17 }
 0x4b1   : > { %3942 = vst [vmem:[%s8249_s22] sm:$0xff] %v3941_v57   ;;  %v3478_v39 = vpop.f32.mrf.mxu2  ;;  %v3503_v62 = vpop.f32.mrf.mxu3 }
 0x4b2   : > { %4035 = vst [vmem:[%s8249_s22 + $0x18] sm:$0xff] %v3956_v22   ;;  %v3479_v7 = vadd.f32 %v8234_v34, %v3478_v39  ;;  %v3504_v25 = vadd.f32 %v8234_v34, %v3503_v62  ;;  %v3451_v2 = vpop.f32.mrf.mxu0  ;;  %v3466_v29 = vpop.f32.mrf.mxu1 }
 0x4b3   : > { %v3452_v63 = vadd.f32 %v8234_v34, %v3451_v2  ;;  %v3467_v47 = vadd.f32 %v8234_v34, %v3466_v29  ;;  %v4030_v2 = vld [vmem:[%s4380_s12 + $0x68] sm:$0xff]  }
 0x4b4   : > { %v3603_v30 = vadd.f32 %v3901_v20, %v3479_v7  ;;  %v3613_v0 = vadd.f32 %v3921_v27, %v3504_v25  ;;  %v3897_v20 = vunpack.c.h.bf16 %v4022_v17  ;;  %v4025_v25 = vld [vmem:[%s4380_s12 + $0x40] sm:$0xff]   ;;  %v3928_v46 = vunpack.c.l.bf16 %v4030_v2 }
 0x4b5   : > { %v3592_v6 = vadd.f32 %v3880_v13, %v3452_v63  ;;  %v3598_v53 = vadd.f32 %v3892_v16, %v3467_v47  ;;  %v3909_v16 = vunpack.c.h.bf16 %v4025_v25  ;;  %v3929_v63 = vunpack.c.h.bf16 %v4030_v2 }
 0x4b6   : > { %v3971_v21 = vpack.c.bf16 %v3603_v30, %v3602_v5  ;;  %v3996_v42 = vpack.c.bf16 %v3613_v0, %v3612_v1  ;;  %v3908_v0 = vunpack.c.l.bf16 %v4025_v25 }
 0x4b8   : > { %4038 = vst [vmem:[%s8249_s22 + $0x30] sm:$0xff] %v3971_v21  }
 0x4b9   : > { %4043 = vst [vmem:[%s8249_s22 + $0x58] sm:$0xff] %v3996_v42   ;;  %v3481_v37 = vpop.f32.mrf.mxu2  ;;  %v3506_v61 = vpop.f32.mrf.mxu3 }
 0x4ba   : > { %v3453_v36 = vpop.f32.mrf.mxu0  ;;  %v3468_v50 = vpop.f32.mrf.mxu1  ;;  %v3482_v58 = vadd.f32 %v8234_v34, %v3481_v37  ;;  %v3507_v51 = vadd.f32 %v8234_v34, %v3506_v61 }
 0x4bb   : > { %v3454_v32 = vadd.f32 %v8234_v34, %v3453_v36  ;;  %v3469_v4 = vadd.f32 %v8234_v34, %v3468_v50 }
 0x4bc   : > { %v3604_v56 = vadd.f32 %v3904_v15, %v3482_v58  ;;  %v3614_v23 = vadd.f32 %v3924_v18, %v3507_v51 }
 0x4bd   : > { %v3593_v10 = vadd.f32 %v3881_v24, %v3454_v32  ;;  %v3599_v48 = vadd.f32 %v3893_v14, %v3469_v4 }
 0x4bf   : > { %v3946_v43 = vpack.c.bf16 %v3593_v10, %v3592_v6  ;;  %v3961_v59 = vpack.c.bf16 %v3599_v48, %v3598_v53  ;;  %v4026_v53 = vld [vmem:[%s4380_s12 + $0x48] sm:$0xff]   ;;  %v4031_v10 = vld [vmem:[%s4380_s12 + $0x70] sm:$0xff]  }
 0x4c0   : > { %v3912_v48 = vunpack.c.l.bf16 %v4026_v53  ;;  %v3932_v15 = vunpack.c.l.bf16 %v4031_v10  ;;  %v3933_v58 = vunpack.c.h.bf16 %v4031_v10 }
 0x4c1   : > { %4033 = vst [vmem:[%s8249_s22 + $0x8] sm:$0xff] %v3946_v43   ;;  %v3483_v44 = vpop.f32.mrf.mxu2  ;;  %v3508_v8 = vpop.f32.mrf.mxu3 }
 0x4c2   : > { %4036 = vst [vmem:[%s8249_s22 + $0x20] sm:$0xff] %v3961_v59   ;;  %v3484_v26 = vadd.f32 %v8234_v34, %v3483_v44  ;;  %v3509_v49 = vadd.f32 %v8234_v34, %v3508_v8  ;;  %v3456_v60 = vpop.f32.mrf.mxu0  ;;  %v3471_v33 = vpop.f32.mrf.mxu1  ;;  %v3913_v59 = vunpack.c.h.bf16 %v4026_v53 }
 0x4c3   : > { %v3457_v11 = vadd.f32 %v8234_v34, %v3456_v60  ;;  %v3472_v57 = vadd.f32 %v8234_v34, %v3471_v33 }
 0x4c4   : > { %v3605_v54 = vadd.f32 %v3905_v35, %v3484_v26  ;;  %v3615_v28 = vadd.f32 %v3925_v31, %v3509_v49 }
 0x4c5   : > { %v3594_v29 = vadd.f32 %v3884_v3, %v3457_v11  ;;  %v3600_v5 = vadd.f32 %v3896_v19, %v3472_v57  ;;  %v3937_v11 = vunpack.c.h.bf16 %v4032_v52 }
 0x4c6   : > { %v3976_v38 = vpack.c.bf16 %v3605_v54, %v3604_v56  ;;  %v4001_v40 = vpack.c.bf16 %v3615_v28, %v3614_v23  ;;  %v4027_v28 = vld [vmem:[%s4380_s12 + $0x50] sm:$0xff]  }
 0x4c7   : > { %v3916_v17 = vunpack.c.l.bf16 %v4027_v28  ;;  %v3917_v19 = vunpack.c.h.bf16 %v4027_v28 }
 0x4c8   : > { %4039 = vst [vmem:[%s8249_s22 + $0x38] sm:$0xff] %v3976_v38   ;;  %v3936_v38 = vunpack.c.l.bf16 %v4032_v52 }
 0x4c9   : > { %4044 = vst [vmem:[%s8249_s22 + $0x60] sm:$0xff] %v4001_v40   ;;  %v3486_v22 = vpop.f32.mrf.mxu2  ;;  %v3511_v45 = vpop.f32.mrf.mxu3 }
 0x4ca   : > { %v3458_v27 = vpop.f32.mrf.mxu0  ;;  %v3473_v39 = vpop.f32.mrf.mxu1  ;;  %v3487_v42 = vadd.f32 %v8234_v34, %v3486_v22  ;;  %v3512_v13 = vadd.f32 %v8234_v34, %v3511_v45 }
 0x4cb   : > { %v3459_v62 = vadd.f32 %v8234_v34, %v3458_v27  ;;  %v3474_v7 = vadd.f32 %v8234_v34, %v3473_v39 }
 0x4cc   : > { %v3606_v14 = vadd.f32 %v3908_v0, %v3487_v42  ;;  %v3616_v36 = vadd.f32 %v3928_v46, %v3512_v13 }
 0x4cd   : > { %v3595_v1 = vadd.f32 %v3885_v55, %v3459_v62  ;;  %v3601_v30 = vadd.f32 %v3897_v20, %v3474_v7 }
 0x4cf   : > { %v3951_v12 = vpack.c.bf16 %v3595_v1, %v3594_v29  ;;  %v3966_v21 = vpack.c.bf16 %v3601_v30, %v3600_v5 }
 0x4d1   : > { %4034 = vst [vmem:[%s8249_s22 + $0x10] sm:$0xff] %v3951_v12   ;;  %v3488_v47 = vpop.f32.mrf.mxu2  ;;  %v3513_v37 = vpop.f32.mrf.mxu3 }
 0x4d2   : > { %4037 = vst [vmem:[%s8249_s22 + $0x28] sm:$0xff] %v3966_v21   ;;  %v3489_v61 = vadd.f32 %v8234_v34, %v3488_v47  ;;  %v3514_v24 = vadd.f32 %v8234_v34, %v3513_v37 }
 0x4d4   : > { %v3607_v50 = vadd.f32 %v3909_v16, %v3489_v61  ;;  %v3617_v32 = vadd.f32 %v3929_v63, %v3514_v24 }
 0x4d6   : > { %v3981_v4 = vpack.c.bf16 %v3607_v50, %v3606_v14  ;;  %v4006_v41 = vpack.c.bf16 %v3617_v32, %v3616_v36 }
 0x4d8   : > { %4040 = vst [vmem:[%s8249_s22 + $0x40] sm:$0xff] %v3981_v4  }
 0x4d9   : > { %4045 = vst [vmem:[%s8249_s22 + $0x68] sm:$0xff] %v4006_v41   ;;  %v3491_v9 = vpop.f32.mrf.mxu2  ;;  %v3516_v6 = vpop.f32.mrf.mxu3 }
 0x4da   : > { %v3492_v18 = vadd.f32 %v8234_v34, %v3491_v9  ;;  %v3517_v43 = vadd.f32 %v8234_v34, %v3516_v6 }
 0x4dc   : > { %v3608_v8 = vadd.f32 %v3912_v48, %v3492_v18  ;;  %v3618_v26 = vadd.f32 %v3932_v15, %v3517_v43 }
 0x4e1   : > { %v3493_v51 = vpop.f32.mrf.mxu2  ;;  %v3518_v35 = vpop.f32.mrf.mxu3 }
 0x4e2   : > { %v3494_v31 = vadd.f32 %v8234_v34, %v3493_v51  ;;  %v3519_v44 = vadd.f32 %v8234_v34, %v3518_v35 }
 0x4e4   : > { %v3609_v49 = vadd.f32 %v3913_v59, %v3494_v31  ;;  %v3619_v60 = vadd.f32 %v3933_v58, %v3519_v44 }
 0x4e6   : > { %v3986_v33 = vpack.c.bf16 %v3609_v49, %v3608_v8  ;;  %v4011_v56 = vpack.c.bf16 %v3619_v60, %v3618_v26 }
 0x4e8   : > { %4041 = vst [vmem:[%s8249_s22 + $0x48] sm:$0xff] %v3986_v33  }
 0x4e9   : > { %4046 = vst [vmem:[%s8249_s22 + $0x70] sm:$0xff] %v4011_v56   ;;  %v3496_v23 = vpop.f32.mrf.mxu2  ;;  %v3521_v54 = vpop.f32.mrf.mxu3 }
 0x4ea   : > { %v3497_v40 = vadd.f32 %v8234_v34, %v3496_v23  ;;  %v3522_v3 = vadd.f32 %v8234_v34, %v3521_v54 }
 0x4ec   : > { %v3610_v20 = vadd.f32 %v3916_v17, %v3497_v40  ;;  %v3620_v27 = vadd.f32 %v3936_v38, %v3522_v3 }
 0x4f1   : > { %v3498_v57 = vpop.f32.mrf.mxu2  ;;  %v3523_v22 = vpop.f32.mrf.mxu3 }
 0x4f2   : > { %v3499_v45 = vadd.f32 %v8234_v34, %v3498_v57  ;;  %v3524_v55 = vadd.f32 %v8234_v34, %v3523_v22 }
 0x4f4   : > { %v3611_v39 = vadd.f32 %v3917_v19, %v3499_v45  ;;  %v3621_v62 = vadd.f32 %v3937_v11, %v3524_v55 }
 0x4f6   : > { %v3991_v7 = vpack.c.bf16 %v3611_v39, %v3610_v20  ;;  %v4016_v25 = vpack.c.bf16 %v3621_v62, %v3620_v27 }
 0x4f8   : > { %4042 = vst [vmem:[%s8249_s22 + $0x50] sm:$0xff] %v3991_v7  }
 0x4f9   : > { %4047 = vst [vmem:[%s8249_s22 + $0x78] sm:$0xff] %v4016_v25  }
 0x4fa PF: > { %s19_s30 = sadd.s32 1, %s4201_s30  }
 0x4fb   : > { %p16_p4 = scmp.ge.s32.totalorder %s19_s30, 4  }
 0x4fd   :  { %18 = sbr.rel (!%p16_p4) target bundleno = 1 (0x1), region = 89 }

</bundles_post_ra>
